<compile_context>
chip_gen: v7x
topology: tpu7x:2x2x1
jax: 0.10.0
libtpu: 0.0.40
codegen_flags: <defaults>
</compile_context>

<pallas_src>
import functools

import jax
import jax.numpy as jnp
from jax.experimental import pallas as pl
from jax.experimental.pallas import tpu as pltpu

BN_EPS = 1e-5


def _bn_relu(y, gb, eps):
    """Train-mode BatchNorm1d + ReLU.

    y:  [B, N] f32 pre-activation (Linear bias omitted: BN's mean subtraction
        cancels a per-feature constant and the variance is shift-invariant).
    gb: [2, N] f32 = (gamma, beta).
    """
    gamma = gb[0:1, :]
    beta = gb[1:2, :]
    mean = jnp.mean(y, axis=0, keepdims=True)
    centered = y - mean
    var = jnp.mean(centered * centered, axis=0, keepdims=True)  # biased (train mode)
    y = centered * jax.lax.rsqrt(var + eps)
    y = y * gamma + beta
    return jnp.maximum(y, 0.0)


def fused_mlp_kernel(x_ref,
                     w1_ref, b1_ref,
                     w2_ref, p2_ref,
                     w3_ref, p3_ref,
                     w4_ref, p4_ref,
                     w5_ref, p5_ref,
                     w6_ref, b6_ref,
                     o_ref, *, eps):
    """Whole network in one invocation; all operands resident in VMEM.

    Weights are bf16; matmuls run bf16 x bf16 -> f32 on the MXU; all VPU/EUP
    math (bias, BN, ReLU) stays in f32.
    """
    # Layer 1: Linear -> ReLU
    h = jnp.dot(x_ref[...].astype(jnp.bfloat16), w1_ref[...],
                preferred_element_type=jnp.float32)
    h = jnp.maximum(h + b1_ref[...], 0.0)

    # Layers 2-5: Linear (bias-free, see _bn_relu) -> BatchNorm1d(train) -> ReLU
    for w_ref, p_ref in ((w2_ref, p2_ref), (w3_ref, p3_ref),
                         (w4_ref, p4_ref), (w5_ref, p5_ref)):
        y = jnp.dot(h.astype(jnp.bfloat16), w_ref[...],
                    preferred_element_type=jnp.float32)
        h = _bn_relu(y, p_ref[...], eps)

    # Layer 6: Linear (padded to 128 lanes) -> ReLU; unmasked lane-dense store.
    y = jnp.dot(h.astype(jnp.bfloat16), w6_ref[...],
                preferred_element_type=jnp.float32) + b6_ref[...]
    o_ref[...] = jnp.maximum(y, 0.0).astype(o_ref.dtype)


def seq_model_forward(x, params, *, eps=BN_EPS):
    """x: [B, input_size] f32 -> [B, num_classes] f32."""
    B = x.shape[0]
    n_pad = params["w6"].shape[1]
    num_classes = params["num_classes"]

    operands = (x,
                params["w1"], params["b1"],
                params["w2"], params["p2"],
                params["w3"], params["p3"],
                params["w4"], params["p4"],
                params["w5"], params["p5"],
                params["w6"], params["b6"])

    # Advisory cost model: the call is HBM-DMA bound on the bf16 weight
    # stream; letting XLA know helps it overlap neighbouring ops.
    flops = 2 * B * sum(int(params[f"w{i}"].shape[0]) * int(params[f"w{i}"].shape[1])
                        for i in range(1, 7))
    transcendentals = sum(int(params[f"p{i}"].shape[1]) for i in range(2, 6))  # rsqrt/BN
    bytes_accessed = (sum(int(op.size) * int(op.dtype.itemsize) for op in operands)
                      + B * n_pad * 4)

    vmem = lambda: pl.BlockSpec(memory_space=pltpu.MemorySpace.VMEM)
    kernel = functools.partial(fused_mlp_kernel, eps=eps)

    out_padded = pl.pallas_call(
        kernel,
        out_shape=jax.ShapeDtypeStruct((B, n_pad), jnp.float32),
        in_specs=[vmem() for _ in range(len(operands))],
        out_specs=vmem(),
        compiler_params=pltpu.CompilerParams(
            # ~6.7 MiB of resident bf16 weights + small f32 params/activations.
            vmem_limit_bytes=32 << 20,
        ),
        cost_estimate=pl.CostEstimate(
            flops=int(flops),
            transcendentals=int(transcendentals),
            bytes_accessed=int(bytes_accessed),
        ),
    )(*operands)

    return out_padded[:, :num_classes]


def seq_model_reference(x, params, *, eps=BN_EPS):
    """Pure-jnp reference (same bf16 weights, f32 BN math) for validation."""
    h = jnp.dot(x.astype(jnp.bfloat16), params["w1"],
                preferred_element_type=jnp.float32)
    h = jnp.maximum(h + params["b1"], 0.0)
    for li in range(2, 6):
        y = jnp.dot(h.astype(jnp.bfloat16), params[f"w{li}"],
                    preferred_element_type=jnp.float32)
        gb = params[f"p{li}"]
        mean = jnp.mean(y, axis=0, keepdims=True)
        var = jnp.mean((y - mean) ** 2, axis=0, keepdims=True)
        y = (y - mean) * jax.lax.rsqrt(var + eps)
        h = jnp.maximum(y * gb[0:1, :] + gb[1:2, :], 0.0)
    y = jnp.dot(h.astype(jnp.bfloat16), params["w6"],
                preferred_element_type=jnp.float32) + params["b6"]
    return jnp.maximum(y, 0.0)[:, :params["num_classes"]]


def init_params(key, input_size, num_classes):
    """Init matching the module's layer shapes.

    Linear weights/biases ~ U(-1/sqrt(fan_in), 1/sqrt(fan_in)) (PyTorch-style
    bounds, not the same RNG stream); weights stored bf16. BN gamma=1, beta=0.
    Linear biases of the four BN layers are dropped (no-op under train BN).
    """
    dims = [input_size, 2048, 1024, 512, 256, 128, num_classes]

    def linear(key, k_in, k_out):
        kw, kb = jax.random.split(key)
        bound = 1.0 / float(k_in) ** 0.5
        w = jax.random.uniform(kw, (k_in, k_out), jnp.float32, -bound, bound)
        b = jax.random.uniform(kb, (k_out,), jnp.float32, -bound, bound)
        return w, b

    keys = jax.random.split(key, 6)
    params = {"num_classes": num_classes}

    # Layer 1: Linear -> ReLU (no BN, bias kept, f32)
    w1, b1 = linear(keys[0], dims[0], dims[1])
    params["w1"] = w1.astype(jnp.bfloat16)
    params["b1"] = b1.reshape(1, dims[1])

    # Layers 2-5: Linear -> BN -> ReLU; bias dropped; pack (gamma, beta) -> (2, N)
    for li in range(1, 5):
        w, _b = linear(keys[li], dims[li], dims[li + 1])
        gamma = jnp.ones((dims[li + 1],), jnp.float32)
        beta = jnp.zeros((dims[li + 1],), jnp.float32)
        params[f"w{li + 1}"] = w.astype(jnp.bfloat16)
        params[f"p{li + 1}"] = jnp.stack([gamma, beta], axis=0)

    # Layer 6: Linear -> ReLU, padded to a 128-lane-multiple output width.
    w6, b6 = linear(keys[5], dims[5], dims[6])
    n_pad = max(128, -(-num_classes // 128) * 128)
    w6_pad = jnp.zeros((dims[5], n_pad), jnp.float32).at[:, :num_classes].set(w6)
    b6_pad = jnp.zeros((1, n_pad), jnp.float32).at[0, :num_classes].set(b6)
    params["w6"] = w6_pad.astype(jnp.bfloat16)
    params["b6"] = b6_pad

    return params


if __name__ == "__main__":
    INPUT_SIZE = 256
    NUM_CLASSES = 16
    BATCH = 8

    key = jax.random.PRNGKey(0)
    key, kx = jax.random.split(key)
    x = jax.random.normal(kx, (BATCH, INPUT_SIZE), jnp.float32)

    params = init_params(key, INPUT_SIZE, NUM_CLASSES)

    out = seq_model_forward(x, params)
    out = jax.block_until_ready(out)

    assert out.shape == (BATCH, NUM_CLASSES), out.shape
    assert out.dtype == jnp.float32
    assert bool(jnp.all(jnp.isfinite(out)))
    assert bool(jnp.all(out >= 0.0))  # final ReLU

    ref = jax.block_until_ready(seq_model_reference(x, params))
    assert bool(jnp.allclose(out, ref, rtol=5e-2, atol=1e-2)), (
        float(jnp.max(jnp.abs(out - ref))))

    print("KERNEL_OK")
</pallas_src>

<mosaic_0001>
module attributes {stable_mosaic.version = 11 : i64} {
  func.func @fused_mlp_kernel(%arg0: memref<8x256xf32, #tpu.memory_space<vmem>>, %arg1: memref<256x2048xbf16, #tpu.memory_space<vmem>>, %arg2: memref<1x2048xf32, #tpu.memory_space<vmem>>, %arg3: memref<2048x1024xbf16, #tpu.memory_space<vmem>>, %arg4: memref<2x1024xf32, #tpu.memory_space<vmem>>, %arg5: memref<1024x512xbf16, #tpu.memory_space<vmem>>, %arg6: memref<2x512xf32, #tpu.memory_space<vmem>>, %arg7: memref<512x256xbf16, #tpu.memory_space<vmem>>, %arg8: memref<2x256xf32, #tpu.memory_space<vmem>>, %arg9: memref<256x128xbf16, #tpu.memory_space<vmem>>, %arg10: memref<2x128xf32, #tpu.memory_space<vmem>>, %arg11: memref<128x128xbf16, #tpu.memory_space<vmem>>, %arg12: memref<1x128xf32, #tpu.memory_space<vmem>>, %arg13: memref<8x128xf32, #tpu.memory_space<vmem>>) attributes {dimension_semantics = [], scalar_prefetch = 0 : i64, scratch_operands = 0 : i64, tpu.core_type = #tpu.core_type<tc>} {
    %c0 = arith.constant 0 : index
    %c0_0 = arith.constant 0 : index
    %0 = vector.load %arg0[%c0, %c0_0] : memref<8x256xf32, #tpu.memory_space<vmem>>, vector<8x256xf32>
    %1 = arith.truncf %0 : vector<8x256xf32> to vector<8x256xbf16>
    %c0_1 = arith.constant 0 : index
    %c0_2 = arith.constant 0 : index
    %2 = vector.load %arg1[%c0_1, %c0_2] : memref<256x2048xbf16, #tpu.memory_space<vmem>>, vector<256x2048xbf16>
    %cst = arith.constant dense<0.000000e+00> : vector<8x2048xf32>
    %3 = tpu.matmul %1, %2, %cst {dimension_numbers = #tpu.dot_dimension_numbers<[1], [0], [0], [1], [0, 0, 1, 1], [], []>} : vector<8x256xbf16>, vector<256x2048xbf16>, vector<8x2048xf32> -> vector<8x2048xf32>
    %c0_3 = arith.constant 0 : index
    %c0_4 = arith.constant 0 : index
    %4 = vector.load %arg2[%c0_3, %c0_4] : memref<1x2048xf32, #tpu.memory_space<vmem>>, vector<1x2048xf32>
    %5 = vector.broadcast %4 : vector<1x2048xf32> to vector<8x2048xf32>
    %6 = arith.addf %3, %5 : vector<8x2048xf32>
    %cst_5 = arith.constant 0.000000e+00 : f32
    %7 = vector.broadcast %cst_5 : f32 to vector<8x2048xf32>
    %8 = arith.maximumf %6, %7 : vector<8x2048xf32>
    %9 = arith.truncf %8 : vector<8x2048xf32> to vector<8x2048xbf16>
    %c0_6 = arith.constant 0 : index
    %c0_7 = arith.constant 0 : index
    %10 = vector.load %arg3[%c0_6, %c0_7] : memref<2048x1024xbf16, #tpu.memory_space<vmem>>, vector<2048x1024xbf16>
    %cst_8 = arith.constant dense<0.000000e+00> : vector<8x1024xf32>
    %11 = tpu.matmul %9, %10, %cst_8 {dimension_numbers = #tpu.dot_dimension_numbers<[1], [0], [0], [1], [0, 0, 1, 1], [], []>} : vector<8x2048xbf16>, vector<2048x1024xbf16>, vector<8x1024xf32> -> vector<8x1024xf32>
    %c0_9 = arith.constant 0 : index
    %c0_10 = arith.constant 0 : index
    %12 = vector.load %arg4[%c0_9, %c0_10] : memref<2x1024xf32, #tpu.memory_space<vmem>>, vector<2x1024xf32>
    %13 = vector.extract_strided_slice %12 {offsets = [0, 0], sizes = [1, 1024], strides = [1, 1]} : vector<2x1024xf32> to vector<1x1024xf32>
    %14 = vector.extract_strided_slice %12 {offsets = [1, 0], sizes = [1, 1024], strides = [1, 1]} : vector<2x1024xf32> to vector<1x1024xf32>
    %cst_11 = arith.constant dense<0.000000e+00> : vector<1024xf32>
    %15 = vector.multi_reduction <add>, %11, %cst_11 [0] : vector<8x1024xf32> to vector<1024xf32>
    %16 = vector.shape_cast %15 : vector<1024xf32> to vector<1x1024xf32>
    %cst_12 = arith.constant 8.000000e+00 : f32
    %17 = vector.broadcast %cst_12 : f32 to vector<1x1024xf32>
    %18 = arith.divf %16, %17 : vector<1x1024xf32>
    %19 = vector.broadcast %18 : vector<1x1024xf32> to vector<8x1024xf32>
    %20 = arith.subf %11, %19 : vector<8x1024xf32>
    %21 = arith.mulf %20, %20 : vector<8x1024xf32>
    %cst_13 = arith.constant dense<0.000000e+00> : vector<1024xf32>
    %22 = vector.multi_reduction <add>, %21, %cst_13 [0] : vector<8x1024xf32> to vector<1024xf32>
    %23 = vector.shape_cast %22 : vector<1024xf32> to vector<1x1024xf32>
    %cst_14 = arith.constant 8.000000e+00 : f32
    %24 = vector.broadcast %cst_14 : f32 to vector<1x1024xf32>
    %25 = arith.divf %23, %24 : vector<1x1024xf32>
    %cst_15 = arith.constant 9.99999974E-6 : f32
    %26 = vector.broadcast %cst_15 : f32 to vector<1x1024xf32>
    %27 = arith.addf %25, %26 : vector<1x1024xf32>
    %28 = math.rsqrt %27 : vector<1x1024xf32>
    %29 = vector.broadcast %28 : vector<1x1024xf32> to vector<8x1024xf32>
    %30 = arith.mulf %20, %29 : vector<8x1024xf32>
    %31 = vector.broadcast %13 : vector<1x1024xf32> to vector<8x1024xf32>
    %32 = arith.mulf %30, %31 : vector<8x1024xf32>
    %33 = vector.broadcast %14 : vector<1x1024xf32> to vector<8x1024xf32>
    %34 = arith.addf %32, %33 : vector<8x1024xf32>
    %cst_16 = arith.constant 0.000000e+00 : f32
    %35 = vector.broadcast %cst_16 : f32 to vector<8x1024xf32>
    %36 = arith.maximumf %34, %35 : vector<8x1024xf32>
    %37 = arith.truncf %36 : vector<8x1024xf32> to vector<8x1024xbf16>
    %c0_17 = arith.constant 0 : index
    %c0_18 = arith.constant 0 : index
    %38 = vector.load %arg5[%c0_17, %c0_18] : memref<1024x512xbf16, #tpu.memory_space<vmem>>, vector<1024x512xbf16>
    %cst_19 = arith.constant dense<0.000000e+00> : vector<8x512xf32>
    %39 = tpu.matmul %37, %38, %cst_19 {dimension_numbers = #tpu.dot_dimension_numbers<[1], [0], [0], [1], [0, 0, 1, 1], [], []>} : vector<8x1024xbf16>, vector<1024x512xbf16>, vector<8x512xf32> -> vector<8x512xf32>
    %c0_20 = arith.constant 0 : index
    %c0_21 = arith.constant 0 : index
    %40 = vector.load %arg6[%c0_20, %c0_21] : memref<2x512xf32, #tpu.memory_space<vmem>>, vector<2x512xf32>
    %41 = vector.extract_strided_slice %40 {offsets = [0, 0], sizes = [1, 512], strides = [1, 1]} : vector<2x512xf32> to vector<1x512xf32>
    %42 = vector.extract_strided_slice %40 {offsets = [1, 0], sizes = [1, 512], strides = [1, 1]} : vector<2x512xf32> to vector<1x512xf32>
    %cst_22 = arith.constant dense<0.000000e+00> : vector<512xf32>
    %43 = vector.multi_reduction <add>, %39, %cst_22 [0] : vector<8x512xf32> to vector<512xf32>
    %44 = vector.shape_cast %43 : vector<512xf32> to vector<1x512xf32>
    %cst_23 = arith.constant 8.000000e+00 : f32
    %45 = vector.broadcast %cst_23 : f32 to vector<1x512xf32>
    %46 = arith.divf %44, %45 : vector<1x512xf32>
    %47 = vector.broadcast %46 : vector<1x512xf32> to vector<8x512xf32>
    %48 = arith.subf %39, %47 : vector<8x512xf32>
    %49 = arith.mulf %48, %48 : vector<8x512xf32>
    %cst_24 = arith.constant dense<0.000000e+00> : vector<512xf32>
    %50 = vector.multi_reduction <add>, %49, %cst_24 [0] : vector<8x512xf32> to vector<512xf32>
    %51 = vector.shape_cast %50 : vector<512xf32> to vector<1x512xf32>
    %cst_25 = arith.constant 8.000000e+00 : f32
    %52 = vector.broadcast %cst_25 : f32 to vector<1x512xf32>
    %53 = arith.divf %51, %52 : vector<1x512xf32>
    %cst_26 = arith.constant 9.99999974E-6 : f32
    %54 = vector.broadcast %cst_26 : f32 to vector<1x512xf32>
    %55 = arith.addf %53, %54 : vector<1x512xf32>
    %56 = math.rsqrt %55 : vector<1x512xf32>
    %57 = vector.broadcast %56 : vector<1x512xf32> to vector<8x512xf32>
    %58 = arith.mulf %48, %57 : vector<8x512xf32>
    %59 = vector.broadcast %41 : vector<1x512xf32> to vector<8x512xf32>
    %60 = arith.mulf %58, %59 : vector<8x512xf32>
    %61 = vector.broadcast %42 : vector<1x512xf32> to vector<8x512xf32>
    %62 = arith.addf %60, %61 : vector<8x512xf32>
    %cst_27 = arith.constant 0.000000e+00 : f32
    %63 = vector.broadcast %cst_27 : f32 to vector<8x512xf32>
    %64 = arith.maximumf %62, %63 : vector<8x512xf32>
    %65 = arith.truncf %64 : vector<8x512xf32> to vector<8x512xbf16>
    %c0_28 = arith.constant 0 : index
    %c0_29 = arith.constant 0 : index
    %66 = vector.load %arg7[%c0_28, %c0_29] : memref<512x256xbf16, #tpu.memory_space<vmem>>, vector<512x256xbf16>
    %cst_30 = arith.constant dense<0.000000e+00> : vector<8x256xf32>
    %67 = tpu.matmul %65, %66, %cst_30 {dimension_numbers = #tpu.dot_dimension_numbers<[1], [0], [0], [1], [0, 0, 1, 1], [], []>} : vector<8x512xbf16>, vector<512x256xbf16>, vector<8x256xf32> -> vector<8x256xf32>
    %c0_31 = arith.constant 0 : index
    %c0_32 = arith.constant 0 : index
    %68 = vector.load %arg8[%c0_31, %c0_32] : memref<2x256xf32, #tpu.memory_space<vmem>>, vector<2x256xf32>
    %69 = vector.extract_strided_slice %68 {offsets = [0, 0], sizes = [1, 256], strides = [1, 1]} : vector<2x256xf32> to vector<1x256xf32>
    %70 = vector.extract_strided_slice %68 {offsets = [1, 0], sizes = [1, 256], strides = [1, 1]} : vector<2x256xf32> to vector<1x256xf32>
    %cst_33 = arith.constant dense<0.000000e+00> : vector<256xf32>
    %71 = vector.multi_reduction <add>, %67, %cst_33 [0] : vector<8x256xf32> to vector<256xf32>
    %72 = vector.shape_cast %71 : vector<256xf32> to vector<1x256xf32>
    %cst_34 = arith.constant 8.000000e+00 : f32
    %73 = vector.broadcast %cst_34 : f32 to vector<1x256xf32>
    %74 = arith.divf %72, %73 : vector<1x256xf32>
    %75 = vector.broadcast %74 : vector<1x256xf32> to vector<8x256xf32>
    %76 = arith.subf %67, %75 : vector<8x256xf32>
    %77 = arith.mulf %76, %76 : vector<8x256xf32>
    %cst_35 = arith.constant dense<0.000000e+00> : vector<256xf32>
    %78 = vector.multi_reduction <add>, %77, %cst_35 [0] : vector<8x256xf32> to vector<256xf32>
    %79 = vector.shape_cast %78 : vector<256xf32> to vector<1x256xf32>
    %cst_36 = arith.constant 8.000000e+00 : f32
    %80 = vector.broadcast %cst_36 : f32 to vector<1x256xf32>
    %81 = arith.divf %79, %80 : vector<1x256xf32>
    %cst_37 = arith.constant 9.99999974E-6 : f32
    %82 = vector.broadcast %cst_37 : f32 to vector<1x256xf32>
    %83 = arith.addf %81, %82 : vector<1x256xf32>
    %84 = math.rsqrt %83 : vector<1x256xf32>
    %85 = vector.broadcast %84 : vector<1x256xf32> to vector<8x256xf32>
    %86 = arith.mulf %76, %85 : vector<8x256xf32>
    %87 = vector.broadcast %69 : vector<1x256xf32> to vector<8x256xf32>
    %88 = arith.mulf %86, %87 : vector<8x256xf32>
    %89 = vector.broadcast %70 : vector<1x256xf32> to vector<8x256xf32>
    %90 = arith.addf %88, %89 : vector<8x256xf32>
    %cst_38 = arith.constant 0.000000e+00 : f32
    %91 = vector.broadcast %cst_38 : f32 to vector<8x256xf32>
    %92 = arith.maximumf %90, %91 : vector<8x256xf32>
    %93 = arith.truncf %92 : vector<8x256xf32> to vector<8x256xbf16>
    %c0_39 = arith.constant 0 : index
    %c0_40 = arith.constant 0 : index
    %94 = vector.load %arg9[%c0_39, %c0_40] : memref<256x128xbf16, #tpu.memory_space<vmem>>, vector<256x128xbf16>
    %cst_41 = arith.constant dense<0.000000e+00> : vector<8x128xf32>
    %95 = tpu.matmul %93, %94, %cst_41 {dimension_numbers = #tpu.dot_dimension_numbers<[1], [0], [0], [1], [0, 0, 1, 1], [], []>} : vector<8x256xbf16>, vector<256x128xbf16>, vector<8x128xf32> -> vector<8x128xf32>
    %c0_42 = arith.constant 0 : index
    %c0_43 = arith.constant 0 : index
    %96 = vector.load %arg10[%c0_42, %c0_43] : memref<2x128xf32, #tpu.memory_space<vmem>>, vector<2x128xf32>
    %97 = vector.extract_strided_slice %96 {offsets = [0, 0], sizes = [1, 128], strides = [1, 1]} : vector<2x128xf32> to vector<1x128xf32>
    %98 = vector.extract_strided_slice %96 {offsets = [1, 0], sizes = [1, 128], strides = [1, 1]} : vector<2x128xf32> to vector<1x128xf32>
    %cst_44 = arith.constant dense<0.000000e+00> : vector<128xf32>
    %99 = vector.multi_reduction <add>, %95, %cst_44 [0] : vector<8x128xf32> to vector<128xf32>
    %100 = vector.shape_cast %99 : vector<128xf32> to vector<1x128xf32>
    %cst_45 = arith.constant 8.000000e+00 : f32
    %101 = vector.broadcast %cst_45 : f32 to vector<1x128xf32>
    %102 = arith.divf %100, %101 : vector<1x128xf32>
    %103 = vector.broadcast %102 : vector<1x128xf32> to vector<8x128xf32>
    %104 = arith.subf %95, %103 : vector<8x128xf32>
    %105 = arith.mulf %104, %104 : vector<8x128xf32>
    %cst_46 = arith.constant dense<0.000000e+00> : vector<128xf32>
    %106 = vector.multi_reduction <add>, %105, %cst_46 [0] : vector<8x128xf32> to vector<128xf32>
    %107 = vector.shape_cast %106 : vector<128xf32> to vector<1x128xf32>
    %cst_47 = arith.constant 8.000000e+00 : f32
    %108 = vector.broadcast %cst_47 : f32 to vector<1x128xf32>
    %109 = arith.divf %107, %108 : vector<1x128xf32>
    %cst_48 = arith.constant 9.99999974E-6 : f32
    %110 = vector.broadcast %cst_48 : f32 to vector<1x128xf32>
    %111 = arith.addf %109, %110 : vector<1x128xf32>
    %112 = math.rsqrt %111 : vector<1x128xf32>
    %113 = vector.broadcast %112 : vector<1x128xf32> to vector<8x128xf32>
    %114 = arith.mulf %104, %113 : vector<8x128xf32>
    %115 = vector.broadcast %97 : vector<1x128xf32> to vector<8x128xf32>
    %116 = arith.mulf %114, %115 : vector<8x128xf32>
    %117 = vector.broadcast %98 : vector<1x128xf32> to vector<8x128xf32>
    %118 = arith.addf %116, %117 : vector<8x128xf32>
    %cst_49 = arith.constant 0.000000e+00 : f32
    %119 = vector.broadcast %cst_49 : f32 to vector<8x128xf32>
    %120 = arith.maximumf %118, %119 : vector<8x128xf32>
    %121 = arith.truncf %120 : vector<8x128xf32> to vector<8x128xbf16>
    %c0_50 = arith.constant 0 : index
    %c0_51 = arith.constant 0 : index
    %122 = vector.load %arg11[%c0_50, %c0_51] : memref<128x128xbf16, #tpu.memory_space<vmem>>, vector<128x128xbf16>
    %cst_52 = arith.constant dense<0.000000e+00> : vector<8x128xf32>
    %123 = tpu.matmul %121, %122, %cst_52 {dimension_numbers = #tpu.dot_dimension_numbers<[1], [0], [0], [1], [0, 0, 1, 1], [], []>} : vector<8x128xbf16>, vector<128x128xbf16>, vector<8x128xf32> -> vector<8x128xf32>
    %c0_53 = arith.constant 0 : index
    %c0_54 = arith.constant 0 : index
    %124 = vector.load %arg12[%c0_53, %c0_54] : memref<1x128xf32, #tpu.memory_space<vmem>>, vector<1x128xf32>
    %125 = vector.broadcast %124 : vector<1x128xf32> to vector<8x128xf32>
    %126 = arith.addf %123, %125 : vector<8x128xf32>
    %cst_55 = arith.constant 0.000000e+00 : f32
    %127 = vector.broadcast %cst_55 : f32 to vector<8x128xf32>
    %128 = arith.maximumf %126, %127 : vector<8x128xf32>
    %c0_56 = arith.constant 0 : index
    %c0_57 = arith.constant 0 : index
    %129 = vector.load %arg13[%c0_56, %c0_57] : memref<8x128xf32, #tpu.memory_space<vmem>>, vector<8x128xf32>
    tpu.vector_store %arg13[%c0_56, %c0_57], %128 {strides = array<i32>} : memref<8x128xf32, #tpu.memory_space<vmem>>, vector<8x128xf32>,
    return
  }
}

</mosaic_0001>

<bundles_post_ra>
// kernel: tpu_custom_call.1
= control target key start
LH: loop header
LB: loop body
LE: loop exit
PB: predicated region body
PF: predicated region fallthrough
CT: control target
= control target key end

     0   :  { %18 = vsyncpa [#allocation3], 0  ;;  %s16233_s0 = inlined_call_operand.hbm [shape: f32[8,256], index: 0, kind: input, shape index: {}]   ;;  %s16234_s1 = inlined_call_operand.hbm [shape: bf16[256,2048], index: 1, kind: input, shape index: {}]   ;;  %s16235_s2 = inlined_call_operand.hbm [shape: f32[1,2048], index: 2, kind: input, shape index: {}]   ;;  %s16236_s3 = inlined_call_operand.hbm [shape: bf16[2048,1024], index: 3, kind: input, shape index: {}]   ;;  %s16237_s4 = inlined_call_operand.hbm [shape: f32[2,1024], index: 4, kind: input, shape index: {}]   ;;  %s16238_s5 = inlined_call_operand.hbm [shape: bf16[1024,512], index: 5, kind: input, shape index: {}]   ;;  %s16239_s6 = inlined_call_operand.hbm [shape: f32[2,512], index: 6, kind: input, shape index: {}]   ;;  %s16240_s7 = inlined_call_operand.hbm [shape: bf16[512,256], index: 7, kind: input, shape index: {}]   ;;  %s16241_s8 = inlined_call_operand.hbm [shape: f32[2,256], index: 8, kind: input, shape index: {}]   ;;  %s16242_s9 = inlined_call_operand.hbm [shape: bf16[256,128], index: 9, kind: input, shape index: {}]   ;;  %s16243_s10 = inlined_call_operand.hbm [shape: f32[2,128], index: 10, kind: input, shape index: {}]   ;;  %s16244_s11 = inlined_call_operand.hbm [shape: bf16[128,128], index: 11, kind: input, shape index: {}]   ;;  %s16245_s12 = inlined_call_operand.hbm [shape: f32[1,128], index: 12, kind: input, shape index: {}]   ;;  %s16246_s13 = inlined_call_operand.hbm [shape: f32[8,128], index: 13, kind: output, shape index: {}]  }
   0x1   :  { %19 = vsyncpa [#allocation6], 0 }
   0x2   :  { %20 = vsyncpa [#allocation9], 0 }
   0x3   :  { %21 = vsyncpa [#allocation12], 0 }
   0x4   :  { %22 = vsyncpa [#allocation15], 0 }
   0x5   :  { %23 = vsyncpa [#allocation18], 0 }
   0x6   :  { %24 = vsyncpa [#allocation21], 0 }
   0x7   :  { %25 = vsyncpa [#allocation4], 0  ;;  %s15597_s25 = smov [#allocation5]   ;;  %s15273_s29 = scalar_lea.hbm %s16234_s1, 32768 }
   0x8   :  { %s41_s26 = sshll.u32 %s15597_s25, 4  ;;  %p15274_p0 = scmp.ne.s32.totalorder %s16234_s1, %s15273_s29  ;;  %s42_s26 = int_to_ptr.vmem [resolvable:$true] %s41_s26 }
   0x9   :  { %p15277_p1 = scmp.lt.u32.totalorder %s15273_s29, %s16234_s1 }
   0xb   :  { %p15279_p2 = pnand %p15277_p1, %p15274_p0 }
   0xd   :  { %15282 = shalt.err (!%p15279_p2)
}
   0xe   :  { %s15283_s17 = scalar_lea.vmem %s42_s26, 32768  ;;  %p15288_p4 = scmp.lt.s32.totalorder %s42_s26, %s42_s26 }
   0xf   :  { %p15284_p3 = scmp.ne.s32.totalorder %s42_s26, %s15283_s17  ;;  %p15289_p5 = scmp.lt.s32.totalorder %s15283_s17, %s15283_s17 }
  0x11   :  { %p15290_p6 = por %p15289_p5, %p15288_p4 }
  0x13   :  { %p15291_p7 = pnand %p15290_p6, %p15284_p3 }
  0x15   :  { %15294 = shalt.err (!%p15291_p7)
}
  0x16   :  { %s15598_s18 = smov 1024   ;;  %s15599_s19 = smov 64  }
  0x17   :  { %47 = dma.hbm_to_vmem [thread:$0]  %s16234_s1, 32768, %s42_s26, [#allocation6], %s15598_s18, %s15598_s18, %s15599_s19  }
  0x18   :  { %s15600_s22 = smov [#allocation8]   ;;  %s15295_s27 = scalar_lea.hbm %s16236_s3, 131072 }
  0x19   :  { %s63_s23 = sshll.u32 %s15600_s22, 4  ;;  %p15296_p8 = scmp.ne.s32.totalorder %s16236_s3, %s15295_s27  ;;  %s64_s23 = int_to_ptr.vmem [resolvable:$true] %s63_s23 }
  0x1a   :  { %p15299_p9 = scmp.lt.u32.totalorder %s15295_s27, %s16236_s3 }
  0x1c   :  { %p15301_p10 = pnand %p15299_p9, %p15296_p8 }
  0x1e   :  { %15304 = shalt.err (!%p15301_p10)
}
  0x1f   :  { %s15305_s15 = scalar_lea.vmem %s64_s23, 131072  ;;  %p15310_p12 = scmp.lt.s32.totalorder %s64_s23, %s64_s23 }
  0x20   :  { %p15306_p11 = scmp.ne.s32.totalorder %s64_s23, %s15305_s15  ;;  %p15311_p13 = scmp.lt.s32.totalorder %s15305_s15, %s15305_s15 }
  0x22   :  { %p15312_p0 = por %p15311_p13, %p15310_p12 }
  0x24   :  { %p15313_p1 = pnand %p15312_p0, %p15306_p11 }
  0x26   :  { %15316 = shalt.err (!%p15313_p1)
}
  0x27   :  { %s15601_s1 = smov 512   ;;  %s15602_s26 = smov 32  }
  0x28   :  { %69 = dma.hbm_to_vmem [thread:$0]  %s16236_s3, 131072, %s64_s23, [#allocation9], %s15601_s1, %s15601_s1, %s15602_s26  }
  0x29   :  { %s15603_s18 = smov [#allocation11]   ;;  %s15317_s24 = scalar_lea.hbm %s16238_s5, 32768 }
  0x2a   :  { %s85_s20 = sshll.u32 %s15603_s18, 4  ;;  %p15318_p2 = scmp.ne.s32.totalorder %s16238_s5, %s15317_s24  ;;  %s86_s20 = int_to_ptr.vmem [resolvable:$true] %s85_s20 }
  0x2b   :  { %p15321_p3 = scmp.lt.u32.totalorder %s15317_s24, %s16238_s5 }
  0x2d   :  { %p15323_p4 = pnand %p15321_p3, %p15318_p2 }
  0x2f   :  { %15326 = shalt.err (!%p15323_p4)
}
  0x30   :  { %s15327_s30 = scalar_lea.vmem %s86_s20, 32768  ;;  %p15332_p6 = scmp.lt.s32.totalorder %s86_s20, %s86_s20 }
  0x31   :  { %p15328_p5 = scmp.ne.s32.totalorder %s86_s20, %s15327_s30  ;;  %p15333_p7 = scmp.lt.s32.totalorder %s15327_s30, %s15327_s30 }
  0x33   :  { %p15334_p8 = por %p15333_p7, %p15332_p6 }
  0x35   :  { %p15335_p9 = pnand %p15334_p8, %p15328_p5 }
  0x37   :  { %15338 = shalt.err (!%p15335_p9)
}
  0x38   :  { %s15604_s3 = smov 256   ;;  %s15605_s23 = smov 16  }
  0x39   :  { %91 = dma.hbm_to_vmem [thread:$0]  %s16238_s5, 32768, %s86_s20, [#allocation12], %s15604_s3, %s15604_s3, %s15605_s23  }
  0x3a   :  { %s15606_s1 = smov [#allocation14]   ;;  %s15339_s18 = scalar_lea.hbm %s16240_s7, 8192 }
  0x3b   :  { %s107_s26 = sshll.u32 %s15606_s1, 4  ;;  %p15340_p10 = scmp.ne.s32.totalorder %s16240_s7, %s15339_s18  ;;  %s108_s26 = int_to_ptr.vmem [resolvable:$true] %s107_s26 }
  0x3c   :  { %p15343_p11 = scmp.lt.u32.totalorder %s15339_s18, %s16240_s7 }
  0x3e   :  { %p15345_p12 = pnand %p15343_p11, %p15340_p10 }
  0x40   :  { %15348 = shalt.err (!%p15345_p12)
}
  0x41   :  { %s15349_s27 = scalar_lea.vmem %s108_s26, 8192  ;;  %p15354_p0 = scmp.lt.s32.totalorder %s108_s26, %s108_s26 }
  0x42   :  { %p15350_p13 = scmp.ne.s32.totalorder %s108_s26, %s15349_s27  ;;  %p15355_p1 = scmp.lt.s32.totalorder %s15349_s27, %s15349_s27 }
  0x44   :  { %p15356_p2 = por %p15355_p1, %p15354_p0 }
  0x46   :  { %p15357_p3 = pnand %p15356_p2, %p15350_p13 }
  0x48   :  { %15360 = shalt.err (!%p15357_p3)
}
  0x49   :  { %s15607_s5 = smov 128   ;;  %s15608_s20 = smov 8  }
  0x4a   :  { %113 = dma.hbm_to_vmem [thread:$0]  %s16240_s7, 8192, %s108_s26, [#allocation15], %s15607_s5, %s15607_s5, %s15608_s20  }
  0x4b   :  { %s15609_s30 = smov [#allocation17]   ;;  %s15610_s23 = smov [#allocation20]  }
  0x4c   :  { %s129_s3 = sshll.u32 %s15609_s30, 4  ;;  %s151_s14 = sshll.u32 %s15610_s23, 4  ;;  %s130_s3 = int_to_ptr.vmem [resolvable:$true] %s129_s3  ;;  %s152_s14 = int_to_ptr.vmem [resolvable:$true] %s151_s14 }
  0x4d   :  { %s15361_s16 = scalar_lea.hbm %s16242_s9, 2048 }
  0x4e   :  { %p15362_p4 = scmp.ne.s32.totalorder %s16242_s9, %s15361_s16  ;;  %p15365_p5 = scmp.lt.u32.totalorder %s15361_s16, %s16242_s9 }
  0x50   :  { %p15367_p6 = pnand %p15365_p5, %p15362_p4 }
  0x52   :  { %15370 = shalt.err (!%p15367_p6)
}
  0x53   :  { %s15371_s7 = scalar_lea.vmem %s130_s3, 2048  ;;  %p15376_p8 = scmp.lt.s32.totalorder %s130_s3, %s130_s3 }
  0x54   :  { %p15372_p7 = scmp.ne.s32.totalorder %s130_s3, %s15371_s7  ;;  %p15377_p9 = scmp.lt.s32.totalorder %s15371_s7, %s15371_s7 }
  0x56   :  { %p15378_p10 = por %p15377_p9, %p15376_p8 }
  0x58   :  { %p15379_p11 = pnand %p15378_p10, %p15372_p7 }
  0x5a   :  { %15382 = shalt.err (!%p15379_p11)
}
  0x5b   :  { %s15611_s26 = smov 4   ;;  %s15383_s20 = scalar_lea.hbm %s16244_s11, 1024 }
  0x5c   :  { %135 = dma.hbm_to_vmem [thread:$0]  %s16242_s9, 2048, %s130_s3, [#allocation18], %s15599_s19, %s15599_s19, %s15611_s26  }
  0x5d   :  { %p15384_p12 = scmp.ne.s32.totalorder %s16244_s11, %s15383_s20  ;;  %p15387_p13 = scmp.lt.u32.totalorder %s15383_s20, %s16244_s11 }
  0x5f   :  { %p15389_p0 = pnand %p15387_p13, %p15384_p12 }
  0x61   :  { %15392 = shalt.err (!%p15389_p0)
}
  0x62   :  { %s15393_s15 = scalar_lea.vmem %s152_s14, 1024  ;;  %p15398_p2 = scmp.lt.s32.totalorder %s152_s14, %s152_s14 }
  0x63   :  { %p15394_p1 = scmp.ne.s32.totalorder %s152_s14, %s15393_s15  ;;  %p15399_p3 = scmp.lt.s32.totalorder %s15393_s15, %s15393_s15 }
  0x65   :  { %p15400_p4 = por %p15399_p3, %p15398_p2 }
  0x67   :  { %p15401_p5 = pnand %p15400_p4, %p15394_p1 }
  0x69   :  { %15404 = shalt.err (!%p15401_p5)
}
  0x6a   :  { %157 = dma.hbm_to_vmem [thread:$0]  %s16244_s11, 1024, %s152_s14, [#allocation21], %s15599_s19, %s15599_s19, %s15611_s26  }
  0x6b   :  { %s15612_s1 = smov [#allocation2]   ;;  %s15613_s17 = smov [#allocation7]  }
  0x6c   :  { %s32_s16 = sshll.u32 %s15612_s1, 4  ;;  %s54_s18 = sshll.u32 %s15613_s17, 4  ;;  %s33_s16 = int_to_ptr.vmem [resolvable:$true] %s32_s16  ;;  %s55_s18 = int_to_ptr.vmem [resolvable:$true] %s54_s18 }
  0x6d   :  { %s15405_s7 = scalar_lea.hbm %s16233_s0, 256 }
  0x6e   :  { %p15406_p6 = scmp.ne.s32.totalorder %s16233_s0, %s15405_s7  ;;  %p15409_p7 = scmp.lt.u32.totalorder %s15405_s7, %s16233_s0 }
  0x70   :  { %p15411_p8 = pnand %p15409_p7, %p15406_p6 }
  0x72   :  { %15414 = shalt.err (!%p15411_p8)
}
  0x73   :  { %s15415_s11 = scalar_lea.vmem %s33_s16, 256  ;;  %p15420_p10 = scmp.lt.s32.totalorder %s33_s16, %s33_s16 }
  0x74   :  { %p15416_p9 = scmp.ne.s32.totalorder %s33_s16, %s15415_s11  ;;  %p15421_p11 = scmp.lt.s32.totalorder %s15415_s11, %s15415_s11 }
  0x76   :  { %p15422_p12 = por %p15421_p11, %p15420_p10 }
  0x78   :  { %p15423_p13 = pnand %p15422_p12, %p15416_p9 }
  0x7a   :  { %15426 = shalt.err (!%p15423_p13)
}
  0x7b   :  { %35 = dma.hbm_to_vmem [thread:$0]  %s16233_s0, 256, %s33_s16, [#allocation3]  }
  0x7c   :  { %s15427_s28 = scalar_lea.hbm %s16235_s2, 256 }
  0x7d   :  { %p15428_p0 = scmp.ne.s32.totalorder %s16235_s2, %s15427_s28  ;;  %p15431_p1 = scmp.lt.u32.totalorder %s15427_s28, %s16235_s2 }
  0x7f   :  { %p15433_p2 = pnand %p15431_p1, %p15428_p0 }
  0x81   :  { %15436 = shalt.err (!%p15433_p2)
}
  0x82   :  { %s15437_s9 = scalar_lea.vmem %s55_s18, 256  ;;  %p15442_p4 = scmp.lt.s32.totalorder %s55_s18, %s55_s18 }
  0x83   :  { %p15438_p3 = scmp.ne.s32.totalorder %s55_s18, %s15437_s9  ;;  %p15443_p5 = scmp.lt.s32.totalorder %s15437_s9, %s15437_s9 }
  0x85   :  { %p15444_p6 = por %p15443_p5, %p15442_p4 }
  0x87   :  { %p15445_p7 = pnand %p15444_p6, %p15438_p3 }
  0x89   :  { %15448 = shalt.err (!%p15445_p7)
}
  0x8a   :  { %57 = dma.hbm_to_vmem [thread:$0]  %s16235_s2, 256, %s55_s18, [#allocation6]  }
  0x8b   :  { %s15614_s1 = smov [#allocation10]   ;;  %s15615_s17 = smov [#allocation13]  }
  0x8c   :  { %s76_s16 = sshll.u32 %s15614_s1, 4  ;;  %s98_s21 = sshll.u32 %s15615_s17, 4  ;;  %s77_s16 = int_to_ptr.vmem [resolvable:$true] %s76_s16  ;;  %s99_s21 = int_to_ptr.vmem [resolvable:$true] %s98_s21 }
  0x8d   :  { %s15449_s24 = scalar_lea.hbm %s16237_s4, 256 }
  0x8e   :  { %p15450_p8 = scmp.ne.s32.totalorder %s16237_s4, %s15449_s24  ;;  %p15453_p9 = scmp.lt.u32.totalorder %s15449_s24, %s16237_s4 }
  0x90   :  { %p15455_p10 = pnand %p15453_p9, %p15450_p8 }
  0x92   :  { %15458 = shalt.err (!%p15455_p10)
}
  0x93   :  { %s15459_s2 = scalar_lea.vmem %s77_s16, 256  ;;  %p15464_p12 = scmp.lt.s32.totalorder %s77_s16, %s77_s16 }
  0x94   :  { %p15460_p11 = scmp.ne.s32.totalorder %s77_s16, %s15459_s2  ;;  %p15465_p13 = scmp.lt.s32.totalorder %s15459_s2, %s15459_s2 }
  0x96   :  { %p15466_p0 = por %p15465_p13, %p15464_p12 }
  0x98   :  { %p15467_p1 = pnand %p15466_p0, %p15460_p11 }
  0x9a   :  { %15470 = shalt.err (!%p15467_p1)
}
  0x9b   :  { %79 = dma.hbm_to_vmem [thread:$0]  %s16237_s4, 256, %s77_s16, [#allocation9]  }
  0x9c   :  { %s15471_s20 = scalar_lea.hbm %s16239_s6, 128 }
  0x9d   :  { %p15472_p2 = scmp.ne.s32.totalorder %s16239_s6, %s15471_s20  ;;  %p15475_p3 = scmp.lt.u32.totalorder %s15471_s20, %s16239_s6 }
  0x9f   :  { %p15477_p4 = pnand %p15475_p3, %p15472_p2 }
  0xa1   :  { %15480 = shalt.err (!%p15477_p4)
}
  0xa2   :  { %s15481_s15 = scalar_lea.vmem %s99_s21, 128  ;;  %p15486_p6 = scmp.lt.s32.totalorder %s99_s21, %s99_s21 }
  0xa3   :  { %p15482_p5 = scmp.ne.s32.totalorder %s99_s21, %s15481_s15  ;;  %p15487_p7 = scmp.lt.s32.totalorder %s15481_s15, %s15481_s15 }
  0xa5   :  { %p15488_p8 = por %p15487_p7, %p15486_p6 }
  0xa7   :  { %p15489_p9 = pnand %p15488_p8, %p15482_p5 }
  0xa9   :  { %15492 = shalt.err (!%p15489_p9)
}
  0xaa   :  { %101 = dma.hbm_to_vmem [thread:$0]  %s16239_s6, 128, %s99_s21, [#allocation12]  }
  0xab   :  { %s15616_s0 = smov [#allocation16]   ;;  %s15617_s1 = smov [#allocation19]  }
  0xac   :  { %s120_s3 = sshll.u32 %s15616_s0, 4  ;;  %s142_s16 = sshll.u32 %s15617_s1, 4  ;;  %s121_s3 = int_to_ptr.vmem [resolvable:$true] %s120_s3  ;;  %s143_s16 = int_to_ptr.vmem [resolvable:$true] %s142_s16 }
  0xad   :  { %s15493_s7 = scalar_lea.hbm %s16241_s8, 64 }
  0xae   :  { %p15494_p10 = scmp.ne.s32.totalorder %s16241_s8, %s15493_s7  ;;  %p15497_p11 = scmp.lt.u32.totalorder %s15493_s7, %s16241_s8 }
  0xb0   :  { %p15499_p12 = pnand %p15497_p11, %p15494_p10 }
  0xb2   :  { %15502 = shalt.err (!%p15499_p12)
}
  0xb3   :  { %s15503_s6 = scalar_lea.vmem %s121_s3, 64  ;;  %p15508_p0 = scmp.lt.s32.totalorder %s121_s3, %s121_s3 }
  0xb4   :  { %p15504_p13 = scmp.ne.s32.totalorder %s121_s3, %s15503_s6  ;;  %p15509_p1 = scmp.lt.s32.totalorder %s15503_s6, %s15503_s6 }
  0xb6   :  { %p15510_p2 = por %p15509_p1, %p15508_p0 }
  0xb8   :  { %p15511_p3 = pnand %p15510_p2, %p15504_p13 }
  0xba   :  { %15514 = shalt.err (!%p15511_p3)
}
  0xbb   :  { %123 = dma.hbm_to_vmem [thread:$0]  %s16241_s8, 64, %s121_s3, [#allocation15]  }
  0xbc   :  { %s15515_s19 = scalar_lea.hbm %s16243_s10, 32 }
  0xbd   :  { %p15516_p4 = scmp.ne.s32.totalorder %s16243_s10, %s15515_s19  ;;  %p15519_p5 = scmp.lt.u32.totalorder %s15515_s19, %s16243_s10 }
  0xbf   :  { %p15521_p6 = pnand %p15519_p5, %p15516_p4 }
  0xc1   :  { %15524 = shalt.err (!%p15521_p6)
}
  0xc2   :  { %s15525_s29 = scalar_lea.vmem %s143_s16, 32  ;;  %p15530_p8 = scmp.lt.s32.totalorder %s143_s16, %s143_s16 }
  0xc3   :  { %p15526_p7 = scmp.ne.s32.totalorder %s143_s16, %s15525_s29  ;;  %p15531_p9 = scmp.lt.s32.totalorder %s15525_s29, %s15525_s29 }
  0xc5   :  { %p15532_p10 = por %p15531_p9, %p15530_p8 }
  0xc7   :  { %p15533_p11 = pnand %p15532_p10, %p15526_p7 }
  0xc9   :  { %15536 = shalt.err (!%p15533_p11)
}
  0xca   :  { %145 = dma.hbm_to_vmem [thread:$0]  %s16243_s10, 32, %s143_s16, [#allocation18]  }
  0xcb   :  { %s15618_s23 = smov [#allocation22]   ;;  %s15537_s0 = scalar_lea.hbm %s16245_s12, 16 }
  0xcc   :  { %s164_s15 = sshll.u32 %s15618_s23, 4  ;;  %p15538_p12 = scmp.ne.s32.totalorder %s16245_s12, %s15537_s0  ;;  %s165_s15 = int_to_ptr.vmem [resolvable:$true] %s164_s15 }
  0xcd   :  { %p15541_p13 = scmp.lt.u32.totalorder %s15537_s0, %s16245_s12 }
  0xcf   :  { %p15543_p0 = pnand %p15541_p13, %p15538_p12 }
  0xd1   :  { %15546 = shalt.err (!%p15543_p0)
}
  0xd2   :  { %s15547_s7 = scalar_lea.vmem %s165_s15, 16  ;;  %s15551_s10 = scalar_lea.vmem %s165_s15, 32 }
  0xd3   :  { %p15548_p1 = scmp.ne.s32.totalorder %s165_s15, %s15547_s7  ;;  %p15552_p2 = scmp.lt.s32.totalorder %s165_s15, %s165_s15 }
  0xd4   :  { %p15553_p3 = scmp.lt.s32.totalorder %s15551_s10, %s15547_s7 }
  0xd6   :  { %p15554_p4 = por %p15553_p3, %p15552_p2 }
  0xd8   :  { %p15555_p5 = pnand %p15554_p4, %p15548_p1 }
  0xda   :  { %15558 = shalt.err (!%p15555_p5)
}
  0xdb   :  { %167 = dma.hbm_to_vmem [thread:$0]  %s16245_s12, 16, %s165_s15, [#allocation21]  }
  0xdc   :  { %15581 = dma.done.wait [#allocation3], 256  }
  0xdd   :  { %15582 = vsyncadd [#allocation3], 4294967040 }
  0xde   :  { %15583 = dma.done.wait [#allocation6], 33024  }
  0xdf   :  { %15584 = vsyncadd [#allocation6], 4294934272 }
  0xe0   :  { %15585 = dma.done.wait [#allocation9], 131328  }
  0xe1   :  { %15586 = vsyncadd [#allocation9], 4294835968 }
  0xe2   :  { %15587 = dma.done.wait [#allocation12], 32896  }
  0xe3   :  { %15588 = vsyncadd [#allocation12], 4294934400 }
  0xe4   :  { %15589 = dma.done.wait [#allocation15], 8256  }
  0xe5   :  { %15590 = vsyncadd [#allocation15], 4294959040 }
  0xe6   :  { %15591 = dma.done.wait [#allocation18], 2080  }
  0xe7   :  { %15592 = vsyncadd [#allocation18], 4294965216 }
  0xe8   :  { %15593 = dma.done.wait [#allocation21], 1040  }
  0xe9   :  { %15594 = vsyncadd [#allocation21], 4294966256  ;;  %v212_v0 = vld [vmem:[#allocation5] sm:$0xff]  ;;  %v213_v2 = vld [vmem:[#allocation5 + $0x8] sm:$0xff]  ;;  %vm15620_vm0 = vmmov 0   ;;  %s15621_s12 = smov [#allocation23]  }
  0xea   :  { %v220_v1 = vld [vmem:[#allocation5 + $0x40] sm:$0xff]  ;;  %v221_v4 = vld [vmem:[#allocation5 + $0x48] sm:$0xff]  ;;  %v209_v53 = vld [vmem:[#allocation2 + $0x8] sm:$0xff]  ;;  %s12880_s25 = sshll.u32 %s15621_s12, 4  ;;  %s12881_s25 = int_to_ptr.vmem [resolvable:$true] %s12880_s25 }
  0xeb   :  { %v12896_v3 = vcombine.high %v212_v0, %v220_v1  ;;  %v12895_v5 = vcombine.low %v212_v0, %v220_v1  ;;  %v228_v6 = vld [vmem:[#allocation5 + $0x80] sm:$0xff]  ;;  %v12898_v8 = vcombine.high %v213_v2, %v221_v4  ;;  %v12897_v9 = vcombine.low %v213_v2, %v221_v4  ;;  %v229_v11 = vld [vmem:[#allocation5 + $0x88] sm:$0xff]  ;;  %s15559_s27 = scalar_lea.vmem %s12881_s25, 128  ;;  %p15564_p7 = scmp.lt.s32.totalorder %s12881_s25, %s12881_s25 }
  0xec   :  { %v236_v7 = vld [vmem:[#allocation5 + $0xc0] sm:$0xff]  ;;  %v237_v12 = vld [vmem:[#allocation5 + $0xc8] sm:$0xff]  ;;  %v15853_v57 = vpack.c.bf16 %v209_v53, %v209_v53  ;;  %p15560_p6 = scmp.ne.s32.totalorder %s12881_s25, %s15559_s27  ;;  %p15565_p8 = scmp.lt.s32.totalorder %s15559_s27, %s15559_s27 }
  0xed   :  { %v12912_v10 = vcombine.high %v228_v6, %v236_v7  ;;  %v244_v13 = vld [vmem:[#allocation5 + $0x100] sm:$0xff]  ;;  %1832 = vmatprep.subr.bf16.mxu0 %v12896_v3  ;;  %v12914_v14 = vcombine.high %v229_v11, %v237_v12  ;;  %v245_v16 = vld [vmem:[#allocation5 + $0x108] sm:$0xff]  ;;  %1873 = vmatprep.subr.bf16.mxu1 %v12898_v8  ;;  %v12911_v18 = vcombine.low %v228_v6, %v236_v7 }
  0xee   :  { %v252_v15 = vld [vmem:[#allocation5 + $0x140] sm:$0xff]  ;;  %v253_v17 = vld [vmem:[#allocation5 + $0x148] sm:$0xff]  ;;  %1833 = vmatpush1.bf16.msra.mxu0 %v12895_v5  ;;  %1874 = vmatpush1.bf16.msra.mxu1 %v12897_v9  ;;  %v12913_v19 = vcombine.low %v229_v11, %v237_v12  ;;  %p15566_p9 = por %p15565_p8, %p15564_p7 }
  0xef   :  { %1834 = vmatprep.subr.bf16.mxu0 %v12912_v10  ;;  %v12928_v20 = vcombine.high %v244_v13, %v252_v15  ;;  %1875 = vmatprep.subr.bf16.mxu1 %v12914_v14  ;;  %v12930_v21 = vcombine.high %v245_v16, %v253_v17  ;;  %v260_v22 = vld [vmem:[#allocation5 + $0x180] sm:$0xff]  ;;  %v261_v24 = vld [vmem:[#allocation5 + $0x188] sm:$0xff]  ;;  %v12927_v26 = vcombine.low %v244_v13, %v252_v15 }
  0xf0   :  { %v268_v23 = vld [vmem:[#allocation5 + $0x1c0] sm:$0xff]  ;;  %v269_v25 = vld [vmem:[#allocation5 + $0x1c8] sm:$0xff]  ;;  %v12929_v27 = vcombine.low %v245_v16, %v253_v17  ;;  %1864 = vmatprep.mubr.bf16.mxu0 %v15853_v57  ;;  %1905 = vmatprep.mubr.bf16.mxu1 %v15853_v57  ;;  %p15567_p10 = pnand %p15566_p9, %p15560_p6 }
  0xf1   :  { %v12944_v28 = vcombine.high %v260_v22, %v268_v23  ;;  %v12946_v29 = vcombine.high %v261_v24, %v269_v25  ;;  %v276_v30 = vld [vmem:[#allocation5 + $0x200] sm:$0xff]  ;;  %v277_v32 = vld [vmem:[#allocation5 + $0x208] sm:$0xff]  ;;  %v12943_v34 = vcombine.low %v260_v22, %v268_v23  ;;  %v12945_v35 = vcombine.low %v261_v24, %v269_v25 }
  0xf2   :  { %1835 = vmatpush1.bf16.msra.mxu0 %v12911_v18  ;;  %1876 = vmatpush1.bf16.msra.mxu1 %v12913_v19  ;;  %v284_v31 = vld [vmem:[#allocation5 + $0x240] sm:$0xff]  ;;  %v285_v33 = vld [vmem:[#allocation5 + $0x248] sm:$0xff] }
  0xf3   :  { %1836 = vmatprep.subr.bf16.mxu0 %v12928_v20  ;;  %1877 = vmatprep.subr.bf16.mxu1 %v12930_v21  ;;  %v12960_v36 = vcombine.high %v276_v30, %v284_v31  ;;  %v12962_v37 = vcombine.high %v277_v32, %v285_v33  ;;  %v292_v38 = vld [vmem:[#allocation5 + $0x280] sm:$0xff]  ;;  %v293_v40 = vld [vmem:[#allocation5 + $0x288] sm:$0xff]  ;;  %v12959_v42 = vcombine.low %v276_v30, %v284_v31 }
  0xf4   :  { %v300_v39 = vld [vmem:[#allocation5 + $0x2c0] sm:$0xff]  ;;  %v301_v41 = vld [vmem:[#allocation5 + $0x2c8] sm:$0xff]  ;;  %v12961_v43 = vcombine.low %v277_v32, %v285_v33 }
  0xf5   :  { %v12976_v44 = vcombine.high %v292_v38, %v300_v39  ;;  %v12978_v45 = vcombine.high %v293_v40, %v301_v41  ;;  %v308_v46 = vld [vmem:[#allocation5 + $0x300] sm:$0xff]  ;;  %v309_v48 = vld [vmem:[#allocation5 + $0x308] sm:$0xff]  ;;  %v12975_v50 = vcombine.low %v292_v38, %v300_v39  ;;  %v12977_v51 = vcombine.low %v293_v40, %v301_v41 }
  0xf6   :  { %1837 = vmatpush1.bf16.msra.mxu0 %v12927_v26  ;;  %1878 = vmatpush1.bf16.msra.mxu1 %v12929_v27  ;;  %v316_v47 = vld [vmem:[#allocation5 + $0x340] sm:$0xff]  ;;  %v317_v49 = vld [vmem:[#allocation5 + $0x348] sm:$0xff] }
  0xf7   :  { %1838 = vmatprep.subr.bf16.mxu0 %v12944_v28  ;;  %1879 = vmatprep.subr.bf16.mxu1 %v12946_v29  ;;  %v12992_v52 = vcombine.high %v308_v46, %v316_v47  ;;  %v12994_v54 = vcombine.high %v309_v48, %v317_v49  ;;  %v324_v55 = vld [vmem:[#allocation5 + $0x380] sm:$0xff]  ;;  %v325_v58 = vld [vmem:[#allocation5 + $0x388] sm:$0xff]  ;;  %v12991_v60 = vcombine.low %v308_v46, %v316_v47 }
  0xf8   :  { %v332_v56 = vld [vmem:[#allocation5 + $0x3c0] sm:$0xff]  ;;  %v333_v59 = vld [vmem:[#allocation5 + $0x3c8] sm:$0xff]  ;;  %v12993_v61 = vcombine.low %v309_v48, %v317_v49 }
  0xf9   :  { %v13008_v62 = vcombine.high %v324_v55, %v332_v56  ;;  %v13010_v63 = vcombine.high %v325_v58, %v333_v59  ;;  %v340_v0 = vld [vmem:[#allocation5 + $0x400] sm:$0xff]  ;;  %v341_v2 = vld [vmem:[#allocation5 + $0x408] sm:$0xff]  ;;  %v13007_v4 = vcombine.low %v324_v55, %v332_v56  ;;  %v13009_v5 = vcombine.low %v325_v58, %v333_v59 }
  0xfa   :  { %1839 = vmatpush1.bf16.msra.mxu0 %v12943_v34  ;;  %1880 = vmatpush1.bf16.msra.mxu1 %v12945_v35  ;;  %v348_v1 = vld [vmem:[#allocation5 + $0x440] sm:$0xff]  ;;  %v349_v3 = vld [vmem:[#allocation5 + $0x448] sm:$0xff] }
  0xfb   :  { %1840 = vmatprep.subr.bf16.mxu0 %v12960_v36  ;;  %1881 = vmatprep.subr.bf16.mxu1 %v12962_v37  ;;  %v13024_v6 = vcombine.high %v340_v0, %v348_v1  ;;  %v13026_v7 = vcombine.high %v341_v2, %v349_v3  ;;  %v356_v8 = vld [vmem:[#allocation5 + $0x480] sm:$0xff]  ;;  %v357_v10 = vld [vmem:[#allocation5 + $0x488] sm:$0xff]  ;;  %v13023_v12 = vcombine.low %v340_v0, %v348_v1  ;;  %v214_v1 = vld [vmem:[#allocation5 + $0x10] sm:$0xff] }
  0xfc   :  { %v364_v9 = vld [vmem:[#allocation5 + $0x4c0] sm:$0xff]  ;;  %v365_v11 = vld [vmem:[#allocation5 + $0x4c8] sm:$0xff]  ;;  %v13025_v13 = vcombine.low %v341_v2, %v349_v3  ;;  %v222_v2 = vld [vmem:[#allocation5 + $0x50] sm:$0xff] }
  0xfd   :  { %v13040_v14 = vcombine.high %v356_v8, %v364_v9  ;;  %v13042_v15 = vcombine.high %v357_v10, %v365_v11  ;;  %v372_v16 = vld [vmem:[#allocation5 + $0x500] sm:$0xff]  ;;  %v373_v18 = vld [vmem:[#allocation5 + $0x508] sm:$0xff]  ;;  %v13039_v20 = vcombine.low %v356_v8, %v364_v9  ;;  %v13041_v21 = vcombine.low %v357_v10, %v365_v11  ;;  %v215_v3 = vld [vmem:[#allocation5 + $0x18] sm:$0xff] }
  0xfe   :  { %1841 = vmatpush1.bf16.msra.mxu0 %v12959_v42  ;;  %1882 = vmatpush1.bf16.msra.mxu1 %v12961_v43  ;;  %v380_v17 = vld [vmem:[#allocation5 + $0x540] sm:$0xff]  ;;  %v381_v19 = vld [vmem:[#allocation5 + $0x548] sm:$0xff]  ;;  %v12900_v8 = vcombine.high %v214_v1, %v222_v2  ;;  %v230_v10 = vld [vmem:[#allocation5 + $0x90] sm:$0xff] }
  0xff   :  { %1842 = vmatprep.subr.bf16.mxu0 %v12976_v44  ;;  %1883 = vmatprep.subr.bf16.mxu1 %v12978_v45  ;;  %v13056_v22 = vcombine.high %v372_v16, %v380_v17  ;;  %v13058_v23 = vcombine.high %v373_v18, %v381_v19  ;;  %v388_v24 = vld [vmem:[#allocation5 + $0x580] sm:$0xff]  ;;  %v389_v26 = vld [vmem:[#allocation5 + $0x588] sm:$0xff]  ;;  %v13055_v28 = vcombine.low %v372_v16, %v380_v17  ;;  %v238_v11 = vld [vmem:[#allocation5 + $0xd0] sm:$0xff] }
 0x100   :  { %v396_v25 = vld [vmem:[#allocation5 + $0x5c0] sm:$0xff]  ;;  %v397_v27 = vld [vmem:[#allocation5 + $0x5c8] sm:$0xff]  ;;  %v13057_v29 = vcombine.low %v373_v18, %v381_v19  ;;  %v12916_v17 = vcombine.high %v230_v10, %v238_v11  ;;  %v246_v18 = vld [vmem:[#allocation5 + $0x110] sm:$0xff] }
 0x101   :  { %v13072_v30 = vcombine.high %v388_v24, %v396_v25  ;;  %v13074_v31 = vcombine.high %v389_v26, %v397_v27  ;;  %v404_v32 = vld [vmem:[#allocation5 + $0x600] sm:$0xff]  ;;  %v405_v34 = vld [vmem:[#allocation5 + $0x608] sm:$0xff]  ;;  %v13071_v36 = vcombine.low %v388_v24, %v396_v25  ;;  %v13073_v37 = vcombine.low %v389_v26, %v397_v27  ;;  %v254_v19 = vld [vmem:[#allocation5 + $0x150] sm:$0xff] }
 0x102   :  { %1843 = vmatpush1.bf16.msra.mxu0 %v12975_v50  ;;  %1884 = vmatpush1.bf16.msra.mxu1 %v12977_v51  ;;  %v412_v33 = vld [vmem:[#allocation5 + $0x640] sm:$0xff]  ;;  %v413_v35 = vld [vmem:[#allocation5 + $0x648] sm:$0xff]  ;;  %v12932_v25 = vcombine.high %v246_v18, %v254_v19  ;;  %v262_v26 = vld [vmem:[#allocation5 + $0x190] sm:$0xff] }
 0x103   :  { %1844 = vmatprep.subr.bf16.mxu0 %v12992_v52  ;;  %1885 = vmatprep.subr.bf16.mxu1 %v12994_v54  ;;  %v13088_v38 = vcombine.high %v404_v32, %v412_v33  ;;  %v13090_v39 = vcombine.high %v405_v34, %v413_v35  ;;  %v420_v40 = vld [vmem:[#allocation5 + $0x680] sm:$0xff]  ;;  %v421_v42 = vld [vmem:[#allocation5 + $0x688] sm:$0xff]  ;;  %v13087_v44 = vcombine.low %v404_v32, %v412_v33  ;;  %v270_v27 = vld [vmem:[#allocation5 + $0x1d0] sm:$0xff] }
 0x104   :  { %v428_v41 = vld [vmem:[#allocation5 + $0x6c0] sm:$0xff]  ;;  %v429_v43 = vld [vmem:[#allocation5 + $0x6c8] sm:$0xff]  ;;  %v13089_v45 = vcombine.low %v405_v34, %v413_v35  ;;  %v12948_v33 = vcombine.high %v262_v26, %v270_v27  ;;  %v278_v34 = vld [vmem:[#allocation5 + $0x210] sm:$0xff] }
 0x105   :  { %v13104_v46 = vcombine.high %v420_v40, %v428_v41  ;;  %v13106_v47 = vcombine.high %v421_v42, %v429_v43  ;;  %v436_v48 = vld [vmem:[#allocation5 + $0x700] sm:$0xff]  ;;  %v437_v50 = vld [vmem:[#allocation5 + $0x708] sm:$0xff]  ;;  %v13103_v52 = vcombine.low %v420_v40, %v428_v41  ;;  %v13105_v53 = vcombine.low %v421_v42, %v429_v43  ;;  %v286_v35 = vld [vmem:[#allocation5 + $0x250] sm:$0xff] }
 0x106   :  { %1845 = vmatpush1.bf16.msra.mxu0 %v12991_v60  ;;  %1886 = vmatpush1.bf16.msra.mxu1 %v12993_v61  ;;  %v444_v49 = vld [vmem:[#allocation5 + $0x740] sm:$0xff]  ;;  %v445_v51 = vld [vmem:[#allocation5 + $0x748] sm:$0xff]  ;;  %v12964_v41 = vcombine.high %v278_v34, %v286_v35  ;;  %v294_v42 = vld [vmem:[#allocation5 + $0x290] sm:$0xff] }
 0x107   :  { %1846 = vmatprep.subr.bf16.mxu0 %v13008_v62  ;;  %1887 = vmatprep.subr.bf16.mxu1 %v13010_v63  ;;  %v13120_v54 = vcombine.high %v436_v48, %v444_v49  ;;  %v13122_v55 = vcombine.high %v437_v50, %v445_v51  ;;  %v452_v56 = vld [vmem:[#allocation5 + $0x780] sm:$0xff]  ;;  %v453_v59 = vld [vmem:[#allocation5 + $0x788] sm:$0xff]  ;;  %v13119_v61 = vcombine.low %v436_v48, %v444_v49  ;;  %v302_v43 = vld [vmem:[#allocation5 + $0x2d0] sm:$0xff] }
 0x108   :  { %v460_v58 = vld [vmem:[#allocation5 + $0x7c0] sm:$0xff]  ;;  %v461_v60 = vld [vmem:[#allocation5 + $0x7c8] sm:$0xff]  ;;  %v13121_v62 = vcombine.low %v437_v50, %v445_v51  ;;  %v12980_v49 = vcombine.high %v294_v42, %v302_v43  ;;  %v310_v50 = vld [vmem:[#allocation5 + $0x310] sm:$0xff] }
 0x109   :  { %v13136_v63 = vcombine.high %v452_v56, %v460_v58  ;;  %v13138_v0 = vcombine.high %v453_v59, %v461_v60  ;;  %v318_v51 = vld [vmem:[#allocation5 + $0x350] sm:$0xff] }
 0x10a   :  { %1847 = vmatpush1.bf16.msra.mxu0 %v13007_v4  ;;  %1888 = vmatpush1.bf16.msra.mxu1 %v13009_v5  ;;  %v223_v4 = vld [vmem:[#allocation5 + $0x58] sm:$0xff]  ;;  %v13135_v5 = vcombine.low %v452_v56, %v460_v58  ;;  %v12996_v58 = vcombine.high %v310_v50, %v318_v51 }
 0x10b   :  { %1848 = vmatprep.subr.bf16.mxu0 %v13024_v6  ;;  %1889 = vmatprep.subr.bf16.mxu1 %v13026_v7  ;;  %v208_v6 = vld [vmem:[#allocation2] sm:$0xff]  ;;  %v13137_v7 = vcombine.low %v453_v59, %v461_v60  ;;  %v12902_v9 = vcombine.high %v215_v3, %v223_v4  ;;  %v12901_v16 = vcombine.low %v215_v3, %v223_v4 }
 0x10c   :  { %v326_v59 = vld [vmem:[#allocation5 + $0x390] sm:$0xff] }
 0x10d   :  { %v334_v60 = vld [vmem:[#allocation5 + $0x3d0] sm:$0xff] }
 0x10e   :  { %1849 = vmatpush1.bf16.msra.mxu0 %v13023_v12  ;;  %1890 = vmatpush1.bf16.msra.mxu1 %v13025_v13  ;;  %v15857_v12 = vpack.c.bf16 %v208_v6, %v208_v6  ;;  %v231_v13 = vld [vmem:[#allocation5 + $0x98] sm:$0xff]  ;;  %v342_v3 = vld [vmem:[#allocation5 + $0x410] sm:$0xff] }
 0x10f   :  { %1850 = vmatprep.subr.bf16.mxu0 %v13040_v14  ;;  %1891 = vmatprep.subr.bf16.mxu1 %v13042_v15  ;;  %v239_v14 = vld [vmem:[#allocation5 + $0xd8] sm:$0xff]  ;;  %v12899_v15 = vcombine.low %v214_v1, %v222_v2  ;;  %v13012_v2 = vcombine.high %v326_v59, %v334_v60  ;;  %v350_v4 = vld [vmem:[#allocation5 + $0x450] sm:$0xff] }
 0x110   :  { %v12917_v24 = vcombine.low %v231_v13, %v239_v14 }
 0x112   :  { %1851 = vmatpush1.bf16.msra.mxu0 %v13039_v20  ;;  %1892 = vmatpush1.bf16.msra.mxu1 %v13041_v21  ;;  %v247_v20 = vld [vmem:[#allocation5 + $0x118] sm:$0xff]  ;;  %v12918_v21 = vcombine.high %v231_v13, %v239_v14  ;;  %v366_v13 = vld [vmem:[#allocation5 + $0x4d0] sm:$0xff] }
 0x113   :  { %1852 = vmatprep.subr.bf16.mxu0 %v13056_v22  ;;  %1893 = vmatprep.subr.bf16.mxu1 %v13058_v23  ;;  %v255_v22 = vld [vmem:[#allocation5 + $0x158] sm:$0xff]  ;;  %v12915_v23 = vcombine.low %v230_v10, %v238_v11  ;;  %v13028_v10 = vcombine.high %v342_v3, %v350_v4  ;;  %v358_v11 = vld [vmem:[#allocation5 + $0x490] sm:$0xff] }
 0x114   :  { %v12933_v32 = vcombine.low %v247_v20, %v255_v22  ;;  %v359_v14 = vld [vmem:[#allocation5 + $0x498] sm:$0xff] }
 0x116   :  { %1853 = vmatpush1.bf16.msra.mxu0 %v13055_v28  ;;  %1894 = vmatpush1.bf16.msra.mxu1 %v13057_v29  ;;  %v263_v28 = vld [vmem:[#allocation5 + $0x198] sm:$0xff]  ;;  %v12934_v29 = vcombine.high %v247_v20, %v255_v22  ;;  %v374_v20 = vld [vmem:[#allocation5 + $0x510] sm:$0xff] }
 0x117   :  { %1854 = vmatprep.subr.bf16.mxu0 %v13072_v30  ;;  %1895 = vmatprep.subr.bf16.mxu1 %v13074_v31  ;;  %v271_v30 = vld [vmem:[#allocation5 + $0x1d8] sm:$0xff]  ;;  %v12931_v31 = vcombine.low %v246_v18, %v254_v19  ;;  %v13044_v19 = vcombine.high %v358_v11, %v366_v13 }
 0x118   :  { %v12949_v40 = vcombine.low %v263_v28, %v271_v30  ;;  %v375_v22 = vld [vmem:[#allocation5 + $0x518] sm:$0xff] }
 0x11a   :  { %1855 = vmatpush1.bf16.msra.mxu0 %v13071_v36  ;;  %1896 = vmatpush1.bf16.msra.mxu1 %v13073_v37  ;;  %v279_v36 = vld [vmem:[#allocation5 + $0x218] sm:$0xff]  ;;  %v12950_v37 = vcombine.high %v263_v28, %v271_v30  ;;  %v390_v28 = vld [vmem:[#allocation5 + $0x590] sm:$0xff] }
 0x11b   :  { %1856 = vmatprep.subr.bf16.mxu0 %v13088_v38  ;;  %1897 = vmatprep.subr.bf16.mxu1 %v13090_v39  ;;  %v287_v38 = vld [vmem:[#allocation5 + $0x258] sm:$0xff]  ;;  %v12947_v39 = vcombine.low %v262_v26, %v270_v27 }
 0x11c   :  { %v12965_v48 = vcombine.low %v279_v36, %v287_v38  ;;  %v391_v30 = vld [vmem:[#allocation5 + $0x598] sm:$0xff] }
 0x11e   :  { %1857 = vmatpush1.bf16.msra.mxu0 %v13087_v44  ;;  %1898 = vmatpush1.bf16.msra.mxu1 %v13089_v45  ;;  %v295_v44 = vld [vmem:[#allocation5 + $0x298] sm:$0xff]  ;;  %v12966_v45 = vcombine.high %v279_v36, %v287_v38  ;;  %v406_v36 = vld [vmem:[#allocation5 + $0x610] sm:$0xff] }
 0x11f   :  { %1858 = vmatprep.subr.bf16.mxu0 %v13104_v46  ;;  %1899 = vmatprep.subr.bf16.mxu1 %v13106_v47  ;;  %v303_v46 = vld [vmem:[#allocation5 + $0x2d8] sm:$0xff]  ;;  %v12963_v47 = vcombine.low %v278_v34, %v286_v35 }
 0x120   :  { %v12981_v56 = vcombine.low %v295_v44, %v303_v46  ;;  %v407_v38 = vld [vmem:[#allocation5 + $0x618] sm:$0xff] }
 0x122   :  { %1859 = vmatpush1.bf16.msra.mxu0 %v13103_v52  ;;  %1900 = vmatpush1.bf16.msra.mxu1 %v13105_v53  ;;  %v311_v52 = vld [vmem:[#allocation5 + $0x318] sm:$0xff]  ;;  %v12982_v53 = vcombine.high %v295_v44, %v303_v46  ;;  %v422_v44 = vld [vmem:[#allocation5 + $0x690] sm:$0xff] }
 0x123   :  { %1860 = vmatprep.subr.bf16.mxu0 %v13120_v54  ;;  %1901 = vmatprep.subr.bf16.mxu1 %v13122_v55  ;;  %v319_v54 = vld [vmem:[#allocation5 + $0x358] sm:$0xff]  ;;  %v12979_v55 = vcombine.low %v294_v42, %v302_v43 }
 0x124   :  { %v12997_v1 = vcombine.low %v311_v52, %v319_v54  ;;  %v423_v46 = vld [vmem:[#allocation5 + $0x698] sm:$0xff] }
 0x126   :  { %1861 = vmatpush1.bf16.msra.mxu0 %v13119_v61  ;;  %1902 = vmatpush1.bf16.msra.mxu1 %v13121_v62  ;;  %v327_v61 = vld [vmem:[#allocation5 + $0x398] sm:$0xff]  ;;  %v12998_v62 = vcombine.high %v311_v52, %v319_v54  ;;  %v438_v52 = vld [vmem:[#allocation5 + $0x710] sm:$0xff] }
 0x127   :  { %1862 = vmatprep.subr.bf16.mxu0 %v13136_v63  ;;  %1903 = vmatprep.subr.bf16.mxu1 %v13138_v0  ;;  %v335_v63 = vld [vmem:[#allocation5 + $0x3d8] sm:$0xff]  ;;  %v12995_v0 = vcombine.low %v310_v50, %v318_v51 }
 0x128   :  { %v13014_v6 = vcombine.high %v327_v61, %v335_v63  ;;  %v439_v54 = vld [vmem:[#allocation5 + $0x718] sm:$0xff] }
 0x12a   :  { %1863 = vmatpush1.bf16.msra.mxu0 %v13135_v5  ;;  %1904 = vmatpush1.bf16.msra.mxu1 %v13137_v7  ;;  %v343_v5 = vld [vmem:[#allocation5 + $0x418] sm:$0xff] }
 0x12b   :  { %1914 = vmatprep.subr.bf16.mxu0 %v12900_v8  ;;  %1955 = vmatprep.subr.bf16.mxu1 %v12902_v9  ;;  %v351_v7 = vld [vmem:[#allocation5 + $0x458] sm:$0xff]  ;;  %v13011_v8 = vcombine.low %v326_v59, %v334_v60  ;;  %v13013_v9 = vcombine.low %v327_v61, %v335_v63  ;;  %v454_v61 = vld [vmem:[#allocation5 + $0x790] sm:$0xff] }
 0x12c   :  { %v13029_v18 = vcombine.low %v343_v5, %v351_v7  ;;  %v455_v63 = vld [vmem:[#allocation5 + $0x798] sm:$0xff] }
 0x12d   :  { %1865 = vmatmul.mubr.bf16.vlgmr.msra.gmra.mrb[0].mxu0 %v15857_v12  ;;  %1906 = vmatmul.mubr.bf16.vlgmr.msra.gmra.mrb[0].mxu1 %v15857_v12 }
 0x12e   :  { %1915 = vmatpush1.bf16.msra.mxu0 %v12899_v15  ;;  %1956 = vmatpush1.bf16.msra.mxu1 %v12901_v16  ;;  %v13030_v15 = vcombine.high %v343_v5, %v351_v7  ;;  %v367_v16 = vld [vmem:[#allocation5 + $0x4d8] sm:$0xff]  ;;  %v216_v5 = vld [vmem:[#allocation5 + $0x20] sm:$0xff]  ;;  %v217_v7 = vld [vmem:[#allocation5 + $0x28] sm:$0xff] }
 0x12f   :  { %1916 = vmatprep.subr.bf16.mxu0 %v12916_v17  ;;  %1957 = vmatprep.subr.bf16.mxu1 %v12918_v21  ;;  %v13027_v17 = vcombine.low %v342_v3, %v350_v4  ;;  %v382_v21 = vld [vmem:[#allocation5 + $0x550] sm:$0xff]  ;;  %v13045_v26 = vcombine.low %v359_v14, %v367_v16 }
 0x130   :  { %1946 = vmatprep.mubr.bf16.mxu0 %v15853_v57  ;;  %1987 = vmatprep.mubr.bf16.mxu1 %v15853_v57  ;;  %v13060_v27 = vcombine.high %v374_v20, %v382_v21 }
 0x132   :  { %1917 = vmatpush1.bf16.msra.mxu0 %v12915_v23  ;;  %1958 = vmatpush1.bf16.msra.mxu1 %v12917_v24  ;;  %v13046_v23 = vcombine.high %v359_v14, %v367_v16  ;;  %v383_v24 = vld [vmem:[#allocation5 + $0x558] sm:$0xff]  ;;  %v232_v14 = vld [vmem:[#allocation5 + $0xa0] sm:$0xff]  ;;  %v233_v16 = vld [vmem:[#allocation5 + $0xa8] sm:$0xff] }
 0x133   :  { %1918 = vmatprep.subr.bf16.mxu0 %v12932_v25  ;;  %1959 = vmatprep.subr.bf16.mxu1 %v12934_v29  ;;  %v13043_v25 = vcombine.low %v358_v11, %v366_v13  ;;  %v398_v29 = vld [vmem:[#allocation5 + $0x5d0] sm:$0xff]  ;;  %v13061_v34 = vcombine.low %v375_v22, %v383_v24 }
 0x134   :  { %v13076_v35 = vcombine.high %v390_v28, %v398_v29 }
 0x136   :  { %1919 = vmatpush1.bf16.msra.mxu0 %v12931_v31  ;;  %1960 = vmatpush1.bf16.msra.mxu1 %v12933_v32  ;;  %v13062_v31 = vcombine.high %v375_v22, %v383_v24  ;;  %v399_v32 = vld [vmem:[#allocation5 + $0x5d8] sm:$0xff]  ;;  %v248_v22 = vld [vmem:[#allocation5 + $0x120] sm:$0xff]  ;;  %v249_v24 = vld [vmem:[#allocation5 + $0x128] sm:$0xff] }
 0x137   :  { %1920 = vmatprep.subr.bf16.mxu0 %v12948_v33  ;;  %1961 = vmatprep.subr.bf16.mxu1 %v12950_v37  ;;  %v13059_v33 = vcombine.low %v374_v20, %v382_v21  ;;  %v414_v37 = vld [vmem:[#allocation5 + $0x650] sm:$0xff]  ;;  %v13077_v42 = vcombine.low %v391_v30, %v399_v32 }
 0x138   :  { %v13092_v43 = vcombine.high %v406_v36, %v414_v37 }
 0x13a   :  { %1921 = vmatpush1.bf16.msra.mxu0 %v12947_v39  ;;  %1962 = vmatpush1.bf16.msra.mxu1 %v12949_v40  ;;  %v13078_v39 = vcombine.high %v391_v30, %v399_v32  ;;  %v415_v40 = vld [vmem:[#allocation5 + $0x658] sm:$0xff]  ;;  %v264_v30 = vld [vmem:[#allocation5 + $0x1a0] sm:$0xff]  ;;  %v265_v32 = vld [vmem:[#allocation5 + $0x1a8] sm:$0xff] }
 0x13b   :  { %1922 = vmatprep.subr.bf16.mxu0 %v12964_v41  ;;  %1963 = vmatprep.subr.bf16.mxu1 %v12966_v45  ;;  %v13075_v41 = vcombine.low %v390_v28, %v398_v29  ;;  %v430_v45 = vld [vmem:[#allocation5 + $0x6d0] sm:$0xff]  ;;  %v13093_v50 = vcombine.low %v407_v38, %v415_v40 }
 0x13c   :  { %v13108_v51 = vcombine.high %v422_v44, %v430_v45 }
 0x13e   :  { %1923 = vmatpush1.bf16.msra.mxu0 %v12963_v47  ;;  %1964 = vmatpush1.bf16.msra.mxu1 %v12965_v48  ;;  %v13094_v47 = vcombine.high %v407_v38, %v415_v40  ;;  %v431_v48 = vld [vmem:[#allocation5 + $0x6d8] sm:$0xff]  ;;  %v280_v38 = vld [vmem:[#allocation5 + $0x220] sm:$0xff]  ;;  %v281_v40 = vld [vmem:[#allocation5 + $0x228] sm:$0xff] }
 0x13f   :  { %1924 = vmatprep.subr.bf16.mxu0 %v12980_v49  ;;  %1965 = vmatprep.subr.bf16.mxu1 %v12982_v53  ;;  %v13091_v49 = vcombine.low %v406_v36, %v414_v37  ;;  %v446_v53 = vld [vmem:[#allocation5 + $0x750] sm:$0xff]  ;;  %v13109_v59 = vcombine.low %v423_v46, %v431_v48 }
 0x140   :  { %v13124_v60 = vcombine.high %v438_v52, %v446_v53 }
 0x142   :  { %1925 = vmatpush1.bf16.msra.mxu0 %v12979_v55  ;;  %1966 = vmatpush1.bf16.msra.mxu1 %v12981_v56  ;;  %v13110_v55 = vcombine.high %v423_v46, %v431_v48  ;;  %v447_v56 = vld [vmem:[#allocation5 + $0x758] sm:$0xff]  ;;  %v296_v46 = vld [vmem:[#allocation5 + $0x2a0] sm:$0xff]  ;;  %v297_v48 = vld [vmem:[#allocation5 + $0x2a8] sm:$0xff] }
 0x143   :  { %1926 = vmatprep.subr.bf16.mxu0 %v12996_v58  ;;  %1967 = vmatprep.subr.bf16.mxu1 %v12998_v62  ;;  %v13107_v58 = vcombine.low %v422_v44, %v430_v45  ;;  %v462_v62 = vld [vmem:[#allocation5 + $0x7d0] sm:$0xff]  ;;  %v13125_v3 = vcombine.low %v439_v54, %v447_v56 }
 0x144   :  { %v13140_v4 = vcombine.high %v454_v61, %v462_v62 }
 0x146   :  { %1927 = vmatpush1.bf16.msra.mxu0 %v12995_v0  ;;  %1968 = vmatpush1.bf16.msra.mxu1 %v12997_v1  ;;  %v13126_v0 = vcombine.high %v439_v54, %v447_v56  ;;  %v463_v1 = vld [vmem:[#allocation5 + $0x7d8] sm:$0xff]  ;;  %v312_v54 = vld [vmem:[#allocation5 + $0x320] sm:$0xff]  ;;  %v313_v56 = vld [vmem:[#allocation5 + $0x328] sm:$0xff] }
 0x147   :  { %1928 = vmatprep.subr.bf16.mxu0 %v13012_v2  ;;  %1969 = vmatprep.subr.bf16.mxu1 %v13014_v6  ;;  %v13123_v2 = vcombine.low %v438_v52, %v446_v53  ;;  %v224_v6 = vld [vmem:[#allocation5 + $0x60] sm:$0xff]  ;;  %v13141_v11 = vcombine.low %v455_v63, %v463_v1 }
 0x148   :  { %v12904_v13 = vcombine.high %v216_v5, %v224_v6 }
 0x14a   :  { %1929 = vmatpush1.bf16.msra.mxu0 %v13011_v8  ;;  %1970 = vmatpush1.bf16.msra.mxu1 %v13013_v9  ;;  %v13142_v8 = vcombine.high %v455_v63, %v463_v1  ;;  %v225_v9 = vld [vmem:[#allocation5 + $0x68] sm:$0xff]  ;;  %v328_v63 = vld [vmem:[#allocation5 + $0x3a0] sm:$0xff] }
 0x14b   :  { %1930 = vmatprep.subr.bf16.mxu0 %v13028_v10  ;;  %1971 = vmatprep.subr.bf16.mxu1 %v13030_v15  ;;  %v13139_v10 = vcombine.low %v454_v61, %v462_v62  ;;  %v240_v15 = vld [vmem:[#allocation5 + $0xe0] sm:$0xff]  ;;  %v12905_v20 = vcombine.low %v217_v7, %v225_v9 }
 0x14c   :  { %v12920_v21 = vcombine.high %v232_v14, %v240_v15 }
 0x14e   :  { %1931 = vmatpush1.bf16.msra.mxu0 %v13027_v17  ;;  %1972 = vmatpush1.bf16.msra.mxu1 %v13029_v18  ;;  %v12906_v17 = vcombine.high %v217_v7, %v225_v9  ;;  %v241_v18 = vld [vmem:[#allocation5 + $0xe8] sm:$0xff]  ;;  %v344_v7 = vld [vmem:[#allocation5 + $0x420] sm:$0xff] }
 0x14f   :  { %1932 = vmatprep.subr.bf16.mxu0 %v13044_v19  ;;  %1973 = vmatprep.subr.bf16.mxu1 %v13046_v23  ;;  %v12903_v19 = vcombine.low %v216_v5, %v224_v6  ;;  %v256_v23 = vld [vmem:[#allocation5 + $0x160] sm:$0xff]  ;;  %v12921_v28 = vcombine.low %v233_v16, %v241_v18  ;;  %v345_v9 = vld [vmem:[#allocation5 + $0x428] sm:$0xff] }
 0x150   :  { %v12936_v29 = vcombine.high %v248_v22, %v256_v23 }
 0x152   :  { %1933 = vmatpush1.bf16.msra.mxu0 %v13043_v25  ;;  %1974 = vmatpush1.bf16.msra.mxu1 %v13045_v26  ;;  %v12922_v25 = vcombine.high %v233_v16, %v241_v18  ;;  %v257_v26 = vld [vmem:[#allocation5 + $0x168] sm:$0xff]  ;;  %v360_v16 = vld [vmem:[#allocation5 + $0x4a0] sm:$0xff] }
 0x153   :  { %1934 = vmatprep.subr.bf16.mxu0 %v13060_v27  ;;  %1975 = vmatprep.subr.bf16.mxu1 %v13062_v31  ;;  %v12919_v27 = vcombine.low %v232_v14, %v240_v15  ;;  %v272_v31 = vld [vmem:[#allocation5 + $0x1e0] sm:$0xff]  ;;  %v12937_v36 = vcombine.low %v249_v24, %v257_v26  ;;  %v361_v18 = vld [vmem:[#allocation5 + $0x4a8] sm:$0xff] }
 0x154   :  { %v12952_v37 = vcombine.high %v264_v30, %v272_v31 }
 0x156   :  { %1935 = vmatpush1.bf16.msra.mxu0 %v13059_v33  ;;  %1976 = vmatpush1.bf16.msra.mxu1 %v13061_v34  ;;  %v12938_v33 = vcombine.high %v249_v24, %v257_v26  ;;  %v273_v34 = vld [vmem:[#allocation5 + $0x1e8] sm:$0xff]  ;;  %v376_v24 = vld [vmem:[#allocation5 + $0x520] sm:$0xff] }
 0x157   :  { %1936 = vmatprep.subr.bf16.mxu0 %v13076_v35  ;;  %1977 = vmatprep.subr.bf16.mxu1 %v13078_v39  ;;  %v12935_v35 = vcombine.low %v248_v22, %v256_v23  ;;  %v288_v39 = vld [vmem:[#allocation5 + $0x260] sm:$0xff]  ;;  %v12953_v44 = vcombine.low %v265_v32, %v273_v34  ;;  %v377_v26 = vld [vmem:[#allocation5 + $0x528] sm:$0xff] }
 0x158   :  { %v12968_v45 = vcombine.high %v280_v38, %v288_v39 }
 0x15a   :  { %1937 = vmatpush1.bf16.msra.mxu0 %v13075_v41  ;;  %1978 = vmatpush1.bf16.msra.mxu1 %v13077_v42  ;;  %v12954_v41 = vcombine.high %v265_v32, %v273_v34  ;;  %v289_v42 = vld [vmem:[#allocation5 + $0x268] sm:$0xff]  ;;  %v392_v32 = vld [vmem:[#allocation5 + $0x5a0] sm:$0xff] }
 0x15b   :  { %1938 = vmatprep.subr.bf16.mxu0 %v13092_v43  ;;  %1979 = vmatprep.subr.bf16.mxu1 %v13094_v47  ;;  %v12951_v43 = vcombine.low %v264_v30, %v272_v31  ;;  %v304_v47 = vld [vmem:[#allocation5 + $0x2e0] sm:$0xff]  ;;  %v12969_v52 = vcombine.low %v281_v40, %v289_v42  ;;  %v393_v34 = vld [vmem:[#allocation5 + $0x5a8] sm:$0xff] }
 0x15c   :  { %v12984_v53 = vcombine.high %v296_v46, %v304_v47 }
 0x15e   :  { %1939 = vmatpush1.bf16.msra.mxu0 %v13091_v49  ;;  %1980 = vmatpush1.bf16.msra.mxu1 %v13093_v50  ;;  %v12970_v49 = vcombine.high %v281_v40, %v289_v42  ;;  %v305_v50 = vld [vmem:[#allocation5 + $0x2e8] sm:$0xff]  ;;  %v408_v40 = vld [vmem:[#allocation5 + $0x620] sm:$0xff] }
 0x15f   :  { %1940 = vmatprep.subr.bf16.mxu0 %v13108_v51  ;;  %1981 = vmatprep.subr.bf16.mxu1 %v13110_v55  ;;  %v12967_v51 = vcombine.low %v280_v38, %v288_v39  ;;  %v320_v55 = vld [vmem:[#allocation5 + $0x360] sm:$0xff]  ;;  %v12985_v61 = vcombine.low %v297_v48, %v305_v50  ;;  %v409_v42 = vld [vmem:[#allocation5 + $0x628] sm:$0xff] }
 0x160   :  { %v13000_v62 = vcombine.high %v312_v54, %v320_v55 }
 0x162   :  { %1941 = vmatpush1.bf16.msra.mxu0 %v13107_v58  ;;  %1982 = vmatpush1.bf16.msra.mxu1 %v13109_v59  ;;  %v12986_v58 = vcombine.high %v297_v48, %v305_v50  ;;  %v321_v59 = vld [vmem:[#allocation5 + $0x368] sm:$0xff]  ;;  %v424_v48 = vld [vmem:[#allocation5 + $0x6a0] sm:$0xff] }
 0x163   :  { %1942 = vmatprep.subr.bf16.mxu0 %v13124_v60  ;;  %1983 = vmatprep.subr.bf16.mxu1 %v13126_v0  ;;  %v12983_v60 = vcombine.low %v296_v46, %v304_v47  ;;  %v336_v0 = vld [vmem:[#allocation5 + $0x3e0] sm:$0xff]  ;;  %v13002_v1 = vcombine.high %v313_v56, %v321_v59  ;;  %v13001_v5 = vcombine.low %v313_v56, %v321_v59  ;;  %v425_v50 = vld [vmem:[#allocation5 + $0x6a8] sm:$0xff] }
 0x164   :  { %v13016_v6 = vcombine.high %v328_v63, %v336_v0  ;;  %v440_v56 = vld [vmem:[#allocation5 + $0x720] sm:$0xff]  ;;  %v441_v59 = vld [vmem:[#allocation5 + $0x728] sm:$0xff] }
 0x166   :  { %1943 = vmatpush1.bf16.msra.mxu0 %v13123_v2  ;;  %1984 = vmatpush1.bf16.msra.mxu1 %v13125_v3  ;;  %v329_v2 = vld [vmem:[#allocation5 + $0x3a8] sm:$0xff] }
 0x167   :  { %1944 = vmatprep.subr.bf16.mxu0 %v13140_v4  ;;  %1985 = vmatprep.subr.bf16.mxu1 %v13142_v8  ;;  %v337_v3 = vld [vmem:[#allocation5 + $0x3e8] sm:$0xff]  ;;  %v12999_v4 = vcombine.low %v312_v54, %v320_v55  ;;  %v352_v8 = vld [vmem:[#allocation5 + $0x460] sm:$0xff] }
 0x168   :  { %v13017_v14 = vcombine.low %v329_v2, %v337_v3  ;;  %v13032_v15 = vcombine.high %v344_v7, %v352_v8 }
 0x16a   :  { %1945 = vmatpush1.bf16.msra.mxu0 %v13139_v10  ;;  %1986 = vmatpush1.bf16.msra.mxu1 %v13141_v11  ;;  %v13018_v10 = vcombine.high %v329_v2, %v337_v3  ;;  %v353_v11 = vld [vmem:[#allocation5 + $0x468] sm:$0xff]  ;;  %v464_v2 = vld [vmem:[#allocation5 + $0x7e0] sm:$0xff] }
 0x16b   :  { %1996 = vmatprep.subr.bf16.mxu0 %v12904_v13  ;;  %2037 = vmatprep.subr.bf16.mxu1 %v12906_v17  ;;  %v13015_v13 = vcombine.low %v328_v63, %v336_v0  ;;  %v368_v17 = vld [vmem:[#allocation5 + $0x4e0] sm:$0xff]  ;;  %v13033_v22 = vcombine.low %v345_v9, %v353_v11  ;;  %v457_v3 = vld [vmem:[#allocation5 + $0x7a8] sm:$0xff] }
 0x16c   :  { %v13048_v23 = vcombine.high %v360_v16, %v368_v17 }
 0x16d   :  { %1947 = vmatmul.mubr.bf16.vlgmr.msra.gmra.mrb[4].mxu0 %v15857_v12  ;;  %1988 = vmatmul.mubr.bf16.vlgmr.msra.gmra.mrb[4].mxu1 %v15857_v12 }
 0x16e   :  { %1997 = vmatpush1.bf16.msra.mxu0 %v12903_v19  ;;  %2038 = vmatpush1.bf16.msra.mxu1 %v12905_v20  ;;  %v13034_v19 = vcombine.high %v345_v9, %v353_v11  ;;  %v369_v20 = vld [vmem:[#allocation5 + $0x4e8] sm:$0xff]  ;;  %v218_v9 = vld [vmem:[#allocation5 + $0x30] sm:$0xff]  ;;  %v219_v11 = vld [vmem:[#allocation5 + $0x38] sm:$0xff] }
 0x16f   :  { %1998 = vmatprep.subr.bf16.mxu0 %v12920_v21  ;;  %2039 = vmatprep.subr.bf16.mxu1 %v12922_v25  ;;  %v13031_v21 = vcombine.low %v344_v7, %v352_v8  ;;  %v384_v25 = vld [vmem:[#allocation5 + $0x560] sm:$0xff]  ;;  %v13049_v30 = vcombine.low %v361_v18, %v369_v20 }
 0x170   :  { %2028 = vmatprep.mubr.bf16.mxu0 %v15853_v57  ;;  %2069 = vmatprep.mubr.bf16.mxu1 %v15853_v57  ;;  %v13064_v31 = vcombine.high %v376_v24, %v384_v25 }
 0x172   :  { %1999 = vmatpush1.bf16.msra.mxu0 %v12919_v27  ;;  %2040 = vmatpush1.bf16.msra.mxu1 %v12921_v28  ;;  %v13050_v27 = vcombine.high %v361_v18, %v369_v20  ;;  %v385_v28 = vld [vmem:[#allocation5 + $0x568] sm:$0xff]  ;;  %v234_v18 = vld [vmem:[#allocation5 + $0xb0] sm:$0xff]  ;;  %v235_v20 = vld [vmem:[#allocation5 + $0xb8] sm:$0xff] }
 0x173   :  { %2000 = vmatprep.subr.bf16.mxu0 %v12936_v29  ;;  %2041 = vmatprep.subr.bf16.mxu1 %v12938_v33  ;;  %v13047_v29 = vcombine.low %v360_v16, %v368_v17  ;;  %v400_v33 = vld [vmem:[#allocation5 + $0x5e0] sm:$0xff]  ;;  %v13065_v38 = vcombine.low %v377_v26, %v385_v28 }
 0x174   :  { %v13080_v39 = vcombine.high %v392_v32, %v400_v33 }
 0x176   :  { %2001 = vmatpush1.bf16.msra.mxu0 %v12935_v35  ;;  %2042 = vmatpush1.bf16.msra.mxu1 %v12937_v36  ;;  %v13066_v35 = vcombine.high %v377_v26, %v385_v28  ;;  %v401_v36 = vld [vmem:[#allocation5 + $0x5e8] sm:$0xff]  ;;  %v250_v26 = vld [vmem:[#allocation5 + $0x130] sm:$0xff]  ;;  %v251_v28 = vld [vmem:[#allocation5 + $0x138] sm:$0xff] }
 0x177   :  { %2002 = vmatprep.subr.bf16.mxu0 %v12952_v37  ;;  %2043 = vmatprep.subr.bf16.mxu1 %v12954_v41  ;;  %v13063_v37 = vcombine.low %v376_v24, %v384_v25  ;;  %v416_v41 = vld [vmem:[#allocation5 + $0x660] sm:$0xff]  ;;  %v13081_v46 = vcombine.low %v393_v34, %v401_v36 }
 0x178   :  { %v13096_v47 = vcombine.high %v408_v40, %v416_v41 }
 0x17a   :  { %2003 = vmatpush1.bf16.msra.mxu0 %v12951_v43  ;;  %2044 = vmatpush1.bf16.msra.mxu1 %v12953_v44  ;;  %v13082_v43 = vcombine.high %v393_v34, %v401_v36  ;;  %v417_v44 = vld [vmem:[#allocation5 + $0x668] sm:$0xff]  ;;  %v266_v34 = vld [vmem:[#allocation5 + $0x1b0] sm:$0xff]  ;;  %v267_v36 = vld [vmem:[#allocation5 + $0x1b8] sm:$0xff] }
 0x17b   :  { %2004 = vmatprep.subr.bf16.mxu0 %v12968_v45  ;;  %2045 = vmatprep.subr.bf16.mxu1 %v12970_v49  ;;  %v13079_v45 = vcombine.low %v392_v32, %v400_v33  ;;  %v432_v49 = vld [vmem:[#allocation5 + $0x6e0] sm:$0xff]  ;;  %v13097_v54 = vcombine.low %v409_v42, %v417_v44 }
 0x17c   :  { %v13112_v55 = vcombine.high %v424_v48, %v432_v49 }
 0x17e   :  { %2005 = vmatpush1.bf16.msra.mxu0 %v12967_v51  ;;  %2046 = vmatpush1.bf16.msra.mxu1 %v12969_v52  ;;  %v13098_v51 = vcombine.high %v409_v42, %v417_v44  ;;  %v433_v52 = vld [vmem:[#allocation5 + $0x6e8] sm:$0xff]  ;;  %v282_v42 = vld [vmem:[#allocation5 + $0x230] sm:$0xff]  ;;  %v283_v44 = vld [vmem:[#allocation5 + $0x238] sm:$0xff] }
 0x17f   :  { %2006 = vmatprep.subr.bf16.mxu0 %v12984_v53  ;;  %2047 = vmatprep.subr.bf16.mxu1 %v12986_v58  ;;  %v13095_v53 = vcombine.low %v408_v40, %v416_v41  ;;  %v448_v58 = vld [vmem:[#allocation5 + $0x760] sm:$0xff]  ;;  %v13113_v63 = vcombine.low %v425_v50, %v433_v52 }
 0x180   :  { %v13128_v0 = vcombine.high %v440_v56, %v448_v58 }
 0x182   :  { %2007 = vmatpush1.bf16.msra.mxu0 %v12983_v60  ;;  %2048 = vmatpush1.bf16.msra.mxu1 %v12985_v61  ;;  %v13114_v60 = vcombine.high %v425_v50, %v433_v52  ;;  %v449_v61 = vld [vmem:[#allocation5 + $0x768] sm:$0xff]  ;;  %v298_v50 = vld [vmem:[#allocation5 + $0x2b0] sm:$0xff] }
 0x183   :  { %2008 = vmatprep.subr.bf16.mxu0 %v13000_v62  ;;  %2049 = vmatprep.subr.bf16.mxu1 %v13002_v1  ;;  %v13111_v62 = vcombine.low %v424_v48, %v432_v49  ;;  %v456_v1 = vld [vmem:[#allocation5 + $0x7a0] sm:$0xff]  ;;  %v13129_v7 = vcombine.low %v441_v59, %v449_v61 }
 0x184   :  { %v13144_v8 = vcombine.high %v456_v1, %v464_v2 }
 0x186   :  { %2009 = vmatpush1.bf16.msra.mxu0 %v12999_v4  ;;  %2050 = vmatpush1.bf16.msra.mxu1 %v13001_v5  ;;  %v13130_v4 = vcombine.high %v441_v59, %v449_v61  ;;  %v465_v5 = vld [vmem:[#allocation5 + $0x7e8] sm:$0xff]  ;;  %v322_v59 = vld [vmem:[#allocation5 + $0x370] sm:$0xff] }
 0x187   :  { %2010 = vmatprep.subr.bf16.mxu0 %v13016_v6  ;;  %2051 = vmatprep.subr.bf16.mxu1 %v13018_v10  ;;  %v13127_v6 = vcombine.low %v440_v56, %v448_v58  ;;  %v226_v10 = vld [vmem:[#allocation5 + $0x70] sm:$0xff]  ;;  %v13145_v16 = vcombine.low %v457_v3, %v465_v5 }
 0x188   :  { %v12908_v17 = vcombine.high %v218_v9, %v226_v10  ;;  %v314_v58 = vld [vmem:[#allocation5 + $0x330] sm:$0xff] }
 0x18a   :  { %2011 = vmatpush1.bf16.msra.mxu0 %v13015_v13  ;;  %2052 = vmatpush1.bf16.msra.mxu1 %v13017_v14  ;;  %v13146_v13 = vcombine.high %v457_v3, %v465_v5  ;;  %v227_v14 = vld [vmem:[#allocation5 + $0x78] sm:$0xff]  ;;  %v338_v3 = vld [vmem:[#allocation5 + $0x3f0] sm:$0xff] }
 0x18b   :  { %2012 = vmatprep.subr.bf16.mxu0 %v13032_v15  ;;  %2053 = vmatprep.subr.bf16.mxu1 %v13034_v19  ;;  %v13143_v15 = vcombine.low %v456_v1, %v464_v2  ;;  %v242_v19 = vld [vmem:[#allocation5 + $0xf0] sm:$0xff]  ;;  %v12909_v24 = vcombine.low %v219_v11, %v227_v14  ;;  %v13004_v1 = vcombine.high %v314_v58, %v322_v59 }
 0x18c   :  { %v12924_v25 = vcombine.high %v234_v18, %v242_v19  ;;  %v330_v2 = vld [vmem:[#allocation5 + $0x3b0] sm:$0xff] }
 0x18e   :  { %2013 = vmatpush1.bf16.msra.mxu0 %v13031_v21  ;;  %2054 = vmatpush1.bf16.msra.mxu1 %v13033_v22  ;;  %v12910_v21 = vcombine.high %v219_v11, %v227_v14  ;;  %v243_v22 = vld [vmem:[#allocation5 + $0xf8] sm:$0xff]  ;;  %v354_v11 = vld [vmem:[#allocation5 + $0x470] sm:$0xff] }
 0x18f   :  { %2014 = vmatprep.subr.bf16.mxu0 %v13048_v23  ;;  %2055 = vmatprep.subr.bf16.mxu1 %v13050_v27  ;;  %v12907_v23 = vcombine.low %v218_v9, %v226_v10  ;;  %v258_v27 = vld [vmem:[#allocation5 + $0x170] sm:$0xff]  ;;  %v12925_v32 = vcombine.low %v235_v20, %v243_v22  ;;  %v13020_v9 = vcombine.high %v330_v2, %v338_v3 }
 0x190   :  { %v12940_v33 = vcombine.high %v250_v26, %v258_v27  ;;  %v346_v10 = vld [vmem:[#allocation5 + $0x430] sm:$0xff] }
 0x192   :  { %2015 = vmatpush1.bf16.msra.mxu0 %v13047_v29  ;;  %2056 = vmatpush1.bf16.msra.mxu1 %v13049_v30  ;;  %v12926_v29 = vcombine.high %v235_v20, %v243_v22  ;;  %v259_v30 = vld [vmem:[#allocation5 + $0x178] sm:$0xff]  ;;  %v370_v20 = vld [vmem:[#allocation5 + $0x4f0] sm:$0xff] }
 0x193   :  { %2016 = vmatprep.subr.bf16.mxu0 %v13064_v31  ;;  %2057 = vmatprep.subr.bf16.mxu1 %v13066_v35  ;;  %v12923_v31 = vcombine.low %v234_v18, %v242_v19  ;;  %v274_v35 = vld [vmem:[#allocation5 + $0x1f0] sm:$0xff]  ;;  %v12941_v40 = vcombine.low %v251_v28, %v259_v30  ;;  %v13036_v18 = vcombine.high %v346_v10, %v354_v11 }
 0x194   :  { %v12956_v41 = vcombine.high %v266_v34, %v274_v35  ;;  %v362_v19 = vld [vmem:[#allocation5 + $0x4b0] sm:$0xff] }
 0x196   :  { %2017 = vmatpush1.bf16.msra.mxu0 %v13063_v37  ;;  %2058 = vmatpush1.bf16.msra.mxu1 %v13065_v38  ;;  %v12942_v37 = vcombine.high %v251_v28, %v259_v30  ;;  %v275_v38 = vld [vmem:[#allocation5 + $0x1f8] sm:$0xff]  ;;  %v386_v28 = vld [vmem:[#allocation5 + $0x570] sm:$0xff] }
 0x197   :  { %2018 = vmatprep.subr.bf16.mxu0 %v13080_v39  ;;  %2059 = vmatprep.subr.bf16.mxu1 %v13082_v43  ;;  %v12939_v39 = vcombine.low %v250_v26, %v258_v27  ;;  %v290_v43 = vld [vmem:[#allocation5 + $0x270] sm:$0xff]  ;;  %v12957_v48 = vcombine.low %v267_v36, %v275_v38  ;;  %v13052_v26 = vcombine.high %v362_v19, %v370_v20 }
 0x198   :  { %v12972_v49 = vcombine.high %v282_v42, %v290_v43  ;;  %v378_v27 = vld [vmem:[#allocation5 + $0x530] sm:$0xff] }
 0x19a   :  { %2019 = vmatpush1.bf16.msra.mxu0 %v13079_v45  ;;  %2060 = vmatpush1.bf16.msra.mxu1 %v13081_v46  ;;  %v12958_v45 = vcombine.high %v267_v36, %v275_v38  ;;  %v291_v46 = vld [vmem:[#allocation5 + $0x278] sm:$0xff]  ;;  %v402_v36 = vld [vmem:[#allocation5 + $0x5f0] sm:$0xff] }
 0x19b   :  { %2020 = vmatprep.subr.bf16.mxu0 %v13096_v47  ;;  %2061 = vmatprep.subr.bf16.mxu1 %v13098_v51  ;;  %v12955_v47 = vcombine.low %v266_v34, %v274_v35  ;;  %v299_v51 = vld [vmem:[#allocation5 + $0x2b8] sm:$0xff]  ;;  %v12974_v52 = vcombine.high %v283_v44, %v291_v46  ;;  %v13068_v34 = vcombine.high %v378_v27, %v386_v28  ;;  %v394_v35 = vld [vmem:[#allocation5 + $0x5b0] sm:$0xff] }
 0x19e   :  { %2021 = vmatpush1.bf16.msra.mxu0 %v13095_v53  ;;  %2062 = vmatpush1.bf16.msra.mxu1 %v13097_v54  ;;  %v307_v53 = vld [vmem:[#allocation5 + $0x2f8] sm:$0xff]  ;;  %v12971_v54 = vcombine.low %v282_v42, %v290_v43  ;;  %v13084_v42 = vcombine.high %v394_v35, %v402_v36  ;;  %v410_v43 = vld [vmem:[#allocation5 + $0x630] sm:$0xff] }
 0x19f   :  { %2022 = vmatprep.subr.bf16.mxu0 %v13112_v55  ;;  %2063 = vmatprep.subr.bf16.mxu1 %v13114_v60  ;;  %v12973_v55 = vcombine.low %v283_v44, %v291_v46  ;;  %v315_v60 = vld [vmem:[#allocation5 + $0x338] sm:$0xff]  ;;  %v12990_v61 = vcombine.high %v299_v51, %v307_v53  ;;  %v418_v44 = vld [vmem:[#allocation5 + $0x670] sm:$0xff] }
 0x1a2   :  { %2023 = vmatpush1.bf16.msra.mxu0 %v13111_v62  ;;  %2064 = vmatpush1.bf16.msra.mxu1 %v13113_v63  ;;  %v323_v62 = vld [vmem:[#allocation5 + $0x378] sm:$0xff] }
 0x1a3   :  { %2024 = vmatprep.subr.bf16.mxu0 %v13128_v0  ;;  %2065 = vmatprep.subr.bf16.mxu1 %v13130_v4  ;;  %v12989_v0 = vcombine.low %v299_v51, %v307_v53  ;;  %v331_v4 = vld [vmem:[#allocation5 + $0x3b8] sm:$0xff]  ;;  %v13006_v5 = vcombine.high %v315_v60, %v323_v62  ;;  %v434_v51 = vld [vmem:[#allocation5 + $0x6f0] sm:$0xff] }
 0x1a6   :  { %2025 = vmatpush1.bf16.msra.mxu0 %v13127_v6  ;;  %2066 = vmatpush1.bf16.msra.mxu1 %v13129_v7  ;;  %v339_v6 = vld [vmem:[#allocation5 + $0x3f8] sm:$0xff]  ;;  %v13003_v7 = vcombine.low %v314_v58, %v322_v59  ;;  %v442_v59 = vld [vmem:[#allocation5 + $0x730] sm:$0xff] }
 0x1a7   :  { %2026 = vmatprep.subr.bf16.mxu0 %v13144_v8  ;;  %2067 = vmatprep.subr.bf16.mxu1 %v13146_v13  ;;  %v13005_v8 = vcombine.low %v315_v60, %v323_v62  ;;  %v347_v13 = vld [vmem:[#allocation5 + $0x438] sm:$0xff]  ;;  %v13022_v14 = vcombine.high %v331_v4, %v339_v6  ;;  %v450_v60 = vld [vmem:[#allocation5 + $0x770] sm:$0xff] }
 0x1aa   :  { %2027 = vmatpush1.bf16.msra.mxu0 %v13143_v15  ;;  %2068 = vmatpush1.bf16.msra.mxu1 %v13145_v16  ;;  %v355_v15 = vld [vmem:[#allocation5 + $0x478] sm:$0xff]  ;;  %v13019_v16 = vcombine.low %v330_v2, %v338_v3  ;;  %v13132_v2 = vcombine.high %v442_v59, %v450_v60  ;;  %v458_v3 = vld [vmem:[#allocation5 + $0x7b0] sm:$0xff] }
 0x1ab   :  { %2078 = vmatprep.subr.bf16.mxu0 %v12908_v17  ;;  %2119 = vmatprep.subr.bf16.mxu1 %v12910_v21  ;;  %v13021_v17 = vcombine.low %v331_v4, %v339_v6  ;;  %v363_v21 = vld [vmem:[#allocation5 + $0x4b8] sm:$0xff]  ;;  %v13038_v22 = vcombine.high %v347_v13, %v355_v15  ;;  %v466_v4 = vld [vmem:[#allocation5 + $0x7f0] sm:$0xff] }
 0x1ad   :  { %2029 = vmatmul.mubr.bf16.vlgmr.msra.gmra.mrb[8].mxu0 %v15857_v12  ;;  %2070 = vmatmul.mubr.bf16.vlgmr.msra.gmra.mrb[8].mxu1 %v15857_v12 }
 0x1ae   :  { %2079 = vmatpush1.bf16.msra.mxu0 %v12907_v23  ;;  %2120 = vmatpush1.bf16.msra.mxu1 %v12909_v24  ;;  %v371_v23 = vld [vmem:[#allocation5 + $0x4f8] sm:$0xff]  ;;  %v13035_v24 = vcombine.low %v346_v10, %v354_v11  ;;  %v13148_v10 = vcombine.high %v458_v3, %v466_v4 }
 0x1af   :  { %2080 = vmatprep.subr.bf16.mxu0 %v12924_v25  ;;  %2121 = vmatprep.subr.bf16.mxu1 %v12926_v29  ;;  %v13037_v25 = vcombine.low %v347_v13, %v355_v15  ;;  %v379_v29 = vld [vmem:[#allocation5 + $0x538] sm:$0xff]  ;;  %v13054_v30 = vcombine.high %v363_v21, %v371_v23  ;;  %v2192_v13 = vld [vmem:[#allocation8] sm:$0xff] }
 0x1b0   :  { %2110 = vmatprep.mubr.bf16.mxu0 %v15853_v57  ;;  %2151 = vmatprep.mubr.bf16.mxu1 %v15853_v57  ;;  %v306_v57 = vld [vmem:[#allocation5 + $0x2f0] sm:$0xff]  ;;  %v2193_v15 = vld [vmem:[#allocation8 + $0x8] sm:$0xff] }
 0x1b1   :  { %v12988_v56 = vcombine.high %v298_v50, %v306_v57  ;;  %v12987_v63 = vcombine.low %v298_v50, %v306_v57  ;;  %v13100_v50 = vcombine.high %v410_v43, %v418_v44  ;;  %v426_v57 = vld [vmem:[#allocation5 + $0x6b0] sm:$0xff] }
 0x1b2   :  { %2081 = vmatpush1.bf16.msra.mxu0 %v12923_v31  ;;  %2122 = vmatpush1.bf16.msra.mxu1 %v12925_v32  ;;  %v387_v31 = vld [vmem:[#allocation5 + $0x578] sm:$0xff]  ;;  %v13051_v32 = vcombine.low %v362_v19, %v370_v20  ;;  %v13116_v58 = vcombine.high %v426_v57, %v434_v51 }
 0x1b3   :  { %2082 = vmatprep.subr.bf16.mxu0 %v12940_v33  ;;  %2123 = vmatprep.subr.bf16.mxu1 %v12942_v37  ;;  %v13053_v33 = vcombine.low %v363_v21, %v371_v23  ;;  %v395_v37 = vld [vmem:[#allocation5 + $0x5b8] sm:$0xff]  ;;  %v13070_v38 = vcombine.high %v379_v29, %v387_v31  ;;  %v2200_v21 = vld [vmem:[#allocation8 + $0x40] sm:$0xff] }
 0x1b4   :  { %v2201_v23 = vld [vmem:[#allocation8 + $0x48] sm:$0xff] }
 0x1b6   :  { %2083 = vmatpush1.bf16.msra.mxu0 %v12939_v39  ;;  %2124 = vmatpush1.bf16.msra.mxu1 %v12941_v40  ;;  %v403_v39 = vld [vmem:[#allocation5 + $0x5f8] sm:$0xff]  ;;  %v13067_v40 = vcombine.low %v378_v27, %v386_v28 }
 0x1b7   :  { %2084 = vmatprep.subr.bf16.mxu0 %v12956_v41  ;;  %2125 = vmatprep.subr.bf16.mxu1 %v12958_v45  ;;  %v13069_v41 = vcombine.low %v379_v29, %v387_v31  ;;  %v411_v45 = vld [vmem:[#allocation5 + $0x638] sm:$0xff]  ;;  %v13086_v46 = vcombine.high %v395_v37, %v403_v39  ;;  %v2208_v29 = vld [vmem:[#allocation8 + $0x80] sm:$0xff] }
 0x1b8   :  { %v2209_v31 = vld [vmem:[#allocation8 + $0x88] sm:$0xff] }
 0x1ba   :  { %2085 = vmatpush1.bf16.msra.mxu0 %v12955_v47  ;;  %2126 = vmatpush1.bf16.msra.mxu1 %v12957_v48  ;;  %v419_v47 = vld [vmem:[#allocation5 + $0x678] sm:$0xff]  ;;  %v13083_v48 = vcombine.low %v394_v35, %v402_v36 }
 0x1bb   :  { %2086 = vmatprep.subr.bf16.mxu0 %v12972_v49  ;;  %2127 = vmatprep.subr.bf16.mxu1 %v12974_v52  ;;  %v13085_v49 = vcombine.low %v395_v37, %v403_v39  ;;  %v427_v52 = vld [vmem:[#allocation5 + $0x6b8] sm:$0xff]  ;;  %v13102_v53 = vcombine.high %v411_v45, %v419_v47  ;;  %v2216_v37 = vld [vmem:[#allocation8 + $0xc0] sm:$0xff] }
 0x1bc   :  { %v2217_v39 = vld [vmem:[#allocation8 + $0xc8] sm:$0xff] }
 0x1be   :  { %2087 = vmatpush1.bf16.msra.mxu0 %v12971_v54  ;;  %2128 = vmatpush1.bf16.msra.mxu1 %v12973_v55  ;;  %v435_v54 = vld [vmem:[#allocation5 + $0x6f8] sm:$0xff]  ;;  %v13099_v55 = vcombine.low %v410_v43, %v418_v44 }
 0x1bf   :  { %2088 = vmatprep.subr.bf16.mxu0 %v12988_v56  ;;  %2129 = vmatprep.subr.bf16.mxu1 %v12990_v61  ;;  %v13101_v56 = vcombine.low %v411_v45, %v419_v47  ;;  %v443_v61 = vld [vmem:[#allocation5 + $0x738] sm:$0xff]  ;;  %v13118_v62 = vcombine.high %v427_v52, %v435_v54  ;;  %v2224_v45 = vld [vmem:[#allocation8 + $0x100] sm:$0xff] }
 0x1c0   :  { %v2225_v47 = vld [vmem:[#allocation8 + $0x108] sm:$0xff] }
 0x1c2   :  { %2089 = vmatpush1.bf16.msra.mxu0 %v12987_v63  ;;  %2130 = vmatpush1.bf16.msra.mxu1 %v12989_v0  ;;  %v451_v63 = vld [vmem:[#allocation5 + $0x778] sm:$0xff]  ;;  %v13115_v0 = vcombine.low %v426_v57, %v434_v51 }
 0x1c3   :  { %2090 = vmatprep.subr.bf16.mxu0 %v13004_v1  ;;  %2131 = vmatprep.subr.bf16.mxu1 %v13006_v5  ;;  %v13117_v1 = vcombine.low %v427_v52, %v435_v54  ;;  %v459_v5 = vld [vmem:[#allocation5 + $0x7b8] sm:$0xff]  ;;  %v13134_v6 = vcombine.high %v443_v61, %v451_v63  ;;  %v2236_v54 = vld [vmem:[#allocation8 + $0x160] sm:$0xff] }
 0x1c6   :  { %2091 = vmatpush1.bf16.msra.mxu0 %v13003_v7  ;;  %2132 = vmatpush1.bf16.msra.mxu1 %v13005_v8  ;;  %v467_v7 = vld [vmem:[#allocation5 + $0x7f8] sm:$0xff]  ;;  %v13131_v8 = vcombine.low %v442_v59, %v450_v60 }
 0x1c7   :  { %2092 = vmatprep.subr.bf16.mxu0 %v13020_v9  ;;  %2133 = vmatprep.subr.bf16.mxu1 %v13022_v14  ;;  %v13133_v9 = vcombine.low %v443_v61, %v451_v63  ;;  %v13150_v11 = vcombine.high %v459_v5, %v467_v7  ;;  %v2196_v14 = vld [vmem:[#allocation8 + $0x20] sm:$0xff]  ;;  %v15878_v61 = vld [vmem:[#allocation7] sm:$0xff] }
 0x1c8   :  { %v13152_v19 = vcombine.high %v2192_v13, %v2196_v14 }
 0x1ca   :  { %2093 = vmatpush1.bf16.msra.mxu0 %v13019_v16  ;;  %2134 = vmatpush1.bf16.msra.mxu1 %v13021_v17  ;;  %v2197_v16 = vld [vmem:[#allocation8 + $0x28] sm:$0xff]  ;;  %v13147_v17 = vcombine.low %v458_v3, %v466_v4 }
 0x1cb   :  { %2094 = vmatprep.subr.bf16.mxu0 %v13036_v18  ;;  %2135 = vmatprep.subr.bf16.mxu1 %v13038_v22  ;;  %v13149_v18 = vcombine.low %v459_v5, %v467_v7  ;;  %v13154_v20 = vcombine.high %v2193_v15, %v2197_v16  ;;  %v2204_v22 = vld [vmem:[#allocation8 + $0x60] sm:$0xff]  ;;  %v2245_v3 = vld [vmem:[#allocation8 + $0x1a8] sm:$0xff] }
 0x1cc   :  { %v13160_v27 = vcombine.high %v2200_v21, %v2204_v22 }
 0x1ce   :  { %2095 = vmatpush1.bf16.msra.mxu0 %v13035_v24  ;;  %2136 = vmatpush1.bf16.msra.mxu1 %v13037_v25  ;;  %v2205_v24 = vld [vmem:[#allocation8 + $0x68] sm:$0xff]  ;;  %v13151_v25 = vcombine.low %v2192_v13, %v2196_v14 }
 0x1cf   :  { %2096 = vmatprep.subr.bf16.mxu0 %v13052_v26  ;;  %2137 = vmatprep.subr.bf16.mxu1 %v13054_v30  ;;  %v13153_v26 = vcombine.low %v2193_v15, %v2197_v16  ;;  %v13162_v28 = vcombine.high %v2201_v23, %v2205_v24  ;;  %v2212_v30 = vld [vmem:[#allocation8 + $0xa0] sm:$0xff] }
 0x1d0   :  { %v13168_v35 = vcombine.high %v2208_v29, %v2212_v30 }
 0x1d2   :  { %2097 = vmatpush1.bf16.msra.mxu0 %v13051_v32  ;;  %2138 = vmatpush1.bf16.msra.mxu1 %v13053_v33  ;;  %v2213_v32 = vld [vmem:[#allocation8 + $0xa8] sm:$0xff]  ;;  %v13159_v33 = vcombine.low %v2200_v21, %v2204_v22 }
 0x1d3   :  { %2098 = vmatprep.subr.bf16.mxu0 %v13068_v34  ;;  %2139 = vmatprep.subr.bf16.mxu1 %v13070_v38  ;;  %v13161_v34 = vcombine.low %v2201_v23, %v2205_v24  ;;  %v13170_v36 = vcombine.high %v2209_v31, %v2213_v32  ;;  %v2220_v38 = vld [vmem:[#allocation8 + $0xe0] sm:$0xff]  ;;  %v13169_v43 = vcombine.low %v2209_v31, %v2213_v32  ;;  %v2261_v31 = vld [vmem:[#allocation8 + $0x228] sm:$0xff] }
 0x1d4   :  { %v13176_v44 = vcombine.high %v2216_v37, %v2220_v38 }
 0x1d6   :  { %2099 = vmatpush1.bf16.msra.mxu0 %v13067_v40  ;;  %2140 = vmatpush1.bf16.msra.mxu1 %v13069_v41  ;;  %v2221_v40 = vld [vmem:[#allocation8 + $0xe8] sm:$0xff]  ;;  %v13167_v41 = vcombine.low %v2208_v29, %v2212_v30 }
 0x1d7   :  { %2100 = vmatprep.subr.bf16.mxu0 %v13084_v42  ;;  %2141 = vmatprep.subr.bf16.mxu1 %v13086_v46  ;;  %v472_v42 = vlaneseq  ;;  %v2228_v46 = vld [vmem:[#allocation8 + $0x120] sm:$0xff]  ;;  %v13177_v57 = vcombine.low %v2217_v39, %v2221_v40  ;;  %v2257_v30 = vld [vmem:[#allocation8 + $0x208] sm:$0xff] }
 0x1d8   :  { %v13184_v51 = vcombine.high %v2224_v45, %v2228_v46 }
 0x1da   :  { %2101 = vmatpush1.bf16.msra.mxu0 %v13083_v48  ;;  %2142 = vmatpush1.bf16.msra.mxu1 %v13085_v49  ;;  %v2229_v48 = vld [vmem:[#allocation8 + $0x128] sm:$0xff]  ;;  %v13175_v49 = vcombine.low %v2216_v37, %v2220_v38  ;;  %v2264_v37 = vld [vmem:[#allocation8 + $0x240] sm:$0xff] }
 0x1db   :  { %2102 = vmatprep.subr.bf16.mxu0 %v13100_v50  ;;  %2143 = vmatprep.subr.bf16.mxu1 %v13102_v53  ;;  %v15873_v50 = vshrl.u32 %v472_v42, 7  ;;  %v13186_v52 = vcombine.high %v2225_v47, %v2229_v48  ;;  %v2232_v53 = vld [vmem:[#allocation8 + $0x140] sm:$0xff]  ;;  %v13185_v60 = vcombine.low %v2225_v47, %v2229_v48  ;;  %v13217_v42 = vcombine.low %v2257_v30, %v2261_v31  ;;  %v2277_v47 = vld [vmem:[#allocation8 + $0x2a8] sm:$0xff] }
 0x1dc   :  { %v13191_v5 = vcombine.low %v2232_v53, %v2236_v54  ;;  %v2268_v38 = vld [vmem:[#allocation8 + $0x260] sm:$0xff] }
 0x1dd   :  { %v15876_v59 = vsub.s32 1, %v15873_v50  ;;  %v13223_v48 = vcombine.low %v2264_v37, %v2268_v38 }
 0x1de   :  { %2103 = vmatpush1.bf16.msra.mxu0 %v13099_v55  ;;  %2144 = vmatpush1.bf16.msra.mxu1 %v13101_v56  ;;  %v2233_v55 = vld [vmem:[#allocation8 + $0x148] sm:$0xff] }
 0x1df   :  { %2104 = vmatprep.subr.bf16.mxu0 %v13116_v58  ;;  %2145 = vmatprep.subr.bf16.mxu1 %v13118_v62  ;;  %v2237_v56 = vld [vmem:[#allocation8 + $0x168] sm:$0xff]  ;;  %v13183_v58 = vcombine.low %v2224_v45, %v2228_v46  ;;  %v13192_v62 = vcombine.high %v2232_v53, %v2236_v54  ;;  %v479_v4 = vrot.slane %v15878_v61, %v15876_v59  ;;  %v2276_v45 = vld [vmem:[#allocation8 + $0x2a0] sm:$0xff] }
 0x1e0   :  { %v13194_v63 = vcombine.high %v2233_v55, %v2237_v56  ;;  %v2273_v46 = vld [vmem:[#allocation8 + $0x288] sm:$0xff]  ;;  %v2284_v53 = vld [vmem:[#allocation8 + $0x2e0] sm:$0xff] }
 0x1e1   :  { %v2281_v54 = vld [vmem:[#allocation8 + $0x2c8] sm:$0xff] }
 0x1e2   :  { %2105 = vmatpush1.bf16.msra.mxu0 %v13115_v0  ;;  %2146 = vmatpush1.bf16.msra.mxu1 %v13117_v1  ;;  %v2240_v0 = vld [vmem:[#allocation8 + $0x180] sm:$0xff] }
 0x1e3   :  { %2106 = vmatprep.subr.bf16.mxu0 %v13132_v2  ;;  %2147 = vmatprep.subr.bf16.mxu1 %v13134_v6  ;;  %v2244_v1 = vld [vmem:[#allocation8 + $0x1a0] sm:$0xff]  ;;  %v2241_v2 = vld [vmem:[#allocation8 + $0x188] sm:$0xff]  ;;  %v13193_v6 = vcombine.low %v2233_v55, %v2237_v56 }
 0x1e4   :  { %v13200_v7 = vcombine.high %v2240_v0, %v2244_v1  ;;  %v13201_v22 = vcombine.low %v2241_v2, %v2245_v3  ;;  %v2285_v55 = vld [vmem:[#allocation8 + $0x2e8] sm:$0xff] }
 0x1e6   :  { %2107 = vmatpush1.bf16.msra.mxu0 %v13131_v8  ;;  %2148 = vmatpush1.bf16.msra.mxu1 %v13133_v9  ;;  %v13202_v9 = vcombine.high %v2241_v2, %v2245_v3  ;;  %v2293_v2 = vld [vmem:[#allocation8 + $0x328] sm:$0xff] }
 0x1e7   :  { %2108 = vmatprep.subr.bf16.mxu0 %v13148_v10  ;;  %2149 = vmatprep.subr.bf16.mxu1 %v13150_v11  ;;  %v2248_v10 = vld [vmem:[#allocation8 + $0x1c0] sm:$0xff] }
 0x1e8   :  { %v2252_v11 = vld [vmem:[#allocation8 + $0x1e0] sm:$0xff] }
 0x1e9   :  { %v13208_v23 = vcombine.high %v2248_v10, %v2252_v11 }
 0x1ea   :  { %2109 = vmatpush1.bf16.msra.mxu0 %v13147_v17  ;;  %2150 = vmatpush1.bf16.msra.mxu1 %v13149_v18  ;;  %v13199_v17 = vcombine.low %v2240_v0, %v2244_v1  ;;  %v2249_v18 = vld [vmem:[#allocation8 + $0x1c8] sm:$0xff]  ;;  %v2292_v0 = vld [vmem:[#allocation8 + $0x320] sm:$0xff] }
 0x1eb   :  { %8336 = vmatprep.subr.bf16.mxu0 %v13152_v19  ;;  %8664 = vmatprep.subr.bf16.mxu1 %v13154_v20  ;;  %v2253_v19 = vld [vmem:[#allocation8 + $0x1e8] sm:$0xff] }
 0x1ec   :  { %v13210_v29 = vcombine.high %v2249_v18, %v2253_v19  ;;  %v2289_v1 = vld [vmem:[#allocation8 + $0x308] sm:$0xff] }
 0x1ed   :  { %2111 = vmatmul.mubr.bf16.vlgmr.msra.gmra.mrb[12].mxu0 %v15857_v12  ;;  %2152 = vmatmul.mubr.bf16.vlgmr.msra.gmra.mrb[12].mxu1 %v15857_v12  ;;  %v13178_v12 = vcombine.high %v2217_v39, %v2221_v40  ;;  %v2265_v39 = vld [vmem:[#allocation8 + $0x248] sm:$0xff] }
 0x1ee   :  { %8337 = vmatpush1.bf16.msra.mxu0 %v13151_v25  ;;  %8665 = vmatpush1.bf16.msra.mxu1 %v13153_v26  ;;  %v2256_v26 = vld [vmem:[#allocation8 + $0x200] sm:$0xff]  ;;  %v2269_v40 = vld [vmem:[#allocation8 + $0x268] sm:$0xff] }
 0x1ef   :  { %8338 = vmatprep.subr.bf16.mxu0 %v13160_v27  ;;  %8666 = vmatprep.subr.bf16.mxu1 %v13162_v28  ;;  %v2260_v27 = vld [vmem:[#allocation8 + $0x220] sm:$0xff] }
 0x1f2   :  { %8339 = vmatpush1.bf16.msra.mxu0 %v13159_v33  ;;  %8667 = vmatpush1.bf16.msra.mxu1 %v13161_v34  ;;  %v13207_v33 = vcombine.low %v2248_v10, %v2252_v11  ;;  %v13209_v34 = vcombine.low %v2249_v18, %v2253_v19  ;;  %v2297_v10 = vld [vmem:[#allocation8 + $0x348] sm:$0xff]  ;;  %v2304_v19 = vld [vmem:[#allocation8 + $0x380] sm:$0xff] }
 0x1f3   :  { %8340 = vmatprep.subr.bf16.mxu0 %v13168_v35  ;;  %8668 = vmatprep.subr.bf16.mxu1 %v13170_v36  ;;  %v13216_v35 = vcombine.high %v2256_v26, %v2260_v27  ;;  %v13218_v36 = vcombine.high %v2257_v30, %v2261_v31  ;;  %v2301_v11 = vld [vmem:[#allocation8 + $0x368] sm:$0xff]  ;;  %v2312_v30 = vld [vmem:[#allocation8 + $0x3c0] sm:$0xff] }
 0x1f4   :  { %v13258_v18 = vcombine.high %v2297_v10, %v2301_v11  ;;  %v2316_v31 = vld [vmem:[#allocation8 + $0x3e0] sm:$0xff] }
 0x1f6   :  { %8341 = vmatpush1.bf16.msra.mxu0 %v13167_v41  ;;  %8669 = vmatpush1.bf16.msra.mxu1 %v13169_v43  ;;  %v13215_v41 = vcombine.low %v2256_v26, %v2260_v27  ;;  %v13224_v43 = vcombine.high %v2264_v37, %v2268_v38  ;;  %v13257_v27 = vcombine.low %v2297_v10, %v2301_v11  ;;  %v2349_v10 = vld [vmem:[#allocation8 + $0x4e8] sm:$0xff] }
 0x1f7   :  { %8342 = vmatprep.subr.bf16.mxu0 %v13176_v44  ;;  %8670 = vmatprep.subr.bf16.mxu1 %v13178_v12  ;;  %v13226_v44 = vcombine.high %v2265_v39, %v2269_v40  ;;  %v2272_v12 = vld [vmem:[#allocation8 + $0x280] sm:$0xff] }
 0x1f8   :  { %v13231_v56 = vcombine.low %v2272_v12, %v2276_v45 }
 0x1fa   :  { %8343 = vmatpush1.bf16.msra.mxu0 %v13175_v49  ;;  %8671 = vmatpush1.bf16.msra.mxu1 %v13177_v57  ;;  %v13225_v49 = vcombine.low %v2265_v39, %v2269_v40  ;;  %v13232_v57 = vcombine.high %v2272_v12, %v2276_v45  ;;  %v13272_v39 = vcombine.high %v2312_v30, %v2316_v31  ;;  %v2325_v12 = vld [vmem:[#allocation8 + $0x428] sm:$0xff] }
 0x1fb   :  { %8344 = vmatprep.subr.bf16.mxu0 %v13184_v51  ;;  %8672 = vmatprep.subr.bf16.mxu1 %v13186_v52  ;;  %v13234_v51 = vcombine.high %v2273_v46, %v2277_v47  ;;  %v2280_v52 = vld [vmem:[#allocation8 + $0x2c0] sm:$0xff]  ;;  %v13271_v45 = vcombine.low %v2312_v30, %v2316_v31  ;;  %v2361_v30 = vld [vmem:[#allocation8 + $0x548] sm:$0xff] }
 0x1fc   :  { %v13239_v3 = vcombine.low %v2280_v52, %v2284_v53  ;;  %v2365_v31 = vld [vmem:[#allocation8 + $0x568] sm:$0xff] }
 0x1fe   :  { %8345 = vmatpush1.bf16.msra.mxu0 %v13183_v58  ;;  %8673 = vmatpush1.bf16.msra.mxu1 %v13185_v60  ;;  %v13233_v58 = vcombine.low %v2273_v46, %v2277_v47  ;;  %v13240_v60 = vcombine.high %v2280_v52, %v2284_v53  ;;  %v2329_v52 = vld [vmem:[#allocation8 + $0x448] sm:$0xff] }
 0x1ff   :  { %8346 = vmatprep.subr.bf16.mxu0 %v13192_v62  ;;  %8674 = vmatprep.subr.bf16.mxu1 %v13194_v63  ;;  %v13242_v62 = vcombine.high %v2281_v54, %v2285_v55  ;;  %v2288_v63 = vld [vmem:[#allocation8 + $0x300] sm:$0xff]  ;;  %v2333_v53 = vld [vmem:[#allocation8 + $0x468] sm:$0xff] }
 0x200   :  { %v15882_v8 = vpop.f32.mrb[0].mxu0  ;;  %v15884_v14 = vpop.f32.mrb[0].mxu1 }
 0x201   :  { %v1868_v13 = vpop.f32.mrb[1].mxu0  ;;  %v15886_v20 = vpop.f32.mrb[1].mxu1 }
 0x202   :  { %v1869_v15 = vadd.f32 %v1868_v13, %v479_v4  ;;  %v1870_v16 = vpop.f32.mrb[2].mxu0  ;;  %8347 = vmatpush1.bf16.msra.mxu0 %v13191_v5  ;;  %8675 = vmatpush1.bf16.msra.mxu1 %v13193_v6  ;;  %v1911_v24 = vpop.f32.mrb[2].mxu1  ;;  %v13241_v4 = vcombine.low %v2281_v54, %v2285_v55  ;;  %v13248_v5 = vcombine.high %v2288_v63, %v2292_v0 }
 0x203   :  { %v1871_v21 = vpop.f32.mrb[3].mxu0  ;;  %8348 = vmatprep.subr.bf16.mxu0 %v13200_v7  ;;  %8676 = vmatprep.subr.bf16.mxu1 %v13202_v9  ;;  %v1912_v28 = vpop.f32.mrb[3].mxu1  ;;  %v13250_v6 = vcombine.high %v2289_v1, %v2293_v2  ;;  %v2296_v7 = vld [vmem:[#allocation8 + $0x340] sm:$0xff]  ;;  %v13247_v13 = vcombine.low %v2288_v63, %v2292_v0  ;;  %v13249_v16 = vcombine.low %v2289_v1, %v2293_v2  ;;  %v2309_v24 = vld [vmem:[#allocation8 + $0x3a8] sm:$0xff] }
 0x204   :  { %v2161_v25 = vmax.f32 %v1869_v15, 0.0  ;;  %v2300_v9 = vld [vmem:[#allocation8 + $0x360] sm:$0xff]  ;;  %v15893_v15 = vsub.s32 0, %v15873_v50  ;;  %v2337_v0 = vld [vmem:[#allocation8 + $0x488] sm:$0xff] }
 0x205   :  { %v2308_v21 = vld [vmem:[#allocation8 + $0x3a0] sm:$0xff]  ;;  %v2341_v1 = vld [vmem:[#allocation8 + $0x4a8] sm:$0xff] }
 0x206   :  { %v15888_v32 = vpack.c.bf16 %v2161_v25, %v2161_v25  ;;  %8349 = vmatpush1.bf16.msra.mxu0 %v13199_v17  ;;  %8677 = vmatpush1.bf16.msra.mxu1 %v13201_v22  ;;  %v13256_v17 = vcombine.high %v2296_v7, %v2300_v9  ;;  %v15896_v22 = vsub.s32 3, %v15873_v50  ;;  %v13255_v25 = vcombine.low %v2296_v7, %v2300_v9  ;;  %v2348_v7 = vld [vmem:[#allocation8 + $0x4e0] sm:$0xff]  ;;  %v2345_v9 = vld [vmem:[#allocation8 + $0x4c8] sm:$0xff] }
 0x207   :  { %8350 = vmatprep.subr.bf16.mxu0 %v13208_v23  ;;  %8678 = vmatprep.subr.bf16.mxu1 %v13210_v29  ;;  %v2305_v23 = vld [vmem:[#allocation8 + $0x388] sm:$0xff]  ;;  %v475_v26 = vrot.slane %v15878_v61, %v15893_v15  ;;  %v13264_v28 = vcombine.high %v2304_v19, %v2308_v21 }
 0x208   :  { %8368 = vmatprep.mubr.bf16.mxu0 %v15888_v32  ;;  %8696 = vmatprep.mubr.bf16.mxu1 %v15888_v32  ;;  %v13266_v29 = vcombine.high %v2305_v23, %v2309_v24  ;;  %v13265_v38 = vcombine.low %v2305_v23, %v2309_v24  ;;  %v2357_v23 = vld [vmem:[#allocation8 + $0x528] sm:$0xff] }
 0x209   :  { %v1867_v37 = vadd.f32 %v15882_v8, %v475_v26 }
 0x20a   :  { %8351 = vmatpush1.bf16.msra.mxu0 %v13207_v33  ;;  %8679 = vmatpush1.bf16.msra.mxu1 %v13209_v34  ;;  %v487_v33 = vrot.slane %v15878_v61, %v15896_v22  ;;  %v2313_v34 = vld [vmem:[#allocation8 + $0x3c8] sm:$0xff] }
 0x20b   :  { %8352 = vmatprep.subr.bf16.mxu0 %v13216_v35  ;;  %8680 = vmatprep.subr.bf16.mxu1 %v13218_v36  ;;  %v2317_v35 = vld [vmem:[#allocation8 + $0x3e8] sm:$0xff]  ;;  %v13263_v36 = vcombine.low %v2304_v19, %v2308_v21  ;;  %v2160_v46 = vmax.f32 %v1867_v37, 0.0  ;;  %v2356_v19 = vld [vmem:[#allocation8 + $0x520] sm:$0xff] }
 0x20c   :  { %v13274_v40 = vcombine.high %v2313_v34, %v2317_v35  ;;  %v13273_v47 = vcombine.low %v2313_v34, %v2317_v35  ;;  %v2353_v21 = vld [vmem:[#allocation8 + $0x508] sm:$0xff]  ;;  %v2368_v37 = vld [vmem:[#allocation8 + $0x580] sm:$0xff] }
 0x20d   :  { %v15904_v55 = vpack.c.bf16 %v2160_v46, %v2160_v46  ;;  %v13313_v34 = vcombine.low %v2353_v21, %v2357_v23  ;;  %v2380_v46 = vld [vmem:[#allocation8 + $0x5e0] sm:$0xff] }
 0x20e   :  { %8353 = vmatpush1.bf16.msra.mxu0 %v13215_v41  ;;  %8681 = vmatpush1.bf16.msra.mxu1 %v13217_v42  ;;  %v2320_v41 = vld [vmem:[#allocation8 + $0x400] sm:$0xff] }
 0x20f   :  { %8354 = vmatprep.subr.bf16.mxu0 %v13224_v43  ;;  %8682 = vmatprep.subr.bf16.mxu1 %v13226_v44  ;;  %v2324_v42 = vld [vmem:[#allocation8 + $0x420] sm:$0xff]  ;;  %v1910_v43 = vadd.f32 %v15886_v20, %v487_v33  ;;  %v2321_v44 = vld [vmem:[#allocation8 + $0x408] sm:$0xff] }
 0x210   :  { %v13282_v8 = vcombine.high %v2321_v44, %v2325_v12  ;;  %v13279_v54 = vcombine.low %v2320_v41, %v2324_v42  ;;  %v13281_v20 = vcombine.low %v2321_v44, %v2325_v12 }
 0x212   :  { %8355 = vmatpush1.bf16.msra.mxu0 %v13223_v48  ;;  %8683 = vmatpush1.bf16.msra.mxu1 %v13225_v49  ;;  %v13280_v48 = vcombine.high %v2320_v41, %v2324_v42  ;;  %v2328_v49 = vld [vmem:[#allocation8 + $0x440] sm:$0xff]  ;;  %v13321_v42 = vcombine.low %v2361_v30, %v2365_v31 }
 0x213   :  { %8356 = vmatprep.subr.bf16.mxu0 %v13232_v57  ;;  %8684 = vmatprep.subr.bf16.mxu1 %v13234_v51  ;;  %v2332_v57 = vld [vmem:[#allocation8 + $0x460] sm:$0xff]  ;;  %v2163_v51 = vmax.f32 %v1910_v43, 0.0 }
 0x214   :  { %v13287_v2 = vcombine.low %v2328_v49, %v2332_v57 }
 0x215   :  { %v15906_v63 = vpack.c.bf16 %v2163_v51, %v2163_v51 }
 0x216   :  { %8357 = vmatpush1.bf16.msra.mxu0 %v13231_v56  ;;  %8685 = vmatpush1.bf16.msra.mxu1 %v13233_v58  ;;  %v13288_v56 = vcombine.high %v2328_v49, %v2332_v57  ;;  %v13290_v58 = vcombine.high %v2329_v52, %v2333_v53 }
 0x217   :  { %8358 = vmatprep.subr.bf16.mxu0 %v13240_v60  ;;  %8686 = vmatprep.subr.bf16.mxu1 %v13242_v62  ;;  %v2336_v60 = vld [vmem:[#allocation8 + $0x480] sm:$0xff] }
 0x218   :  { %v2340_v62 = vld [vmem:[#allocation8 + $0x4a0] sm:$0xff] }
 0x219   :  { %v13295_v11 = vcombine.low %v2336_v60, %v2340_v62 }
 0x21a   :  { %8359 = vmatpush1.bf16.msra.mxu0 %v13239_v3  ;;  %8687 = vmatpush1.bf16.msra.mxu1 %v13241_v4  ;;  %v13289_v3 = vcombine.low %v2329_v52, %v2333_v53  ;;  %v13296_v4 = vcombine.high %v2336_v60, %v2340_v62  ;;  %v2384_v60 = vld [vmem:[#allocation8 + $0x600] sm:$0xff] }
 0x21b   :  { %8360 = vmatprep.subr.bf16.mxu0 %v13248_v5  ;;  %8688 = vmatprep.subr.bf16.mxu1 %v13250_v6  ;;  %v13298_v5 = vcombine.high %v2337_v0, %v2341_v1  ;;  %v2344_v6 = vld [vmem:[#allocation8 + $0x4c0] sm:$0xff] }
 0x21c   :  { %v13303_v24 = vcombine.low %v2344_v6, %v2348_v7  ;;  %v2388_v62 = vld [vmem:[#allocation8 + $0x620] sm:$0xff] }
 0x21e   :  { %8361 = vmatpush1.bf16.msra.mxu0 %v13247_v13  ;;  %8689 = vmatpush1.bf16.msra.mxu1 %v13249_v16  ;;  %v13297_v13 = vcombine.low %v2337_v0, %v2341_v1  ;;  %v13304_v16 = vcombine.high %v2344_v6, %v2348_v7  ;;  %v2385_v1 = vld [vmem:[#allocation8 + $0x608] sm:$0xff]  ;;  %v2392_v7 = vld [vmem:[#allocation8 + $0x640] sm:$0xff] }
 0x21f   :  { %8362 = vmatprep.subr.bf16.mxu0 %v13256_v17  ;;  %8690 = vmatprep.subr.bf16.mxu1 %v13258_v18  ;;  %v13306_v17 = vcombine.high %v2345_v9, %v2349_v10  ;;  %v2352_v18 = vld [vmem:[#allocation8 + $0x500] sm:$0xff] }
 0x220   :  { %v13312_v26 = vcombine.high %v2352_v18, %v2356_v19  ;;  %v13311_v33 = vcombine.low %v2352_v18, %v2356_v19  ;;  %v2400_v19 = vld [vmem:[#allocation8 + $0x680] sm:$0xff] }
 0x222   :  { %8363 = vmatpush1.bf16.msra.mxu0 %v13255_v25  ;;  %8691 = vmatpush1.bf16.msra.mxu1 %v13257_v27  ;;  %v13305_v25 = vcombine.low %v2345_v9, %v2349_v10  ;;  %v13314_v27 = vcombine.high %v2353_v21, %v2357_v23  ;;  %v2396_v9 = vld [vmem:[#allocation8 + $0x660] sm:$0xff]  ;;  %v2393_v10 = vld [vmem:[#allocation8 + $0x648] sm:$0xff] }
 0x223   :  { %8364 = vmatprep.subr.bf16.mxu0 %v13264_v28  ;;  %8692 = vmatprep.subr.bf16.mxu1 %v13266_v29  ;;  %v2360_v28 = vld [vmem:[#allocation8 + $0x540] sm:$0xff]  ;;  %v2401_v23 = vld [vmem:[#allocation8 + $0x688] sm:$0xff] }
 0x224   :  { %v2364_v29 = vld [vmem:[#allocation8 + $0x560] sm:$0xff] }
 0x225   :  { %v13320_v35 = vcombine.high %v2360_v28, %v2364_v29  ;;  %v13319_v41 = vcombine.low %v2360_v28, %v2364_v29  ;;  %v2404_v21 = vld [vmem:[#allocation8 + $0x6a0] sm:$0xff] }
 0x226   :  { %8365 = vmatpush1.bf16.msra.mxu0 %v13263_v36  ;;  %8693 = vmatpush1.bf16.msra.mxu1 %v13265_v38  ;;  %v13322_v36 = vcombine.high %v2361_v30, %v2365_v31  ;;  %v2372_v38 = vld [vmem:[#allocation8 + $0x5a0] sm:$0xff]  ;;  %v2409_v31 = vld [vmem:[#allocation8 + $0x6c8] sm:$0xff] }
 0x227   :  { %8366 = vmatprep.subr.bf16.mxu0 %v13272_v39  ;;  %8694 = vmatprep.subr.bf16.mxu1 %v13274_v40  ;;  %v2369_v39 = vld [vmem:[#allocation8 + $0x588] sm:$0xff]  ;;  %v13328_v43 = vcombine.high %v2368_v37, %v2372_v38  ;;  %v13327_v51 = vcombine.low %v2368_v37, %v2372_v38  ;;  %v2408_v29 = vld [vmem:[#allocation8 + $0x6c0] sm:$0xff] }
 0x228   :  { %v2373_v40 = vld [vmem:[#allocation8 + $0x5a8] sm:$0xff]  ;;  %v2412_v30 = vld [vmem:[#allocation8 + $0x6e0] sm:$0xff] }
 0x229   :  { %v13330_v12 = vcombine.high %v2369_v39, %v2373_v40  ;;  %v2416_v38 = vld [vmem:[#allocation8 + $0x700] sm:$0xff] }
 0x22a   :  { %8367 = vmatpush1.bf16.msra.mxu0 %v13271_v45  ;;  %8695 = vmatpush1.bf16.msra.mxu1 %v13273_v47  ;;  %v2376_v45 = vld [vmem:[#allocation8 + $0x5c0] sm:$0xff] }
 0x22b   :  { %8377 = vmatprep.subr.bf16.mxu0 %v13280_v48  ;;  %8705 = vmatprep.subr.bf16.mxu1 %v13282_v8  ;;  %v2377_v48 = vld [vmem:[#allocation8 + $0x5c8] sm:$0xff] }
 0x22c   :  { %v2381_v8 = vld [vmem:[#allocation8 + $0x5e8] sm:$0xff] }
 0x22d   :  { %8369 = vmatmul.mubr.bf16.vlgmr.msra.gmra.mrb[16].mxu0 %v15904_v55  ;;  %8697 = vmatmul.mubr.bf16.vlgmr.msra.gmra.mrb[16].mxu1 %v15904_v55 }
 0x22e   :  { %8378 = vmatpush1.bf16.msra.mxu0 %v13279_v54  ;;  %8706 = vmatpush1.bf16.msra.mxu1 %v13281_v20  ;;  %v13329_v54 = vcombine.low %v2369_v39, %v2373_v40  ;;  %v13336_v20 = vcombine.high %v2376_v45, %v2380_v46  ;;  %v2420_v39 = vld [vmem:[#allocation8 + $0x720] sm:$0xff]  ;;  %v2417_v40 = vld [vmem:[#allocation8 + $0x708] sm:$0xff] }
 0x22f   :  { %8379 = vmatprep.subr.bf16.mxu0 %v13288_v56  ;;  %8707 = vmatprep.subr.bf16.mxu1 %v13290_v58  ;;  %v13338_v58 = vcombine.high %v2377_v48, %v2381_v8 }
 0x230   :  { %8409 = vmatprep.mubr.bf16.mxu0 %v15906_v63  ;;  %8737 = vmatprep.mubr.bf16.mxu1 %v15906_v63 }
 0x232   :  { %8380 = vmatpush1.bf16.msra.mxu0 %v13287_v2  ;;  %8708 = vmatpush1.bf16.msra.mxu1 %v13289_v3  ;;  %v2389_v2 = vld [vmem:[#allocation8 + $0x628] sm:$0xff]  ;;  %v13335_v3 = vcombine.low %v2376_v45, %v2380_v46  ;;  %v2424_v46 = vld [vmem:[#allocation8 + $0x740] sm:$0xff] }
 0x233   :  { %8381 = vmatprep.subr.bf16.mxu0 %v13296_v4  ;;  %8709 = vmatprep.subr.bf16.mxu1 %v13298_v5  ;;  %v13337_v4 = vcombine.low %v2377_v48, %v2381_v8  ;;  %v13344_v5 = vcombine.high %v2384_v60, %v2388_v62  ;;  %v13346_v6 = vcombine.high %v2385_v1, %v2389_v2  ;;  %v2428_v48 = vld [vmem:[#allocation8 + $0x760] sm:$0xff]  ;;  %v2425_v8 = vld [vmem:[#allocation8 + $0x748] sm:$0xff] }
 0x236   :  { %8382 = vmatpush1.bf16.msra.mxu0 %v13295_v11  ;;  %8710 = vmatpush1.bf16.msra.mxu1 %v13297_v13  ;;  %v2397_v11 = vld [vmem:[#allocation8 + $0x668] sm:$0xff]  ;;  %v13343_v13 = vcombine.low %v2384_v60, %v2388_v62  ;;  %v2436_v60 = vld [vmem:[#allocation8 + $0x7a0] sm:$0xff]  ;;  %v15924_v62 = vsub.s32 5, %v15873_v50 }
 0x237   :  { %8383 = vmatprep.subr.bf16.mxu0 %v13304_v16  ;;  %8711 = vmatprep.subr.bf16.mxu1 %v13306_v17  ;;  %v13345_v16 = vcombine.low %v2385_v1, %v2389_v2  ;;  %v13352_v17 = vcombine.high %v2392_v7, %v2396_v9  ;;  %v13354_v18 = vcombine.high %v2393_v10, %v2397_v11  ;;  %v2437_v1 = vld [vmem:[#allocation8 + $0x7a8] sm:$0xff] }
 0x238   :  { %v13383_v2 = vcombine.low %v2424_v46, %v2428_v48 }
 0x23a   :  { %8384 = vmatpush1.bf16.msra.mxu0 %v13303_v24  ;;  %8712 = vmatpush1.bf16.msra.mxu1 %v13305_v25  ;;  %v2405_v24 = vld [vmem:[#allocation8 + $0x6a8] sm:$0xff]  ;;  %v13351_v25 = vcombine.low %v2392_v7, %v2396_v9  ;;  %v2440_v7 = vld [vmem:[#allocation8 + $0x7c0] sm:$0xff] }
 0x23b   :  { %8385 = vmatprep.subr.bf16.mxu0 %v13312_v26  ;;  %8713 = vmatprep.subr.bf16.mxu1 %v13314_v27  ;;  %v13353_v26 = vcombine.low %v2393_v10, %v2397_v11  ;;  %v13360_v27 = vcombine.high %v2400_v19, %v2404_v21  ;;  %v13362_v28 = vcombine.high %v2401_v23, %v2405_v24  ;;  %v2444_v9 = vld [vmem:[#allocation8 + $0x7e0] sm:$0xff]  ;;  %v2441_v11 = vld [vmem:[#allocation8 + $0x7c8] sm:$0xff] }
 0x23c   :  { %v495_v10 = vrot.slane %v15878_v61, %v15924_v62 }
 0x23e   :  { %8386 = vmatpush1.bf16.msra.mxu0 %v13311_v33  ;;  %8714 = vmatpush1.bf16.msra.mxu1 %v13313_v34  ;;  %v2413_v33 = vld [vmem:[#allocation8 + $0x6e8] sm:$0xff]  ;;  %v13359_v34 = vcombine.low %v2400_v19, %v2404_v21  ;;  %v13400_v19 = vcombine.high %v2440_v7, %v2444_v9 }
 0x23f   :  { %8387 = vmatprep.subr.bf16.mxu0 %v13320_v35  ;;  %8715 = vmatprep.subr.bf16.mxu1 %v13322_v36  ;;  %v13361_v35 = vcombine.low %v2401_v23, %v2405_v24  ;;  %v13368_v36 = vcombine.high %v2408_v29, %v2412_v30  ;;  %v13370_v37 = vcombine.high %v2409_v31, %v2413_v33  ;;  %v2448_v23 = vld [vmem:[#allocation8 + $0x800] sm:$0xff] }
 0x240   :  { %v15912_v44 = vpop.f32.mrb[4].mxu0  ;;  %v15916_v49 = vpop.f32.mrb[4].mxu1  ;;  %v2452_v24 = vld [vmem:[#allocation8 + $0x820] sm:$0xff] }
 0x241   :  { %v15914_v47 = vpop.f32.mrb[5].mxu0  ;;  %v15918_v52 = vpop.f32.mrb[5].mxu1 }
 0x242   :  { %v1952_v57 = vpop.f32.mrb[6].mxu0  ;;  %8388 = vmatpush1.bf16.msra.mxu0 %v13319_v41  ;;  %8716 = vmatpush1.bf16.msra.mxu1 %v13321_v42  ;;  %v1993_v56 = vpop.f32.mrb[6].mxu1  ;;  %v2421_v41 = vld [vmem:[#allocation8 + $0x728] sm:$0xff]  ;;  %v13367_v42 = vcombine.low %v2408_v29, %v2412_v30  ;;  %v13408_v30 = vcombine.high %v2448_v23, %v2452_v24 }
 0x243   :  { %v1953_v53 = vpop.f32.mrb[7].mxu0  ;;  %8389 = vmatprep.subr.bf16.mxu0 %v13328_v43  ;;  %8717 = vmatprep.subr.bf16.mxu1 %v13330_v12  ;;  %v1994_v0 = vpop.f32.mrb[7].mxu1  ;;  %v13369_v43 = vcombine.low %v2409_v31, %v2413_v33  ;;  %v13376_v12 = vcombine.high %v2416_v38, %v2420_v39  ;;  %v13378_v45 = vcombine.high %v2417_v40, %v2421_v41  ;;  %v2429_v57 = vld [vmem:[#allocation8 + $0x768] sm:$0xff]  ;;  %v2456_v33 = vld [vmem:[#allocation8 + $0x840] sm:$0xff] }
 0x244   :  { %v15921_v53 = vsub.s32 2, %v15873_v50  ;;  %v13386_v56 = vcombine.high %v2425_v8, %v2429_v57  ;;  %v2433_v0 = vld [vmem:[#allocation8 + $0x788] sm:$0xff] }
 0x246   :  { %8390 = vmatpush1.bf16.msra.mxu0 %v13327_v51  ;;  %8718 = vmatpush1.bf16.msra.mxu1 %v13329_v54  ;;  %v13375_v51 = vcombine.low %v2416_v38, %v2420_v39  ;;  %v13377_v54 = vcombine.low %v2417_v40, %v2421_v41  ;;  %v2464_v40 = vld [vmem:[#allocation8 + $0x880] sm:$0xff] }
 0x247   :  { %8391 = vmatprep.subr.bf16.mxu0 %v13336_v20  ;;  %8719 = vmatprep.subr.bf16.mxu1 %v13338_v58  ;;  %v13384_v20 = vcombine.high %v2424_v46, %v2428_v48  ;;  %v2432_v58 = vld [vmem:[#allocation8 + $0x780] sm:$0xff] }
 0x248   :  { %v2468_v41 = vld [vmem:[#allocation8 + $0x8a0] sm:$0xff] }
 0x24a   :  { %8392 = vmatpush1.bf16.msra.mxu0 %v13335_v3  ;;  %8720 = vmatpush1.bf16.msra.mxu1 %v13337_v4  ;;  %v483_v3 = vrot.slane %v15878_v61, %v15921_v53  ;;  %v13385_v4 = vcombine.low %v2425_v8, %v2429_v57  ;;  %v13399_v61 = vcombine.low %v2440_v7, %v2444_v9 }
 0x24b   :  { %8393 = vmatprep.subr.bf16.mxu0 %v13344_v5  ;;  %8721 = vmatprep.subr.bf16.mxu1 %v13346_v6  ;;  %v13392_v5 = vcombine.high %v2432_v58, %v2436_v60  ;;  %v13394_v6 = vcombine.high %v2433_v0, %v2437_v1  ;;  %v13424_v8 = vcombine.high %v2464_v40, %v2468_v41 }
 0x24e   :  { %8394 = vmatpush1.bf16.msra.mxu0 %v13343_v13  ;;  %8722 = vmatpush1.bf16.msra.mxu1 %v13345_v16  ;;  %v2445_v13 = vld [vmem:[#allocation8 + $0x7e8] sm:$0xff]  ;;  %v13391_v16 = vcombine.low %v2432_v58, %v2436_v60  ;;  %v13423_v58 = vcombine.low %v2464_v40, %v2468_v41 }
 0x24f   :  { %8395 = vmatprep.subr.bf16.mxu0 %v13352_v17  ;;  %8723 = vmatprep.subr.bf16.mxu1 %v13354_v18  ;;  %v1908_v17 = vadd.f32 %v15884_v14, %v483_v3  ;;  %v13393_v18 = vcombine.low %v2433_v0, %v2437_v1  ;;  %v13402_v21 = vcombine.high %v2441_v11, %v2445_v13  ;;  %v2484_v3 = vld [vmem:[#allocation8 + $0x920] sm:$0xff] }
 0x250   :  { %v13401_v29 = vcombine.low %v2441_v11, %v2445_v13  ;;  %v2488_v11 = vld [vmem:[#allocation8 + $0x940] sm:$0xff] }
 0x251   :  { %v2492_v13 = vld [vmem:[#allocation8 + $0x960] sm:$0xff] }
 0x252   :  { %8396 = vmatpush1.bf16.msra.mxu0 %v13351_v25  ;;  %8724 = vmatpush1.bf16.msra.mxu1 %v13353_v26  ;;  %v1951_v25 = vadd.f32 %v15914_v47, %v495_v10  ;;  %v2449_v26 = vld [vmem:[#allocation8 + $0x808] sm:$0xff] }
 0x253   :  { %8397 = vmatprep.subr.bf16.mxu0 %v13360_v27  ;;  %8725 = vmatprep.subr.bf16.mxu1 %v13362_v28  ;;  %v2453_v27 = vld [vmem:[#allocation8 + $0x828] sm:$0xff]  ;;  %v2162_v28 = vmax.f32 %v1908_v17, 0.0 }
 0x254   :  { %v13410_v14 = vcombine.high %v2449_v26, %v2453_v27  ;;  %v2165_v31 = vmax.f32 %v1951_v25, 0.0  ;;  %v13409_v47 = vcombine.low %v2449_v26, %v2453_v27  ;;  %v2493_v17 = vld [vmem:[#allocation8 + $0x968] sm:$0xff]  ;;  %v2500_v25 = vld [vmem:[#allocation8 + $0x9a0] sm:$0xff] }
 0x255   :  { %v15932_v38 = vpack.c.bf16 %v2162_v28, %v2162_v28  ;;  %v2497_v26 = vld [vmem:[#allocation8 + $0x988] sm:$0xff] }
 0x256   :  { %8398 = vmatpush1.bf16.msra.mxu0 %v13359_v34  ;;  %8726 = vmatpush1.bf16.msra.mxu1 %v13361_v35  ;;  %v2460_v34 = vld [vmem:[#allocation8 + $0x860] sm:$0xff]  ;;  %v13407_v35 = vcombine.low %v2448_v23, %v2452_v24  ;;  %v2501_v27 = vld [vmem:[#allocation8 + $0x9a8] sm:$0xff] }
 0x257   :  { %8399 = vmatprep.subr.bf16.mxu0 %v13368_v36  ;;  %8727 = vmatprep.subr.bf16.mxu1 %v13370_v37  ;;  %v2457_v36 = vld [vmem:[#allocation8 + $0x848] sm:$0xff]  ;;  %v13416_v39 = vcombine.high %v2456_v33, %v2460_v34  ;;  %v13415_v46 = vcombine.low %v2456_v33, %v2460_v34  ;;  %v2496_v24 = vld [vmem:[#allocation8 + $0x980] sm:$0xff] }
 0x258   :  { %v2461_v37 = vld [vmem:[#allocation8 + $0x868] sm:$0xff]  ;;  %v2508_v33 = vld [vmem:[#allocation8 + $0x9e0] sm:$0xff] }
 0x259   :  { %v13417_v48 = vcombine.low %v2457_v36, %v2461_v37 }
 0x25a   :  { %8400 = vmatpush1.bf16.msra.mxu0 %v13367_v42  ;;  %8728 = vmatpush1.bf16.msra.mxu1 %v13369_v43  ;;  %v15934_v42 = vpack.c.bf16 %v2165_v31, %v2165_v31  ;;  %v13418_v43 = vcombine.high %v2457_v36, %v2461_v37  ;;  %v2504_v31 = vld [vmem:[#allocation8 + $0x9c0] sm:$0xff]  ;;  %v2509_v36 = vld [vmem:[#allocation8 + $0x9e8] sm:$0xff] }
 0x25b   :  { %8401 = vmatprep.subr.bf16.mxu0 %v13376_v12  ;;  %8729 = vmatprep.subr.bf16.mxu1 %v13378_v45  ;;  %v2465_v12 = vld [vmem:[#allocation8 + $0x888] sm:$0xff] }
 0x25c   :  { %v2469_v45 = vld [vmem:[#allocation8 + $0x8a8] sm:$0xff] }
 0x25d   :  { %v13426_v57 = vcombine.high %v2465_v12, %v2469_v45  ;;  %v13425_v60 = vcombine.low %v2465_v12, %v2469_v45  ;;  %v13464_v12 = vcombine.high %v2504_v31, %v2508_v33 }
 0x25e   :  { %8402 = vmatpush1.bf16.msra.mxu0 %v13375_v51  ;;  %8730 = vmatpush1.bf16.msra.mxu1 %v13377_v54  ;;  %v2472_v51 = vld [vmem:[#allocation8 + $0x8c0] sm:$0xff] }
 0x25f   :  { %8403 = vmatprep.subr.bf16.mxu0 %v13384_v20  ;;  %8731 = vmatprep.subr.bf16.mxu1 %v13386_v56  ;;  %v2476_v54 = vld [vmem:[#allocation8 + $0x8e0] sm:$0xff]  ;;  %v2473_v20 = vld [vmem:[#allocation8 + $0x8c8] sm:$0xff] }
 0x260   :  { %v2477_v56 = vld [vmem:[#allocation8 + $0x8e8] sm:$0xff]  ;;  %v13432_v0 = vcombine.high %v2472_v51, %v2476_v54 }
 0x261   :  { %v13434_v1 = vcombine.high %v2473_v20, %v2477_v56  ;;  %v13433_v7 = vcombine.low %v2473_v20, %v2477_v56  ;;  %v13463_v20 = vcombine.low %v2504_v31, %v2508_v33  ;;  %v2545_v31 = vld [vmem:[#allocation8 + $0xb08] sm:$0xff] }
 0x262   :  { %8404 = vmatpush1.bf16.msra.mxu0 %v13383_v2  ;;  %8732 = vmatpush1.bf16.msra.mxu1 %v13385_v4  ;;  %v2480_v2 = vld [vmem:[#allocation8 + $0x900] sm:$0xff]  ;;  %v2481_v4 = vld [vmem:[#allocation8 + $0x908] sm:$0xff] }
 0x263   :  { %8405 = vmatprep.subr.bf16.mxu0 %v13392_v5  ;;  %8733 = vmatprep.subr.bf16.mxu1 %v13394_v6  ;;  %v2485_v5 = vld [vmem:[#allocation8 + $0x928] sm:$0xff]  ;;  %v13431_v6 = vcombine.low %v2472_v51, %v2476_v54  ;;  %v13440_v9 = vcombine.high %v2480_v2, %v2484_v3 }
 0x264   :  { %v13442_v10 = vcombine.high %v2481_v4, %v2485_v5  ;;  %v2513_v51 = vld [vmem:[#allocation8 + $0xa08] sm:$0xff] }
 0x265   :  { %v2517_v54 = vld [vmem:[#allocation8 + $0xa28] sm:$0xff] }
 0x266   :  { %8406 = vmatpush1.bf16.msra.mxu0 %v13391_v16  ;;  %8734 = vmatpush1.bf16.msra.mxu1 %v13393_v18  ;;  %v2489_v16 = vld [vmem:[#allocation8 + $0x948] sm:$0xff]  ;;  %v13439_v18 = vcombine.low %v2480_v2, %v2484_v3 }
 0x267   :  { %8407 = vmatprep.subr.bf16.mxu0 %v13400_v19  ;;  %8735 = vmatprep.subr.bf16.mxu1 %v13402_v21  ;;  %v13441_v19 = vcombine.low %v2481_v4, %v2485_v5  ;;  %v13448_v21 = vcombine.high %v2488_v11, %v2492_v13  ;;  %v13450_v23 = vcombine.high %v2489_v16, %v2493_v17  ;;  %v2521_v2 = vld [vmem:[#allocation8 + $0xa48] sm:$0xff] }
 0x268   :  { %v13449_v28 = vcombine.low %v2489_v16, %v2493_v17  ;;  %v2525_v3 = vld [vmem:[#allocation8 + $0xa68] sm:$0xff]  ;;  %v13473_v5 = vcombine.low %v2513_v51, %v2517_v54 }
 0x269   :  { %v13481_v17 = vcombine.low %v2521_v2, %v2525_v3  ;;  %v2549_v33 = vld [vmem:[#allocation8 + $0xb28] sm:$0xff] }
 0x26a   :  { %8408 = vmatpush1.bf16.msra.mxu0 %v13399_v61  ;;  %8736 = vmatpush1.bf16.msra.mxu1 %v13401_v29  ;;  %v13447_v61 = vcombine.low %v2488_v11, %v2492_v13  ;;  %v13456_v29 = vcombine.high %v2496_v24, %v2500_v25  ;;  %v2529_v11 = vld [vmem:[#allocation8 + $0xa88] sm:$0xff] }
 0x26b   :  { %8418 = vmatprep.subr.bf16.mxu0 %v13408_v30  ;;  %8746 = vmatprep.subr.bf16.mxu1 %v13410_v14  ;;  %v13458_v14 = vcombine.high %v2497_v26, %v2501_v27  ;;  %v2533_v13 = vld [vmem:[#allocation8 + $0xaa8] sm:$0xff] }
 0x26d   :  { %8410 = vmatmul.mubr.bf16.vlgmr.msra.gmra.mrb[16].mxu0 %v15932_v38  ;;  %8738 = vmatmul.mubr.bf16.vlgmr.msra.gmra.mrb[16].mxu1 %v15932_v38 }
 0x26e   :  { %8419 = vmatpush1.bf16.msra.mxu0 %v13407_v35  ;;  %8450 = vmatprep.mubr.bf16.mxu0 %v15934_v42  ;;  %v2505_v35 = vld [vmem:[#allocation8 + $0x9c8] sm:$0xff] }
 0x26f   :  { %8747 = vmatpush1.bf16.msra.mxu1 %v13409_v47  ;;  %8778 = vmatprep.mubr.bf16.mxu1 %v15934_v42  ;;  %v13465_v56 = vcombine.low %v2505_v35, %v2509_v36 }
 0x270   :  { %8420 = vmatprep.subr.bf16.mxu0 %v13416_v39  ;;  %8748 = vmatprep.subr.bf16.mxu1 %v13418_v43  ;;  %v13455_v39 = vcombine.low %v2496_v24, %v2500_v25  ;;  %v13457_v43 = vcombine.low %v2497_v26, %v2501_v27  ;;  %v2537_v24 = vld [vmem:[#allocation8 + $0xac8] sm:$0xff]  ;;  %v13489_v27 = vcombine.low %v2529_v11, %v2533_v13 }
 0x271   :  { %v2541_v25 = vld [vmem:[#allocation8 + $0xae8] sm:$0xff] }
 0x272   :  { %8421 = vmatpush1.bf16.msra.mxu0 %v13415_v46  ;;  %v13466_v46 = vcombine.high %v2505_v35, %v2509_v36  ;;  %v13497_v36 = vcombine.low %v2537_v24, %v2541_v25 }
 0x273   :  { %8749 = vmatpush1.bf16.msra.mxu1 %v13417_v48  ;;  %8422 = vmatprep.subr.bf16.mxu0 %v13424_v8  ;;  %v2512_v48 = vld [vmem:[#allocation8 + $0xa00] sm:$0xff] }
 0x274   :  { %8750 = vmatprep.subr.bf16.mxu1 %v13426_v57  ;;  %v2516_v8 = vld [vmem:[#allocation8 + $0xa20] sm:$0xff] }
 0x275   :  { %v13471_v4 = vcombine.low %v2512_v48, %v2516_v8 }
 0x276   :  { %8423 = vmatpush1.bf16.msra.mxu0 %v13423_v58  ;;  %v13472_v58 = vcombine.high %v2512_v48, %v2516_v8  ;;  %v15949_v48 = vsub.s32 4, %v15873_v50  ;;  %v13505_v8 = vcombine.low %v2545_v31, %v2549_v33 }
 0x277   :  { %8751 = vmatpush1.bf16.msra.mxu1 %v13425_v60  ;;  %8424 = vmatprep.subr.bf16.mxu0 %v13432_v0  ;;  %v13474_v60 = vcombine.high %v2513_v51, %v2517_v54  ;;  %v2520_v0 = vld [vmem:[#allocation8 + $0xa40] sm:$0xff] }
 0x278   :  { %8752 = vmatprep.subr.bf16.mxu1 %v13434_v1  ;;  %v2524_v1 = vld [vmem:[#allocation8 + $0xa60] sm:$0xff] }
 0x279   :  { %v13479_v16 = vcombine.low %v2520_v0, %v2524_v1  ;;  %v2560_v54 = vld [vmem:[#allocation8 + $0xb80] sm:$0xff] }
 0x27a   :  { %8425 = vmatpush1.bf16.msra.mxu0 %v13431_v6  ;;  %v13480_v6 = vcombine.high %v2520_v0, %v2524_v1  ;;  %v15954_v1 = vld [vmem:[#allocation7] sm:$0xff] }
 0x27b   :  { %8753 = vmatpush1.bf16.msra.mxu1 %v13433_v7  ;;  %8426 = vmatprep.subr.bf16.mxu0 %v13440_v9  ;;  %v13482_v7 = vcombine.high %v2521_v2, %v2525_v3  ;;  %v2528_v9 = vld [vmem:[#allocation8 + $0xa80] sm:$0xff]  ;;  %v491_v2 = vrot.slane %v15954_v1, %v15949_v48 }
 0x27c   :  { %8754 = vmatprep.subr.bf16.mxu1 %v13442_v10  ;;  %v2532_v10 = vld [vmem:[#allocation8 + $0xaa0] sm:$0xff] }
 0x27d   :  { %v13487_v26 = vcombine.low %v2528_v9, %v2532_v10 }
 0x27e   :  { %8427 = vmatpush1.bf16.msra.mxu0 %v13439_v18  ;;  %v13488_v18 = vcombine.high %v2528_v9, %v2532_v10  ;;  %v2569_v10 = vld [vmem:[#allocation8 + $0xbc8] sm:$0xff] }
 0x27f   :  { %8755 = vmatpush1.bf16.msra.mxu1 %v13441_v19  ;;  %8428 = vmatprep.subr.bf16.mxu0 %v13448_v21  ;;  %v13490_v19 = vcombine.high %v2529_v11, %v2533_v13  ;;  %v2536_v21 = vld [vmem:[#allocation8 + $0xac0] sm:$0xff]  ;;  %v2573_v11 = vld [vmem:[#allocation8 + $0xbe8] sm:$0xff] }
 0x280   :  { %v15940_v30 = vpop.f32.mrb[8].mxu0  ;;  %8756 = vmatprep.subr.bf16.mxu1 %v13450_v23  ;;  %v15944_v37 = vpop.f32.mrb[8].mxu1  ;;  %v2540_v23 = vld [vmem:[#allocation8 + $0xae0] sm:$0xff] }
 0x281   :  { %v15942_v34 = vpop.f32.mrb[9].mxu0  ;;  %v15946_v40 = vpop.f32.mrb[9].mxu1  ;;  %v13495_v35 = vcombine.low %v2536_v21, %v2540_v23 }
 0x282   :  { %v2034_v47 = vpop.f32.mrb[10].mxu0  ;;  %8429 = vmatpush1.bf16.msra.mxu0 %v13447_v61  ;;  %v2075_v45 = vpop.f32.mrb[10].mxu1  ;;  %v13496_v61 = vcombine.high %v2536_v21, %v2540_v23  ;;  %v2576_v21 = vld [vmem:[#allocation8 + $0xc00] sm:$0xff] }
 0x283   :  { %8757 = vmatpush1.bf16.msra.mxu1 %v13449_v28  ;;  %v2035_v41 = vpop.f32.mrb[11].mxu0  ;;  %8430 = vmatprep.subr.bf16.mxu0 %v13456_v29  ;;  %v2076_v57 = vpop.f32.mrb[11].mxu1  ;;  %v13498_v28 = vcombine.high %v2537_v24, %v2541_v25  ;;  %v2544_v29 = vld [vmem:[#allocation8 + $0xb00] sm:$0xff]  ;;  %v2557_v45 = vld [vmem:[#allocation8 + $0xb68] sm:$0xff] }
 0x284   :  { %8758 = vmatprep.subr.bf16.mxu1 %v13458_v14  ;;  %v2548_v14 = vld [vmem:[#allocation8 + $0xb20] sm:$0xff]  ;;  %v2577_v25 = vld [vmem:[#allocation8 + $0xc08] sm:$0xff] }
 0x285   :  { %v13504_v47 = vcombine.high %v2544_v29, %v2548_v14  ;;  %v2552_v41 = vld [vmem:[#allocation8 + $0xb40] sm:$0xff] }
 0x286   :  { %8431 = vmatpush1.bf16.msra.mxu0 %v13455_v39  ;;  %v13506_v39 = vcombine.high %v2545_v31, %v2549_v33  ;;  %v2580_v23 = vld [vmem:[#allocation8 + $0xc20] sm:$0xff] }
 0x287   :  { %8759 = vmatpush1.bf16.msra.mxu1 %v13457_v43  ;;  %8432 = vmatprep.subr.bf16.mxu0 %v13464_v12  ;;  %v2556_v43 = vld [vmem:[#allocation8 + $0xb60] sm:$0xff]  ;;  %v2553_v12 = vld [vmem:[#allocation8 + $0xb48] sm:$0xff] }
 0x288   :  { %8760 = vmatprep.subr.bf16.mxu1 %v13466_v46  ;;  %v13503_v46 = vcombine.low %v2544_v29, %v2548_v14  ;;  %v13512_v57 = vcombine.high %v2552_v41, %v2556_v43  ;;  %v13514_v51 = vcombine.high %v2553_v12, %v2557_v45  ;;  %v13511_v0 = vcombine.low %v2552_v41, %v2556_v43  ;;  %v2584_v31 = vld [vmem:[#allocation8 + $0xc40] sm:$0xff] }
 0x289   :  { %v13513_v3 = vcombine.low %v2553_v12, %v2557_v45  ;;  %v13536_v29 = vcombine.high %v2576_v21, %v2580_v23  ;;  %v2588_v33 = vld [vmem:[#allocation8 + $0xc60] sm:$0xff] }
 0x28a   :  { %8433 = vmatpush1.bf16.msra.mxu0 %v13463_v20  ;;  %v2564_v20 = vld [vmem:[#allocation8 + $0xba0] sm:$0xff]  ;;  %v13544_v41 = vcombine.high %v2584_v31, %v2588_v33 }
 0x28b   :  { %8761 = vmatpush1.bf16.msra.mxu1 %v13465_v56  ;;  %8434 = vmatprep.subr.bf16.mxu0 %v13472_v58  ;;  %v15952_v56 = vsub.s32 7, %v15873_v50  ;;  %v2561_v58 = vld [vmem:[#allocation8 + $0xb88] sm:$0xff]  ;;  %v13519_v13 = vcombine.low %v2560_v54, %v2564_v20  ;;  %v2592_v43 = vld [vmem:[#allocation8 + $0xc80] sm:$0xff] }
 0x28c   :  { %8762 = vmatprep.subr.bf16.mxu1 %v13474_v60  ;;  %v2565_v60 = vld [vmem:[#allocation8 + $0xba8] sm:$0xff]  ;;  %v2596_v12 = vld [vmem:[#allocation8 + $0xca0] sm:$0xff] }
 0x28d   :  { %v503_v9 = vrot.slane %v15954_v1, %v15952_v56 }
 0x28e   :  { %8435 = vmatpush1.bf16.msra.mxu0 %v13471_v4  ;;  %v13520_v4 = vcombine.high %v2560_v54, %v2564_v20  ;;  %v13552_v20 = vcombine.high %v2592_v43, %v2596_v12 }
 0x28f   :  { %8763 = vmatpush1.bf16.msra.mxu1 %v13473_v5  ;;  %8436 = vmatprep.subr.bf16.mxu0 %v13480_v6  ;;  %v13522_v5 = vcombine.high %v2561_v58, %v2565_v60  ;;  %v2568_v6 = vld [vmem:[#allocation8 + $0xbc0] sm:$0xff]  ;;  %v1992_v24 = vadd.f32 %v15918_v52, %v503_v9 }
 0x290   :  { %8764 = vmatprep.subr.bf16.mxu1 %v13482_v7  ;;  %v2572_v7 = vld [vmem:[#allocation8 + $0xbe0] sm:$0xff] }
 0x291   :  { %v2167_v14 = vmax.f32 %v1992_v24, 0.0  ;;  %v2608_v9 = vld [vmem:[#allocation8 + $0xd00] sm:$0xff]  ;;  %v2617_v24 = vld [vmem:[#allocation8 + $0xd48] sm:$0xff] }
 0x292   :  { %8437 = vmatpush1.bf16.msra.mxu0 %v13479_v16  ;;  %v1949_v16 = vadd.f32 %v15912_v44, %v491_v2  ;;  %v2601_v2 = vld [vmem:[#allocation8 + $0xcc8] sm:$0xff] }
 0x293   :  { %8765 = vmatpush1.bf16.msra.mxu1 %v13481_v17  ;;  %8438 = vmatprep.subr.bf16.mxu0 %v13488_v18  ;;  %v13521_v17 = vcombine.low %v2561_v58, %v2565_v60  ;;  %v13528_v18 = vcombine.high %v2568_v6, %v2572_v7  ;;  %v15964_v45 = vpack.c.bf16 %v2167_v14, %v2167_v14  ;;  %v2600_v60 = vld [vmem:[#allocation8 + $0xcc0] sm:$0xff]  ;;  %v2625_v14 = vld [vmem:[#allocation8 + $0xd88] sm:$0xff] }
 0x294   :  { %8766 = vmatprep.subr.bf16.mxu1 %v13490_v19  ;;  %v13530_v19 = vcombine.high %v2569_v10, %v2573_v11 }
 0x296   :  { %8439 = vmatpush1.bf16.msra.mxu0 %v13487_v26  ;;  %v2581_v26 = vld [vmem:[#allocation8 + $0xc28] sm:$0xff] }
 0x297   :  { %8767 = vmatpush1.bf16.msra.mxu1 %v13489_v27  ;;  %8440 = vmatprep.subr.bf16.mxu0 %v13496_v61  ;;  %v13527_v27 = vcombine.low %v2568_v6, %v2572_v7  ;;  %v2164_v61 = vmax.f32 %v1949_v16, 0.0  ;;  %v13538_v44 = vcombine.high %v2577_v25, %v2581_v26  ;;  %v13537_v52 = vcombine.low %v2577_v25, %v2581_v26  ;;  %v2621_v25 = vld [vmem:[#allocation8 + $0xd68] sm:$0xff] }
 0x298   :  { %8768 = vmatprep.subr.bf16.mxu1 %v13498_v28  ;;  %v13529_v28 = vcombine.low %v2569_v10, %v2573_v11  ;;  %v2612_v10 = vld [vmem:[#allocation8 + $0xd20] sm:$0xff]  ;;  %v2609_v11 = vld [vmem:[#allocation8 + $0xd08] sm:$0xff] }
 0x299   :  { %v13567_v26 = vcombine.low %v2608_v9, %v2612_v10 }
 0x29a   :  { %8441 = vmatpush1.bf16.msra.mxu0 %v13495_v35  ;;  %v13535_v35 = vcombine.low %v2576_v21, %v2580_v23  ;;  %v2616_v21 = vld [vmem:[#allocation8 + $0xd40] sm:$0xff] }
 0x29b   :  { %8769 = vmatpush1.bf16.msra.mxu1 %v13497_v36  ;;  %8442 = vmatprep.subr.bf16.mxu0 %v13504_v47  ;;  %v2585_v36 = vld [vmem:[#allocation8 + $0xc48] sm:$0xff]  ;;  %v2620_v23 = vld [vmem:[#allocation8 + $0xd60] sm:$0xff] }
 0x29c   :  { %8770 = vmatprep.subr.bf16.mxu1 %v13506_v39  ;;  %v2589_v47 = vld [vmem:[#allocation8 + $0xc68] sm:$0xff]  ;;  %v15962_v39 = vpack.c.bf16 %v2164_v61, %v2164_v61  ;;  %v13576_v61 = vcombine.high %v2616_v21, %v2620_v23 }
 0x29d   :  { %v13545_v54 = vcombine.low %v2585_v36, %v2589_v47 }
 0x29e   :  { %8443 = vmatpush1.bf16.msra.mxu0 %v13503_v46  ;;  %v13546_v46 = vcombine.high %v2585_v36, %v2589_v47 }
 0x29f   :  { %8771 = vmatpush1.bf16.msra.mxu1 %v13505_v8  ;;  %8444 = vmatprep.subr.bf16.mxu0 %v13512_v57  ;;  %v2593_v8 = vld [vmem:[#allocation8 + $0xc88] sm:$0xff] }
 0x2a0   :  { %8772 = vmatprep.subr.bf16.mxu1 %v13514_v51  ;;  %v2597_v57 = vld [vmem:[#allocation8 + $0xca8] sm:$0xff]  ;;  %v13543_v51 = vcombine.low %v2584_v31, %v2588_v33  ;;  %v13575_v33 = vcombine.low %v2616_v21, %v2620_v23 }
 0x2a1   :  { %v13554_v58 = vcombine.high %v2593_v8, %v2597_v57  ;;  %v2629_v31 = vld [vmem:[#allocation8 + $0xda8] sm:$0xff] }
 0x2a2   :  { %8445 = vmatpush1.bf16.msra.mxu0 %v13511_v0  ;;  %v2604_v0 = vld [vmem:[#allocation8 + $0xce0] sm:$0xff]  ;;  %v2653_v21 = vld [vmem:[#allocation8 + $0xe68] sm:$0xff] }
 0x2a3   :  { %8773 = vmatpush1.bf16.msra.mxu1 %v13513_v3  ;;  %8446 = vmatprep.subr.bf16.mxu0 %v13520_v4  ;;  %v2605_v3 = vld [vmem:[#allocation8 + $0xce8] sm:$0xff]  ;;  %v13551_v4 = vcombine.low %v2592_v43, %v2596_v12  ;;  %v13560_v6 = vcombine.high %v2600_v60, %v2604_v0  ;;  %v13559_v16 = vcombine.low %v2600_v60, %v2604_v0  ;;  %v2636_v43 = vld [vmem:[#allocation8 + $0xde0] sm:$0xff] }
 0x2a4   :  { %8774 = vmatprep.subr.bf16.mxu1 %v13522_v5  ;;  %v13553_v5 = vcombine.low %v2593_v8, %v2597_v57  ;;  %v13562_v7 = vcombine.high %v2601_v2, %v2605_v3  ;;  %v2637_v8 = vld [vmem:[#allocation8 + $0xde8] sm:$0xff]  ;;  %v13585_v60 = vcombine.low %v2625_v14, %v2629_v31 }
 0x2a6   :  { %8447 = vmatpush1.bf16.msra.mxu0 %v13519_v13  ;;  %v2613_v13 = vld [vmem:[#allocation8 + $0xd28] sm:$0xff] }
 0x2a7   :  { %8775 = vmatpush1.bf16.msra.mxu1 %v13521_v17  ;;  %8448 = vmatprep.subr.bf16.mxu0 %v13528_v18  ;;  %v13561_v17 = vcombine.low %v2601_v2, %v2605_v3  ;;  %v13568_v18 = vcombine.high %v2608_v9, %v2612_v10  ;;  %v2645_v9 = vld [vmem:[#allocation8 + $0xe28] sm:$0xff] }
 0x2a8   :  { %8776 = vmatprep.subr.bf16.mxu1 %v13530_v19  ;;  %v13570_v19 = vcombine.high %v2609_v11, %v2613_v13 }
 0x2aa   :  { %8449 = vmatpush1.bf16.msra.mxu0 %v13527_v27  ;;  %v13569_v27 = vcombine.low %v2609_v11, %v2613_v13 }
 0x2ab   :  { %8777 = vmatpush1.bf16.msra.mxu1 %v13529_v28  ;;  %8459 = vmatprep.subr.bf16.mxu0 %v13536_v29  ;;  %v13578_v28 = vcombine.high %v2617_v24, %v2621_v25  ;;  %v2624_v29 = vld [vmem:[#allocation8 + $0xd80] sm:$0xff] }
 0x2ac   :  { %8787 = vmatprep.subr.bf16.mxu1 %v13538_v44  ;;  %v2628_v44 = vld [vmem:[#allocation8 + $0xda0] sm:$0xff] }
 0x2ad   :  { %8451 = vmatmul.mubr.bf16.vlgmr.msra.gmra.mrb[16].mxu0 %v15962_v39  ;;  %v13584_v36 = vcombine.high %v2624_v29, %v2628_v44 }
 0x2ae   :  { %8779 = vmatmul.mubr.bf16.vlgmr.msra.gmra.mrb[16].mxu1 %v15962_v39  ;;  %8460 = vmatpush1.bf16.msra.mxu0 %v13535_v35  ;;  %v13577_v35 = vcombine.low %v2617_v24, %v2621_v25 }
 0x2af   :  { %8491 = vmatprep.mubr.bf16.mxu0 %v15964_v45  ;;  %8788 = vmatpush1.bf16.msra.mxu1 %v13537_v52  ;;  %v13586_v52 = vcombine.high %v2625_v14, %v2629_v31 }
 0x2b0   :  { %8819 = vmatprep.mubr.bf16.mxu1 %v15964_v45  ;;  %8461 = vmatprep.subr.bf16.mxu0 %v13544_v41  ;;  %v2632_v41 = vld [vmem:[#allocation8 + $0xdc0] sm:$0xff] }
 0x2b1   :  { %8789 = vmatprep.subr.bf16.mxu1 %v13546_v46  ;;  %v2633_v46 = vld [vmem:[#allocation8 + $0xdc8] sm:$0xff]  ;;  %v13592_v0 = vcombine.high %v2632_v41, %v2636_v43  ;;  %v13591_v10 = vcombine.low %v2632_v41, %v2636_v43 }
 0x2b2   :  { %8462 = vmatpush1.bf16.msra.mxu0 %v13543_v51  ;;  %v13594_v3 = vcombine.high %v2633_v46, %v2637_v8  ;;  %v13593_v11 = vcombine.low %v2633_v46, %v2637_v8  ;;  %v2669_v41 = vld [vmem:[#allocation8 + $0xee8] sm:$0xff] }
 0x2b3   :  { %8790 = vmatpush1.bf16.msra.mxu1 %v13545_v54  ;;  %8463 = vmatprep.subr.bf16.mxu0 %v13552_v20  ;;  %v13583_v54 = vcombine.low %v2624_v29, %v2628_v44  ;;  %v2661_v29 = vld [vmem:[#allocation8 + $0xea8] sm:$0xff] }
 0x2b4   :  { %8791 = vmatprep.subr.bf16.mxu1 %v13554_v58 }
 0x2b6   :  { %8464 = vmatpush1.bf16.msra.mxu0 %v13551_v4  ;;  %v2640_v4 = vld [vmem:[#allocation8 + $0xe00] sm:$0xff] }
 0x2b7   :  { %8792 = vmatpush1.bf16.msra.mxu1 %v13553_v5  ;;  %8465 = vmatprep.subr.bf16.mxu0 %v13560_v6  ;;  %v2644_v5 = vld [vmem:[#allocation8 + $0xe20] sm:$0xff] }
 0x2b8   :  { %8793 = vmatprep.subr.bf16.mxu1 %v13562_v7  ;;  %v2641_v7 = vld [vmem:[#allocation8 + $0xe08] sm:$0xff]  ;;  %v13600_v13 = vcombine.high %v2640_v4, %v2644_v5  ;;  %v13599_v23 = vcombine.low %v2640_v4, %v2644_v5 }
 0x2b9   :  { %v13601_v24 = vcombine.low %v2641_v7, %v2645_v9 }
 0x2ba   :  { %8466 = vmatpush1.bf16.msra.mxu0 %v13559_v16  ;;  %v13602_v16 = vcombine.high %v2641_v7, %v2645_v9  ;;  %v2684_v7 = vld [vmem:[#allocation8 + $0xf60] sm:$0xff]  ;;  %v2681_v9 = vld [vmem:[#allocation8 + $0xf48] sm:$0xff] }
 0x2bb   :  { %8794 = vmatpush1.bf16.msra.mxu1 %v13561_v17  ;;  %8467 = vmatprep.subr.bf16.mxu0 %v13568_v18  ;;  %v2648_v17 = vld [vmem:[#allocation8 + $0xe40] sm:$0xff] }
 0x2bc   :  { %8795 = vmatprep.subr.bf16.mxu1 %v13570_v19  ;;  %v2652_v18 = vld [vmem:[#allocation8 + $0xe60] sm:$0xff]  ;;  %v2649_v19 = vld [vmem:[#allocation8 + $0xe48] sm:$0xff] }
 0x2bd   :  { %v13608_v25 = vcombine.high %v2648_v17, %v2652_v18  ;;  %v13607_v44 = vcombine.low %v2648_v17, %v2652_v18  ;;  %v13609_v14 = vcombine.low %v2649_v19, %v2653_v21 }
 0x2be   :  { %8468 = vmatpush1.bf16.msra.mxu0 %v13567_v26  ;;  %v13610_v26 = vcombine.high %v2649_v19, %v2653_v21  ;;  %v2688_v19 = vld [vmem:[#allocation8 + $0xf80] sm:$0xff] }
 0x2bf   :  { %8796 = vmatpush1.bf16.msra.mxu1 %v13569_v27  ;;  %8469 = vmatprep.subr.bf16.mxu0 %v13576_v61  ;;  %v2656_v27 = vld [vmem:[#allocation8 + $0xe80] sm:$0xff] }
 0x2c0   :  { %v15970_v47 = vpop.f32.mrb[12].mxu0  ;;  %8797 = vmatprep.subr.bf16.mxu1 %v13578_v28  ;;  %v15974_v57 = vpop.f32.mrb[12].mxu1  ;;  %v2660_v61 = vld [vmem:[#allocation8 + $0xea0] sm:$0xff]  ;;  %v2657_v28 = vld [vmem:[#allocation8 + $0xe88] sm:$0xff] }
 0x2c1   :  { %v15972_v12 = vpop.f32.mrb[13].mxu0  ;;  %v15976_v20 = vpop.f32.mrb[13].mxu1  ;;  %v13616_v31 = vcombine.high %v2656_v27, %v2660_v61  ;;  %v13615_v43 = vcombine.low %v2656_v27, %v2660_v61  ;;  %v13617_v46 = vcombine.low %v2657_v28, %v2661_v29  ;;  %v2692_v21 = vld [vmem:[#allocation8 + $0xfa0] sm:$0xff] }
 0x2c2   :  { %v2116_v51 = vpop.f32.mrb[14].mxu0  ;;  %8470 = vmatpush1.bf16.msra.mxu0 %v13575_v33  ;;  %v2157_v2 = vpop.f32.mrb[14].mxu1  ;;  %v13618_v33 = vcombine.high %v2657_v28, %v2661_v29  ;;  %v13648_v61 = vcombine.high %v2688_v19, %v2692_v21  ;;  %v2696_v29 = vld [vmem:[#allocation8 + $0xfc0] sm:$0xff] }
 0x2c3   :  { %8798 = vmatpush1.bf16.msra.mxu1 %v13577_v35  ;;  %v2117_v58 = vpop.f32.mrb[15].mxu0  ;;  %8471 = vmatprep.subr.bf16.mxu0 %v13584_v36  ;;  %v2158_v6 = vpop.f32.mrb[15].mxu1  ;;  %v2664_v35 = vld [vmem:[#allocation8 + $0xec0] sm:$0xff] }
 0x2c4   :  { %8799 = vmatprep.subr.bf16.mxu1 %v13586_v52  ;;  %v2668_v36 = vld [vmem:[#allocation8 + $0xee0] sm:$0xff]  ;;  %v2665_v52 = vld [vmem:[#allocation8 + $0xec8] sm:$0xff] }
 0x2c5   :  { %v13624_v8 = vcombine.high %v2664_v35, %v2668_v36  ;;  %v13626_v51 = vcombine.high %v2665_v52, %v2669_v41  ;;  %v2676_v58 = vld [vmem:[#allocation8 + $0xf20] sm:$0xff]  ;;  %v13623_v2 = vcombine.low %v2664_v35, %v2668_v36  ;;  %v13647_v35 = vcombine.low %v2688_v19, %v2692_v21  ;;  %v2721_v21 = vld [vmem:[#allocation8 + $0x1088] sm:$0xff] }
 0x2c6   :  { %8472 = vmatpush1.bf16.msra.mxu0 %v13583_v54  ;;  %v2672_v54 = vld [vmem:[#allocation8 + $0xf00] sm:$0xff] }
 0x2c7   :  { %8800 = vmatpush1.bf16.msra.mxu1 %v13585_v60  ;;  %8473 = vmatprep.subr.bf16.mxu0 %v13592_v0  ;;  %v2673_v60 = vld [vmem:[#allocation8 + $0xf08] sm:$0xff]  ;;  %v13632_v4 = vcombine.high %v2672_v54, %v2676_v58  ;;  %v2680_v6 = vld [vmem:[#allocation8 + $0xf40] sm:$0xff] }
 0x2c8   :  { %8801 = vmatprep.subr.bf16.mxu1 %v13594_v3  ;;  %v2677_v0 = vld [vmem:[#allocation8 + $0xf28] sm:$0xff]  ;;  %v13625_v3 = vcombine.low %v2665_v52, %v2669_v41  ;;  %v13640_v17 = vcombine.high %v2680_v6, %v2684_v7 }
 0x2c9   :  { %v13634_v5 = vcombine.high %v2673_v60, %v2677_v0 }
 0x2ca   :  { %8474 = vmatpush1.bf16.msra.mxu0 %v13591_v10  ;;  %v2685_v10 = vld [vmem:[#allocation8 + $0xf68] sm:$0xff] }
 0x2cb   :  { %8802 = vmatpush1.bf16.msra.mxu1 %v13593_v11  ;;  %8475 = vmatprep.subr.bf16.mxu0 %v13600_v13  ;;  %v13631_v11 = vcombine.low %v2672_v54, %v2676_v58  ;;  %v15979_v13 = vsub.s32 6, %v15873_v50  ;;  %v13642_v18 = vcombine.high %v2681_v9, %v2685_v10  ;;  %v13641_v50 = vcombine.low %v2681_v9, %v2685_v10  ;;  %v2709_v54 = vld [vmem:[#allocation8 + $0x1028] sm:$0xff] }
 0x2cc   :  { %8803 = vmatprep.subr.bf16.mxu1 %v13602_v16  ;;  %v13633_v16 = vcombine.low %v2673_v60, %v2677_v0  ;;  %v2717_v9 = vld [vmem:[#allocation8 + $0x1068] sm:$0xff] }
 0x2cd   :  { %v499_v27 = vrot.slane %v15954_v1, %v15979_v13 }
 0x2ce   :  { %8476 = vmatpush1.bf16.msra.mxu0 %v13599_v23  ;;  %v2689_v23 = vld [vmem:[#allocation8 + $0xf88] sm:$0xff] }
 0x2cf   :  { %8804 = vmatpush1.bf16.msra.mxu1 %v13601_v24  ;;  %8477 = vmatprep.subr.bf16.mxu0 %v13608_v25  ;;  %v2693_v24 = vld [vmem:[#allocation8 + $0xfa8] sm:$0xff]  ;;  %v15981_v25 = vld [vmem:[#allocation7 + $0x8] sm:$0xff]  ;;  %v1990_v36 = vadd.f32 %v15916_v49, %v499_v27 }
 0x2d0   :  { %8805 = vmatprep.subr.bf16.mxu1 %v13610_v26  ;;  %v13639_v26 = vcombine.low %v2680_v6, %v2684_v7  ;;  %v13650_v28 = vcombine.high %v2689_v23, %v2693_v24  ;;  %v13649_v1 = vcombine.low %v2689_v23, %v2693_v24  ;;  %v2713_v7 = vld [vmem:[#allocation8 + $0x1048] sm:$0xff] }
 0x2d1   :  { %v2166_v60 = vmax.f32 %v1990_v36, 0.0  ;;  %v13674_v19 = vcombine.high %v2713_v7, %v2717_v9  ;;  %v2725_v23 = vld [vmem:[#allocation8 + $0x10a8] sm:$0xff]  ;;  %v2736_v36 = vld [vmem:[#allocation8 + $0x1100] sm:$0xff] }
 0x2d2   :  { %8478 = vmatpush1.bf16.msra.mxu0 %v13607_v44  ;;  %v2700_v44 = vld [vmem:[#allocation8 + $0xfe0] sm:$0xff] }
 0x2d3   :  { %8806 = vmatpush1.bf16.msra.mxu1 %v13609_v14  ;;  %8479 = vmatprep.subr.bf16.mxu0 %v13616_v31  ;;  %v511_v14 = vrot.slane %v15981_v25, %v15876_v59  ;;  %v2697_v31 = vld [vmem:[#allocation8 + $0xfc8] sm:$0xff]  ;;  %v13656_v52 = vcombine.high %v2696_v29, %v2700_v44  ;;  %v13655_v58 = vcombine.low %v2696_v29, %v2700_v44 }
 0x2d4   :  { %8807 = vmatprep.subr.bf16.mxu1 %v13618_v33  ;;  %v2701_v33 = vld [vmem:[#allocation8 + $0xfe8] sm:$0xff]  ;;  %v15989_v10 = vpack.c.bf16 %v2166_v60, %v2166_v60 }
 0x2d5   :  { %v13658_v41 = vcombine.high %v2697_v31, %v2701_v33  ;;  %v13657_v0 = vcombine.low %v2697_v31, %v2701_v33  ;;  %v2729_v29 = vld [vmem:[#allocation8 + $0x10c8] sm:$0xff]  ;;  %v13681_v31 = vcombine.low %v2721_v21, %v2725_v23 }
 0x2d6   :  { %8480 = vmatpush1.bf16.msra.mxu0 %v13615_v43  ;;  %v2704_v43 = vld [vmem:[#allocation8 + $0x1000] sm:$0xff]  ;;  %v2733_v44 = vld [vmem:[#allocation8 + $0x10e8] sm:$0xff] }
 0x2d7   :  { %8808 = vmatpush1.bf16.msra.mxu1 %v13617_v46  ;;  %8481 = vmatprep.subr.bf16.mxu0 %v13624_v8  ;;  %v2708_v46 = vld [vmem:[#allocation8 + $0x1020] sm:$0xff]  ;;  %v2033_v8 = vadd.f32 %v15942_v34, %v511_v14  ;;  %v2745_v60 = vld [vmem:[#allocation8 + $0x1148] sm:$0xff] }
 0x2d8   :  { %8809 = vmatprep.subr.bf16.mxu1 %v13626_v51  ;;  %v2705_v51 = vld [vmem:[#allocation8 + $0x1008] sm:$0xff]  ;;  %v13663_v6 = vcombine.low %v2704_v43, %v2708_v46 }
 0x2d9   :  { %v13666_v49 = vcombine.high %v2705_v51, %v2709_v54  ;;  %v13665_v34 = vcombine.low %v2705_v51, %v2709_v54  ;;  %v2744_v54 = vld [vmem:[#allocation8 + $0x1140] sm:$0xff] }
 0x2da   :  { %8482 = vmatpush1.bf16.msra.mxu0 %v13623_v2  ;;  %v13664_v2 = vcombine.high %v2704_v43, %v2708_v46  ;;  %v13689_v46 = vcombine.low %v2729_v29, %v2733_v44 }
 0x2db   :  { %8810 = vmatpush1.bf16.msra.mxu1 %v13625_v3  ;;  %8483 = vmatprep.subr.bf16.mxu0 %v13632_v4  ;;  %v2169_v3 = vmax.f32 %v2033_v8, 0.0  ;;  %v2712_v4 = vld [vmem:[#allocation8 + $0x1040] sm:$0xff] }
 0x2dc   :  { %8811 = vmatprep.subr.bf16.mxu1 %v13634_v5  ;;  %v2716_v5 = vld [vmem:[#allocation8 + $0x1060] sm:$0xff] }
 0x2dd   :  { %v13671_v24 = vcombine.low %v2712_v4, %v2716_v5 }
 0x2de   :  { %8484 = vmatpush1.bf16.msra.mxu0 %v13631_v11  ;;  %v13672_v11 = vcombine.high %v2712_v4, %v2716_v5  ;;  %v2752_v5 = vld [vmem:[#allocation8 + $0x1180] sm:$0xff] }
 0x2df   :  { %8812 = vmatpush1.bf16.msra.mxu1 %v13633_v16  ;;  %8485 = vmatprep.subr.bf16.mxu0 %v13640_v17  ;;  %v2720_v16 = vld [vmem:[#allocation8 + $0x1080] sm:$0xff] }
 0x2e0   :  { %8813 = vmatprep.subr.bf16.mxu1 %v13642_v18  ;;  %v2724_v17 = vld [vmem:[#allocation8 + $0x10a0] sm:$0xff]  ;;  %v15991_v18 = vpack.c.bf16 %v2169_v3, %v2169_v3 }
 0x2e1   :  { %v13680_v27 = vcombine.high %v2720_v16, %v2724_v17  ;;  %v13679_v14 = vcombine.low %v2720_v16, %v2724_v17 }
 0x2e2   :  { %8486 = vmatpush1.bf16.msra.mxu0 %v13639_v26  ;;  %v13673_v26 = vcombine.low %v2713_v7, %v2717_v9  ;;  %v2753_v7 = vld [vmem:[#allocation8 + $0x1188] sm:$0xff] }
 0x2e3   :  { %8814 = vmatpush1.bf16.msra.mxu1 %v13641_v50  ;;  %8487 = vmatprep.subr.bf16.mxu0 %v13648_v61  ;;  %v13682_v50 = vcombine.high %v2721_v21, %v2725_v23  ;;  %v2728_v61 = vld [vmem:[#allocation8 + $0x10c0] sm:$0xff]  ;;  %v2757_v9 = vld [vmem:[#allocation8 + $0x11a8] sm:$0xff] }
 0x2e4   :  { %8815 = vmatprep.subr.bf16.mxu1 %v13650_v28  ;;  %v2732_v28 = vld [vmem:[#allocation8 + $0x10e0] sm:$0xff]  ;;  %v13714_v17 = vcombine.high %v2753_v7, %v2757_v9  ;;  %v2761_v23 = vld [vmem:[#allocation8 + $0x11c8] sm:$0xff] }
 0x2e5   :  { %v13688_v33 = vcombine.high %v2728_v61, %v2732_v28  ;;  %v13687_v43 = vcombine.low %v2728_v61, %v2732_v28  ;;  %v2764_v21 = vld [vmem:[#allocation8 + $0x11e0] sm:$0xff] }
 0x2e6   :  { %8488 = vmatpush1.bf16.msra.mxu0 %v13647_v35  ;;  %v13690_v35 = vcombine.high %v2729_v29, %v2733_v44  ;;  %v2768_v28 = vld [vmem:[#allocation8 + $0x1200] sm:$0xff]  ;;  %v2769_v44 = vld [vmem:[#allocation8 + $0x1208] sm:$0xff] }
 0x2e7   :  { %8816 = vmatpush1.bf16.msra.mxu1 %v13649_v1  ;;  %8489 = vmatprep.subr.bf16.mxu0 %v13656_v52  ;;  %v2740_v1 = vld [vmem:[#allocation8 + $0x1120] sm:$0xff]  ;;  %v2737_v52 = vld [vmem:[#allocation8 + $0x1108] sm:$0xff] }
 0x2e8   :  { %8817 = vmatprep.subr.bf16.mxu1 %v13658_v41  ;;  %v2741_v41 = vld [vmem:[#allocation8 + $0x1128] sm:$0xff]  ;;  %v13696_v8 = vcombine.high %v2736_v36, %v2740_v1  ;;  %v2772_v29 = vld [vmem:[#allocation8 + $0x1220] sm:$0xff] }
 0x2e9   :  { %v13698_v51 = vcombine.high %v2737_v52, %v2741_v41 }
 0x2ea   :  { %8490 = vmatpush1.bf16.msra.mxu0 %v13655_v58  ;;  %v2748_v58 = vld [vmem:[#allocation8 + $0x1160] sm:$0xff] }
 0x2eb   :  { %8818 = vmatpush1.bf16.msra.mxu1 %v13657_v0  ;;  %8500 = vmatprep.subr.bf16.mxu0 %v13664_v2  ;;  %v2749_v0 = vld [vmem:[#allocation8 + $0x1168] sm:$0xff]  ;;  %v13695_v2 = vcombine.low %v2736_v36, %v2740_v1  ;;  %v13704_v3 = vcombine.high %v2744_v54, %v2748_v58  ;;  %v2776_v1 = vld [vmem:[#allocation8 + $0x1240] sm:$0xff] }
 0x2ec   :  { %8828 = vmatprep.subr.bf16.mxu1 %v13666_v49  ;;  %v13697_v49 = vcombine.low %v2737_v52, %v2741_v41  ;;  %v13706_v4 = vcombine.high %v2745_v60, %v2749_v0  ;;  %v2780_v52 = vld [vmem:[#allocation8 + $0x1260] sm:$0xff]  ;;  %v2777_v41 = vld [vmem:[#allocation8 + $0x1248] sm:$0xff] }
 0x2ed   :  { %8492 = vmatmul.mubr.bf16.vlgmr.msra.gmra.mrb[16].mxu0 %v15989_v10 }
 0x2ee   :  { %8820 = vmatmul.mubr.bf16.vlgmr.msra.gmra.mrb[16].mxu1 %v15989_v10  ;;  %8501 = vmatpush1.bf16.msra.mxu0 %v13663_v6  ;;  %v2756_v6 = vld [vmem:[#allocation8 + $0x11a0] sm:$0xff] }
 0x2ef   :  { %8532 = vmatprep.mubr.bf16.mxu0 %v15991_v18  ;;  %8829 = vmatpush1.bf16.msra.mxu1 %v13665_v34  ;;  %v13703_v34 = vcombine.low %v2744_v54, %v2748_v58  ;;  %v13712_v16 = vcombine.high %v2752_v5, %v2756_v6  ;;  %v2784_v58 = vld [vmem:[#allocation8 + $0x1280] sm:$0xff] }
 0x2f0   :  { %8860 = vmatprep.mubr.bf16.mxu1 %v15991_v18  ;;  %8502 = vmatprep.subr.bf16.mxu0 %v13672_v11  ;;  %v13705_v11 = vcombine.low %v2745_v60, %v2749_v0  ;;  %v2788_v60 = vld [vmem:[#allocation8 + $0x12a0] sm:$0xff]  ;;  %v2785_v0 = vld [vmem:[#allocation8 + $0x1288] sm:$0xff] }
 0x2f1   :  { %8830 = vmatprep.subr.bf16.mxu1 %v13674_v19  ;;  %v2760_v19 = vld [vmem:[#allocation8 + $0x11c0] sm:$0xff] }
 0x2f2   :  { %8503 = vmatpush1.bf16.msra.mxu0 %v13671_v24  ;;  %v2765_v24 = vld [vmem:[#allocation8 + $0x11e8] sm:$0xff] }
 0x2f3   :  { %8831 = vmatpush1.bf16.msra.mxu1 %v13673_v26  ;;  %8504 = vmatprep.subr.bf16.mxu0 %v13680_v27  ;;  %v13711_v26 = vcombine.low %v2752_v5, %v2756_v6  ;;  %v13713_v27 = vcombine.low %v2753_v7, %v2757_v9  ;;  %v13722_v61 = vcombine.high %v2761_v23, %v2765_v24  ;;  %v2792_v6 = vld [vmem:[#allocation8 + $0x12c0] sm:$0xff]  ;;  %v2793_v9 = vld [vmem:[#allocation8 + $0x12c8] sm:$0xff] }
 0x2f4   :  { %8832 = vmatprep.subr.bf16.mxu1 %v13682_v50  ;;  %v13720_v50 = vcombine.high %v2760_v19, %v2764_v21  ;;  %v2796_v7 = vld [vmem:[#allocation8 + $0x12e0] sm:$0xff] }
 0x2f6   :  { %8505 = vmatpush1.bf16.msra.mxu0 %v13679_v14  ;;  %v2773_v14 = vld [vmem:[#allocation8 + $0x1228] sm:$0xff] }
 0x2f7   :  { %8833 = vmatpush1.bf16.msra.mxu1 %v13681_v31  ;;  %8506 = vmatprep.subr.bf16.mxu0 %v13688_v33  ;;  %v13719_v31 = vcombine.low %v2760_v19, %v2764_v21  ;;  %v13721_v33 = vcombine.low %v2761_v23, %v2765_v24  ;;  %v13730_v36 = vcombine.high %v2769_v44, %v2773_v14  ;;  %v2800_v21 = vld [vmem:[#allocation8 + $0x1300] sm:$0xff]  ;;  %v2801_v24 = vld [vmem:[#allocation8 + $0x1308] sm:$0xff] }
 0x2f8   :  { %8834 = vmatprep.subr.bf16.mxu1 %v13690_v35  ;;  %v13728_v35 = vcombine.high %v2768_v28, %v2772_v29  ;;  %v2804_v23 = vld [vmem:[#allocation8 + $0x1320] sm:$0xff] }
 0x2fa   :  { %8507 = vmatpush1.bf16.msra.mxu0 %v13687_v43  ;;  %v2781_v43 = vld [vmem:[#allocation8 + $0x1268] sm:$0xff] }
 0x2fb   :  { %8835 = vmatpush1.bf16.msra.mxu1 %v13689_v46  ;;  %8508 = vmatprep.subr.bf16.mxu0 %v13696_v8  ;;  %v13727_v46 = vcombine.low %v2768_v28, %v2772_v29  ;;  %v13729_v8 = vcombine.low %v2769_v44, %v2773_v14  ;;  %v13738_v54 = vcombine.high %v2777_v41, %v2781_v43  ;;  %v2808_v29 = vld [vmem:[#allocation8 + $0x1340] sm:$0xff]  ;;  %v2809_v14 = vld [vmem:[#allocation8 + $0x1348] sm:$0xff] }
 0x2fc   :  { %8836 = vmatprep.subr.bf16.mxu1 %v13698_v51  ;;  %v13736_v51 = vcombine.high %v2776_v1, %v2780_v52  ;;  %v2812_v44 = vld [vmem:[#allocation8 + $0x1360] sm:$0xff] }
 0x2fe   :  { %8509 = vmatpush1.bf16.msra.mxu0 %v13695_v2  ;;  %v2789_v2 = vld [vmem:[#allocation8 + $0x12a8] sm:$0xff] }
 0x2ff   :  { %8837 = vmatpush1.bf16.msra.mxu1 %v13697_v49  ;;  %8510 = vmatprep.subr.bf16.mxu0 %v13704_v3  ;;  %v13735_v49 = vcombine.low %v2776_v1, %v2780_v52  ;;  %v13737_v3 = vcombine.low %v2777_v41, %v2781_v43  ;;  %v13746_v5 = vcombine.high %v2785_v0, %v2789_v2  ;;  %v2816_v52 = vld [vmem:[#allocation8 + $0x1380] sm:$0xff]  ;;  %v2817_v43 = vld [vmem:[#allocation8 + $0x1388] sm:$0xff] }
 0x300   :  { %8838 = vmatprep.subr.bf16.mxu1 %v13706_v4  ;;  %v13744_v4 = vcombine.high %v2784_v58, %v2788_v60  ;;  %v2820_v41 = vld [vmem:[#allocation8 + $0x13a0] sm:$0xff] }
 0x302   :  { %8511 = vmatpush1.bf16.msra.mxu0 %v13703_v34  ;;  %v2797_v34 = vld [vmem:[#allocation8 + $0x12e8] sm:$0xff] }
 0x303   :  { %8839 = vmatpush1.bf16.msra.mxu1 %v13705_v11  ;;  %8512 = vmatprep.subr.bf16.mxu0 %v13712_v16  ;;  %v13743_v11 = vcombine.low %v2784_v58, %v2788_v60  ;;  %v13745_v16 = vcombine.low %v2785_v0, %v2789_v2  ;;  %v13754_v19 = vcombine.high %v2793_v9, %v2797_v34  ;;  %v2824_v0 = vld [vmem:[#allocation8 + $0x13c0] sm:$0xff] }
 0x304   :  { %8840 = vmatprep.subr.bf16.mxu1 %v13714_v17  ;;  %v13752_v17 = vcombine.high %v2792_v6, %v2796_v7  ;;  %v13776_v58 = vcombine.high %v2816_v52, %v2820_v41  ;;  %v2828_v2 = vld [vmem:[#allocation8 + $0x13e0] sm:$0xff] }
 0x306   :  { %8513 = vmatpush1.bf16.msra.mxu0 %v13711_v26  ;;  %v2805_v26 = vld [vmem:[#allocation8 + $0x1328] sm:$0xff] }
 0x307   :  { %8841 = vmatpush1.bf16.msra.mxu1 %v13713_v27  ;;  %8514 = vmatprep.subr.bf16.mxu0 %v13720_v50  ;;  %v13751_v27 = vcombine.low %v2792_v6, %v2796_v7  ;;  %v13753_v50 = vcombine.low %v2793_v9, %v2797_v34  ;;  %v13762_v28 = vcombine.high %v2801_v24, %v2805_v26 }
 0x308   :  { %8842 = vmatprep.subr.bf16.mxu1 %v13722_v61  ;;  %v13760_v61 = vcombine.high %v2800_v21, %v2804_v23  ;;  %v13784_v9 = vcombine.high %v2824_v0, %v2828_v2 }
 0x30a   :  { %8515 = vmatpush1.bf16.msra.mxu0 %v13719_v31  ;;  %v2813_v31 = vld [vmem:[#allocation8 + $0x1368] sm:$0xff] }
 0x30b   :  { %8843 = vmatpush1.bf16.msra.mxu1 %v13721_v33  ;;  %8516 = vmatprep.subr.bf16.mxu0 %v13728_v35  ;;  %v13759_v33 = vcombine.low %v2800_v21, %v2804_v23  ;;  %v13761_v35 = vcombine.low %v2801_v24, %v2805_v26  ;;  %v13770_v1 = vcombine.high %v2809_v14, %v2813_v31  ;;  %v2837_v21 = vld [vmem:[#allocation8 + $0x1428] sm:$0xff] }
 0x30c   :  { %8844 = vmatprep.subr.bf16.mxu1 %v13730_v36  ;;  %v13768_v36 = vcombine.high %v2808_v29, %v2812_v44  ;;  %v13783_v23 = vcombine.low %v2824_v0, %v2828_v2  ;;  %v2857_v0 = vld [vmem:[#allocation8 + $0x14c8] sm:$0xff] }
 0x30d   :  { %v2861_v2 = vld [vmem:[#allocation8 + $0x14e8] sm:$0xff] }
 0x30e   :  { %8517 = vmatpush1.bf16.msra.mxu0 %v13727_v46  ;;  %v2821_v46 = vld [vmem:[#allocation8 + $0x13a8] sm:$0xff] }
 0x30f   :  { %8845 = vmatpush1.bf16.msra.mxu1 %v13729_v8  ;;  %8518 = vmatprep.subr.bf16.mxu0 %v13736_v51  ;;  %v13767_v8 = vcombine.low %v2808_v29, %v2812_v44  ;;  %v507_v51 = vrot.slane %v15981_v25, %v15893_v15  ;;  %v13778_v60 = vcombine.high %v2817_v43, %v2821_v46  ;;  %v2841_v44 = vld [vmem:[#allocation8 + $0x1448] sm:$0xff] }
 0x310   :  { %8846 = vmatprep.subr.bf16.mxu1 %v13738_v54  ;;  %v13769_v54 = vcombine.low %v2809_v14, %v2813_v31  ;;  %v13777_v7 = vcombine.low %v2817_v43, %v2821_v46  ;;  %v2845_v14 = vld [vmem:[#allocation8 + $0x1468] sm:$0xff] }
 0x311   :  { %v2031_v6 = vadd.f32 %v15940_v30, %v507_v51  ;;  %v2853_v43 = vld [vmem:[#allocation8 + $0x14a8] sm:$0xff] }
 0x312   :  { %8519 = vmatpush1.bf16.msra.mxu0 %v13735_v49  ;;  %v519_v49 = vrot.slane %v15981_v25, %v15896_v22 }
 0x313   :  { %8847 = vmatpush1.bf16.msra.mxu1 %v13737_v3  ;;  %8520 = vmatprep.subr.bf16.mxu0 %v13744_v4  ;;  %v2825_v3 = vld [vmem:[#allocation8 + $0x13c8] sm:$0xff]  ;;  %v2168_v24 = vmax.f32 %v2031_v6, 0.0  ;;  %v2864_v6 = vld [vmem:[#allocation8 + $0x1500] sm:$0xff] }
 0x314   :  { %8848 = vmatprep.subr.bf16.mxu1 %v13746_v5  ;;  %v2829_v4 = vld [vmem:[#allocation8 + $0x13e8] sm:$0xff]  ;;  %v13775_v5 = vcombine.low %v2816_v52, %v2820_v41  ;;  %v13802_v52 = vcombine.high %v2841_v44, %v2845_v14 }
 0x315   :  { %v13786_v34 = vcombine.high %v2825_v3, %v2829_v4  ;;  %v13785_v26 = vcombine.low %v2825_v3, %v2829_v4  ;;  %v16003_v31 = vpack.c.bf16 %v2168_v24, %v2168_v24  ;;  %v2849_v41 = vld [vmem:[#allocation8 + $0x1488] sm:$0xff] }
 0x316   :  { %8521 = vmatpush1.bf16.msra.mxu0 %v13743_v11  ;;  %v2832_v11 = vld [vmem:[#allocation8 + $0x1400] sm:$0xff]  ;;  %v13809_v3 = vcombine.low %v2849_v41, %v2853_v43  ;;  %v2873_v24 = vld [vmem:[#allocation8 + $0x1548] sm:$0xff] }
 0x317   :  { %8849 = vmatpush1.bf16.msra.mxu1 %v13745_v16  ;;  %8522 = vmatprep.subr.bf16.mxu0 %v13752_v17  ;;  %v2836_v16 = vld [vmem:[#allocation8 + $0x1420] sm:$0xff]  ;;  %v2074_v17 = vadd.f32 %v15946_v40, %v519_v49 }
 0x318   :  { %8850 = vmatprep.subr.bf16.mxu1 %v13754_v19  ;;  %v2833_v19 = vld [vmem:[#allocation8 + $0x1408] sm:$0xff]  ;;  %v13791_v29 = vcombine.low %v2832_v11, %v2836_v16 }
 0x319   :  { %v13794_v30 = vcombine.high %v2833_v19, %v2837_v21  ;;  %v13793_v40 = vcombine.low %v2833_v19, %v2837_v21  ;;  %v2872_v21 = vld [vmem:[#allocation8 + $0x1540] sm:$0xff] }
 0x31a   :  { %8523 = vmatpush1.bf16.msra.mxu0 %v13751_v27  ;;  %v13792_v27 = vcombine.high %v2832_v11, %v2836_v16  ;;  %v13817_v16 = vcombine.low %v2857_v0, %v2861_v2 }
 0x31b   :  { %8851 = vmatpush1.bf16.msra.mxu1 %v13753_v50  ;;  %8524 = vmatprep.subr.bf16.mxu0 %v13760_v61  ;;  %v2171_v50 = vmax.f32 %v2074_v17, 0.0  ;;  %v2840_v61 = vld [vmem:[#allocation8 + $0x1440] sm:$0xff] }
 0x31c   :  { %8852 = vmatprep.subr.bf16.mxu1 %v13762_v28  ;;  %v2844_v28 = vld [vmem:[#allocation8 + $0x1460] sm:$0xff] }
 0x31d   :  { %v13799_v46 = vcombine.low %v2840_v61, %v2844_v28 }
 0x31e   :  { %8525 = vmatpush1.bf16.msra.mxu0 %v13759_v33  ;;  %v13800_v33 = vcombine.high %v2840_v61, %v2844_v28  ;;  %v2880_v28 = vld [vmem:[#allocation8 + $0x1580] sm:$0xff] }
 0x31f   :  { %8853 = vmatpush1.bf16.msra.mxu1 %v13761_v35  ;;  %8526 = vmatprep.subr.bf16.mxu0 %v13768_v36  ;;  %v2848_v35 = vld [vmem:[#allocation8 + $0x1480] sm:$0xff] }
 0x320   :  { %8854 = vmatprep.subr.bf16.mxu1 %v13770_v1  ;;  %v2852_v36 = vld [vmem:[#allocation8 + $0x14a0] sm:$0xff]  ;;  %v16005_v1 = vpack.c.bf16 %v2171_v50, %v2171_v50 }
 0x321   :  { %v13808_v51 = vcombine.high %v2848_v35, %v2852_v36  ;;  %v13807_v49 = vcombine.low %v2848_v35, %v2852_v36 }
 0x322   :  { %8527 = vmatpush1.bf16.msra.mxu0 %v13767_v8  ;;  %v13801_v8 = vcombine.low %v2841_v44, %v2845_v14  ;;  %v2881_v44 = vld [vmem:[#allocation8 + $0x1588] sm:$0xff] }
 0x323   :  { %8855 = vmatpush1.bf16.msra.mxu1 %v13769_v54  ;;  %8528 = vmatprep.subr.bf16.mxu0 %v13776_v58  ;;  %v13810_v54 = vcombine.high %v2849_v41, %v2853_v43  ;;  %v2856_v58 = vld [vmem:[#allocation8 + $0x14c0] sm:$0xff]  ;;  %v2885_v14 = vld [vmem:[#allocation8 + $0x15a8] sm:$0xff] }
 0x324   :  { %8856 = vmatprep.subr.bf16.mxu1 %v13778_v60  ;;  %v2860_v60 = vld [vmem:[#allocation8 + $0x14e0] sm:$0xff]  ;;  %v13842_v36 = vcombine.high %v2881_v44, %v2885_v14  ;;  %v2889_v43 = vld [vmem:[#allocation8 + $0x15c8] sm:$0xff] }
 0x325   :  { %v13816_v4 = vcombine.high %v2856_v58, %v2860_v60  ;;  %v13815_v11 = vcombine.low %v2856_v58, %v2860_v60  ;;  %v2892_v41 = vld [vmem:[#allocation8 + $0x15e0] sm:$0xff] }
 0x326   :  { %8529 = vmatpush1.bf16.msra.mxu0 %v13775_v5  ;;  %v13818_v5 = vcombine.high %v2857_v0, %v2861_v2  ;;  %v2896_v60 = vld [vmem:[#allocation8 + $0x1600] sm:$0xff]  ;;  %v2897_v2 = vld [vmem:[#allocation8 + $0x1608] sm:$0xff] }
 0x327   :  { %8857 = vmatpush1.bf16.msra.mxu1 %v13777_v7  ;;  %8530 = vmatprep.subr.bf16.mxu0 %v13784_v9  ;;  %v2868_v7 = vld [vmem:[#allocation8 + $0x1520] sm:$0xff]  ;;  %v2865_v9 = vld [vmem:[#allocation8 + $0x1508] sm:$0xff] }
 0x328   :  { %8858 = vmatprep.subr.bf16.mxu1 %v13786_v34  ;;  %v2869_v34 = vld [vmem:[#allocation8 + $0x1528] sm:$0xff]  ;;  %v13824_v17 = vcombine.high %v2864_v6, %v2868_v7  ;;  %v2900_v0 = vld [vmem:[#allocation8 + $0x1620] sm:$0xff] }
 0x329   :  { %v13826_v19 = vcombine.high %v2865_v9, %v2869_v34 }
 0x32a   :  { %8531 = vmatpush1.bf16.msra.mxu0 %v13783_v23  ;;  %v2876_v23 = vld [vmem:[#allocation8 + $0x1560] sm:$0xff] }
 0x32b   :  { %8859 = vmatpush1.bf16.msra.mxu1 %v13785_v26  ;;  %8541 = vmatprep.subr.bf16.mxu0 %v13792_v27  ;;  %v2877_v26 = vld [vmem:[#allocation8 + $0x1568] sm:$0xff]  ;;  %v13823_v27 = vcombine.low %v2864_v6, %v2868_v7  ;;  %v13832_v50 = vcombine.high %v2872_v21, %v2876_v23  ;;  %v2904_v7 = vld [vmem:[#allocation8 + $0x1640] sm:$0xff] }
 0x32c   :  { %8869 = vmatprep.subr.bf16.mxu1 %v13794_v30  ;;  %v13825_v30 = vcombine.low %v2865_v9, %v2869_v34  ;;  %v13834_v61 = vcombine.high %v2873_v24, %v2877_v26  ;;  %v2908_v9 = vld [vmem:[#allocation8 + $0x1660] sm:$0xff]  ;;  %v2905_v34 = vld [vmem:[#allocation8 + $0x1648] sm:$0xff] }
 0x32d   :  { %8533 = vmatmul.mubr.bf16.vlgmr.msra.gmra.mrb[16].mxu0 %v16003_v31 }
 0x32e   :  { %8861 = vmatmul.mubr.bf16.vlgmr.msra.gmra.mrb[16].mxu1 %v16003_v31  ;;  %8542 = vmatpush1.bf16.msra.mxu0 %v13791_v29  ;;  %v2884_v29 = vld [vmem:[#allocation8 + $0x15a0] sm:$0xff] }
 0x32f   :  { %8573 = vmatprep.mubr.bf16.mxu0 %v16005_v1  ;;  %8870 = vmatpush1.bf16.msra.mxu1 %v13793_v40  ;;  %v13831_v40 = vcombine.low %v2872_v21, %v2876_v23  ;;  %v13840_v35 = vcombine.high %v2880_v28, %v2884_v29  ;;  %v2912_v23 = vld [vmem:[#allocation8 + $0x1680] sm:$0xff] }
 0x330   :  { %8901 = vmatprep.mubr.bf16.mxu1 %v16005_v1  ;;  %8543 = vmatprep.subr.bf16.mxu0 %v13800_v33  ;;  %v13833_v33 = vcombine.low %v2873_v24, %v2877_v26  ;;  %v2916_v24 = vld [vmem:[#allocation8 + $0x16a0] sm:$0xff]  ;;  %v2913_v26 = vld [vmem:[#allocation8 + $0x1688] sm:$0xff] }
 0x331   :  { %8871 = vmatprep.subr.bf16.mxu1 %v13802_v52  ;;  %v2888_v52 = vld [vmem:[#allocation8 + $0x15c0] sm:$0xff] }
 0x332   :  { %8544 = vmatpush1.bf16.msra.mxu0 %v13799_v46  ;;  %v2893_v46 = vld [vmem:[#allocation8 + $0x15e8] sm:$0xff] }
 0x333   :  { %8872 = vmatpush1.bf16.msra.mxu1 %v13801_v8  ;;  %8545 = vmatprep.subr.bf16.mxu0 %v13808_v51  ;;  %v13839_v8 = vcombine.low %v2880_v28, %v2884_v29  ;;  %v13841_v51 = vcombine.low %v2881_v44, %v2885_v14  ;;  %v13850_v58 = vcombine.high %v2889_v43, %v2893_v46  ;;  %v2920_v29 = vld [vmem:[#allocation8 + $0x16c0] sm:$0xff]  ;;  %v2921_v14 = vld [vmem:[#allocation8 + $0x16c8] sm:$0xff] }
 0x334   :  { %8873 = vmatprep.subr.bf16.mxu1 %v13810_v54  ;;  %v13848_v54 = vcombine.high %v2888_v52, %v2892_v41  ;;  %v2924_v44 = vld [vmem:[#allocation8 + $0x16e0] sm:$0xff] }
 0x336   :  { %8546 = vmatpush1.bf16.msra.mxu0 %v13807_v49  ;;  %v2901_v49 = vld [vmem:[#allocation8 + $0x1628] sm:$0xff] }
 0x337   :  { %8874 = vmatpush1.bf16.msra.mxu1 %v13809_v3  ;;  %8547 = vmatprep.subr.bf16.mxu0 %v13816_v4  ;;  %v13847_v3 = vcombine.low %v2888_v52, %v2892_v41  ;;  %v13849_v4 = vcombine.low %v2889_v43, %v2893_v46  ;;  %v13858_v6 = vcombine.high %v2897_v2, %v2901_v49  ;;  %v2928_v41 = vld [vmem:[#allocation8 + $0x1700] sm:$0xff]  ;;  %v2929_v46 = vld [vmem:[#allocation8 + $0x1708] sm:$0xff] }
 0x338   :  { %8875 = vmatprep.subr.bf16.mxu1 %v13818_v5  ;;  %v13856_v5 = vcombine.high %v2896_v60, %v2900_v0  ;;  %v2932_v43 = vld [vmem:[#allocation8 + $0x1720] sm:$0xff] }
 0x33a   :  { %8548 = vmatpush1.bf16.msra.mxu0 %v13815_v11  ;;  %v2909_v11 = vld [vmem:[#allocation8 + $0x1668] sm:$0xff] }
 0x33b   :  { %8876 = vmatpush1.bf16.msra.mxu1 %v13817_v16  ;;  %8549 = vmatprep.subr.bf16.mxu0 %v13824_v17  ;;  %v13855_v16 = vcombine.low %v2896_v60, %v2900_v0  ;;  %v13857_v17 = vcombine.low %v2897_v2, %v2901_v49  ;;  %v13866_v21 = vcombine.high %v2905_v34, %v2909_v11  ;;  %v2936_v0 = vld [vmem:[#allocation8 + $0x1740] sm:$0xff]  ;;  %v2937_v49 = vld [vmem:[#allocation8 + $0x1748] sm:$0xff] }
 0x33c   :  { %8877 = vmatprep.subr.bf16.mxu1 %v13826_v19  ;;  %v13864_v19 = vcombine.high %v2904_v7, %v2908_v9  ;;  %v2940_v2 = vld [vmem:[#allocation8 + $0x1760] sm:$0xff] }
 0x33e   :  { %8550 = vmatpush1.bf16.msra.mxu0 %v13823_v27  ;;  %v2917_v27 = vld [vmem:[#allocation8 + $0x16a8] sm:$0xff] }
 0x33f   :  { %8878 = vmatpush1.bf16.msra.mxu1 %v13825_v30  ;;  %8551 = vmatprep.subr.bf16.mxu0 %v13832_v50  ;;  %v13863_v30 = vcombine.low %v2904_v7, %v2908_v9  ;;  %v13865_v50 = vcombine.low %v2905_v34, %v2909_v11  ;;  %v13874_v28 = vcombine.high %v2913_v26, %v2917_v27  ;;  %v2944_v9 = vld [vmem:[#allocation8 + $0x1780] sm:$0xff]  ;;  %v2945_v11 = vld [vmem:[#allocation8 + $0x1788] sm:$0xff] }
 0x340   :  { %8879 = vmatprep.subr.bf16.mxu1 %v13834_v61  ;;  %v13872_v61 = vcombine.high %v2912_v23, %v2916_v24  ;;  %v2948_v34 = vld [vmem:[#allocation8 + $0x17a0] sm:$0xff] }
 0x342   :  { %8552 = vmatpush1.bf16.msra.mxu0 %v13831_v40  ;;  %v2925_v40 = vld [vmem:[#allocation8 + $0x16e8] sm:$0xff] }
 0x343   :  { %8880 = vmatpush1.bf16.msra.mxu1 %v13833_v33  ;;  %8553 = vmatprep.subr.bf16.mxu0 %v13840_v35  ;;  %v13871_v33 = vcombine.low %v2912_v23, %v2916_v24  ;;  %v13873_v35 = vcombine.low %v2913_v26, %v2917_v27  ;;  %v13882_v52 = vcombine.high %v2921_v14, %v2925_v40  ;;  %v2952_v26 = vld [vmem:[#allocation8 + $0x17c0] sm:$0xff] }
 0x344   :  { %8881 = vmatprep.subr.bf16.mxu1 %v13842_v36  ;;  %v13880_v36 = vcombine.high %v2920_v29, %v2924_v44  ;;  %v13904_v23 = vcombine.high %v2944_v9, %v2948_v34  ;;  %v2956_v27 = vld [vmem:[#allocation8 + $0x17e0] sm:$0xff] }
 0x346   :  { %8554 = vmatpush1.bf16.msra.mxu0 %v13839_v8  ;;  %v2933_v8 = vld [vmem:[#allocation8 + $0x1728] sm:$0xff] }
 0x347   :  { %8882 = vmatpush1.bf16.msra.mxu1 %v13841_v51  ;;  %8555 = vmatprep.subr.bf16.mxu0 %v13848_v54  ;;  %v13879_v51 = vcombine.low %v2920_v29, %v2924_v44  ;;  %v13881_v54 = vcombine.low %v2921_v14, %v2925_v40  ;;  %v13890_v60 = vcombine.high %v2929_v46, %v2933_v8 }
 0x348   :  { %8883 = vmatprep.subr.bf16.mxu1 %v13850_v58  ;;  %v13888_v58 = vcombine.high %v2928_v41, %v2932_v43  ;;  %v13912_v14 = vcombine.high %v2952_v26, %v2956_v27 }
 0x34a   :  { %8556 = vmatpush1.bf16.msra.mxu0 %v13847_v3  ;;  %v2941_v3 = vld [vmem:[#allocation8 + $0x1768] sm:$0xff] }
 0x34b   :  { %8884 = vmatpush1.bf16.msra.mxu1 %v13849_v4  ;;  %8557 = vmatprep.subr.bf16.mxu0 %v13856_v5  ;;  %v13887_v4 = vcombine.low %v2928_v41, %v2932_v43  ;;  %v13889_v5 = vcombine.low %v2929_v46, %v2933_v8  ;;  %v13898_v7 = vcombine.high %v2937_v49, %v2941_v3  ;;  %v2965_v41 = vld [vmem:[#allocation8 + $0x1828] sm:$0xff] }
 0x34c   :  { %8885 = vmatprep.subr.bf16.mxu1 %v13858_v6  ;;  %v13896_v6 = vcombine.high %v2936_v0, %v2940_v2 }
 0x34e   :  { %8558 = vmatpush1.bf16.msra.mxu0 %v13855_v16  ;;  %v2949_v16 = vld [vmem:[#allocation8 + $0x17a8] sm:$0xff] }
 0x34f   :  { %8886 = vmatpush1.bf16.msra.mxu1 %v13857_v17  ;;  %8559 = vmatprep.subr.bf16.mxu0 %v13864_v19  ;;  %v13895_v17 = vcombine.low %v2936_v0, %v2940_v2  ;;  %v515_v19 = vrot.slane %v15981_v25, %v15921_v53  ;;  %v13906_v24 = vcombine.high %v2945_v11, %v2949_v16  ;;  %v2969_v0 = vld [vmem:[#allocation8 + $0x1848] sm:$0xff] }
 0x350   :  { %8887 = vmatprep.subr.bf16.mxu1 %v13866_v21  ;;  %v13897_v21 = vcombine.low %v2937_v49, %v2941_v3  ;;  %v13905_v44 = vcombine.low %v2945_v11, %v2949_v16  ;;  %v2973_v2 = vld [vmem:[#allocation8 + $0x1868] sm:$0xff] }
 0x351   :  { %v2072_v29 = vadd.f32 %v15944_v37, %v515_v19  ;;  %v13929_v16 = vcombine.low %v2969_v0, %v2973_v2 }
 0x352   :  { %8560 = vmatpush1.bf16.msra.mxu0 %v13863_v30  ;;  %v527_v30 = vrot.slane %v15981_v25, %v15924_v62  ;;  %v13911_v25 = vcombine.low %v2952_v26, %v2956_v27  ;;  %v2989_v26 = vld [vmem:[#allocation8 + $0x18e8] sm:$0xff] }
 0x353   :  { %8888 = vmatpush1.bf16.msra.mxu1 %v13865_v50  ;;  %8561 = vmatprep.subr.bf16.mxu0 %v13872_v61  ;;  %v2953_v50 = vld [vmem:[#allocation8 + $0x17c8] sm:$0xff]  ;;  %v2170_v43 = vmax.f32 %v2072_v29, 0.0  ;;  %v2996_v29 = vld [vmem:[#allocation8 + $0x1920] sm:$0xff] }
 0x354   :  { %8889 = vmatprep.subr.bf16.mxu1 %v13874_v28  ;;  %v2957_v61 = vld [vmem:[#allocation8 + $0x17e8] sm:$0xff]  ;;  %v13903_v28 = vcombine.low %v2944_v9, %v2948_v34 }
 0x355   :  { %v13914_v40 = vcombine.high %v2953_v50, %v2957_v61  ;;  %v13913_v46 = vcombine.low %v2953_v50, %v2957_v61  ;;  %v16017_v49 = vpack.c.bf16 %v2170_v43, %v2170_v43  ;;  %v2977_v9 = vld [vmem:[#allocation8 + $0x1888] sm:$0xff] }
 0x356   :  { %8562 = vmatpush1.bf16.msra.mxu0 %v13871_v33  ;;  %v2960_v33 = vld [vmem:[#allocation8 + $0x1800] sm:$0xff]  ;;  %v2981_v34 = vld [vmem:[#allocation8 + $0x18a8] sm:$0xff] }
 0x357   :  { %8890 = vmatpush1.bf16.msra.mxu1 %v13873_v35  ;;  %8563 = vmatprep.subr.bf16.mxu0 %v13880_v36  ;;  %v2964_v35 = vld [vmem:[#allocation8 + $0x1820] sm:$0xff]  ;;  %v2115_v36 = vadd.f32 %v15972_v12, %v527_v30  ;;  %v13938_v19 = vcombine.high %v2977_v9, %v2981_v34  ;;  %v13937_v30 = vcombine.low %v2977_v9, %v2981_v34  ;;  %v3005_v43 = vld [vmem:[#allocation8 + $0x1968] sm:$0xff] }
 0x358   :  { %8891 = vmatprep.subr.bf16.mxu1 %v13882_v52  ;;  %v2961_v52 = vld [vmem:[#allocation8 + $0x1808] sm:$0xff]  ;;  %v13920_v8 = vcombine.high %v2960_v33, %v2964_v35 }
 0x359   :  { %v13922_v37 = vcombine.high %v2961_v52, %v2965_v41  ;;  %v13921_v12 = vcombine.low %v2961_v52, %v2965_v41  ;;  %v3000_v52 = vld [vmem:[#allocation8 + $0x1940] sm:$0xff]  ;;  %v3017_v9 = vld [vmem:[#allocation8 + $0x19c8] sm:$0xff] }
 0x35a   :  { %8564 = vmatpush1.bf16.msra.mxu0 %v13879_v51  ;;  %v2173_v51 = vmax.f32 %v2115_v36, 0.0  ;;  %v3004_v41 = vld [vmem:[#allocation8 + $0x1960] sm:$0xff]  ;;  %v3021_v34 = vld [vmem:[#allocation8 + $0x19e8] sm:$0xff] }
 0x35b   :  { %8892 = vmatpush1.bf16.msra.mxu1 %v13881_v54  ;;  %8565 = vmatprep.subr.bf16.mxu0 %v13888_v58  ;;  %v2968_v54 = vld [vmem:[#allocation8 + $0x1840] sm:$0xff] }
 0x35c   :  { %8893 = vmatprep.subr.bf16.mxu1 %v13890_v60  ;;  %v2972_v58 = vld [vmem:[#allocation8 + $0x1860] sm:$0xff]  ;;  %v13919_v60 = vcombine.low %v2960_v33, %v2964_v35 }
 0x35d   :  { %v13928_v3 = vcombine.high %v2968_v54, %v2972_v58  ;;  %v13927_v11 = vcombine.low %v2968_v54, %v2972_v58  ;;  %v3008_v54 = vld [vmem:[#allocation8 + $0x1980] sm:$0xff] }
 0x35e   :  { %8566 = vmatpush1.bf16.msra.mxu0 %v13887_v4  ;;  %v2976_v4 = vld [vmem:[#allocation8 + $0x1880] sm:$0xff] }
 0x35f   :  { %8894 = vmatpush1.bf16.msra.mxu1 %v13889_v5  ;;  %8567 = vmatprep.subr.bf16.mxu0 %v13896_v6  ;;  %v2980_v5 = vld [vmem:[#allocation8 + $0x18a0] sm:$0xff]  ;;  %v16019_v6 = vpack.c.bf16 %v2173_v51, %v2173_v51 }
 0x360   :  { %8895 = vmatprep.subr.bf16.mxu1 %v13898_v7  ;;  %v13930_v7 = vcombine.high %v2969_v0, %v2973_v2  ;;  %v13935_v27 = vcombine.low %v2976_v4, %v2980_v5  ;;  %v3012_v58 = vld [vmem:[#allocation8 + $0x19a0] sm:$0xff]  ;;  %v3013_v0 = vld [vmem:[#allocation8 + $0x19a8] sm:$0xff]  ;;  %v13959_v2 = vcombine.low %v3000_v52, %v3004_v41 }
 0x362   :  { %8568 = vmatpush1.bf16.msra.mxu0 %v13895_v17  ;;  %v13936_v17 = vcombine.high %v2976_v4, %v2980_v5  ;;  %v3016_v5 = vld [vmem:[#allocation8 + $0x19c0] sm:$0xff] }
 0x363   :  { %8896 = vmatpush1.bf16.msra.mxu1 %v13897_v21  ;;  %8569 = vmatprep.subr.bf16.mxu0 %v13904_v23  ;;  %v2984_v21 = vld [vmem:[#allocation8 + $0x18c0] sm:$0xff] }
 0x364   :  { %8897 = vmatprep.subr.bf16.mxu1 %v13906_v24  ;;  %v2988_v23 = vld [vmem:[#allocation8 + $0x18e0] sm:$0xff]  ;;  %v2985_v24 = vld [vmem:[#allocation8 + $0x18c8] sm:$0xff] }
 0x365   :  { %v13944_v50 = vcombine.high %v2984_v21, %v2988_v23  ;;  %v13946_v61 = vcombine.high %v2985_v24, %v2989_v26  ;;  %v13945_v33 = vcombine.low %v2985_v24, %v2989_v26  ;;  %v3025_v24 = vld [vmem:[#allocation8 + $0x1a08] sm:$0xff] }
 0x366   :  { %8570 = vmatpush1.bf16.msra.mxu0 %v13903_v28  ;;  %v2992_v28 = vld [vmem:[#allocation8 + $0x1900] sm:$0xff]  ;;  %v3029_v26 = vld [vmem:[#allocation8 + $0x1a28] sm:$0xff] }
 0x367   :  { %8898 = vmatpush1.bf16.msra.mxu1 %v13905_v44  ;;  %8571 = vmatprep.subr.bf16.mxu0 %v13912_v14  ;;  %v2993_v44 = vld [vmem:[#allocation8 + $0x1908] sm:$0xff]  ;;  %v13952_v35 = vcombine.high %v2992_v28, %v2996_v29 }
 0x368   :  { %8899 = vmatprep.subr.bf16.mxu1 %v13914_v40  ;;  %v2997_v14 = vld [vmem:[#allocation8 + $0x1928] sm:$0xff]  ;;  %v13943_v40 = vcombine.low %v2984_v21, %v2988_v23  ;;  %v3024_v21 = vld [vmem:[#allocation8 + $0x1a00] sm:$0xff] }
 0x369   :  { %v13954_v36 = vcombine.high %v2993_v44, %v2997_v14  ;;  %v3028_v23 = vld [vmem:[#allocation8 + $0x1a20] sm:$0xff] }
 0x36a   :  { %8572 = vmatpush1.bf16.msra.mxu0 %v13911_v25  ;;  %v3001_v25 = vld [vmem:[#allocation8 + $0x1948] sm:$0xff] }
 0x36b   :  { %8900 = vmatpush1.bf16.msra.mxu1 %v13913_v46  ;;  %8582 = vmatprep.subr.bf16.mxu0 %v13920_v8  ;;  %v13951_v46 = vcombine.low %v2992_v28, %v2996_v29  ;;  %v13953_v8 = vcombine.low %v2993_v44, %v2997_v14  ;;  %v13962_v51 = vcombine.high %v3001_v25, %v3005_v43  ;;  %v3032_v28 = vld [vmem:[#allocation8 + $0x1a40] sm:$0xff]  ;;  %v3033_v44 = vld [vmem:[#allocation8 + $0x1a48] sm:$0xff] }
 0x36c   :  { %8910 = vmatprep.subr.bf16.mxu1 %v13922_v37  ;;  %v13960_v37 = vcombine.high %v3000_v52, %v3004_v41  ;;  %v3036_v29 = vld [vmem:[#allocation8 + $0x1a60] sm:$0xff]  ;;  %v3037_v14 = vld [vmem:[#allocation8 + $0x1a68] sm:$0xff] }
 0x36d   :  { %8574 = vmatmul.mubr.bf16.vlgmr.msra.gmra.mrb[16].mxu0 %v16017_v49  ;;  %v3040_v52 = vld [vmem:[#allocation8 + $0x1a80] sm:$0xff] }
 0x36e   :  { %8902 = vmatmul.mubr.bf16.vlgmr.msra.gmra.mrb[16].mxu1 %v16017_v49  ;;  %8583 = vmatpush1.bf16.msra.mxu0 %v13919_v60  ;;  %v3009_v60 = vld [vmem:[#allocation8 + $0x1988] sm:$0xff]  ;;  %v3044_v41 = vld [vmem:[#allocation8 + $0x1aa0] sm:$0xff] }
 0x36f   :  { %8614 = vmatprep.mubr.bf16.mxu0 %v16019_v6  ;;  %8911 = vmatpush1.bf16.msra.mxu1 %v13921_v12  ;;  %v13961_v12 = vcombine.low %v3001_v25, %v3005_v43  ;;  %v13970_v4 = vcombine.high %v3009_v60, %v3013_v0  ;;  %v3041_v25 = vld [vmem:[#allocation8 + $0x1a88] sm:$0xff] }
 0x370   :  { %8942 = vmatprep.mubr.bf16.mxu1 %v16019_v6  ;;  %8584 = vmatprep.subr.bf16.mxu0 %v13928_v3  ;;  %v13968_v3 = vcombine.high %v3008_v54, %v3012_v58  ;;  %v3045_v43 = vld [vmem:[#allocation8 + $0x1aa8] sm:$0xff] }
 0x371   :  { %8912 = vmatprep.subr.bf16.mxu1 %v13930_v7  ;;  %v3020_v7 = vld [vmem:[#allocation8 + $0x19e0] sm:$0xff] }
 0x372   :  { %8585 = vmatpush1.bf16.msra.mxu0 %v13927_v11  ;;  %v13967_v11 = vcombine.low %v3008_v54, %v3012_v58  ;;  %v3048_v54 = vld [vmem:[#allocation8 + $0x1ac0] sm:$0xff] }
 0x373   :  { %8913 = vmatpush1.bf16.msra.mxu1 %v13929_v16  ;;  %8586 = vmatprep.subr.bf16.mxu0 %v13936_v17  ;;  %v13969_v16 = vcombine.low %v3009_v60, %v3013_v0  ;;  %v13976_v17 = vcombine.high %v3016_v5, %v3020_v7  ;;  %v3052_v58 = vld [vmem:[#allocation8 + $0x1ae0] sm:$0xff]  ;;  %v3049_v60 = vld [vmem:[#allocation8 + $0x1ac8] sm:$0xff] }
 0x374   :  { %8914 = vmatprep.subr.bf16.mxu1 %v13938_v19  ;;  %v13978_v19 = vcombine.high %v3017_v9, %v3021_v34  ;;  %v3053_v0 = vld [vmem:[#allocation8 + $0x1ae8] sm:$0xff] }
 0x376   :  { %8587 = vmatpush1.bf16.msra.mxu0 %v13935_v27  ;;  %v13975_v27 = vcombine.low %v3016_v5, %v3020_v7  ;;  %v3056_v5 = vld [vmem:[#allocation8 + $0x1b00] sm:$0xff] }
 0x377   :  { %8915 = vmatpush1.bf16.msra.mxu1 %v13937_v30  ;;  %8588 = vmatprep.subr.bf16.mxu0 %v13944_v50  ;;  %v13977_v30 = vcombine.low %v3017_v9, %v3021_v34  ;;  %v13984_v50 = vcombine.high %v3024_v21, %v3028_v23  ;;  %v3060_v7 = vld [vmem:[#allocation8 + $0x1b20] sm:$0xff]  ;;  %v3057_v9 = vld [vmem:[#allocation8 + $0x1b08] sm:$0xff] }
 0x378   :  { %8916 = vmatprep.subr.bf16.mxu1 %v13946_v61  ;;  %v13986_v61 = vcombine.high %v3025_v24, %v3029_v26  ;;  %v3061_v34 = vld [vmem:[#allocation8 + $0x1b28] sm:$0xff] }
 0x37a   :  { %8589 = vmatpush1.bf16.msra.mxu0 %v13943_v40  ;;  %v13983_v40 = vcombine.low %v3024_v21, %v3028_v23  ;;  %v3064_v21 = vld [vmem:[#allocation8 + $0x1b40] sm:$0xff] }
 0x37b   :  { %8917 = vmatpush1.bf16.msra.mxu1 %v13945_v33  ;;  %8590 = vmatprep.subr.bf16.mxu0 %v13952_v35  ;;  %v13985_v33 = vcombine.low %v3025_v24, %v3029_v26  ;;  %v13992_v35 = vcombine.high %v3032_v28, %v3036_v29  ;;  %v3068_v23 = vld [vmem:[#allocation8 + $0x1b60] sm:$0xff]  ;;  %v3065_v24 = vld [vmem:[#allocation8 + $0x1b48] sm:$0xff] }
 0x37c   :  { %8918 = vmatprep.subr.bf16.mxu1 %v13954_v36  ;;  %v13994_v36 = vcombine.high %v3033_v44, %v3037_v14  ;;  %v3069_v26 = vld [vmem:[#allocation8 + $0x1b68] sm:$0xff] }
 0x37e   :  { %8591 = vmatpush1.bf16.msra.mxu0 %v13951_v46  ;;  %v13991_v46 = vcombine.low %v3032_v28, %v3036_v29  ;;  %v3072_v28 = vld [vmem:[#allocation8 + $0x1b80] sm:$0xff] }
 0x37f   :  { %8919 = vmatpush1.bf16.msra.mxu1 %v13953_v8  ;;  %8592 = vmatprep.subr.bf16.mxu0 %v13960_v37  ;;  %v13993_v8 = vcombine.low %v3033_v44, %v3037_v14  ;;  %v14000_v37 = vcombine.high %v3040_v52, %v3044_v41  ;;  %v3076_v29 = vld [vmem:[#allocation8 + $0x1ba0] sm:$0xff]  ;;  %v3073_v44 = vld [vmem:[#allocation8 + $0x1b88] sm:$0xff] }
 0x380   :  { %8920 = vmatprep.subr.bf16.mxu1 %v13962_v51  ;;  %v14002_v51 = vcombine.high %v3041_v25, %v3045_v43  ;;  %v3077_v14 = vld [vmem:[#allocation8 + $0x1ba8] sm:$0xff] }
 0x382   :  { %8593 = vmatpush1.bf16.msra.mxu0 %v13959_v2  ;;  %v13999_v2 = vcombine.low %v3040_v52, %v3044_v41  ;;  %v14032_v52 = vcombine.high %v3072_v28, %v3076_v29  ;;  %v14034_v41 = vcombine.high %v3073_v44, %v3077_v14 }
 0x383   :  { %8921 = vmatpush1.bf16.msra.mxu1 %v13961_v12  ;;  %8594 = vmatprep.subr.bf16.mxu0 %v13968_v3  ;;  %v14001_v12 = vcombine.low %v3041_v25, %v3045_v43  ;;  %v14008_v3 = vcombine.high %v3048_v54, %v3052_v58  ;;  %v3080_v25 = vld [vmem:[#allocation8 + $0x1bc0] sm:$0xff] }
 0x384   :  { %8922 = vmatprep.subr.bf16.mxu1 %v13970_v4  ;;  %v14010_v4 = vcombine.high %v3049_v60, %v3053_v0  ;;  %v3084_v43 = vld [vmem:[#allocation8 + $0x1be0] sm:$0xff] }
 0x386   :  { %8595 = vmatpush1.bf16.msra.mxu0 %v13967_v11  ;;  %v14007_v11 = vcombine.low %v3048_v54, %v3052_v58  ;;  %v14033_v58 = vcombine.low %v3073_v44, %v3077_v14  ;;  %v3109_v44 = vld [vmem:[#allocation8 + $0x1ca8] sm:$0xff] }
 0x387   :  { %8923 = vmatpush1.bf16.msra.mxu1 %v13969_v16  ;;  %8596 = vmatprep.subr.bf16.mxu0 %v13976_v17  ;;  %v14009_v16 = vcombine.low %v3049_v60, %v3053_v0  ;;  %v14016_v17 = vcombine.high %v3056_v5, %v3060_v7  ;;  %v14040_v60 = vcombine.high %v3080_v25, %v3084_v43 }
 0x388   :  { %8924 = vmatprep.subr.bf16.mxu1 %v13978_v19  ;;  %v14018_v19 = vcombine.high %v3057_v9, %v3061_v34 }
 0x38a   :  { %8597 = vmatpush1.bf16.msra.mxu0 %v13975_v27  ;;  %v14015_v27 = vcombine.low %v3056_v5, %v3060_v7  ;;  %v3093_v5 = vld [vmem:[#allocation8 + $0x1c28] sm:$0xff]  ;;  %v14039_v7 = vcombine.low %v3080_v25, %v3084_v43 }
 0x38b   :  { %8925 = vmatpush1.bf16.msra.mxu1 %v13977_v30  ;;  %8598 = vmatprep.subr.bf16.mxu0 %v13984_v50  ;;  %v14017_v30 = vcombine.low %v3057_v9, %v3061_v34  ;;  %v14024_v50 = vcombine.high %v3064_v21, %v3068_v23  ;;  %v3113_v25 = vld [vmem:[#allocation8 + $0x1cc8] sm:$0xff] }
 0x38c   :  { %8926 = vmatprep.subr.bf16.mxu1 %v13986_v61  ;;  %v14026_v61 = vcombine.high %v3065_v24, %v3069_v26  ;;  %v3117_v43 = vld [vmem:[#allocation8 + $0x1ce8] sm:$0xff] }
 0x38e   :  { %8599 = vmatpush1.bf16.msra.mxu0 %v13983_v40  ;;  %v14023_v40 = vcombine.low %v3064_v21, %v3068_v23  ;;  %v3097_v23 = vld [vmem:[#allocation8 + $0x1c48] sm:$0xff] }
 0x38f   :  { %8927 = vmatpush1.bf16.msra.mxu1 %v13985_v33  ;;  %8600 = vmatprep.subr.bf16.mxu0 %v13992_v35  ;;  %v16025_v33 = vld [vmem:[#allocation7 + $0x8] sm:$0xff] }
 0x390   :  { %8928 = vmatprep.subr.bf16.mxu1 %v13994_v36  ;;  %v523_v35 = vrot.slane %v16025_v33, %v15949_v48  ;;  %v14025_v36 = vcombine.low %v3065_v24, %v3069_v26  ;;  %v3101_v24 = vld [vmem:[#allocation8 + $0x1c68] sm:$0xff] }
 0x392   :  { %8601 = vmatpush1.bf16.msra.mxu0 %v13991_v46  ;;  %v535_v46 = vrot.slane %v16025_v33, %v15952_v56  ;;  %v2113_v54 = vadd.f32 %v15970_v47, %v523_v35 }
 0x393   :  { %8929 = vmatpush1.bf16.msra.mxu1 %v13993_v8  ;;  %8602 = vmatprep.subr.bf16.mxu0 %v14000_v37  ;;  %v3081_v8 = vld [vmem:[#allocation8 + $0x1bc8] sm:$0xff] }
 0x394   :  { %8930 = vmatprep.subr.bf16.mxu1 %v14002_v51  ;;  %v3085_v37 = vld [vmem:[#allocation8 + $0x1be8] sm:$0xff]  ;;  %v14031_v51 = vcombine.low %v3072_v28, %v3076_v29  ;;  %v2172_v9 = vmax.f32 %v2113_v54, 0.0  ;;  %v14058_v28 = vcombine.high %v3097_v23, %v3101_v24  ;;  %v3120_v54 = vld [vmem:[#allocation8 + $0x1d00] sm:$0xff] }
 0x395   :  { %v14042_v0 = vcombine.high %v3081_v8, %v3085_v37  ;;  %v14041_v34 = vcombine.low %v3081_v8, %v3085_v37  ;;  %v3105_v29 = vld [vmem:[#allocation8 + $0x1c88] sm:$0xff] }
 0x396   :  { %8603 = vmatpush1.bf16.msra.mxu0 %v13999_v2  ;;  %v3088_v2 = vld [vmem:[#allocation8 + $0x1c00] sm:$0xff]  ;;  %v16033_v26 = vpack.c.bf16 %v2172_v9, %v2172_v9  ;;  %v14065_v8 = vcombine.low %v3105_v29, %v3109_v44  ;;  %v3129_v9 = vld [vmem:[#allocation8 + $0x1d48] sm:$0xff] }
 0x397   :  { %8931 = vmatpush1.bf16.msra.mxu1 %v14001_v12  ;;  %8604 = vmatprep.subr.bf16.mxu0 %v14008_v3  ;;  %v3092_v12 = vld [vmem:[#allocation8 + $0x1c20] sm:$0xff]  ;;  %v2156_v3 = vadd.f32 %v15976_v20, %v535_v46 }
 0x398   :  { %8932 = vmatprep.subr.bf16.mxu1 %v14010_v4  ;;  %v3089_v4 = vld [vmem:[#allocation8 + $0x1c08] sm:$0xff]  ;;  %v14047_v21 = vcombine.low %v3088_v2, %v3092_v12 }
 0x399   :  { %v14050_v47 = vcombine.high %v3089_v4, %v3093_v5  ;;  %v14049_v20 = vcombine.low %v3089_v4, %v3093_v5  ;;  %v3128_v5 = vld [vmem:[#allocation8 + $0x1d40] sm:$0xff] }
 0x39a   :  { %8605 = vmatpush1.bf16.msra.mxu0 %v14007_v11  ;;  %v14048_v11 = vcombine.high %v3088_v2, %v3092_v12  ;;  %v14073_v12 = vcombine.low %v3113_v25, %v3117_v43 }
 0x39b   :  { %8933 = vmatpush1.bf16.msra.mxu1 %v14009_v16  ;;  %8606 = vmatprep.subr.bf16.mxu0 %v14016_v17  ;;  %v2175_v16 = vmax.f32 %v2156_v3, 0.0  ;;  %v3096_v17 = vld [vmem:[#allocation8 + $0x1c40] sm:$0xff] }
 0x39c   :  { %8934 = vmatprep.subr.bf16.mxu1 %v14018_v19  ;;  %v3100_v19 = vld [vmem:[#allocation8 + $0x1c60] sm:$0xff] }
 0x39d   :  { %v14055_v14 = vcombine.low %v3096_v17, %v3100_v19 }
 0x39e   :  { %8607 = vmatpush1.bf16.msra.mxu0 %v14015_v27  ;;  %v14056_v27 = vcombine.high %v3096_v17, %v3100_v19  ;;  %v3136_v19 = vld [vmem:[#allocation8 + $0x1d80] sm:$0xff] }
 0x39f   :  { %8935 = vmatpush1.bf16.msra.mxu1 %v14017_v30  ;;  %8608 = vmatprep.subr.bf16.mxu0 %v14024_v50  ;;  %v3104_v30 = vld [vmem:[#allocation8 + $0x1c80] sm:$0xff] }
 0x3a0   :  { %8936 = vmatprep.subr.bf16.mxu1 %v14026_v61  ;;  %v3108_v50 = vld [vmem:[#allocation8 + $0x1ca0] sm:$0xff]  ;;  %v16035_v61 = vpack.c.bf16 %v2175_v16, %v2175_v16 }
 0x3a1   :  { %v14064_v35 = vcombine.high %v3104_v30, %v3108_v50  ;;  %v14063_v46 = vcombine.low %v3104_v30, %v3108_v50 }
 0x3a2   :  { %8609 = vmatpush1.bf16.msra.mxu0 %v14023_v40  ;;  %v14057_v40 = vcombine.low %v3097_v23, %v3101_v24  ;;  %v3137_v23 = vld [vmem:[#allocation8 + $0x1d88] sm:$0xff] }
 0x3a3   :  { %8937 = vmatpush1.bf16.msra.mxu1 %v14025_v36  ;;  %8610 = vmatprep.subr.bf16.mxu0 %v14032_v52  ;;  %v14066_v36 = vcombine.high %v3105_v29, %v3109_v44  ;;  %v3112_v52 = vld [vmem:[#allocation8 + $0x1cc0] sm:$0xff]  ;;  %v3141_v24 = vld [vmem:[#allocation8 + $0x1da8] sm:$0xff] }
 0x3a4   :  { %8938 = vmatprep.subr.bf16.mxu1 %v14034_v41  ;;  %v3116_v41 = vld [vmem:[#allocation8 + $0x1ce0] sm:$0xff]  ;;  %v14098_v50 = vcombine.high %v3137_v23, %v3141_v24  ;;  %v3145_v44 = vld [vmem:[#allocation8 + $0x1dc8] sm:$0xff] }
 0x3a5   :  { %v14072_v37 = vcombine.high %v3112_v52, %v3116_v41  ;;  %v14071_v2 = vcombine.low %v3112_v52, %v3116_v41  ;;  %v3148_v29 = vld [vmem:[#allocation8 + $0x1de0] sm:$0xff] }
 0x3a6   :  { %8611 = vmatpush1.bf16.msra.mxu0 %v14031_v51  ;;  %v14074_v51 = vcombine.high %v3113_v25, %v3117_v43  ;;  %v3152_v41 = vld [vmem:[#allocation8 + $0x1e00] sm:$0xff]  ;;  %v3153_v43 = vld [vmem:[#allocation8 + $0x1e08] sm:$0xff] }
 0x3a7   :  { %8939 = vmatpush1.bf16.msra.mxu1 %v14033_v58  ;;  %8612 = vmatprep.subr.bf16.mxu0 %v14040_v60  ;;  %v3124_v58 = vld [vmem:[#allocation8 + $0x1d20] sm:$0xff]  ;;  %v3121_v60 = vld [vmem:[#allocation8 + $0x1d08] sm:$0xff] }
 0x3a8   :  { %8940 = vmatprep.subr.bf16.mxu1 %v14042_v0  ;;  %v3125_v0 = vld [vmem:[#allocation8 + $0x1d28] sm:$0xff]  ;;  %v14080_v3 = vcombine.high %v3120_v54, %v3124_v58  ;;  %v3156_v25 = vld [vmem:[#allocation8 + $0x1e20] sm:$0xff] }
 0x3a9   :  { %v14082_v4 = vcombine.high %v3121_v60, %v3125_v0 }
 0x3aa   :  { %8613 = vmatpush1.bf16.msra.mxu0 %v14039_v7  ;;  %v3132_v7 = vld [vmem:[#allocation8 + $0x1d60] sm:$0xff] }
 0x3ab   :  { %8941 = vmatpush1.bf16.msra.mxu1 %v14041_v34  ;;  %8623 = vmatprep.subr.bf16.mxu0 %v14048_v11  ;;  %v3133_v34 = vld [vmem:[#allocation8 + $0x1d68] sm:$0xff]  ;;  %v14079_v11 = vcombine.low %v3120_v54, %v3124_v58  ;;  %v14088_v16 = vcombine.high %v3128_v5, %v3132_v7  ;;  %v3160_v58 = vld [vmem:[#allocation8 + $0x1e40] sm:$0xff] }
 0x3ac   :  { %8951 = vmatprep.subr.bf16.mxu1 %v14050_v47  ;;  %v14081_v47 = vcombine.low %v3121_v60, %v3125_v0  ;;  %v14090_v17 = vcombine.high %v3129_v9, %v3133_v34  ;;  %v3164_v60 = vld [vmem:[#allocation8 + $0x1e60] sm:$0xff]  ;;  %v3161_v0 = vld [vmem:[#allocation8 + $0x1e48] sm:$0xff] }
 0x3ad   :  { %8615 = vmatmul.mubr.bf16.vlgmr.msra.gmra.mrb[16].mxu0 %v16033_v26 }
 0x3ae   :  { %8943 = vmatmul.mubr.bf16.vlgmr.msra.gmra.mrb[16].mxu1 %v16033_v26  ;;  %8624 = vmatpush1.bf16.msra.mxu0 %v14047_v21  ;;  %v3140_v21 = vld [vmem:[#allocation8 + $0x1da0] sm:$0xff] }
 0x3af   :  { %8655 = vmatprep.mubr.bf16.mxu0 %v16035_v61  ;;  %8952 = vmatpush1.bf16.msra.mxu1 %v14049_v20  ;;  %v14087_v20 = vcombine.low %v3128_v5, %v3132_v7  ;;  %v14096_v30 = vcombine.high %v3136_v19, %v3140_v21  ;;  %v3168_v7 = vld [vmem:[#allocation8 + $0x1e80] sm:$0xff] }
 0x3b0   :  { %8983 = vmatprep.mubr.bf16.mxu1 %v16035_v61  ;;  %8625 = vmatprep.subr.bf16.mxu0 %v14056_v27  ;;  %v14089_v27 = vcombine.low %v3129_v9, %v3133_v34  ;;  %v3172_v9 = vld [vmem:[#allocation8 + $0x1ea0] sm:$0xff]  ;;  %v3169_v34 = vld [vmem:[#allocation8 + $0x1e88] sm:$0xff] }
 0x3b1   :  { %8953 = vmatprep.subr.bf16.mxu1 %v14058_v28  ;;  %v3144_v28 = vld [vmem:[#allocation8 + $0x1dc0] sm:$0xff] }
 0x3b2   :  { %8626 = vmatpush1.bf16.msra.mxu0 %v14055_v14  ;;  %v3149_v14 = vld [vmem:[#allocation8 + $0x1de8] sm:$0xff] }
 0x3b3   :  { %8954 = vmatpush1.bf16.msra.mxu1 %v14057_v40  ;;  %8627 = vmatprep.subr.bf16.mxu0 %v14064_v35  ;;  %v14095_v40 = vcombine.low %v3136_v19, %v3140_v21  ;;  %v14097_v35 = vcombine.low %v3137_v23, %v3141_v24  ;;  %v14106_v52 = vcombine.high %v3145_v44, %v3149_v14  ;;  %v3176_v21 = vld [vmem:[#allocation8 + $0x1ec0] sm:$0xff]  ;;  %v3177_v24 = vld [vmem:[#allocation8 + $0x1ec8] sm:$0xff] }
 0x3b4   :  { %8955 = vmatprep.subr.bf16.mxu1 %v14066_v36  ;;  %v14104_v36 = vcombine.high %v3144_v28, %v3148_v29  ;;  %v3180_v23 = vld [vmem:[#allocation8 + $0x1ee0] sm:$0xff] }
 0x3b6   :  { %8628 = vmatpush1.bf16.msra.mxu0 %v14063_v46  ;;  %v3157_v46 = vld [vmem:[#allocation8 + $0x1e28] sm:$0xff] }
 0x3b7   :  { %8956 = vmatpush1.bf16.msra.mxu1 %v14065_v8  ;;  %8629 = vmatprep.subr.bf16.mxu0 %v14072_v37  ;;  %v14103_v8 = vcombine.low %v3144_v28, %v3148_v29  ;;  %v14105_v37 = vcombine.low %v3145_v44, %v3149_v14  ;;  %v14114_v54 = vcombine.high %v3153_v43, %v3157_v46  ;;  %v3184_v29 = vld [vmem:[#allocation8 + $0x1f00] sm:$0xff]  ;;  %v3185_v14 = vld [vmem:[#allocation8 + $0x1f08] sm:$0xff] }
 0x3b8   :  { %8957 = vmatprep.subr.bf16.mxu1 %v14074_v51  ;;  %v14112_v51 = vcombine.high %v3152_v41, %v3156_v25  ;;  %v3188_v44 = vld [vmem:[#allocation8 + $0x1f20] sm:$0xff] }
 0x3ba   :  { %8630 = vmatpush1.bf16.msra.mxu0 %v14071_v2  ;;  %v3165_v2 = vld [vmem:[#allocation8 + $0x1e68] sm:$0xff] }
 0x3bb   :  { %8958 = vmatpush1.bf16.msra.mxu1 %v14073_v12  ;;  %8631 = vmatprep.subr.bf16.mxu0 %v14080_v3  ;;  %v14111_v12 = vcombine.low %v3152_v41, %v3156_v25  ;;  %v14113_v3 = vcombine.low %v3153_v43, %v3157_v46  ;;  %v14122_v5 = vcombine.high %v3161_v0, %v3165_v2  ;;  %v3192_v25 = vld [vmem:[#allocation8 + $0x1f40] sm:$0xff]  ;;  %v3193_v46 = vld [vmem:[#allocation8 + $0x1f48] sm:$0xff] }
 0x3bc   :  { %8959 = vmatprep.subr.bf16.mxu1 %v14082_v4  ;;  %v14120_v4 = vcombine.high %v3160_v58, %v3164_v60  ;;  %v3196_v43 = vld [vmem:[#allocation8 + $0x1f60] sm:$0xff] }
 0x3be   :  { %8632 = vmatpush1.bf16.msra.mxu0 %v14079_v11  ;;  %v3173_v11 = vld [vmem:[#allocation8 + $0x1ea8] sm:$0xff] }
 0x3bf   :  { %8960 = vmatpush1.bf16.msra.mxu1 %v14081_v47  ;;  %8633 = vmatprep.subr.bf16.mxu0 %v14088_v16  ;;  %v14119_v47 = vcombine.low %v3160_v58, %v3164_v60  ;;  %v14121_v16 = vcombine.low %v3161_v0, %v3165_v2  ;;  %v14130_v19 = vcombine.high %v3169_v34, %v3173_v11  ;;  %v3200_v60 = vld [vmem:[#allocation8 + $0x1f80] sm:$0xff]  ;;  %v3201_v2 = vld [vmem:[#allocation8 + $0x1f88] sm:$0xff] }
 0x3c0   :  { %8961 = vmatprep.subr.bf16.mxu1 %v14090_v17  ;;  %v14128_v17 = vcombine.high %v3168_v7, %v3172_v9  ;;  %v3204_v0 = vld [vmem:[#allocation8 + $0x1fa0] sm:$0xff] }
 0x3c2   :  { %8634 = vmatpush1.bf16.msra.mxu0 %v14087_v20  ;;  %v3181_v20 = vld [vmem:[#allocation8 + $0x1ee8] sm:$0xff] }
 0x3c3   :  { %8962 = vmatpush1.bf16.msra.mxu1 %v14089_v27  ;;  %8635 = vmatprep.subr.bf16.mxu0 %v14096_v30  ;;  %v14127_v27 = vcombine.low %v3168_v7, %v3172_v9  ;;  %v14129_v30 = vcombine.low %v3169_v34, %v3173_v11  ;;  %v14138_v28 = vcombine.high %v3177_v24, %v3181_v20  ;;  %v3208_v34 = vld [vmem:[#allocation8 + $0x1fc0] sm:$0xff] }
 0x3c4   :  { %8963 = vmatprep.subr.bf16.mxu1 %v14098_v50  ;;  %v14136_v50 = vcombine.high %v3176_v21, %v3180_v23  ;;  %v14160_v7 = vcombine.high %v3200_v60, %v3204_v0  ;;  %v3212_v11 = vld [vmem:[#allocation8 + $0x1fe0] sm:$0xff] }
 0x3c6   :  { %8636 = vmatpush1.bf16.msra.mxu0 %v14095_v40  ;;  %v3189_v40 = vld [vmem:[#allocation8 + $0x1f28] sm:$0xff] }
 0x3c7   :  { %8964 = vmatpush1.bf16.msra.mxu1 %v14097_v35  ;;  %8637 = vmatprep.subr.bf16.mxu0 %v14104_v36  ;;  %v14135_v35 = vcombine.low %v3176_v21, %v3180_v23  ;;  %v14137_v36 = vcombine.low %v3177_v24, %v3181_v20  ;;  %v14146_v41 = vcombine.high %v3185_v14, %v3189_v40  ;;  %v2194_v24 = vld [vmem:[#allocation8 + $0x10] sm:$0xff] }
 0x3c8   :  { %8965 = vmatprep.subr.bf16.mxu1 %v14106_v52  ;;  %v14144_v52 = vcombine.high %v3184_v29, %v3188_v44  ;;  %v14168_v23 = vcombine.high %v3208_v34, %v3212_v11  ;;  %v2198_v20 = vld [vmem:[#allocation8 + $0x30] sm:$0xff] }
 0x3ca   :  { %8638 = vmatpush1.bf16.msra.mxu0 %v14103_v8  ;;  %v3197_v8 = vld [vmem:[#allocation8 + $0x1f68] sm:$0xff] }
 0x3cb   :  { %8966 = vmatpush1.bf16.msra.mxu1 %v14105_v37  ;;  %8639 = vmatprep.subr.bf16.mxu0 %v14112_v51  ;;  %v14143_v37 = vcombine.low %v3184_v29, %v3188_v44  ;;  %v14145_v51 = vcombine.low %v3185_v14, %v3189_v40  ;;  %v14154_v58 = vcombine.high %v3193_v46, %v3197_v8  ;;  %v2206_v40 = vld [vmem:[#allocation8 + $0x70] sm:$0xff] }
 0x3cc   :  { %8967 = vmatprep.subr.bf16.mxu1 %v14114_v54  ;;  %v14152_v54 = vcombine.high %v3192_v25, %v3196_v43  ;;  %v13156_v44 = vcombine.high %v2194_v24, %v2198_v20 }
 0x3ce   :  { %8640 = vmatpush1.bf16.msra.mxu0 %v14111_v12  ;;  %v3205_v12 = vld [vmem:[#allocation8 + $0x1fa8] sm:$0xff] }
 0x3cf   :  { %8968 = vmatpush1.bf16.msra.mxu1 %v14113_v3  ;;  %8641 = vmatprep.subr.bf16.mxu0 %v14120_v4  ;;  %v14151_v3 = vcombine.low %v3192_v25, %v3196_v43  ;;  %v531_v4 = vrot.slane %v16025_v33, %v15979_v13  ;;  %v14162_v9 = vcombine.high %v3201_v2, %v3205_v12 }
 0x3d0   :  { %8969 = vmatprep.subr.bf16.mxu1 %v14122_v5  ;;  %v14153_v5 = vcombine.low %v3193_v46, %v3197_v8  ;;  %v14161_v21 = vcombine.low %v3201_v2, %v3205_v12  ;;  %v2210_v46 = vld [vmem:[#allocation8 + $0x90] sm:$0xff] }
 0x3d1   :  { %v2214_v8 = vld [vmem:[#allocation8 + $0xb0] sm:$0xff] }
 0x3d2   :  { %8642 = vmatpush1.bf16.msra.mxu0 %v14119_v47  ;;  %v3209_v47 = vld [vmem:[#allocation8 + $0x1fc8] sm:$0xff]  ;;  %v2218_v12 = vld [vmem:[#allocation8 + $0xd0] sm:$0xff] }
 0x3d3   :  { %8970 = vmatpush1.bf16.msra.mxu1 %v14121_v16  ;;  %8643 = vmatprep.subr.bf16.mxu0 %v14128_v17  ;;  %v3213_v16 = vld [vmem:[#allocation8 + $0x1fe8] sm:$0xff]  ;;  %v14159_v17 = vcombine.low %v3200_v60, %v3204_v0  ;;  %v13172_v0 = vcombine.high %v2210_v46, %v2214_v8 }
 0x3d4   :  { %8971 = vmatprep.subr.bf16.mxu1 %v14130_v19  ;;  %v2154_v19 = vadd.f32 %v15974_v57, %v531_v4  ;;  %v14170_v33 = vcombine.high %v3209_v47, %v3213_v16  ;;  %v14169_v29 = vcombine.low %v3209_v47, %v3213_v16  ;;  %v2202_v57 = vld [vmem:[#allocation8 + $0x50] sm:$0xff]  ;;  %v2219_v4 = vld [vmem:[#allocation8 + $0xd8] sm:$0xff] }
 0x3d5   :  { %v13164_v43 = vcombine.high %v2202_v57, %v2206_v40  ;;  %v2226_v47 = vld [vmem:[#allocation8 + $0x110] sm:$0xff] }
 0x3d6   :  { %8644 = vmatpush1.bf16.msra.mxu0 %v14127_v27  ;;  %v2195_v27 = vld [vmem:[#allocation8 + $0x18] sm:$0xff]  ;;  %v2230_v16 = vld [vmem:[#allocation8 + $0x130] sm:$0xff] }
 0x3d7   :  { %8972 = vmatpush1.bf16.msra.mxu1 %v14129_v30  ;;  %8645 = vmatprep.subr.bf16.mxu0 %v14136_v50  ;;  %v2199_v30 = vld [vmem:[#allocation8 + $0x38] sm:$0xff]  ;;  %v14167_v50 = vcombine.low %v3208_v34, %v3212_v11 }
 0x3d8   :  { %8973 = vmatprep.subr.bf16.mxu1 %v14138_v28  ;;  %v2174_v28 = vmax.f32 %v2154_v19, 0.0  ;;  %v13158_v14 = vcombine.high %v2195_v27, %v2199_v30  ;;  %v13157_v25 = vcombine.low %v2195_v27, %v2199_v30  ;;  %v2231_v19 = vld [vmem:[#allocation8 + $0x138] sm:$0xff] }
 0x3d9   :  { %v2235_v27 = vld [vmem:[#allocation8 + $0x158] sm:$0xff] }
 0x3da   :  { %8646 = vmatpush1.bf16.msra.mxu0 %v14135_v35  ;;  %v13155_v35 = vcombine.low %v2194_v24, %v2198_v20  ;;  %v2234_v24 = vld [vmem:[#allocation8 + $0x150] sm:$0xff]  ;;  %v2239_v30 = vld [vmem:[#allocation8 + $0x178] sm:$0xff] }
 0x3db   :  { %8974 = vmatpush1.bf16.msra.mxu1 %v14137_v36  ;;  %8647 = vmatprep.subr.bf16.mxu0 %v14144_v52  ;;  %v2203_v36 = vld [vmem:[#allocation8 + $0x58] sm:$0xff]  ;;  %v2238_v20 = vld [vmem:[#allocation8 + $0x170] sm:$0xff] }
 0x3dc   :  { %8975 = vmatprep.subr.bf16.mxu1 %v14146_v41  ;;  %v2207_v52 = vld [vmem:[#allocation8 + $0x78] sm:$0xff]  ;;  %v16044_v41 = vpack.c.bf16 %v2174_v28, %v2174_v28 }
 0x3dd   :  { %v13165_v60 = vcombine.low %v2203_v36, %v2207_v52 }
 0x3de   :  { %8648 = vmatpush1.bf16.msra.mxu0 %v14143_v37  ;;  %v13166_v37 = vcombine.high %v2203_v36, %v2207_v52  ;;  %v13195_v36 = vcombine.low %v2234_v24, %v2238_v20  ;;  %v13197_v52 = vcombine.low %v2235_v27, %v2239_v30 }
 0x3df   :  { %8976 = vmatpush1.bf16.msra.mxu1 %v14145_v51  ;;  %8649 = vmatprep.subr.bf16.mxu0 %v14152_v54  ;;  %v2211_v51 = vld [vmem:[#allocation8 + $0x98] sm:$0xff] }
 0x3e0   :  { %8977 = vmatprep.subr.bf16.mxu1 %v14154_v58  ;;  %v2215_v54 = vld [vmem:[#allocation8 + $0xb8] sm:$0xff]  ;;  %v13163_v58 = vcombine.low %v2202_v57, %v2206_v40  ;;  %v2246_v57 = vld [vmem:[#allocation8 + $0x1b0] sm:$0xff] }
 0x3e1   :  { %v13174_v2 = vcombine.high %v2211_v51, %v2215_v54  ;;  %v2243_v40 = vld [vmem:[#allocation8 + $0x198] sm:$0xff] }
 0x3e2   :  { %8650 = vmatpush1.bf16.msra.mxu0 %v14151_v3  ;;  %v2222_v3 = vld [vmem:[#allocation8 + $0xf0] sm:$0xff] }
 0x3e3   :  { %8978 = vmatpush1.bf16.msra.mxu1 %v14153_v5  ;;  %8651 = vmatprep.subr.bf16.mxu0 %v14160_v7  ;;  %v2223_v5 = vld [vmem:[#allocation8 + $0xf8] sm:$0xff]  ;;  %v13171_v7 = vcombine.low %v2210_v46, %v2214_v8  ;;  %v13180_v34 = vcombine.high %v2218_v12, %v2222_v3  ;;  %v2250_v46 = vld [vmem:[#allocation8 + $0x1d0] sm:$0xff] }
 0x3e4   :  { %8979 = vmatprep.subr.bf16.mxu1 %v14162_v9  ;;  %v13173_v9 = vcombine.low %v2211_v51, %v2215_v54  ;;  %v13182_v11 = vcombine.high %v2219_v4, %v2223_v5  ;;  %v2254_v8 = vld [vmem:[#allocation8 + $0x1f0] sm:$0xff]  ;;  %v2255_v51 = vld [vmem:[#allocation8 + $0x1f8] sm:$0xff] }
 0x3e6   :  { %8652 = vmatpush1.bf16.msra.mxu0 %v14159_v17  ;;  %v2227_v17 = vld [vmem:[#allocation8 + $0x118] sm:$0xff] }
 0x3e7   :  { %8980 = vmatpush1.bf16.msra.mxu1 %v14161_v21  ;;  %8653 = vmatprep.subr.bf16.mxu0 %v14168_v23  ;;  %v13181_v21 = vcombine.low %v2219_v4, %v2223_v5  ;;  %v13188_v23 = vcombine.high %v2226_v47, %v2230_v16  ;;  %v13189_v28 = vcombine.low %v2227_v17, %v2231_v19  ;;  %v2263_v4 = vld [vmem:[#allocation8 + $0x238] sm:$0xff] }
 0x3e8   :  { %8981 = vmatprep.subr.bf16.mxu1 %v14170_v33  ;;  %v13190_v33 = vcombine.high %v2227_v17, %v2231_v19  ;;  %v13211_v5 = vcombine.low %v2250_v46, %v2254_v8  ;;  %v2271_v17 = vld [vmem:[#allocation8 + $0x278] sm:$0xff] }
 0x3ea   :  { %8654 = vmatpush1.bf16.msra.mxu0 %v14167_v50  ;;  %v13187_v50 = vcombine.low %v2226_v47, %v2230_v16  ;;  %v2270_v47 = vld [vmem:[#allocation8 + $0x270] sm:$0xff]  ;;  %v2267_v16 = vld [vmem:[#allocation8 + $0x258] sm:$0xff] }
 0x3eb   :  { %8982 = vmatpush1.bf16.msra.mxu1 %v14169_v29  ;;  %8992 = vmatprep.subr.bf16.mxu0 %v13156_v44  ;;  %v13196_v29 = vcombine.high %v2234_v24, %v2238_v20  ;;  %v13198_v44 = vcombine.high %v2235_v27, %v2239_v30  ;;  %v2278_v24 = vld [vmem:[#allocation8 + $0x2b0] sm:$0xff]  ;;  %v2275_v20 = vld [vmem:[#allocation8 + $0x298] sm:$0xff] }
 0x3ec   :  { %9320 = vmatprep.subr.bf16.mxu1 %v13158_v14  ;;  %v2242_v14 = vld [vmem:[#allocation8 + $0x190] sm:$0xff]  ;;  %v2279_v27 = vld [vmem:[#allocation8 + $0x2b8] sm:$0xff] }
 0x3ed   :  { %8656 = vmatmul.mubr.bf16.vlgmr.msra.gmra.mrb[16].mxu0 %v16044_v41  ;;  %v13203_v54 = vcombine.low %v2242_v14, %v2246_v57 }
 0x3ee   :  { %8984 = vmatmul.mubr.bf16.vlgmr.msra.gmra.mrb[16].mxu1 %v16044_v41  ;;  %8993 = vmatpush1.bf16.msra.mxu0 %v13155_v35  ;;  %v2247_v35 = vld [vmem:[#allocation8 + $0x1b8] sm:$0xff] }
 0x3ef   :  { %9024 = vmatprep.mubr.bf16.mxu0 %v15888_v32  ;;  %9321 = vmatpush1.bf16.msra.mxu1 %v13157_v25  ;;  %v13204_v25 = vcombine.high %v2242_v14, %v2246_v57  ;;  %v2286_v14 = vld [vmem:[#allocation8 + $0x2f0] sm:$0xff]  ;;  %v2283_v57 = vld [vmem:[#allocation8 + $0x2d8] sm:$0xff] }
 0x3f0   :  { %9352 = vmatprep.mubr.bf16.mxu1 %v15888_v32  ;;  %8994 = vmatprep.subr.bf16.mxu0 %v13164_v43  ;;  %v13179_v32 = vcombine.low %v2218_v12, %v2222_v3  ;;  %v13206_v43 = vcombine.high %v2243_v40, %v2247_v35  ;;  %v2262_v12 = vld [vmem:[#allocation8 + $0x230] sm:$0xff]  ;;  %v2259_v3 = vld [vmem:[#allocation8 + $0x218] sm:$0xff] }
 0x3f1   :  { %9322 = vmatprep.subr.bf16.mxu1 %v13166_v37  ;;  %v2251_v37 = vld [vmem:[#allocation8 + $0x1d8] sm:$0xff] }
 0x3f2   :  { %8995 = vmatpush1.bf16.msra.mxu0 %v13163_v58  ;;  %v13205_v58 = vcombine.low %v2243_v40, %v2247_v35  ;;  %v2287_v40 = vld [vmem:[#allocation8 + $0x2f8] sm:$0xff] }
 0x3f3   :  { %9323 = vmatpush1.bf16.msra.mxu1 %v13165_v60  ;;  %8996 = vmatprep.subr.bf16.mxu0 %v13172_v0  ;;  %v13212_v60 = vcombine.high %v2250_v46, %v2254_v8  ;;  %v13214_v0 = vcombine.high %v2251_v37, %v2255_v51  ;;  %v2294_v46 = vld [vmem:[#allocation8 + $0x330] sm:$0xff]  ;;  %v2291_v8 = vld [vmem:[#allocation8 + $0x318] sm:$0xff] }
 0x3f4   :  { %9324 = vmatprep.subr.bf16.mxu1 %v13174_v2  ;;  %v2258_v2 = vld [vmem:[#allocation8 + $0x210] sm:$0xff] }
 0x3f5   :  { %v13219_v19 = vcombine.low %v2258_v2, %v2262_v12 }
 0x3f6   :  { %8997 = vmatpush1.bf16.msra.mxu0 %v13171_v7  ;;  %v13213_v7 = vcombine.low %v2251_v37, %v2255_v51  ;;  %v2295_v37 = vld [vmem:[#allocation8 + $0x338] sm:$0xff] }
 0x3f7   :  { %9325 = vmatpush1.bf16.msra.mxu1 %v13173_v9  ;;  %8998 = vmatprep.subr.bf16.mxu0 %v13180_v34  ;;  %v13220_v9 = vcombine.high %v2258_v2, %v2262_v12  ;;  %v13222_v34 = vcombine.high %v2259_v3, %v2263_v4  ;;  %v2302_v2 = vld [vmem:[#allocation8 + $0x370] sm:$0xff]  ;;  %v2299_v12 = vld [vmem:[#allocation8 + $0x358] sm:$0xff] }
 0x3f8   :  { %9326 = vmatprep.subr.bf16.mxu1 %v13182_v11  ;;  %v2266_v11 = vld [vmem:[#allocation8 + $0x250] sm:$0xff] }
 0x3f9   :  { %v13227_v30 = vcombine.low %v2266_v11, %v2270_v47 }
 0x3fa   :  { %8999 = vmatpush1.bf16.msra.mxu0 %v13179_v32  ;;  %v13221_v32 = vcombine.low %v2259_v3, %v2263_v4  ;;  %v2303_v3 = vld [vmem:[#allocation8 + $0x378] sm:$0xff] }
 0x3fb   :  { %9327 = vmatpush1.bf16.msra.mxu1 %v13181_v21  ;;  %9000 = vmatprep.subr.bf16.mxu0 %v13188_v23  ;;  %v13228_v21 = vcombine.high %v2266_v11, %v2270_v47  ;;  %v13230_v23 = vcombine.high %v2267_v16, %v2271_v17  ;;  %v2310_v11 = vld [vmem:[#allocation8 + $0x3b0] sm:$0xff]  ;;  %v2307_v47 = vld [vmem:[#allocation8 + $0x398] sm:$0xff] }
 0x3fc   :  { %9328 = vmatprep.subr.bf16.mxu1 %v13190_v33  ;;  %v2274_v33 = vld [vmem:[#allocation8 + $0x290] sm:$0xff] }
 0x3fd   :  { %v13235_v35 = vcombine.low %v2274_v33, %v2278_v24 }
 0x3fe   :  { %9001 = vmatpush1.bf16.msra.mxu0 %v13187_v50  ;;  %v13229_v50 = vcombine.low %v2267_v16, %v2271_v17  ;;  %v2311_v16 = vld [vmem:[#allocation8 + $0x3b8] sm:$0xff] }
 0x3ff   :  { %9329 = vmatpush1.bf16.msra.mxu1 %v13189_v28  ;;  %9002 = vmatprep.subr.bf16.mxu0 %v13196_v29  ;;  %v13236_v28 = vcombine.high %v2274_v33, %v2278_v24  ;;  %v13238_v29 = vcombine.high %v2275_v20, %v2279_v27  ;;  %v2318_v33 = vld [vmem:[#allocation8 + $0x3f0] sm:$0xff]  ;;  %v2315_v24 = vld [vmem:[#allocation8 + $0x3d8] sm:$0xff] }
 0x400   :  { %9330 = vmatprep.subr.bf16.mxu1 %v13198_v44  ;;  %v2282_v44 = vld [vmem:[#allocation8 + $0x2d0] sm:$0xff] }
 0x401   :  { %v13243_v51 = vcombine.low %v2282_v44, %v2286_v14 }
 0x402   :  { %9003 = vmatpush1.bf16.msra.mxu0 %v13195_v36  ;;  %v13237_v36 = vcombine.low %v2275_v20, %v2279_v27  ;;  %v2319_v20 = vld [vmem:[#allocation8 + $0x3f8] sm:$0xff] }
 0x403   :  { %9331 = vmatpush1.bf16.msra.mxu1 %v13197_v52  ;;  %9004 = vmatprep.subr.bf16.mxu0 %v13204_v25  ;;  %v13244_v52 = vcombine.high %v2282_v44, %v2286_v14  ;;  %v13246_v25 = vcombine.high %v2283_v57, %v2287_v40  ;;  %v2326_v44 = vld [vmem:[#allocation8 + $0x430] sm:$0xff]  ;;  %v2323_v14 = vld [vmem:[#allocation8 + $0x418] sm:$0xff] }
 0x404   :  { %9332 = vmatprep.subr.bf16.mxu1 %v13206_v43  ;;  %v2290_v43 = vld [vmem:[#allocation8 + $0x310] sm:$0xff] }
 0x405   :  { %v13251_v4 = vcombine.low %v2290_v43, %v2294_v46 }
 0x406   :  { %9005 = vmatpush1.bf16.msra.mxu0 %v13203_v54  ;;  %v13245_v54 = vcombine.low %v2283_v57, %v2287_v40  ;;  %v2327_v57 = vld [vmem:[#allocation8 + $0x438] sm:$0xff] }
 0x407   :  { %9333 = vmatpush1.bf16.msra.mxu1 %v13205_v58  ;;  %9006 = vmatprep.subr.bf16.mxu0 %v13212_v60  ;;  %v13252_v58 = vcombine.high %v2290_v43, %v2294_v46  ;;  %v13254_v60 = vcombine.high %v2291_v8, %v2295_v37  ;;  %v2334_v43 = vld [vmem:[#allocation8 + $0x470] sm:$0xff] }
 0x408   :  { %9334 = vmatprep.subr.bf16.mxu1 %v13214_v0  ;;  %v2298_v0 = vld [vmem:[#allocation8 + $0x350] sm:$0xff] }
 0x409   :  { %v13259_v17 = vcombine.low %v2298_v0, %v2302_v2 }
 0x40a   :  { %9007 = vmatpush1.bf16.msra.mxu0 %v13211_v5  ;;  %v13253_v5 = vcombine.low %v2291_v8, %v2295_v37  ;;  %v2331_v8 = vld [vmem:[#allocation8 + $0x458] sm:$0xff] }
 0x40b   :  { %9335 = vmatpush1.bf16.msra.mxu1 %v13213_v7  ;;  %9008 = vmatprep.subr.bf16.mxu0 %v13220_v9  ;;  %v13260_v7 = vcombine.high %v2298_v0, %v2302_v2  ;;  %v13262_v9 = vcombine.high %v2299_v12, %v2303_v3  ;;  %v2335_v37 = vld [vmem:[#allocation8 + $0x478] sm:$0xff] }
 0x40c   :  { %9336 = vmatprep.subr.bf16.mxu1 %v13222_v34  ;;  %v2306_v34 = vld [vmem:[#allocation8 + $0x390] sm:$0xff]  ;;  %v13294_v0 = vcombine.high %v2331_v8, %v2335_v37  ;;  %v2339_v2 = vld [vmem:[#allocation8 + $0x498] sm:$0xff] }
 0x40d   :  { %v13267_v27 = vcombine.low %v2306_v34, %v2310_v11 }
 0x40e   :  { %9009 = vmatpush1.bf16.msra.mxu0 %v13219_v19  ;;  %v13261_v19 = vcombine.low %v2299_v12, %v2303_v3  ;;  %v2343_v12 = vld [vmem:[#allocation8 + $0x4b8] sm:$0xff] }
 0x40f   :  { %9337 = vmatpush1.bf16.msra.mxu1 %v13221_v32  ;;  %9010 = vmatprep.subr.bf16.mxu0 %v13228_v21  ;;  %v13268_v32 = vcombine.high %v2306_v34, %v2310_v11  ;;  %v13270_v21 = vcombine.high %v2307_v47, %v2311_v16  ;;  %v2350_v34 = vld [vmem:[#allocation8 + $0x4f0] sm:$0xff]  ;;  %v2347_v11 = vld [vmem:[#allocation8 + $0x4d8] sm:$0xff] }
 0x410   :  { %9338 = vmatprep.subr.bf16.mxu1 %v13230_v23  ;;  %v2314_v23 = vld [vmem:[#allocation8 + $0x3d0] sm:$0xff] }
 0x411   :  { %v13275_v40 = vcombine.low %v2314_v23, %v2318_v33 }
 0x412   :  { %9011 = vmatpush1.bf16.msra.mxu0 %v13227_v30  ;;  %v13269_v30 = vcombine.low %v2307_v47, %v2311_v16  ;;  %v2351_v47 = vld [vmem:[#allocation8 + $0x4f8] sm:$0xff] }
 0x413   :  { %9339 = vmatpush1.bf16.msra.mxu1 %v13229_v50  ;;  %9012 = vmatprep.subr.bf16.mxu0 %v13236_v28  ;;  %v13276_v50 = vcombine.high %v2314_v23, %v2318_v33  ;;  %v13278_v28 = vcombine.high %v2315_v24, %v2319_v20  ;;  %v2355_v23 = vld [vmem:[#allocation8 + $0x518] sm:$0xff] }
 0x414   :  { %9340 = vmatprep.subr.bf16.mxu1 %v13238_v29  ;;  %v2322_v29 = vld [vmem:[#allocation8 + $0x410] sm:$0xff]  ;;  %v2359_v33 = vld [vmem:[#allocation8 + $0x538] sm:$0xff] }
 0x415   :  { %v13283_v46 = vcombine.low %v2322_v29, %v2326_v44 }
 0x416   :  { %9013 = vmatpush1.bf16.msra.mxu0 %v13235_v35  ;;  %v13277_v35 = vcombine.low %v2315_v24, %v2319_v20  ;;  %v13309_v24 = vcombine.low %v2347_v11, %v2351_v47 }
 0x417   :  { %9341 = vmatpush1.bf16.msra.mxu1 %v13237_v36  ;;  %9014 = vmatprep.subr.bf16.mxu0 %v13244_v52  ;;  %v13284_v36 = vcombine.high %v2322_v29, %v2326_v44  ;;  %v13286_v52 = vcombine.high %v2323_v14, %v2327_v57  ;;  %v2367_v29 = vld [vmem:[#allocation8 + $0x578] sm:$0xff] }
 0x418   :  { %9342 = vmatprep.subr.bf16.mxu1 %v13246_v25  ;;  %v2330_v25 = vld [vmem:[#allocation8 + $0x450] sm:$0xff] }
 0x419   :  { %v13291_v3 = vcombine.low %v2330_v25, %v2334_v43 }
 0x41a   :  { %9015 = vmatpush1.bf16.msra.mxu0 %v13243_v51  ;;  %v13285_v51 = vcombine.low %v2323_v14, %v2327_v57  ;;  %v13317_v14 = vcombine.low %v2355_v23, %v2359_v33 }
 0x41b   :  { %9343 = vmatpush1.bf16.msra.mxu1 %v13245_v54  ;;  %9016 = vmatprep.subr.bf16.mxu0 %v13252_v58  ;;  %v13292_v54 = vcombine.high %v2330_v25, %v2334_v43  ;;  %v2338_v58 = vld [vmem:[#allocation8 + $0x490] sm:$0xff]  ;;  %v2375_v25 = vld [vmem:[#allocation8 + $0x5b8] sm:$0xff] }
 0x41c   :  { %9344 = vmatprep.subr.bf16.mxu1 %v13254_v60  ;;  %v2342_v60 = vld [vmem:[#allocation8 + $0x4b0] sm:$0xff] }
 0x41d   :  { %v13299_v16 = vcombine.low %v2338_v58, %v2342_v60 }
 0x41e   :  { %9017 = vmatpush1.bf16.msra.mxu0 %v13251_v4  ;;  %v13293_v4 = vcombine.low %v2331_v8, %v2335_v37 }
 0x41f   :  { %9345 = vmatpush1.bf16.msra.mxu1 %v13253_v5  ;;  %9018 = vmatprep.subr.bf16.mxu0 %v13260_v7  ;;  %v13300_v5 = vcombine.high %v2338_v58, %v2342_v60  ;;  %v13302_v7 = vcombine.high %v2339_v2, %v2343_v12  ;;  %v2379_v58 = vld [vmem:[#allocation8 + $0x5d8] sm:$0xff] }
 0x420   :  { %9346 = vmatprep.subr.bf16.mxu1 %v13262_v9  ;;  %v2346_v9 = vld [vmem:[#allocation8 + $0x4d0] sm:$0xff]  ;;  %v2383_v60 = vld [vmem:[#allocation8 + $0x5f8] sm:$0xff] }
 0x422   :  { %9019 = vmatpush1.bf16.msra.mxu0 %v13259_v17  ;;  %v13308_v17 = vcombine.high %v2346_v9, %v2350_v34 }
 0x423   :  { %9347 = vmatpush1.bf16.msra.mxu1 %v13261_v19  ;;  %9020 = vmatprep.subr.bf16.mxu0 %v13268_v32  ;;  %v13310_v19 = vcombine.high %v2347_v11, %v2351_v47  ;;  %v2354_v32 = vld [vmem:[#allocation8 + $0x510] sm:$0xff]  ;;  %v13341_v11 = vcombine.low %v2379_v58, %v2383_v60 }
 0x424   :  { %9348 = vmatprep.subr.bf16.mxu1 %v13270_v21  ;;  %v2358_v21 = vld [vmem:[#allocation8 + $0x530] sm:$0xff] }
 0x425   :  { %v13316_v20 = vcombine.high %v2354_v32, %v2358_v21  ;;  %v13315_v44 = vcombine.low %v2354_v32, %v2358_v21  ;;  %v2399_v32 = vld [vmem:[#allocation8 + $0x678] sm:$0xff] }
 0x426   :  { %9021 = vmatpush1.bf16.msra.mxu0 %v13267_v27  ;;  %v13318_v27 = vcombine.high %v2355_v23, %v2359_v33 }
 0x427   :  { %9349 = vmatpush1.bf16.msra.mxu1 %v13269_v30  ;;  %9022 = vmatprep.subr.bf16.mxu0 %v13276_v50  ;;  %v2362_v30 = vld [vmem:[#allocation8 + $0x550] sm:$0xff] }
 0x428   :  { %9350 = vmatprep.subr.bf16.mxu1 %v13278_v28  ;;  %v2366_v50 = vld [vmem:[#allocation8 + $0x570] sm:$0xff]  ;;  %v2363_v28 = vld [vmem:[#allocation8 + $0x558] sm:$0xff] }
 0x429   :  { %v13324_v57 = vcombine.high %v2362_v30, %v2366_v50  ;;  %v13323_v43 = vcombine.low %v2362_v30, %v2366_v50  ;;  %v2407_v30 = vld [vmem:[#allocation8 + $0x6b8] sm:$0xff] }
 0x42a   :  { %9023 = vmatpush1.bf16.msra.mxu0 %v13275_v40  ;;  %v13326_v40 = vcombine.high %v2363_v28, %v2367_v29 }
 0x42b   :  { %9351 = vmatpush1.bf16.msra.mxu1 %v13277_v35  ;;  %9033 = vmatprep.subr.bf16.mxu0 %v13284_v36  ;;  %v2370_v35 = vld [vmem:[#allocation8 + $0x590] sm:$0xff] }
 0x42c   :  { %9361 = vmatprep.subr.bf16.mxu1 %v13286_v52  ;;  %v2374_v36 = vld [vmem:[#allocation8 + $0x5b0] sm:$0xff]  ;;  %v2371_v52 = vld [vmem:[#allocation8 + $0x598] sm:$0xff] }
 0x42d   :  { %9025 = vmatmul.mubr.bf16.vlgmr.msra.gmra.mrb[20].mxu0 %v15904_v55  ;;  %v13332_v8 = vcombine.high %v2370_v35, %v2374_v36  ;;  %v13334_v37 = vcombine.high %v2371_v52, %v2375_v25 }
 0x42e   :  { %9353 = vmatmul.mubr.bf16.vlgmr.msra.gmra.mrb[20].mxu1 %v15904_v55  ;;  %9034 = vmatpush1.bf16.msra.mxu0 %v13283_v46  ;;  %v13301_v55 = vcombine.low %v2339_v2, %v2343_v12  ;;  %v13325_v46 = vcombine.low %v2363_v28, %v2367_v29  ;;  %v13333_v2 = vcombine.low %v2371_v52, %v2375_v25 }
 0x42f   :  { %9065 = vmatprep.mubr.bf16.mxu0 %v15906_v63  ;;  %9362 = vmatpush1.bf16.msra.mxu1 %v13285_v51  ;;  %v2378_v51 = vld [vmem:[#allocation8 + $0x5d0] sm:$0xff] }
 0x430   :  { %9393 = vmatprep.mubr.bf16.mxu1 %v15906_v63  ;;  %9035 = vmatprep.subr.bf16.mxu0 %v13292_v54  ;;  %v13307_v63 = vcombine.low %v2346_v9, %v2350_v34  ;;  %v2382_v54 = vld [vmem:[#allocation8 + $0x5f0] sm:$0xff]  ;;  %v2391_v9 = vld [vmem:[#allocation8 + $0x638] sm:$0xff] }
 0x431   :  { %9363 = vmatprep.subr.bf16.mxu1 %v13294_v0  ;;  %v13331_v0 = vcombine.low %v2370_v35, %v2374_v36  ;;  %v13340_v12 = vcombine.high %v2378_v51, %v2382_v54  ;;  %v13339_v34 = vcombine.low %v2378_v51, %v2382_v54  ;;  %v2415_v35 = vld [vmem:[#allocation8 + $0x6f8] sm:$0xff] }
 0x432   :  { %9036 = vmatpush1.bf16.msra.mxu0 %v13291_v3  ;;  %v13342_v3 = vcombine.high %v2379_v58, %v2383_v60  ;;  %v2423_v51 = vld [vmem:[#allocation8 + $0x738] sm:$0xff] }
 0x433   :  { %9364 = vmatpush1.bf16.msra.mxu1 %v13293_v4  ;;  %9037 = vmatprep.subr.bf16.mxu0 %v13300_v5  ;;  %v2386_v4 = vld [vmem:[#allocation8 + $0x610] sm:$0xff] }
 0x434   :  { %9365 = vmatprep.subr.bf16.mxu1 %v13302_v7  ;;  %v2390_v5 = vld [vmem:[#allocation8 + $0x630] sm:$0xff]  ;;  %v2387_v7 = vld [vmem:[#allocation8 + $0x618] sm:$0xff] }
 0x435   :  { %v13348_v47 = vcombine.high %v2386_v4, %v2390_v5  ;;  %v13347_v21 = vcombine.low %v2386_v4, %v2390_v5  ;;  %v13349_v23 = vcombine.low %v2387_v7, %v2391_v9  ;;  %v2431_v4 = vld [vmem:[#allocation8 + $0x778] sm:$0xff] }
 0x436   :  { %9038 = vmatpush1.bf16.msra.mxu0 %v13299_v16  ;;  %v13350_v16 = vcombine.high %v2387_v7, %v2391_v9 }
 0x437   :  { %9366 = vmatpush1.bf16.msra.mxu1 %v13301_v55  ;;  %9039 = vmatprep.subr.bf16.mxu0 %v13308_v17  ;;  %v2394_v55 = vld [vmem:[#allocation8 + $0x650] sm:$0xff] }
 0x438   :  { %9367 = vmatprep.subr.bf16.mxu1 %v13310_v19  ;;  %v2398_v17 = vld [vmem:[#allocation8 + $0x670] sm:$0xff]  ;;  %v2395_v19 = vld [vmem:[#allocation8 + $0x658] sm:$0xff] }
 0x439   :  { %v13356_v33 = vcombine.high %v2394_v55, %v2398_v17  ;;  %v13355_v50 = vcombine.low %v2394_v55, %v2398_v17  ;;  %v13357_v28 = vcombine.low %v2395_v19, %v2399_v32  ;;  %v2439_v55 = vld [vmem:[#allocation8 + $0x7b8] sm:$0xff] }
 0x43a   :  { %9040 = vmatpush1.bf16.msra.mxu0 %v13307_v63  ;;  %v13358_v63 = vcombine.high %v2395_v19, %v2399_v32 }
 0x43b   :  { %9368 = vmatpush1.bf16.msra.mxu1 %v13309_v24  ;;  %9041 = vmatprep.subr.bf16.mxu0 %v13316_v20  ;;  %v2402_v24 = vld [vmem:[#allocation8 + $0x690] sm:$0xff] }
 0x43c   :  { %9369 = vmatprep.subr.bf16.mxu1 %v13318_v27  ;;  %v2406_v20 = vld [vmem:[#allocation8 + $0x6b0] sm:$0xff]  ;;  %v2403_v27 = vld [vmem:[#allocation8 + $0x698] sm:$0xff] }
 0x43d   :  { %v13364_v29 = vcombine.high %v2402_v24, %v2406_v20  ;;  %v13363_v36 = vcombine.low %v2402_v24, %v2406_v20  ;;  %v13365_v52 = vcombine.low %v2403_v27, %v2407_v30  ;;  %v2447_v24 = vld [vmem:[#allocation8 + $0x7f8] sm:$0xff] }
 0x43e   :  { %9042 = vmatpush1.bf16.msra.mxu0 %v13315_v44  ;;  %v13366_v44 = vcombine.high %v2403_v27, %v2407_v30 }
 0x43f   :  { %9370 = vmatpush1.bf16.msra.mxu1 %v13317_v14  ;;  %9043 = vmatprep.subr.bf16.mxu0 %v13324_v57  ;;  %v2410_v14 = vld [vmem:[#allocation8 + $0x6d0] sm:$0xff] }
 0x440   :  { %9371 = vmatprep.subr.bf16.mxu1 %v13326_v40  ;;  %v2414_v57 = vld [vmem:[#allocation8 + $0x6f0] sm:$0xff]  ;;  %v2411_v40 = vld [vmem:[#allocation8 + $0x6d8] sm:$0xff] }
 0x441   :  { %v13372_v25 = vcombine.high %v2410_v14, %v2414_v57  ;;  %v13371_v54 = vcombine.low %v2410_v14, %v2414_v57  ;;  %v13373_v58 = vcombine.low %v2411_v40, %v2415_v35  ;;  %v2455_v14 = vld [vmem:[#allocation8 + $0x838] sm:$0xff] }
 0x442   :  { %9044 = vmatpush1.bf16.msra.mxu0 %v13323_v43  ;;  %v13374_v43 = vcombine.high %v2411_v40, %v2415_v35 }
 0x443   :  { %9372 = vmatpush1.bf16.msra.mxu1 %v13325_v46  ;;  %9045 = vmatprep.subr.bf16.mxu0 %v13332_v8  ;;  %v2418_v46 = vld [vmem:[#allocation8 + $0x710] sm:$0xff] }
 0x444   :  { %9373 = vmatprep.subr.bf16.mxu1 %v13334_v37  ;;  %v2422_v8 = vld [vmem:[#allocation8 + $0x730] sm:$0xff]  ;;  %v2419_v37 = vld [vmem:[#allocation8 + $0x718] sm:$0xff] }
 0x445   :  { %v13380_v60 = vcombine.high %v2418_v46, %v2422_v8  ;;  %v13379_v5 = vcombine.low %v2418_v46, %v2422_v8  ;;  %v13381_v7 = vcombine.low %v2419_v37, %v2423_v51  ;;  %v2459_v46 = vld [vmem:[#allocation8 + $0x858] sm:$0xff] }
 0x446   :  { %9046 = vmatpush1.bf16.msra.mxu0 %v13331_v0  ;;  %v13382_v0 = vcombine.high %v2419_v37, %v2423_v51  ;;  %v2463_v8 = vld [vmem:[#allocation8 + $0x878] sm:$0xff] }
 0x447   :  { %9374 = vmatpush1.bf16.msra.mxu1 %v13333_v2  ;;  %9047 = vmatprep.subr.bf16.mxu0 %v13340_v12  ;;  %v2426_v2 = vld [vmem:[#allocation8 + $0x750] sm:$0xff] }
 0x448   :  { %9375 = vmatprep.subr.bf16.mxu1 %v13342_v3  ;;  %v2430_v12 = vld [vmem:[#allocation8 + $0x770] sm:$0xff]  ;;  %v2427_v3 = vld [vmem:[#allocation8 + $0x758] sm:$0xff] }
 0x449   :  { %v13388_v9 = vcombine.high %v2426_v2, %v2430_v12  ;;  %v13387_v17 = vcombine.low %v2426_v2, %v2430_v12  ;;  %v13389_v19 = vcombine.low %v2427_v3, %v2431_v4  ;;  %v2471_v2 = vld [vmem:[#allocation8 + $0x8b8] sm:$0xff] }
 0x44a   :  { %9048 = vmatpush1.bf16.msra.mxu0 %v13339_v34  ;;  %v13390_v34 = vcombine.high %v2427_v3, %v2431_v4  ;;  %v13421_v3 = vcombine.low %v2459_v46, %v2463_v8 }
 0x44b   :  { %9376 = vmatpush1.bf16.msra.mxu1 %v13341_v11  ;;  %9049 = vmatprep.subr.bf16.mxu0 %v13348_v47  ;;  %v2434_v11 = vld [vmem:[#allocation8 + $0x790] sm:$0xff] }
 0x44c   :  { %9377 = vmatprep.subr.bf16.mxu1 %v13350_v16  ;;  %v2438_v47 = vld [vmem:[#allocation8 + $0x7b0] sm:$0xff]  ;;  %v2435_v16 = vld [vmem:[#allocation8 + $0x798] sm:$0xff] }
 0x44d   :  { %v13396_v32 = vcombine.high %v2434_v11, %v2438_v47  ;;  %v13395_v20 = vcombine.low %v2434_v11, %v2438_v47  ;;  %v13397_v27 = vcombine.low %v2435_v16, %v2439_v55  ;;  %v2479_v11 = vld [vmem:[#allocation8 + $0x8f8] sm:$0xff] }
 0x44e   :  { %9050 = vmatpush1.bf16.msra.mxu0 %v13347_v21  ;;  %v13398_v21 = vcombine.high %v2435_v16, %v2439_v55 }
 0x44f   :  { %9378 = vmatpush1.bf16.msra.mxu1 %v13349_v23  ;;  %9051 = vmatprep.subr.bf16.mxu0 %v13356_v33  ;;  %v2442_v23 = vld [vmem:[#allocation8 + $0x7d0] sm:$0xff] }
 0x450   :  { %9379 = vmatprep.subr.bf16.mxu1 %v13358_v63  ;;  %v2446_v33 = vld [vmem:[#allocation8 + $0x7f0] sm:$0xff]  ;;  %v2443_v63 = vld [vmem:[#allocation8 + $0x7d8] sm:$0xff] }
 0x451   :  { %v13404_v30 = vcombine.high %v2442_v23, %v2446_v33  ;;  %v13403_v57 = vcombine.low %v2442_v23, %v2446_v33  ;;  %v13405_v40 = vcombine.low %v2443_v63, %v2447_v24 }
 0x452   :  { %9052 = vmatpush1.bf16.msra.mxu0 %v13355_v50  ;;  %v13406_v50 = vcombine.high %v2443_v63, %v2447_v24  ;;  %v2490_v24 = vld [vmem:[#allocation8 + $0x950] sm:$0xff] }
 0x453   :  { %9380 = vmatpush1.bf16.msra.mxu1 %v13357_v28  ;;  %9053 = vmatprep.subr.bf16.mxu0 %v13364_v29  ;;  %v2450_v28 = vld [vmem:[#allocation8 + $0x810] sm:$0xff] }
 0x454   :  { %9381 = vmatprep.subr.bf16.mxu1 %v13366_v44  ;;  %v2454_v29 = vld [vmem:[#allocation8 + $0x830] sm:$0xff]  ;;  %v2451_v44 = vld [vmem:[#allocation8 + $0x818] sm:$0xff] }
 0x455   :  { %v13412_v35 = vcombine.high %v2450_v28, %v2454_v29  ;;  %v13413_v37 = vcombine.low %v2451_v44, %v2455_v14 }
 0x456   :  { %9054 = vmatpush1.bf16.msra.mxu0 %v13363_v36  ;;  %v13414_v36 = vcombine.high %v2451_v44, %v2455_v14  ;;  %v2498_v14 = vld [vmem:[#allocation8 + $0x990] sm:$0xff] }
 0x457   :  { %9382 = vmatpush1.bf16.msra.mxu1 %v13365_v52  ;;  %9055 = vmatprep.subr.bf16.mxu0 %v13372_v25  ;;  %v2458_v52 = vld [vmem:[#allocation8 + $0x850] sm:$0xff] }
 0x458   :  { %9383 = vmatprep.subr.bf16.mxu1 %v13374_v43  ;;  %v2462_v25 = vld [vmem:[#allocation8 + $0x870] sm:$0xff]  ;;  %v13411_v43 = vcombine.low %v2450_v28, %v2454_v29 }
 0x459   :  { %v13420_v51 = vcombine.high %v2458_v52, %v2462_v25  ;;  %v13419_v12 = vcombine.low %v2458_v52, %v2462_v25 }
 0x45a   :  { %9056 = vmatpush1.bf16.msra.mxu0 %v13371_v54  ;;  %v2466_v54 = vld [vmem:[#allocation8 + $0x890] sm:$0xff] }
 0x45b   :  { %9384 = vmatpush1.bf16.msra.mxu1 %v13373_v58  ;;  %9057 = vmatprep.subr.bf16.mxu0 %v13380_v60  ;;  %v2470_v58 = vld [vmem:[#allocation8 + $0x8b0] sm:$0xff]  ;;  %v13422_v60 = vcombine.high %v2459_v46, %v2463_v8 }
 0x45c   :  { %9385 = vmatprep.subr.bf16.mxu1 %v13382_v0  ;;  %v2467_v0 = vld [vmem:[#allocation8 + $0x898] sm:$0xff]  ;;  %v13428_v4 = vcombine.high %v2466_v54, %v2470_v58  ;;  %v13427_v47 = vcombine.low %v2466_v54, %v2470_v58  ;;  %v2506_v46 = vld [vmem:[#allocation8 + $0x9d0] sm:$0xff] }
 0x45d   :  { %v2510_v8 = vld [vmem:[#allocation8 + $0x9f0] sm:$0xff] }
 0x45e   :  { %9058 = vmatpush1.bf16.msra.mxu0 %v13379_v5  ;;  %v13430_v5 = vcombine.high %v2467_v0, %v2471_v2 }
 0x45f   :  { %9386 = vmatpush1.bf16.msra.mxu1 %v13381_v7  ;;  %9059 = vmatprep.subr.bf16.mxu0 %v13388_v9  ;;  %v2474_v7 = vld [vmem:[#allocation8 + $0x8d0] sm:$0xff] }
 0x460   :  { %9387 = vmatprep.subr.bf16.mxu1 %v13390_v34  ;;  %v2478_v9 = vld [vmem:[#allocation8 + $0x8f0] sm:$0xff]  ;;  %v2475_v34 = vld [vmem:[#allocation8 + $0x8d8] sm:$0xff] }
 0x461   :  { %v13436_v16 = vcombine.high %v2474_v7, %v2478_v9  ;;  %v13438_v55 = vcombine.high %v2475_v34, %v2479_v11  ;;  %v13437_v23 = vcombine.low %v2475_v34, %v2479_v11  ;;  %v2522_v11 = vld [vmem:[#allocation8 + $0xa50] sm:$0xff] }
 0x462   :  { %9060 = vmatpush1.bf16.msra.mxu0 %v13387_v17  ;;  %v2482_v17 = vld [vmem:[#allocation8 + $0x910] sm:$0xff] }
 0x463   :  { %9388 = vmatpush1.bf16.msra.mxu1 %v13389_v19  ;;  %9061 = vmatprep.subr.bf16.mxu0 %v13396_v32  ;;  %v2486_v19 = vld [vmem:[#allocation8 + $0x930] sm:$0xff]  ;;  %v2483_v32 = vld [vmem:[#allocation8 + $0x918] sm:$0xff] }
 0x464   :  { %9389 = vmatprep.subr.bf16.mxu1 %v13398_v21  ;;  %v2487_v21 = vld [vmem:[#allocation8 + $0x938] sm:$0xff]  ;;  %v13444_v33 = vcombine.high %v2482_v17, %v2486_v19 }
 0x465   :  { %v13446_v63 = vcombine.high %v2483_v32, %v2487_v21  ;;  %v13445_v28 = vcombine.low %v2483_v32, %v2487_v21  ;;  %v2530_v21 = vld [vmem:[#allocation8 + $0xa90] sm:$0xff] }
 0x466   :  { %9062 = vmatpush1.bf16.msra.mxu0 %v13395_v20  ;;  %v2494_v20 = vld [vmem:[#allocation8 + $0x970] sm:$0xff] }
 0x467   :  { %9390 = vmatpush1.bf16.msra.mxu1 %v13397_v27  ;;  %9063 = vmatprep.subr.bf16.mxu0 %v13404_v30  ;;  %v2491_v27 = vld [vmem:[#allocation8 + $0x958] sm:$0xff]  ;;  %v13452_v29 = vcombine.high %v2490_v24, %v2494_v20 }
 0x468   :  { %9391 = vmatprep.subr.bf16.mxu1 %v13406_v50  ;;  %v2495_v30 = vld [vmem:[#allocation8 + $0x978] sm:$0xff]  ;;  %v13443_v50 = vcombine.low %v2482_v17, %v2486_v19 }
 0x469   :  { %v13454_v44 = vcombine.high %v2491_v27, %v2495_v30  ;;  %v13453_v52 = vcombine.low %v2491_v27, %v2495_v30  ;;  %v2538_v30 = vld [vmem:[#allocation8 + $0xad0] sm:$0xff] }
 0x46a   :  { %9064 = vmatpush1.bf16.msra.mxu0 %v13403_v57  ;;  %v2502_v57 = vld [vmem:[#allocation8 + $0x9b0] sm:$0xff] }
 0x46b   :  { %9392 = vmatpush1.bf16.msra.mxu1 %v13405_v40  ;;  %9074 = vmatprep.subr.bf16.mxu0 %v13412_v35  ;;  %v2499_v40 = vld [vmem:[#allocation8 + $0x998] sm:$0xff]  ;;  %v13460_v25 = vcombine.high %v2498_v14, %v2502_v57  ;;  %v13459_v54 = vcombine.low %v2498_v14, %v2502_v57 }
 0x46c   :  { %9402 = vmatprep.subr.bf16.mxu1 %v13414_v36  ;;  %v2503_v35 = vld [vmem:[#allocation8 + $0x9b8] sm:$0xff]  ;;  %v13451_v36 = vcombine.low %v2490_v24, %v2494_v20 }
 0x46d   :  { %9066 = vmatmul.mubr.bf16.vlgmr.msra.gmra.mrb[20].mxu0 %v15932_v38  ;;  %v13461_v58 = vcombine.low %v2499_v40, %v2503_v35 }
 0x46e   :  { %9394 = vmatmul.mubr.bf16.vlgmr.msra.gmra.mrb[20].mxu1 %v15932_v38  ;;  %9075 = vmatpush1.bf16.msra.mxu0 %v13411_v43  ;;  %v13429_v38 = vcombine.low %v2467_v0, %v2471_v2  ;;  %v13462_v43 = vcombine.high %v2499_v40, %v2503_v35  ;;  %v2514_v2 = vld [vmem:[#allocation8 + $0xa10] sm:$0xff] }
 0x46f   :  { %9106 = vmatprep.mubr.bf16.mxu0 %v15934_v42  ;;  %9403 = vmatpush1.bf16.msra.mxu1 %v13413_v37  ;;  %v2507_v37 = vld [vmem:[#allocation8 + $0x9d8] sm:$0xff]  ;;  %v2546_v35 = vld [vmem:[#allocation8 + $0xb10] sm:$0xff] }
 0x470   :  { %9434 = vmatprep.mubr.bf16.mxu1 %v15934_v42  ;;  %9076 = vmatprep.subr.bf16.mxu0 %v13420_v51  ;;  %v13435_v42 = vcombine.low %v2474_v7, %v2478_v9  ;;  %v2511_v51 = vld [vmem:[#allocation8 + $0x9f8] sm:$0xff] }
 0x471   :  { %9404 = vmatprep.subr.bf16.mxu1 %v13422_v60  ;;  %v13468_v60 = vcombine.high %v2506_v46, %v2510_v8  ;;  %v13470_v0 = vcombine.high %v2507_v37, %v2511_v51  ;;  %v13469_v7 = vcombine.low %v2507_v37, %v2511_v51  ;;  %v2554_v51 = vld [vmem:[#allocation8 + $0xb50] sm:$0xff] }
 0x472   :  { %9077 = vmatpush1.bf16.msra.mxu0 %v13419_v12  ;;  %v2518_v12 = vld [vmem:[#allocation8 + $0xa30] sm:$0xff] }
 0x473   :  { %9405 = vmatpush1.bf16.msra.mxu1 %v13421_v3  ;;  %9078 = vmatprep.subr.bf16.mxu0 %v13428_v4  ;;  %v2515_v3 = vld [vmem:[#allocation8 + $0xa18] sm:$0xff]  ;;  %v13476_v9 = vcombine.high %v2514_v2, %v2518_v12 }
 0x474   :  { %9406 = vmatprep.subr.bf16.mxu1 %v13430_v5  ;;  %v2519_v4 = vld [vmem:[#allocation8 + $0xa38] sm:$0xff]  ;;  %v13467_v5 = vcombine.low %v2506_v46, %v2510_v8 }
 0x475   :  { %v13478_v34 = vcombine.high %v2515_v3, %v2519_v4  ;;  %v13477_v17 = vcombine.low %v2515_v3, %v2519_v4  ;;  %v2562_v4 = vld [vmem:[#allocation8 + $0xb90] sm:$0xff] }
 0x476   :  { %9079 = vmatpush1.bf16.msra.mxu0 %v13427_v47  ;;  %v2526_v47 = vld [vmem:[#allocation8 + $0xa70] sm:$0xff] }
 0x477   :  { %9407 = vmatpush1.bf16.msra.mxu1 %v13429_v38  ;;  %9080 = vmatprep.subr.bf16.mxu0 %v13436_v16  ;;  %v2523_v38 = vld [vmem:[#allocation8 + $0xa58] sm:$0xff]  ;;  %v13484_v19 = vcombine.high %v2522_v11, %v2526_v47 }
 0x478   :  { %9408 = vmatprep.subr.bf16.mxu1 %v13438_v55  ;;  %v2527_v16 = vld [vmem:[#allocation8 + $0xa78] sm:$0xff]  ;;  %v13475_v55 = vcombine.low %v2514_v2, %v2518_v12 }
 0x479   :  { %v13486_v32 = vcombine.high %v2523_v38, %v2527_v16  ;;  %v13485_v24 = vcombine.low %v2523_v38, %v2527_v16  ;;  %v2570_v16 = vld [vmem:[#allocation8 + $0xbd0] sm:$0xff] }
 0x47a   :  { %9081 = vmatpush1.bf16.msra.mxu0 %v13435_v42  ;;  %v2534_v42 = vld [vmem:[#allocation8 + $0xab0] sm:$0xff] }
 0x47b   :  { %9409 = vmatpush1.bf16.msra.mxu1 %v13437_v23  ;;  %9082 = vmatprep.subr.bf16.mxu0 %v13444_v33  ;;  %v2531_v23 = vld [vmem:[#allocation8 + $0xa98] sm:$0xff]  ;;  %v13492_v20 = vcombine.high %v2530_v21, %v2534_v42 }
 0x47c   :  { %9410 = vmatprep.subr.bf16.mxu1 %v13446_v63  ;;  %v2535_v33 = vld [vmem:[#allocation8 + $0xab8] sm:$0xff]  ;;  %v13483_v63 = vcombine.low %v2522_v11, %v2526_v47 }
 0x47d   :  { %v13494_v27 = vcombine.high %v2531_v23, %v2535_v33  ;;  %v13493_v14 = vcombine.low %v2531_v23, %v2535_v33  ;;  %v2578_v33 = vld [vmem:[#allocation8 + $0xc10] sm:$0xff] }
 0x47e   :  { %9083 = vmatpush1.bf16.msra.mxu0 %v13443_v50  ;;  %v2542_v50 = vld [vmem:[#allocation8 + $0xaf0] sm:$0xff] }
 0x47f   :  { %9411 = vmatpush1.bf16.msra.mxu1 %v13445_v28  ;;  %9084 = vmatprep.subr.bf16.mxu0 %v13452_v29  ;;  %v2539_v28 = vld [vmem:[#allocation8 + $0xad8] sm:$0xff]  ;;  %v13500_v57 = vcombine.high %v2538_v30, %v2542_v50 }
 0x480   :  { %9412 = vmatprep.subr.bf16.mxu1 %v13454_v44  ;;  %v2543_v29 = vld [vmem:[#allocation8 + $0xaf8] sm:$0xff]  ;;  %v13491_v44 = vcombine.low %v2530_v21, %v2534_v42 }
 0x481   :  { %v13502_v40 = vcombine.high %v2539_v28, %v2543_v29  ;;  %v13501_v46 = vcombine.low %v2539_v28, %v2543_v29  ;;  %v2586_v29 = vld [vmem:[#allocation8 + $0xc50] sm:$0xff] }
 0x482   :  { %9085 = vmatpush1.bf16.msra.mxu0 %v13451_v36  ;;  %v2550_v36 = vld [vmem:[#allocation8 + $0xb30] sm:$0xff] }
 0x483   :  { %9413 = vmatpush1.bf16.msra.mxu1 %v13453_v52  ;;  %9086 = vmatprep.subr.bf16.mxu0 %v13460_v25  ;;  %v2547_v52 = vld [vmem:[#allocation8 + $0xb18] sm:$0xff]  ;;  %v13508_v8 = vcombine.high %v2546_v35, %v2550_v36 }
 0x484   :  { %9414 = vmatprep.subr.bf16.mxu1 %v13462_v43  ;;  %v2551_v25 = vld [vmem:[#allocation8 + $0xb38] sm:$0xff]  ;;  %v13499_v43 = vcombine.low %v2538_v30, %v2542_v50 }
 0x485   :  { %v13510_v37 = vcombine.high %v2547_v52, %v2551_v25  ;;  %v13509_v2 = vcombine.low %v2547_v52, %v2551_v25  ;;  %v2594_v52 = vld [vmem:[#allocation8 + $0xc90] sm:$0xff] }
 0x486   :  { %9087 = vmatpush1.bf16.msra.mxu0 %v13459_v54  ;;  %v2558_v54 = vld [vmem:[#allocation8 + $0xb70] sm:$0xff] }
 0x487   :  { %9415 = vmatpush1.bf16.msra.mxu1 %v13461_v58  ;;  %9088 = vmatprep.subr.bf16.mxu0 %v13468_v60  ;;  %v2555_v58 = vld [vmem:[#allocation8 + $0xb58] sm:$0xff]  ;;  %v13516_v12 = vcombine.high %v2554_v51, %v2558_v54  ;;  %v2598_v25 = vld [vmem:[#allocation8 + $0xcb0] sm:$0xff] }
 0x488   :  { %9416 = vmatprep.subr.bf16.mxu1 %v13470_v0  ;;  %v2559_v60 = vld [vmem:[#allocation8 + $0xb78] sm:$0xff]  ;;  %v13507_v0 = vcombine.low %v2546_v35, %v2550_v36 }
 0x489   :  { %v13518_v3 = vcombine.high %v2555_v58, %v2559_v60  ;;  %v13517_v11 = vcombine.low %v2555_v58, %v2559_v60  ;;  %v2602_v60 = vld [vmem:[#allocation8 + $0xcd0] sm:$0xff] }
 0x48a   :  { %9089 = vmatpush1.bf16.msra.mxu0 %v13467_v5  ;;  %v2566_v5 = vld [vmem:[#allocation8 + $0xbb0] sm:$0xff] }
 0x48b   :  { %9417 = vmatpush1.bf16.msra.mxu1 %v13469_v7  ;;  %9090 = vmatprep.subr.bf16.mxu0 %v13476_v9  ;;  %v2563_v7 = vld [vmem:[#allocation8 + $0xb98] sm:$0xff]  ;;  %v13524_v47 = vcombine.high %v2562_v4, %v2566_v5 }
 0x48c   :  { %9418 = vmatprep.subr.bf16.mxu1 %v13478_v34  ;;  %v2567_v9 = vld [vmem:[#allocation8 + $0xbb8] sm:$0xff]  ;;  %v13515_v34 = vcombine.low %v2554_v51, %v2558_v54  ;;  %v13556_v54 = vcombine.high %v2594_v52, %v2598_v25 }
 0x48d   :  { %v13526_v38 = vcombine.high %v2563_v7, %v2567_v9  ;;  %v13525_v21 = vcombine.low %v2563_v7, %v2567_v9  ;;  %v2610_v7 = vld [vmem:[#allocation8 + $0xd10] sm:$0xff] }
 0x48e   :  { %9091 = vmatpush1.bf16.msra.mxu0 %v13475_v55  ;;  %v2574_v55 = vld [vmem:[#allocation8 + $0xbf0] sm:$0xff] }
 0x48f   :  { %9419 = vmatpush1.bf16.msra.mxu1 %v13477_v17  ;;  %9092 = vmatprep.subr.bf16.mxu0 %v13484_v19  ;;  %v2571_v17 = vld [vmem:[#allocation8 + $0xbd8] sm:$0xff]  ;;  %v13532_v42 = vcombine.high %v2570_v16, %v2574_v55  ;;  %v2614_v9 = vld [vmem:[#allocation8 + $0xd30] sm:$0xff] }
 0x490   :  { %9420 = vmatprep.subr.bf16.mxu1 %v13486_v32  ;;  %v2575_v19 = vld [vmem:[#allocation8 + $0xbf8] sm:$0xff]  ;;  %v13523_v32 = vcombine.low %v2562_v4, %v2566_v5 }
 0x491   :  { %v13534_v23 = vcombine.high %v2571_v17, %v2575_v19  ;;  %v13533_v30 = vcombine.low %v2571_v17, %v2575_v19  ;;  %v2622_v17 = vld [vmem:[#allocation8 + $0xd70] sm:$0xff]  ;;  %v2619_v19 = vld [vmem:[#allocation8 + $0xd58] sm:$0xff] }
 0x492   :  { %9093 = vmatpush1.bf16.msra.mxu0 %v13483_v63  ;;  %v2582_v63 = vld [vmem:[#allocation8 + $0xc30] sm:$0xff] }
 0x493   :  { %9421 = vmatpush1.bf16.msra.mxu1 %v13485_v24  ;;  %9094 = vmatprep.subr.bf16.mxu0 %v13492_v20  ;;  %v2579_v24 = vld [vmem:[#allocation8 + $0xc18] sm:$0xff]  ;;  %v13540_v50 = vcombine.high %v2578_v33, %v2582_v63 }
 0x494   :  { %9422 = vmatprep.subr.bf16.mxu1 %v13494_v27  ;;  %v2583_v20 = vld [vmem:[#allocation8 + $0xc38] sm:$0xff]  ;;  %v13531_v27 = vcombine.low %v2570_v16, %v2574_v55  ;;  %v2618_v55 = vld [vmem:[#allocation8 + $0xd50] sm:$0xff] }
 0x495   :  { %v13542_v28 = vcombine.high %v2579_v24, %v2583_v20  ;;  %v13541_v35 = vcombine.low %v2579_v24, %v2583_v20  ;;  %v2630_v24 = vld [vmem:[#allocation8 + $0xdb0] sm:$0xff]  ;;  %v2627_v20 = vld [vmem:[#allocation8 + $0xd98] sm:$0xff] }
 0x496   :  { %9095 = vmatpush1.bf16.msra.mxu0 %v13491_v44  ;;  %v2590_v44 = vld [vmem:[#allocation8 + $0xc70] sm:$0xff] }
 0x497   :  { %9423 = vmatpush1.bf16.msra.mxu1 %v13493_v14  ;;  %9096 = vmatprep.subr.bf16.mxu0 %v13500_v57  ;;  %v13539_v14 = vcombine.low %v2578_v33, %v2582_v63  ;;  %v2587_v57 = vld [vmem:[#allocation8 + $0xc58] sm:$0xff]  ;;  %v13548_v36 = vcombine.high %v2586_v29, %v2590_v44  ;;  %v2626_v63 = vld [vmem:[#allocation8 + $0xd90] sm:$0xff] }
 0x498   :  { %9424 = vmatprep.subr.bf16.mxu1 %v13502_v40  ;;  %v2591_v40 = vld [vmem:[#allocation8 + $0xc78] sm:$0xff] }
 0x499   :  { %v13549_v51 = vcombine.low %v2587_v57, %v2591_v40 }
 0x49a   :  { %9097 = vmatpush1.bf16.msra.mxu0 %v13499_v43  ;;  %v13550_v43 = vcombine.high %v2587_v57, %v2591_v40  ;;  %v2638_v57 = vld [vmem:[#allocation8 + $0xdf0] sm:$0xff] }
 0x49b   :  { %9425 = vmatpush1.bf16.msra.mxu1 %v13501_v46  ;;  %9098 = vmatprep.subr.bf16.mxu0 %v13508_v8  ;;  %v2595_v46 = vld [vmem:[#allocation8 + $0xc98] sm:$0xff] }
 0x49c   :  { %9426 = vmatprep.subr.bf16.mxu1 %v13510_v37  ;;  %v2599_v8 = vld [vmem:[#allocation8 + $0xcb8] sm:$0xff]  ;;  %v13547_v37 = vcombine.low %v2586_v29, %v2590_v44 }
 0x49d   :  { %v13558_v58 = vcombine.high %v2595_v46, %v2599_v8 }
 0x49e   :  { %9099 = vmatpush1.bf16.msra.mxu0 %v13507_v0  ;;  %v2606_v0 = vld [vmem:[#allocation8 + $0xcf0] sm:$0xff] }
 0x49f   :  { %9427 = vmatpush1.bf16.msra.mxu1 %v13509_v2  ;;  %9100 = vmatprep.subr.bf16.mxu0 %v13516_v12  ;;  %v2603_v2 = vld [vmem:[#allocation8 + $0xcd8] sm:$0xff]  ;;  %v13564_v4 = vcombine.high %v2602_v60, %v2606_v0 }
 0x4a0   :  { %9428 = vmatprep.subr.bf16.mxu1 %v13518_v3  ;;  %v2607_v12 = vld [vmem:[#allocation8 + $0xcf8] sm:$0xff]  ;;  %v13555_v3 = vcombine.low %v2594_v52, %v2598_v25 }
 0x4a1   :  { %v13566_v5 = vcombine.high %v2603_v2, %v2607_v12  ;;  %v2635_v52 = vld [vmem:[#allocation8 + $0xdd8] sm:$0xff] }
 0x4a2   :  { %9101 = vmatpush1.bf16.msra.mxu0 %v13515_v34  ;;  %v2611_v34 = vld [vmem:[#allocation8 + $0xd18] sm:$0xff] }
 0x4a3   :  { %9429 = vmatpush1.bf16.msra.mxu1 %v13517_v11  ;;  %9102 = vmatprep.subr.bf16.mxu0 %v13524_v47  ;;  %v2615_v11 = vld [vmem:[#allocation8 + $0xd38] sm:$0xff]  ;;  %v13565_v47 = vcombine.low %v2603_v2, %v2607_v12 }
 0x4a4   :  { %9430 = vmatprep.subr.bf16.mxu1 %v13526_v38  ;;  %v13572_v38 = vcombine.high %v2610_v7, %v2614_v9  ;;  %v13574_v16 = vcombine.high %v2611_v34, %v2615_v11  ;;  %v2639_v25 = vld [vmem:[#allocation8 + $0xdf8] sm:$0xff] }
 0x4a6   :  { %9103 = vmatpush1.bf16.msra.mxu0 %v13523_v32  ;;  %v2623_v32 = vld [vmem:[#allocation8 + $0xd78] sm:$0xff] }
 0x4a7   :  { %9431 = vmatpush1.bf16.msra.mxu1 %v13525_v21  ;;  %9104 = vmatprep.subr.bf16.mxu0 %v13532_v42  ;;  %v13571_v21 = vcombine.low %v2610_v7, %v2614_v9  ;;  %v13573_v42 = vcombine.low %v2611_v34, %v2615_v11  ;;  %v13582_v33 = vcombine.high %v2619_v19, %v2623_v32  ;;  %v2643_v34 = vld [vmem:[#allocation8 + $0xe18] sm:$0xff] }
 0x4a8   :  { %9432 = vmatprep.subr.bf16.mxu1 %v13534_v23  ;;  %v13580_v23 = vcombine.high %v2618_v55, %v2622_v17  ;;  %v2647_v11 = vld [vmem:[#allocation8 + $0xe38] sm:$0xff] }
 0x4aa   :  { %9105 = vmatpush1.bf16.msra.mxu0 %v13531_v27  ;;  %v2631_v27 = vld [vmem:[#allocation8 + $0xdb8] sm:$0xff] }
 0x4ab   :  { %9433 = vmatpush1.bf16.msra.mxu1 %v13533_v30  ;;  %9115 = vmatprep.subr.bf16.mxu0 %v13540_v50  ;;  %v13579_v30 = vcombine.low %v2618_v55, %v2622_v17  ;;  %v13581_v50 = vcombine.low %v2619_v19, %v2623_v32  ;;  %v13590_v44 = vcombine.high %v2627_v20, %v2631_v27 }
 0x4ac   :  { %9443 = vmatprep.subr.bf16.mxu1 %v13542_v28  ;;  %v13588_v28 = vcombine.high %v2626_v63, %v2630_v24  ;;  %v13597_v55 = vcombine.low %v2635_v52, %v2639_v25  ;;  %v13606_v32 = vcombine.high %v2643_v34, %v2647_v11 }
 0x4ad   :  { %9107 = vmatmul.mubr.bf16.vlgmr.msra.gmra.mrb[20].mxu0 %v15962_v39 }
 0x4ae   :  { %9435 = vmatmul.mubr.bf16.vlgmr.msra.gmra.mrb[20].mxu1 %v15962_v39  ;;  %9116 = vmatpush1.bf16.msra.mxu0 %v13539_v14  ;;  %v13557_v39 = vcombine.low %v2595_v46, %v2599_v8  ;;  %v2634_v14 = vld [vmem:[#allocation8 + $0xdd0] sm:$0xff] }
 0x4af   :  { %9147 = vmatprep.mubr.bf16.mxu0 %v15964_v45  ;;  %9444 = vmatpush1.bf16.msra.mxu1 %v13541_v35  ;;  %v13596_v2 = vcombine.high %v2634_v14, %v2638_v57 }
 0x4b0   :  { %9475 = vmatprep.mubr.bf16.mxu1 %v15964_v45  ;;  %9117 = vmatprep.subr.bf16.mxu0 %v13548_v36  ;;  %v13563_v45 = vcombine.low %v2602_v60, %v2606_v0  ;;  %v13589_v0 = vcombine.low %v2627_v20, %v2631_v27 }
 0x4b1   :  { %9445 = vmatprep.subr.bf16.mxu1 %v13550_v43 }
 0x4b2   :  { %9118 = vmatpush1.bf16.msra.mxu0 %v13547_v37  ;;  %v13587_v37 = vcombine.low %v2626_v63, %v2630_v24  ;;  %v2651_v63 = vld [vmem:[#allocation8 + $0xe58] sm:$0xff] }
 0x4b3   :  { %9446 = vmatpush1.bf16.msra.mxu1 %v13549_v51  ;;  %9119 = vmatprep.subr.bf16.mxu0 %v13556_v54  ;;  %v2655_v24 = vld [vmem:[#allocation8 + $0xe78] sm:$0xff] }
 0x4b4   :  { %9447 = vmatprep.subr.bf16.mxu1 %v13558_v58 }
 0x4b6   :  { %9120 = vmatpush1.bf16.msra.mxu0 %v13555_v3 }
 0x4b7   :  { %9448 = vmatpush1.bf16.msra.mxu1 %v13557_v39  ;;  %9121 = vmatprep.subr.bf16.mxu0 %v13564_v4  ;;  %v13598_v39 = vcombine.high %v2635_v52, %v2639_v25  ;;  %v2642_v4 = vld [vmem:[#allocation8 + $0xe10] sm:$0xff] }
 0x4b8   :  { %9449 = vmatprep.subr.bf16.mxu1 %v13566_v5  ;;  %v2646_v5 = vld [vmem:[#allocation8 + $0xe30] sm:$0xff] }
 0x4b9   :  { %v13604_v17 = vcombine.high %v2642_v4, %v2646_v5  ;;  %v13603_v27 = vcombine.low %v2642_v4, %v2646_v5  ;;  %v2662_v52 = vld [vmem:[#allocation8 + $0xeb0] sm:$0xff] }
 0x4ba   :  { %9122 = vmatpush1.bf16.msra.mxu0 %v13563_v45  ;;  %v2670_v4 = vld [vmem:[#allocation8 + $0xef0] sm:$0xff] }
 0x4bb   :  { %9450 = vmatpush1.bf16.msra.mxu1 %v13565_v47  ;;  %9123 = vmatprep.subr.bf16.mxu0 %v13572_v38  ;;  %v13595_v47 = vcombine.low %v2634_v14, %v2638_v57  ;;  %v13614_v57 = vcombine.high %v2651_v63, %v2655_v24 }
 0x4bc   :  { %9451 = vmatprep.subr.bf16.mxu1 %v13574_v16 }
 0x4be   :  { %9124 = vmatpush1.bf16.msra.mxu0 %v13571_v21  ;;  %v2650_v21 = vld [vmem:[#allocation8 + $0xe50] sm:$0xff] }
 0x4bf   :  { %9452 = vmatpush1.bf16.msra.mxu1 %v13573_v42  ;;  %9125 = vmatprep.subr.bf16.mxu0 %v13580_v23  ;;  %v2654_v42 = vld [vmem:[#allocation8 + $0xe70] sm:$0xff] }
 0x4c0   :  { %v16062_v29 = vpop.f32.mrb[16].mxu0  ;;  %9453 = vmatprep.subr.bf16.mxu1 %v13582_v33 }
 0x4c1   :  { %v9650_v40 = vrot.slane %v16062_v29, 4  ;;  %v16065_v35 = vpop.f32.mrb[16].mxu1  ;;  %v16067_v36 = vpop.f32.mrb[17].mxu0 }
 0x4c2   :  { %v9662_v43 = vrot.slane %v16065_v35, 4  ;;  %v16070_v46 = vpop.f32.mrb[17].mxu1  ;;  %v8661_v8 = vpop.f32.mrb[18].mxu0  ;;  %9126 = vmatpush1.bf16.msra.mxu0 %v13579_v30 }
 0x4c3   :  { %v9651_v51 = vadd.f32 %v9650_v40, %v16062_v29  ;;  %v9668_v54 = vrot.slane %v16070_v46, 4  ;;  %v8989_v58 = vpop.f32.mrb[18].mxu1  ;;  %9454 = vmatpush1.bf16.msra.mxu1 %v13581_v50  ;;  %v8662_v60 = vpop.f32.mrb[19].mxu0  ;;  %9127 = vmatprep.subr.bf16.mxu0 %v13588_v28  ;;  %v13605_v28 = vcombine.low %v2643_v34, %v2647_v11  ;;  %v2658_v40 = vld [vmem:[#allocation8 + $0xe90] sm:$0xff]  ;;  %v2659_v8 = vld [vmem:[#allocation8 + $0xe98] sm:$0xff] }
 0x4c4   :  { %v9663_v12 = vadd.f32 %v9662_v43, %v16065_v35  ;;  %v8990_v3 = vpop.f32.mrb[19].mxu1  ;;  %9455 = vmatprep.subr.bf16.mxu1 %v13590_v44  ;;  %v13612_v44 = vcombine.high %v2650_v21, %v2654_v42  ;;  %v13619_v11 = vcombine.low %v2658_v40, %v2662_v52 }
 0x4c5   :  { %v9652_v7 = vrot.slane %v9651_v51, 2  ;;  %v9669_v9 = vadd.f32 %v9668_v54, %v16070_v46  ;;  %v13611_v54 = vcombine.low %v2650_v21, %v2654_v42  ;;  %v2675_v21 = vld [vmem:[#allocation8 + $0xf18] sm:$0xff] }
 0x4c6   :  { %v9664_v45 = vrot.slane %v9663_v12, 2  ;;  %9128 = vmatpush1.bf16.msra.mxu0 %v13587_v37  ;;  %v2663_v37 = vld [vmem:[#allocation8 + $0xeb8] sm:$0xff] }
 0x4c7   :  { %v9653_v38 = vadd.f32 %v9652_v7, %v9651_v51  ;;  %v9670_v16 = vrot.slane %v9669_v9, 2  ;;  %9456 = vmatpush1.bf16.msra.mxu1 %v13589_v0  ;;  %9129 = vmatprep.subr.bf16.mxu0 %v13596_v2  ;;  %v13613_v0 = vcombine.low %v2651_v63, %v2655_v24  ;;  %v13620_v2 = vcombine.high %v2658_v40, %v2662_v52  ;;  %v2679_v42 = vld [vmem:[#allocation8 + $0xf38] sm:$0xff] }
 0x4c8   :  { %v9665_v19 = vadd.f32 %v9664_v45, %v9663_v12  ;;  %9457 = vmatprep.subr.bf16.mxu1 %v13598_v39  ;;  %v13622_v3 = vcombine.high %v2659_v8, %v2663_v37  ;;  %v2666_v39 = vld [vmem:[#allocation8 + $0xed0] sm:$0xff]  ;;  %v2683_v40 = vld [vmem:[#allocation8 + $0xf58] sm:$0xff] }
 0x4c9   :  { %v9654_v23 = vrot.slane %v9653_v38, 1  ;;  %v9671_v33 = vadd.f32 %v9670_v16, %v9669_v9  ;;  %v2671_v9 = vld [vmem:[#allocation8 + $0xef8] sm:$0xff] }
 0x4ca   :  { %v9666_v20 = vrot.slane %v9665_v19, 1  ;;  %9130 = vmatpush1.bf16.msra.mxu0 %v13595_v47  ;;  %v13621_v47 = vcombine.low %v2659_v8, %v2663_v37  ;;  %v2687_v52 = vld [vmem:[#allocation8 + $0xf78] sm:$0xff] }
 0x4cb   :  { %v9655_v30 = vadd.f32 %v9654_v23, %v9653_v38  ;;  %v9672_v50 = vrot.slane %v9671_v33, 1  ;;  %9458 = vmatpush1.bf16.msra.mxu1 %v13597_v55  ;;  %9131 = vmatprep.subr.bf16.mxu0 %v13604_v17  ;;  %v13628_v38 = vcombine.high %v2666_v39, %v2670_v4  ;;  %v2678_v17 = vld [vmem:[#allocation8 + $0xf30] sm:$0xff] }
 0x4cc   :  { %v9667_v14 = vadd.f32 %v9666_v20, %v9665_v19  ;;  %9459 = vmatprep.subr.bf16.mxu1 %v13606_v32 }
 0x4cd   :  { %v9699_v25 = vmul.f32 0.125, %v9655_v30  ;;  %v9673_v43 = vadd.f32 %v9672_v50, %v9671_v33  ;;  %v13627_v33 = vcombine.low %v2666_v39, %v2670_v4  ;;  %v13638_v50 = vcombine.high %v2675_v21, %v2679_v42 }
 0x4ce   :  { %v9701_v51 = vmul.f32 0.125, %v9667_v14  ;;  %9132 = vmatpush1.bf16.msra.mxu0 %v13603_v27 }
 0x4cf   :  { %v16077_v58 = vsub.f32 %v16062_v29, %v9699_v25  ;;  %v9702_v60 = vmul.f32 0.125, %v9673_v43  ;;  %9460 = vmatpush1.bf16.msra.mxu1 %v13605_v28  ;;  %9133 = vmatprep.subr.bf16.mxu0 %v13612_v44  ;;  %v2667_v29 = vld [vmem:[#allocation8 + $0xed8] sm:$0xff]  ;;  %v2682_v28 = vld [vmem:[#allocation8 + $0xf50] sm:$0xff] }
 0x4d0   :  { %v16080_v12 = vsub.f32 %v16065_v35, %v9701_v51  ;;  %9461 = vmatprep.subr.bf16.mxu1 %v13614_v57  ;;  %v13630_v55 = vcombine.high %v2667_v29, %v2671_v9  ;;  %v13629_v20 = vcombine.low %v2667_v29, %v2671_v9  ;;  %v2686_v44 = vld [vmem:[#allocation8 + $0xf70] sm:$0xff]  ;;  %v13637_v51 = vcombine.low %v2675_v21, %v2679_v42  ;;  %v2695_v29 = vld [vmem:[#allocation8 + $0xfb8] sm:$0xff] }
 0x4d1   :  { %v9715_v5 = vmul.f32 %v16077_v58, %v16077_v58  ;;  %v16085_v7 = vsub.f32 %v16070_v46, %v9702_v60  ;;  %v2674_v46 = vld [vmem:[#allocation8 + $0xf10] sm:$0xff]  ;;  %v2703_v21 = vld [vmem:[#allocation8 + $0xff8] sm:$0xff] }
 0x4d2   :  { %v9717_v34 = vmul.f32 %v16080_v12, %v16080_v12  ;;  %9134 = vmatpush1.bf16.msra.mxu0 %v13611_v54  ;;  %v13636_v27 = vcombine.high %v2674_v46, %v2678_v17  ;;  %v13635_v43 = vcombine.low %v2674_v46, %v2678_v17  ;;  %v13644_v54 = vcombine.high %v2682_v28, %v2686_v44  ;;  %v2702_v46 = vld [vmem:[#allocation8 + $0xff0] sm:$0xff] }
 0x4d3   :  { %v9723_v45 = vrot.slane %v9715_v5, 4  ;;  %v9718_v35 = vmul.f32 %v16085_v7, %v16085_v7  ;;  %9462 = vmatpush1.bf16.msra.mxu1 %v13613_v0  ;;  %9135 = vmatprep.subr.bf16.mxu0 %v13620_v2  ;;  %v13646_v0 = vcombine.high %v2683_v40, %v2687_v52  ;;  %v2690_v2 = vld [vmem:[#allocation8 + $0xf90] sm:$0xff] }
 0x4d4   :  { %v9735_v16 = vrot.slane %v9717_v34, 4  ;;  %9463 = vmatprep.subr.bf16.mxu1 %v13622_v3  ;;  %v2694_v3 = vld [vmem:[#allocation8 + $0xfb0] sm:$0xff] }
 0x4d5   :  { %v9724_v19 = vadd.f32 %v9723_v45, %v9715_v5  ;;  %v9741_v32 = vrot.slane %v9718_v35, 4  ;;  %v2691_v5 = vld [vmem:[#allocation8 + $0xf98] sm:$0xff] }
 0x4d6   :  { %v9736_v23 = vadd.f32 %v9735_v16, %v9717_v34  ;;  %9136 = vmatpush1.bf16.msra.mxu0 %v13619_v11  ;;  %v13643_v34 = vcombine.low %v2682_v28, %v2686_v44  ;;  %v13654_v16 = vcombine.high %v2691_v5, %v2695_v29  ;;  %v2707_v28 = vld [vmem:[#allocation8 + $0x1018] sm:$0xff] }
 0x4d7   :  { %v9725_v63 = vrot.slane %v9724_v19, 2  ;;  %v9742_v24 = vadd.f32 %v9741_v32, %v9718_v35  ;;  %9464 = vmatpush1.bf16.msra.mxu1 %v13621_v47  ;;  %9137 = vmatprep.subr.bf16.mxu0 %v13628_v38  ;;  %v13645_v35 = vcombine.low %v2683_v40, %v2687_v52  ;;  %v13652_v47 = vcombine.high %v2690_v2, %v2694_v3  ;;  %v2699_v32 = vld [vmem:[#allocation8 + $0xfd8] sm:$0xff] }
 0x4d8   :  { %v9737_v30 = vrot.slane %v9736_v23, 2  ;;  %9465 = vmatprep.subr.bf16.mxu1 %v13630_v55  ;;  %v2698_v55 = vld [vmem:[#allocation8 + $0xfd0] sm:$0xff]  ;;  %v2711_v44 = vld [vmem:[#allocation8 + $0x1038] sm:$0xff] }
 0x4d9   :  { %v9726_v14 = vadd.f32 %v9725_v63, %v9724_v19  ;;  %v9743_v57 = vrot.slane %v9742_v24, 2  ;;  %v13653_v63 = vcombine.low %v2691_v5, %v2695_v29 }
 0x4da   :  { %v9738_v25 = vadd.f32 %v9737_v30, %v9736_v23  ;;  %9138 = vmatpush1.bf16.msra.mxu0 %v13627_v33  ;;  %v13651_v23 = vcombine.low %v2690_v2, %v2694_v3  ;;  %v2710_v30 = vld [vmem:[#allocation8 + $0x1030] sm:$0xff]  ;;  %v13669_v2 = vcombine.low %v2707_v28, %v2711_v44 }
 0x4db   :  { %v9727_v8 = vrot.slane %v9726_v14, 1  ;;  %v9744_v37 = vadd.f32 %v9743_v57, %v9742_v24  ;;  %9466 = vmatpush1.bf16.msra.mxu1 %v13629_v20  ;;  %9139 = vmatprep.subr.bf16.mxu0 %v13636_v27  ;;  %v13660_v24 = vcombine.high %v2698_v55, %v2702_v46  ;;  %v13662_v20 = vcombine.high %v2699_v32, %v2703_v21  ;;  %v2706_v27 = vld [vmem:[#allocation8 + $0x1010] sm:$0xff] }
 0x4dc   :  { %v9739_v60 = vrot.slane %v9738_v25, 1  ;;  %9467 = vmatprep.subr.bf16.mxu1 %v13638_v50  ;;  %v16091_v50 = vld [vmem:[#allocation10] sm:$0xff]  ;;  %v13661_v57 = vcombine.low %v2699_v32, %v2703_v21  ;;  %v13668_v40 = vcombine.high %v2706_v27, %v2710_v30  ;;  %v2722_v3 = vld [vmem:[#allocation8 + $0x1090] sm:$0xff] }
 0x4dd   :  { %v9728_v39 = vadd.f32 %v9727_v8, %v9726_v14  ;;  %v9745_v4 = vrot.slane %v9744_v37, 1  ;;  %v13659_v14 = vcombine.low %v2698_v55, %v2702_v46  ;;  %v9808_v52 = vrot.slane %v16091_v50, %v15893_v15  ;;  %v2714_v8 = vld [vmem:[#allocation8 + $0x1050] sm:$0xff] }
 0x4de   :  { %v9740_v9 = vadd.f32 %v9739_v60, %v9738_v25  ;;  %9140 = vmatpush1.bf16.msra.mxu0 %v13635_v43  ;;  %v9816_v25 = vrot.slane %v16091_v50, %v15949_v48  ;;  %v13670_v43 = vcombine.high %v2707_v28, %v2711_v44  ;;  %v2719_v60 = vld [vmem:[#allocation8 + $0x1078] sm:$0xff]  ;;  %v9896_v5 = vrot.slane %v16091_v50, %v15924_v62 }
 0x4df   :  { %v9771_v11 = vmul.f32 0.125, %v9728_v39  ;;  %v9746_v45 = vadd.f32 %v9745_v4, %v9744_v37  ;;  %9468 = vmatpush1.bf16.msra.mxu1 %v13637_v51  ;;  %9141 = vmatprep.subr.bf16.mxu0 %v13644_v54  ;;  %v2718_v37 = vld [vmem:[#allocation8 + $0x1070] sm:$0xff]  ;;  %v13667_v51 = vcombine.low %v2706_v27, %v2710_v30  ;;  %v2715_v54 = vld [vmem:[#allocation8 + $0x1058] sm:$0xff]  ;;  %v9820_v4 = vrot.slane %v16091_v50, %v15979_v13 }
 0x4e0   :  { %v9773_v38 = vmul.f32 0.125, %v9740_v9  ;;  %9469 = vmatprep.subr.bf16.mxu1 %v13646_v0  ;;  %v9888_v0 = vrot.slane %v16091_v50, %v15876_v59  ;;  %v2726_v39 = vld [vmem:[#allocation8 + $0x10b0] sm:$0xff]  ;;  %v9848_v29 = vrot.slane %v9808_v52, %v15893_v15  ;;  %v9856_v9 = vrot.slane %v9816_v25, %v15893_v15  ;;  %v2735_v30 = vld [vmem:[#allocation8 + $0x10f8] sm:$0xff] }
 0x4e1   :  { %v9779_v17 = vadd.f32 1e-05, %v9771_v11  ;;  %v9774_v19 = vmul.f32 0.125, %v9746_v45  ;;  %v13675_v45 = vcombine.low %v2714_v8, %v2718_v37  ;;  %v9900_v55 = vrot.slane %v16091_v50, %v15952_v56  ;;  %v2738_v25 = vld [vmem:[#allocation8 + $0x1110] sm:$0xff] }
 0x4e2   :  { %v9781_v42 = vadd.f32 1e-05, %v9773_v38  ;;  %9142 = vmatpush1.bf16.msra.mxu0 %v13643_v34  ;;  %v13676_v34 = vcombine.high %v2714_v8, %v2718_v37  ;;  %v2723_v38 = vld [vmem:[#allocation8 + $0x1098] sm:$0xff]  ;;  %v9928_v32 = vrot.slane %v9888_v0, %v15876_v59  ;;  %v13683_v28 = vcombine.low %v2722_v3, %v2726_v39 }
 0x4e3   :  { %15240 = vrsqrt.f32 %v9779_v17  ;;  %v9782_v33 = vadd.f32 1e-05, %v9774_v19  ;;  %9470 = vmatpush1.bf16.msra.mxu1 %v13645_v35  ;;  %9143 = vmatprep.subr.bf16.mxu0 %v13652_v47  ;;  %v13677_v35 = vcombine.low %v2715_v54, %v2719_v60  ;;  %v13678_v47 = vcombine.high %v2715_v54, %v2719_v60  ;;  %v2743_v8 = vld [vmem:[#allocation8 + $0x1138] sm:$0xff] }
 0x4e4   :  { %15242 = vrsqrt.f32 %v9781_v42  ;;  %9471 = vmatprep.subr.bf16.mxu1 %v13654_v16  ;;  %v2727_v16 = vld [vmem:[#allocation8 + $0x10b8] sm:$0xff]  ;;  %v13684_v19 = vcombine.high %v2722_v3, %v2726_v39  ;;  %v9860_v42 = vrot.slane %v9820_v4, %v15893_v15  ;;  %v9940_v50 = vrot.slane %v9900_v55, %v15876_v59  ;;  %v2750_v3 = vld [vmem:[#allocation8 + $0x1170] sm:$0xff] }
 0x4e5   :  { %15244 = vrsqrt.f32 %v9782_v33  ;;  %v13685_v44 = vcombine.low %v2723_v38, %v2727_v16  ;;  %v2747_v39 = vld [vmem:[#allocation8 + $0x1158] sm:$0xff] }
 0x4e6   :  { %9144 = vmatpush1.bf16.msra.mxu0 %v13651_v23  ;;  %v9936_v23 = vrot.slane %v9896_v5, %v15876_v59  ;;  %v2751_v4 = vld [vmem:[#allocation8 + $0x1178] sm:$0xff] }
 0x4e7   :  { %9472 = vmatpush1.bf16.msra.mxu1 %v13653_v63  ;;  %9145 = vmatprep.subr.bf16.mxu0 %v13660_v24  ;;  %v2734_v24 = vld [vmem:[#allocation8 + $0x10f0] sm:$0xff] }
 0x4e8   :  { %9473 = vmatprep.subr.bf16.mxu1 %v13662_v20 }
 0x4ea   :  { %9146 = vmatpush1.bf16.msra.mxu0 %v13659_v14 }
 0x4eb   :  { %9474 = vmatpush1.bf16.msra.mxu1 %v13661_v57  ;;  %9156 = vmatprep.subr.bf16.mxu0 %v13668_v40 }
 0x4ec   :  { %9484 = vmatprep.subr.bf16.mxu1 %v13670_v43  ;;  %v2739_v43 = vld [vmem:[#allocation8 + $0x1118] sm:$0xff] }
 0x4ed   :  { %v15241_v11 = vpop.eup %15240  ;;  %9148 = vmatmul.mubr.bf16.vlgmr.msra.gmra.mrb[20].mxu0 %v15989_v10  ;;  %v13702_v0 = vcombine.high %v2739_v43, %v2743_v8 }
 0x4ee   :  { %v15243_v46 = vpop.eup %15242  ;;  %v9795_v17 = vmul.f32 %v15241_v11, %v16077_v58  ;;  %9476 = vmatmul.mubr.bf16.vlgmr.msra.gmra.mrb[20].mxu1 %v15989_v10  ;;  %9157 = vmatpush1.bf16.msra.mxu0 %v13667_v51  ;;  %v13686_v58 = vcombine.high %v2723_v38, %v2727_v16  ;;  %v2730_v10 = vld [vmem:[#allocation8 + $0x10d0] sm:$0xff]  ;;  %v13709_v16 = vcombine.low %v2747_v39, %v2751_v4 }
 0x4ef   :  { %v9797_v21 = vmul.f32 %v15243_v46, %v16080_v12  ;;  %9188 = vmatprep.mubr.bf16.mxu0 %v15991_v18  ;;  %9485 = vmatpush1.bf16.msra.mxu1 %v13669_v2  ;;  %v15245_v33 = vpop.eup %15244  ;;  %v2731_v12 = vld [vmem:[#allocation8 + $0x10d8] sm:$0xff]  ;;  %v13691_v51 = vcombine.low %v2730_v10, %v2734_v24  ;;  %v2746_v2 = vld [vmem:[#allocation8 + $0x1150] sm:$0xff] }
 0x4f0   :  { %v9877_v63 = vmul.f32 %v9848_v29, %v9795_v17  ;;  %9516 = vmatprep.mubr.bf16.mxu1 %v15991_v18  ;;  %9158 = vmatprep.subr.bf16.mxu0 %v13676_v34  ;;  %v9798_v27 = vmul.f32 %v15245_v33, %v16085_v7  ;;  %v13692_v18 = vcombine.high %v2730_v10, %v2734_v24  ;;  %v2742_v7 = vld [vmem:[#allocation8 + $0x1130] sm:$0xff]  ;;  %v2771_v24 = vld [vmem:[#allocation8 + $0x1218] sm:$0xff] }
 0x4f1   :  { %v9879_v20 = vmul.f32 %v9856_v9, %v9797_v21  ;;  %9486 = vmatprep.subr.bf16.mxu1 %v13678_v47  ;;  %v13694_v52 = vcombine.high %v2731_v12, %v2735_v30  ;;  %v13693_v54 = vcombine.low %v2731_v12, %v2735_v30  ;;  %v13700_v60 = vcombine.high %v2738_v25, %v2742_v7  ;;  %v2754_v11 = vld [vmem:[#allocation8 + $0x1190] sm:$0xff]  ;;  %v2759_v47 = vld [vmem:[#allocation8 + $0x11b8] sm:$0xff] }
 0x4f2   :  { %9159 = vmatpush1.bf16.msra.mxu0 %v13675_v45  ;;  %v16118_v14 = vadd.f32 %v9928_v32, %v9877_v63  ;;  %v9880_v57 = vmul.f32 %v9860_v42, %v9798_v27  ;;  %v13699_v5 = vcombine.low %v2738_v25, %v2742_v7  ;;  %v13701_v29 = vcombine.low %v2739_v43, %v2743_v8  ;;  %v2758_v45 = vld [vmem:[#allocation8 + $0x11b0] sm:$0xff]  ;;  %v2763_v32 = vld [vmem:[#allocation8 + $0x11d8] sm:$0xff] }
 0x4f3   :  { %9487 = vmatpush1.bf16.msra.mxu1 %v13677_v35  ;;  %9160 = vmatprep.subr.bf16.mxu0 %v13684_v19  ;;  %v16120_v40 = vadd.f32 %v9936_v23, %v9879_v20  ;;  %v13708_v9 = vcombine.high %v2746_v2, %v2750_v3  ;;  %v13710_v34 = vcombine.high %v2747_v39, %v2751_v4  ;;  %v2755_v35 = vld [vmem:[#allocation8 + $0x1198] sm:$0xff]  ;;  %v2762_v17 = vld [vmem:[#allocation8 + $0x11d0] sm:$0xff] }
 0x4f4   :  { %9488 = vmatprep.subr.bf16.mxu1 %v13686_v58  ;;  %v16122_v37 = vadd.f32 %v9940_v50, %v9880_v57  ;;  %v13707_v38 = vcombine.low %v2746_v2, %v2750_v3  ;;  %v13716_v55 = vcombine.high %v2754_v11, %v2758_v45  ;;  %v13718_v46 = vcombine.high %v2755_v35, %v2759_v47  ;;  %v2766_v19 = vld [vmem:[#allocation8 + $0x11f0] sm:$0xff]  ;;  %v2767_v21 = vld [vmem:[#allocation8 + $0x11f8] sm:$0xff] }
 0x4f5   :  { %v13715_v42 = vcombine.low %v2754_v11, %v2758_v45  ;;  %v13717_v23 = vcombine.low %v2755_v35, %v2759_v47  ;;  %v13724_v33 = vcombine.high %v2762_v17, %v2766_v19  ;;  %v13726_v63 = vcombine.high %v2763_v32, %v2767_v21  ;;  %v2770_v58 = vld [vmem:[#allocation8 + $0x1210] sm:$0xff]  ;;  %v2775_v20 = vld [vmem:[#allocation8 + $0x1238] sm:$0xff] }
 0x4f6   :  { %9161 = vmatpush1.bf16.msra.mxu0 %v13683_v28  ;;  %v2774_v10 = vld [vmem:[#allocation8 + $0x1230] sm:$0xff]  ;;  %v13723_v27 = vcombine.low %v2762_v17, %v2766_v19  ;;  %v13725_v12 = vcombine.low %v2763_v32, %v2767_v21  ;;  %v13734_v50 = vcombine.high %v2771_v24, %v2775_v20  ;;  %v2783_v57 = vld [vmem:[#allocation8 + $0x1278] sm:$0xff]  ;;  %v13733_v25 = vcombine.low %v2771_v24, %v2775_v20 }
 0x4f7   :  { %9489 = vmatpush1.bf16.msra.mxu1 %v13685_v44  ;;  %9162 = vmatprep.subr.bf16.mxu0 %v13692_v18  ;;  %v13732_v30 = vcombine.high %v2770_v58, %v2774_v10  ;;  %v2778_v28 = vld [vmem:[#allocation8 + $0x1250] sm:$0xff]  ;;  %v2779_v18 = vld [vmem:[#allocation8 + $0x1258] sm:$0xff] }
 0x4f8   :  { %9490 = vmatprep.subr.bf16.mxu1 %v13694_v52  ;;  %v2782_v44 = vld [vmem:[#allocation8 + $0x1270] sm:$0xff]  ;;  %v13731_v52 = vcombine.low %v2770_v58, %v2774_v10  ;;  %v13742_v43 = vcombine.high %v2779_v18, %v2783_v57  ;;  %v13741_v2 = vcombine.low %v2779_v18, %v2783_v57 }
 0x4f9   :  { %v13740_v7 = vcombine.high %v2778_v28, %v2782_v44  ;;  %v2786_v8 = vld [vmem:[#allocation8 + $0x1290] sm:$0xff] }
 0x4fa   :  { %9163 = vmatpush1.bf16.msra.mxu0 %v13691_v51  ;;  %v2790_v51 = vld [vmem:[#allocation8 + $0x12b0] sm:$0xff] }
 0x4fb   :  { %9491 = vmatpush1.bf16.msra.mxu1 %v13693_v54  ;;  %9164 = vmatprep.subr.bf16.mxu0 %v13700_v60  ;;  %v2787_v54 = vld [vmem:[#allocation8 + $0x1298] sm:$0xff]  ;;  %v13748_v3 = vcombine.high %v2786_v8, %v2790_v51  ;;  %v2794_v4 = vld [vmem:[#allocation8 + $0x12d0] sm:$0xff] }
 0x4fc   :  { %9492 = vmatprep.subr.bf16.mxu1 %v13702_v0  ;;  %v2791_v60 = vld [vmem:[#allocation8 + $0x12b8] sm:$0xff]  ;;  %v13739_v0 = vcombine.low %v2778_v28, %v2782_v44  ;;  %v2802_v47 = vld [vmem:[#allocation8 + $0x1310] sm:$0xff] }
 0x4fd   :  { %v13750_v39 = vcombine.high %v2787_v54, %v2791_v60  ;;  %v13749_v11 = vcombine.low %v2787_v54, %v2791_v60  ;;  %v2810_v21 = vld [vmem:[#allocation8 + $0x1350] sm:$0xff] }
 0x4fe   :  { %9165 = vmatpush1.bf16.msra.mxu0 %v13699_v5  ;;  %v2798_v5 = vld [vmem:[#allocation8 + $0x12f0] sm:$0xff] }
 0x4ff   :  { %9493 = vmatpush1.bf16.msra.mxu1 %v13701_v29  ;;  %9166 = vmatprep.subr.bf16.mxu0 %v13708_v9  ;;  %v2795_v29 = vld [vmem:[#allocation8 + $0x12d8] sm:$0xff]  ;;  %v13756_v45 = vcombine.high %v2794_v4, %v2798_v5  ;;  %v2818_v20 = vld [vmem:[#allocation8 + $0x1390] sm:$0xff] }
 0x500   :  { %9494 = vmatprep.subr.bf16.mxu1 %v13710_v34  ;;  %v2799_v9 = vld [vmem:[#allocation8 + $0x12f8] sm:$0xff]  ;;  %v13747_v34 = vcombine.low %v2786_v8, %v2790_v51  ;;  %v2826_v57 = vld [vmem:[#allocation8 + $0x13d0] sm:$0xff] }
 0x501   :  { %v13758_v35 = vcombine.high %v2795_v29, %v2799_v9  ;;  %v13757_v17 = vcombine.low %v2795_v29, %v2799_v9  ;;  %v2834_v60 = vld [vmem:[#allocation8 + $0x1410] sm:$0xff] }
 0x502   :  { %9167 = vmatpush1.bf16.msra.mxu0 %v13707_v38  ;;  %v2806_v38 = vld [vmem:[#allocation8 + $0x1330] sm:$0xff] }
 0x503   :  { %9495 = vmatpush1.bf16.msra.mxu1 %v13709_v16  ;;  %9168 = vmatprep.subr.bf16.mxu0 %v13716_v55  ;;  %v2803_v16 = vld [vmem:[#allocation8 + $0x1318] sm:$0xff]  ;;  %v13764_v19 = vcombine.high %v2802_v47, %v2806_v38  ;;  %v2842_v9 = vld [vmem:[#allocation8 + $0x1450] sm:$0xff] }
 0x504   :  { %9496 = vmatprep.subr.bf16.mxu1 %v13718_v46  ;;  %v2807_v55 = vld [vmem:[#allocation8 + $0x1338] sm:$0xff]  ;;  %v13755_v46 = vcombine.low %v2794_v4, %v2798_v5 }
 0x505   :  { %v13766_v32 = vcombine.high %v2803_v16, %v2807_v55  ;;  %v13765_v58 = vcombine.low %v2803_v16, %v2807_v55  ;;  %v2850_v16 = vld [vmem:[#allocation8 + $0x1490] sm:$0xff] }
 0x506   :  { %9169 = vmatpush1.bf16.msra.mxu0 %v13715_v42  ;;  %v2814_v42 = vld [vmem:[#allocation8 + $0x1370] sm:$0xff] }
 0x507   :  { %9497 = vmatpush1.bf16.msra.mxu1 %v13717_v23  ;;  %9170 = vmatprep.subr.bf16.mxu0 %v13724_v33  ;;  %v2811_v23 = vld [vmem:[#allocation8 + $0x1358] sm:$0xff]  ;;  %v13772_v10 = vcombine.high %v2810_v21, %v2814_v42  ;;  %v2854_v55 = vld [vmem:[#allocation8 + $0x14b0] sm:$0xff] }
 0x508   :  { %9498 = vmatprep.subr.bf16.mxu1 %v13726_v63  ;;  %v2815_v33 = vld [vmem:[#allocation8 + $0x1378] sm:$0xff]  ;;  %v13763_v63 = vcombine.low %v2802_v47, %v2806_v38 }
 0x509   :  { %v13774_v24 = vcombine.high %v2811_v23, %v2815_v33  ;;  %v13773_v28 = vcombine.low %v2811_v23, %v2815_v33  ;;  %v2858_v33 = vld [vmem:[#allocation8 + $0x14d0] sm:$0xff] }
 0x50a   :  { %9171 = vmatpush1.bf16.msra.mxu0 %v13723_v27  ;;  %v2822_v27 = vld [vmem:[#allocation8 + $0x13b0] sm:$0xff] }
 0x50b   :  { %9499 = vmatpush1.bf16.msra.mxu1 %v13725_v12  ;;  %9172 = vmatprep.subr.bf16.mxu0 %v13732_v30  ;;  %v2819_v12 = vld [vmem:[#allocation8 + $0x1398] sm:$0xff]  ;;  %v13780_v44 = vcombine.high %v2818_v20, %v2822_v27 }
 0x50c   :  { %9500 = vmatprep.subr.bf16.mxu1 %v13734_v50  ;;  %v2823_v30 = vld [vmem:[#allocation8 + $0x13b8] sm:$0xff]  ;;  %v13771_v50 = vcombine.low %v2810_v21, %v2814_v42  ;;  %v13812_v42 = vcombine.high %v2850_v16, %v2854_v55 }
 0x50d   :  { %v13782_v18 = vcombine.high %v2819_v12, %v2823_v30  ;;  %v13781_v8 = vcombine.low %v2819_v12, %v2823_v30  ;;  %v2866_v12 = vld [vmem:[#allocation8 + $0x1510] sm:$0xff] }
 0x50e   :  { %9173 = vmatpush1.bf16.msra.mxu0 %v13731_v52  ;;  %v2830_v52 = vld [vmem:[#allocation8 + $0x13f0] sm:$0xff] }
 0x50f   :  { %9501 = vmatpush1.bf16.msra.mxu1 %v13733_v25  ;;  %9174 = vmatprep.subr.bf16.mxu0 %v13740_v7  ;;  %v2827_v25 = vld [vmem:[#allocation8 + $0x13d8] sm:$0xff]  ;;  %v13788_v51 = vcombine.high %v2826_v57, %v2830_v52  ;;  %v2870_v30 = vld [vmem:[#allocation8 + $0x1530] sm:$0xff] }
 0x510   :  { %9502 = vmatprep.subr.bf16.mxu1 %v13742_v43  ;;  %v2831_v7 = vld [vmem:[#allocation8 + $0x13f8] sm:$0xff]  ;;  %v13779_v43 = vcombine.low %v2818_v20, %v2822_v27 }
 0x511   :  { %v13790_v54 = vcombine.high %v2827_v25, %v2831_v7  ;;  %v13789_v4 = vcombine.low %v2827_v25, %v2831_v7  ;;  %v2878_v25 = vld [vmem:[#allocation8 + $0x1570] sm:$0xff]  ;;  %v2875_v7 = vld [vmem:[#allocation8 + $0x1558] sm:$0xff] }
 0x512   :  { %9175 = vmatpush1.bf16.msra.mxu0 %v13739_v0  ;;  %v2838_v0 = vld [vmem:[#allocation8 + $0x1430] sm:$0xff] }
 0x513   :  { %9503 = vmatpush1.bf16.msra.mxu1 %v13741_v2  ;;  %9176 = vmatprep.subr.bf16.mxu0 %v13748_v3  ;;  %v2835_v2 = vld [vmem:[#allocation8 + $0x1418] sm:$0xff]  ;;  %v13796_v5 = vcombine.high %v2834_v60, %v2838_v0 }
 0x514   :  { %9504 = vmatprep.subr.bf16.mxu1 %v13750_v39  ;;  %v2839_v3 = vld [vmem:[#allocation8 + $0x1438] sm:$0xff]  ;;  %v13787_v39 = vcombine.low %v2826_v57, %v2830_v52  ;;  %v2874_v52 = vld [vmem:[#allocation8 + $0x1550] sm:$0xff] }
 0x515   :  { %v13798_v29 = vcombine.high %v2835_v2, %v2839_v3  ;;  %v13797_v47 = vcombine.low %v2835_v2, %v2839_v3  ;;  %v2886_v2 = vld [vmem:[#allocation8 + $0x15b0] sm:$0xff]  ;;  %v2883_v3 = vld [vmem:[#allocation8 + $0x1598] sm:$0xff] }
 0x516   :  { %9177 = vmatpush1.bf16.msra.mxu0 %v13747_v34  ;;  %v2846_v34 = vld [vmem:[#allocation8 + $0x1470] sm:$0xff] }
 0x517   :  { %9505 = vmatpush1.bf16.msra.mxu1 %v13749_v11  ;;  %9178 = vmatprep.subr.bf16.mxu0 %v13756_v45  ;;  %v13795_v11 = vcombine.low %v2834_v60, %v2838_v0  ;;  %v2843_v45 = vld [vmem:[#allocation8 + $0x1458] sm:$0xff]  ;;  %v13804_v38 = vcombine.high %v2842_v9, %v2846_v34  ;;  %v2882_v0 = vld [vmem:[#allocation8 + $0x1590] sm:$0xff] }
 0x518   :  { %9506 = vmatprep.subr.bf16.mxu1 %v13758_v35  ;;  %v2847_v35 = vld [vmem:[#allocation8 + $0x1478] sm:$0xff] }
 0x519   :  { %v13805_v21 = vcombine.low %v2843_v45, %v2847_v35 }
 0x51a   :  { %9179 = vmatpush1.bf16.msra.mxu0 %v13755_v46  ;;  %v13806_v46 = vcombine.high %v2843_v45, %v2847_v35  ;;  %v2891_v45 = vld [vmem:[#allocation8 + $0x15d8] sm:$0xff] }
 0x51b   :  { %9507 = vmatpush1.bf16.msra.mxu1 %v13757_v17  ;;  %9180 = vmatprep.subr.bf16.mxu0 %v13764_v19  ;;  %v2851_v17 = vld [vmem:[#allocation8 + $0x1498] sm:$0xff] }
 0x51c   :  { %9508 = vmatprep.subr.bf16.mxu1 %v13766_v32  ;;  %v2855_v19 = vld [vmem:[#allocation8 + $0x14b8] sm:$0xff]  ;;  %v13803_v32 = vcombine.low %v2842_v9, %v2846_v34  ;;  %v2890_v34 = vld [vmem:[#allocation8 + $0x15d0] sm:$0xff] }
 0x51d   :  { %v13814_v23 = vcombine.high %v2851_v17, %v2855_v19  ;;  %v2895_v35 = vld [vmem:[#allocation8 + $0x15f8] sm:$0xff] }
 0x51e   :  { %9181 = vmatpush1.bf16.msra.mxu0 %v13763_v63  ;;  %v2862_v63 = vld [vmem:[#allocation8 + $0x14f0] sm:$0xff] }
 0x51f   :  { %9509 = vmatpush1.bf16.msra.mxu1 %v13765_v58  ;;  %9182 = vmatprep.subr.bf16.mxu0 %v13772_v10  ;;  %v2859_v58 = vld [vmem:[#allocation8 + $0x14d8] sm:$0xff]  ;;  %v13820_v20 = vcombine.high %v2858_v33, %v2862_v63 }
 0x520   :  { %9510 = vmatprep.subr.bf16.mxu1 %v13774_v24  ;;  %v2863_v10 = vld [vmem:[#allocation8 + $0x14f8] sm:$0xff]  ;;  %v13811_v24 = vcombine.low %v2850_v16, %v2854_v55  ;;  %v13854_v55 = vcombine.high %v2891_v45, %v2895_v35 }
 0x521   :  { %v13822_v27 = vcombine.high %v2859_v58, %v2863_v10 }
 0x522   :  { %9183 = vmatpush1.bf16.msra.mxu0 %v13771_v50  ;;  %v2867_v50 = vld [vmem:[#allocation8 + $0x1518] sm:$0xff] }
 0x523   :  { %9511 = vmatpush1.bf16.msra.mxu1 %v13773_v28  ;;  %9184 = vmatprep.subr.bf16.mxu0 %v13780_v44  ;;  %v2871_v28 = vld [vmem:[#allocation8 + $0x1538] sm:$0xff]  ;;  %v13821_v44 = vcombine.low %v2859_v58, %v2863_v10  ;;  %v2910_v58 = vld [vmem:[#allocation8 + $0x1670] sm:$0xff] }
 0x524   :  { %9512 = vmatprep.subr.bf16.mxu1 %v13782_v18  ;;  %v13828_v18 = vcombine.high %v2866_v12, %v2870_v30  ;;  %v13830_v57 = vcombine.high %v2867_v50, %v2871_v28  ;;  %v2907_v10 = vld [vmem:[#allocation8 + $0x1658] sm:$0xff] }
 0x526   :  { %9185 = vmatpush1.bf16.msra.mxu0 %v13779_v43  ;;  %v2879_v43 = vld [vmem:[#allocation8 + $0x1578] sm:$0xff] }
 0x527   :  { %9513 = vmatpush1.bf16.msra.mxu1 %v13781_v8  ;;  %9186 = vmatprep.subr.bf16.mxu0 %v13788_v51  ;;  %v13827_v8 = vcombine.low %v2866_v12, %v2870_v30  ;;  %v13829_v51 = vcombine.low %v2867_v50, %v2871_v28  ;;  %v13838_v60 = vcombine.high %v2875_v7, %v2879_v43  ;;  %v2914_v30 = vld [vmem:[#allocation8 + $0x1690] sm:$0xff]  ;;  %v2915_v28 = vld [vmem:[#allocation8 + $0x1698] sm:$0xff] }
 0x528   :  { %9514 = vmatprep.subr.bf16.mxu1 %v13790_v54  ;;  %v13836_v54 = vcombine.high %v2874_v52, %v2878_v25  ;;  %v2918_v50 = vld [vmem:[#allocation8 + $0x16b0] sm:$0xff] }
 0x52a   :  { %9187 = vmatpush1.bf16.msra.mxu0 %v13787_v39  ;;  %v2887_v39 = vld [vmem:[#allocation8 + $0x15b8] sm:$0xff] }
 0x52b   :  { %9515 = vmatpush1.bf16.msra.mxu1 %v13789_v4  ;;  %9197 = vmatprep.subr.bf16.mxu0 %v13796_v5  ;;  %v13835_v4 = vcombine.low %v2874_v52, %v2878_v25  ;;  %v13837_v5 = vcombine.low %v2875_v7, %v2879_v43  ;;  %v13846_v9 = vcombine.high %v2883_v3, %v2887_v39  ;;  %v2922_v25 = vld [vmem:[#allocation8 + $0x16d0] sm:$0xff]  ;;  %v2923_v43 = vld [vmem:[#allocation8 + $0x16d8] sm:$0xff] }
 0x52c   :  { %9525 = vmatprep.subr.bf16.mxu1 %v13798_v29  ;;  %v13844_v29 = vcombine.high %v2882_v0, %v2886_v2  ;;  %v2926_v7 = vld [vmem:[#allocation8 + $0x16f0] sm:$0xff] }
 0x52d   :  { %9189 = vmatmul.mubr.bf16.vlgmr.msra.gmra.mrb[20].mxu0 %v16003_v31 }
 0x52e   :  { %9517 = vmatmul.mubr.bf16.vlgmr.msra.gmra.mrb[20].mxu1 %v16003_v31  ;;  %9198 = vmatpush1.bf16.msra.mxu0 %v13795_v11  ;;  %v13813_v31 = vcombine.low %v2851_v17, %v2855_v19  ;;  %v2894_v11 = vld [vmem:[#allocation8 + $0x15f0] sm:$0xff]  ;;  %v2899_v19 = vld [vmem:[#allocation8 + $0x1618] sm:$0xff] }
 0x52f   :  { %9229 = vmatprep.mubr.bf16.mxu0 %v16005_v1  ;;  %9526 = vmatpush1.bf16.msra.mxu1 %v13797_v47  ;;  %v13843_v47 = vcombine.low %v2882_v0, %v2886_v2  ;;  %v13852_v16 = vcombine.high %v2890_v34, %v2894_v11  ;;  %v2902_v17 = vld [vmem:[#allocation8 + $0x1630] sm:$0xff] }
 0x530   :  { %9557 = vmatprep.mubr.bf16.mxu1 %v16005_v1  ;;  %9199 = vmatprep.subr.bf16.mxu0 %v13804_v38  ;;  %v13819_v1 = vcombine.low %v2858_v33, %v2862_v63  ;;  %v13845_v38 = vcombine.low %v2883_v3, %v2887_v39  ;;  %v2906_v63 = vld [vmem:[#allocation8 + $0x1650] sm:$0xff]  ;;  %v2931_v39 = vld [vmem:[#allocation8 + $0x1718] sm:$0xff] }
 0x531   :  { %9527 = vmatprep.subr.bf16.mxu1 %v13806_v46  ;;  %v2898_v46 = vld [vmem:[#allocation8 + $0x1610] sm:$0xff] }
 0x532   :  { %9200 = vmatpush1.bf16.msra.mxu0 %v13803_v32  ;;  %v2903_v32 = vld [vmem:[#allocation8 + $0x1638] sm:$0xff]  ;;  %v2930_v2 = vld [vmem:[#allocation8 + $0x1710] sm:$0xff] }
 0x533   :  { %9528 = vmatpush1.bf16.msra.mxu1 %v13805_v21  ;;  %9201 = vmatprep.subr.bf16.mxu0 %v13812_v42  ;;  %v13851_v21 = vcombine.low %v2890_v34, %v2894_v11  ;;  %v13853_v42 = vcombine.low %v2891_v45, %v2895_v35  ;;  %v13862_v33 = vcombine.high %v2899_v19, %v2903_v32  ;;  %v2934_v3 = vld [vmem:[#allocation8 + $0x1730] sm:$0xff]  ;;  %v2939_v35 = vld [vmem:[#allocation8 + $0x1758] sm:$0xff] }
 0x534   :  { %9529 = vmatprep.subr.bf16.mxu1 %v13814_v23  ;;  %v13860_v23 = vcombine.high %v2898_v46, %v2902_v17  ;;  %v2938_v11 = vld [vmem:[#allocation8 + $0x1750] sm:$0xff] }
 0x535   :  { %v2942_v45 = vld [vmem:[#allocation8 + $0x1770] sm:$0xff] }
 0x536   :  { %9202 = vmatpush1.bf16.msra.mxu0 %v13811_v24  ;;  %v2911_v24 = vld [vmem:[#allocation8 + $0x1678] sm:$0xff] }
 0x537   :  { %9530 = vmatpush1.bf16.msra.mxu1 %v13813_v31  ;;  %9203 = vmatprep.subr.bf16.mxu0 %v13820_v20  ;;  %v13859_v31 = vcombine.low %v2898_v46, %v2902_v17  ;;  %v13861_v20 = vcombine.low %v2899_v19, %v2903_v32  ;;  %v13870_v12 = vcombine.high %v2907_v10, %v2911_v24  ;;  %v2946_v17 = vld [vmem:[#allocation8 + $0x1790] sm:$0xff]  ;;  %v2947_v32 = vld [vmem:[#allocation8 + $0x1798] sm:$0xff] }
 0x538   :  { %9531 = vmatprep.subr.bf16.mxu1 %v13822_v27  ;;  %v13868_v27 = vcombine.high %v2906_v63, %v2910_v58  ;;  %v2950_v19 = vld [vmem:[#allocation8 + $0x17b0] sm:$0xff] }
 0x53a   :  { %9204 = vmatpush1.bf16.msra.mxu0 %v13819_v1  ;;  %v2919_v1 = vld [vmem:[#allocation8 + $0x16b8] sm:$0xff] }
 0x53b   :  { %9532 = vmatpush1.bf16.msra.mxu1 %v13821_v44  ;;  %9205 = vmatprep.subr.bf16.mxu0 %v13828_v18  ;;  %v13867_v44 = vcombine.low %v2906_v63, %v2910_v58  ;;  %v13869_v18 = vcombine.low %v2907_v10, %v2911_v24  ;;  %v13878_v52 = vcombine.high %v2915_v28, %v2919_v1  ;;  %v2954_v58 = vld [vmem:[#allocation8 + $0x17d0] sm:$0xff]  ;;  %v2955_v24 = vld [vmem:[#allocation8 + $0x17d8] sm:$0xff] }
 0x53c   :  { %9533 = vmatprep.subr.bf16.mxu1 %v13830_v57  ;;  %v13876_v57 = vcombine.high %v2914_v30, %v2918_v50  ;;  %v2958_v10 = vld [vmem:[#allocation8 + $0x17f0] sm:$0xff] }
 0x53e   :  { %9206 = vmatpush1.bf16.msra.mxu0 %v13827_v8  ;;  %v2927_v8 = vld [vmem:[#allocation8 + $0x16f8] sm:$0xff] }
 0x53f   :  { %9534 = vmatpush1.bf16.msra.mxu1 %v13829_v51  ;;  %9207 = vmatprep.subr.bf16.mxu0 %v13836_v54  ;;  %v13875_v51 = vcombine.low %v2914_v30, %v2918_v50  ;;  %v13877_v54 = vcombine.low %v2915_v28, %v2919_v1  ;;  %v13886_v0 = vcombine.high %v2923_v43, %v2927_v8  ;;  %v2962_v50 = vld [vmem:[#allocation8 + $0x1810] sm:$0xff]  ;;  %v2963_v1 = vld [vmem:[#allocation8 + $0x1818] sm:$0xff] }
 0x540   :  { %9535 = vmatprep.subr.bf16.mxu1 %v13838_v60  ;;  %v13884_v60 = vcombine.high %v2922_v25, %v2926_v7  ;;  %v2966_v28 = vld [vmem:[#allocation8 + $0x1830] sm:$0xff] }
 0x542   :  { %9208 = vmatpush1.bf16.msra.mxu0 %v13835_v4  ;;  %v2935_v4 = vld [vmem:[#allocation8 + $0x1738] sm:$0xff] }
 0x543   :  { %9536 = vmatpush1.bf16.msra.mxu1 %v13837_v5  ;;  %9209 = vmatprep.subr.bf16.mxu0 %v13844_v29  ;;  %v13883_v5 = vcombine.low %v2922_v25, %v2926_v7  ;;  %v13885_v29 = vcombine.low %v2923_v43, %v2927_v8  ;;  %v13894_v34 = vcombine.high %v2931_v39, %v2935_v4  ;;  %v2970_v7 = vld [vmem:[#allocation8 + $0x1850] sm:$0xff] }
 0x544   :  { %9537 = vmatprep.subr.bf16.mxu1 %v13846_v9  ;;  %v13892_v9 = vcombine.high %v2930_v2, %v2934_v3  ;;  %v2974_v43 = vld [vmem:[#allocation8 + $0x1870] sm:$0xff]  ;;  %v13923_v8 = vcombine.low %v2962_v50, %v2966_v28 }
 0x546   :  { %9210 = vmatpush1.bf16.msra.mxu0 %v13843_v47  ;;  %v2943_v47 = vld [vmem:[#allocation8 + $0x1778] sm:$0xff] }
 0x547   :  { %9538 = vmatpush1.bf16.msra.mxu1 %v13845_v38  ;;  %9211 = vmatprep.subr.bf16.mxu0 %v13852_v16  ;;  %v13891_v38 = vcombine.low %v2930_v2, %v2934_v3  ;;  %v13893_v16 = vcombine.low %v2931_v39, %v2935_v4  ;;  %v13902_v46 = vcombine.high %v2939_v35, %v2943_v47  ;;  %v2978_v2 = vld [vmem:[#allocation8 + $0x1890] sm:$0xff]  ;;  %v2979_v4 = vld [vmem:[#allocation8 + $0x1898] sm:$0xff] }
 0x548   :  { %9539 = vmatprep.subr.bf16.mxu1 %v13854_v55  ;;  %v13900_v55 = vcombine.high %v2938_v11, %v2942_v45  ;;  %v2982_v3 = vld [vmem:[#allocation8 + $0x18b0] sm:$0xff] }
 0x54a   :  { %9212 = vmatpush1.bf16.msra.mxu0 %v13851_v21  ;;  %v2951_v21 = vld [vmem:[#allocation8 + $0x17b8] sm:$0xff] }
 0x54b   :  { %9540 = vmatpush1.bf16.msra.mxu1 %v13853_v42  ;;  %9213 = vmatprep.subr.bf16.mxu0 %v13860_v23  ;;  %v13899_v42 = vcombine.low %v2938_v11, %v2942_v45  ;;  %v13901_v23 = vcombine.low %v2939_v35, %v2943_v47  ;;  %v13910_v63 = vcombine.high %v2947_v32, %v2951_v21  ;;  %v2986_v45 = vld [vmem:[#allocation8 + $0x18d0] sm:$0xff]  ;;  %v2987_v47 = vld [vmem:[#allocation8 + $0x18d8] sm:$0xff] }
 0x54c   :  { %9541 = vmatprep.subr.bf16.mxu1 %v13862_v33  ;;  %v13908_v33 = vcombine.high %v2946_v17, %v2950_v19  ;;  %v2990_v35 = vld [vmem:[#allocation8 + $0x18f0] sm:$0xff] }
 0x54e   :  { %9214 = vmatpush1.bf16.msra.mxu0 %v13859_v31  ;;  %v2959_v31 = vld [vmem:[#allocation8 + $0x17f8] sm:$0xff] }
 0x54f   :  { %9542 = vmatpush1.bf16.msra.mxu1 %v13861_v20  ;;  %9215 = vmatprep.subr.bf16.mxu0 %v13868_v27  ;;  %v13907_v20 = vcombine.low %v2946_v17, %v2950_v19  ;;  %v13909_v27 = vcombine.low %v2947_v32, %v2951_v21  ;;  %v13918_v30 = vcombine.high %v2955_v24, %v2959_v31  ;;  %v2994_v17 = vld [vmem:[#allocation8 + $0x1910] sm:$0xff]  ;;  %v2995_v32 = vld [vmem:[#allocation8 + $0x1918] sm:$0xff] }
 0x550   :  { %9543 = vmatprep.subr.bf16.mxu1 %v13870_v12  ;;  %v13916_v12 = vcombine.high %v2954_v58, %v2958_v10  ;;  %v2998_v19 = vld [vmem:[#allocation8 + $0x1930] sm:$0xff]  ;;  %v2999_v21 = vld [vmem:[#allocation8 + $0x1938] sm:$0xff] }
 0x552   :  { %9216 = vmatpush1.bf16.msra.mxu0 %v13867_v44  ;;  %v2967_v44 = vld [vmem:[#allocation8 + $0x1838] sm:$0xff] }
 0x553   :  { %9544 = vmatpush1.bf16.msra.mxu1 %v13869_v18  ;;  %9217 = vmatprep.subr.bf16.mxu0 %v13876_v57  ;;  %v13915_v18 = vcombine.low %v2954_v58, %v2958_v10  ;;  %v13917_v57 = vcombine.low %v2955_v24, %v2959_v31  ;;  %v13926_v25 = vcombine.high %v2963_v1, %v2967_v44  ;;  %v3006_v58 = vld [vmem:[#allocation8 + $0x1970] sm:$0xff]  ;;  %v3003_v10 = vld [vmem:[#allocation8 + $0x1958] sm:$0xff] }
 0x554   :  { %9545 = vmatprep.subr.bf16.mxu1 %v13878_v52  ;;  %v13924_v52 = vcombine.high %v2962_v50, %v2966_v28  ;;  %v3007_v24 = vld [vmem:[#allocation8 + $0x1978] sm:$0xff]  ;;  %v13955_v31 = vcombine.low %v2994_v17, %v2998_v19  ;;  %v3014_v50 = vld [vmem:[#allocation8 + $0x19b0] sm:$0xff] }
 0x555   :  { %v3011_v28 = vld [vmem:[#allocation8 + $0x1998] sm:$0xff] }
 0x556   :  { %9218 = vmatpush1.bf16.msra.mxu0 %v13875_v51  ;;  %v2971_v51 = vld [vmem:[#allocation8 + $0x1858] sm:$0xff] }
 0x557   :  { %9546 = vmatpush1.bf16.msra.mxu1 %v13877_v54  ;;  %9219 = vmatprep.subr.bf16.mxu0 %v13884_v60  ;;  %v2975_v54 = vld [vmem:[#allocation8 + $0x1878] sm:$0xff]  ;;  %v13925_v60 = vcombine.low %v2963_v1, %v2967_v44 }
 0x558   :  { %9547 = vmatprep.subr.bf16.mxu1 %v13886_v0  ;;  %v13932_v0 = vcombine.high %v2970_v7, %v2974_v43  ;;  %v13934_v39 = vcombine.high %v2971_v51, %v2975_v54  ;;  %v3015_v1 = vld [vmem:[#allocation8 + $0x19b8] sm:$0xff] }
 0x55a   :  { %9220 = vmatpush1.bf16.msra.mxu0 %v13883_v5  ;;  %v2983_v5 = vld [vmem:[#allocation8 + $0x18b8] sm:$0xff] }
 0x55b   :  { %9548 = vmatpush1.bf16.msra.mxu1 %v13885_v29  ;;  %9221 = vmatprep.subr.bf16.mxu0 %v13892_v9  ;;  %v13931_v29 = vcombine.low %v2970_v7, %v2974_v43  ;;  %v13933_v9 = vcombine.low %v2971_v51, %v2975_v54  ;;  %v13942_v11 = vcombine.high %v2979_v4, %v2983_v5  ;;  %v3022_v7 = vld [vmem:[#allocation8 + $0x19f0] sm:$0xff]  ;;  %v3019_v43 = vld [vmem:[#allocation8 + $0x19d8] sm:$0xff] }
 0x55c   :  { %9549 = vmatprep.subr.bf16.mxu1 %v13894_v34  ;;  %v13940_v34 = vcombine.high %v2978_v2, %v2982_v3  ;;  %v13973_v54 = vcombine.low %v3011_v28, %v3015_v1 }
 0x55e   :  { %9222 = vmatpush1.bf16.msra.mxu0 %v13891_v38  ;;  %v2991_v38 = vld [vmem:[#allocation8 + $0x18f8] sm:$0xff] }
 0x55f   :  { %9550 = vmatpush1.bf16.msra.mxu1 %v13893_v16  ;;  %9223 = vmatprep.subr.bf16.mxu0 %v13900_v55  ;;  %v13939_v16 = vcombine.low %v2978_v2, %v2982_v3  ;;  %v13948_v55 = vcombine.high %v2986_v45, %v2990_v35  ;;  %v3026_v2 = vld [vmem:[#allocation8 + $0x1a10] sm:$0xff] }
 0x560   :  { %9551 = vmatprep.subr.bf16.mxu1 %v13902_v46  ;;  %v13950_v46 = vcombine.high %v2987_v47, %v2991_v38  ;;  %v3030_v3 = vld [vmem:[#allocation8 + $0x1a30] sm:$0xff] }
 0x562   :  { %9224 = vmatpush1.bf16.msra.mxu0 %v13899_v42  ;;  %v13949_v42 = vcombine.low %v2987_v47, %v2991_v38  ;;  %v3039_v47 = vld [vmem:[#allocation8 + $0x1a78] sm:$0xff]  ;;  %v13987_v38 = vcombine.low %v3026_v2, %v3030_v3 }
 0x563   :  { %9552 = vmatpush1.bf16.msra.mxu1 %v13901_v23  ;;  %9225 = vmatprep.subr.bf16.mxu0 %v13908_v33  ;;  %v13956_v23 = vcombine.high %v2994_v17, %v2998_v19  ;;  %v13958_v33 = vcombine.high %v2995_v32, %v2999_v21  ;;  %v3042_v17 = vld [vmem:[#allocation8 + $0x1a90] sm:$0xff] }
 0x564   :  { %9553 = vmatprep.subr.bf16.mxu1 %v13910_v63  ;;  %v3002_v63 = vld [vmem:[#allocation8 + $0x1950] sm:$0xff] }
 0x565   :  { %v13963_v44 = vcombine.low %v3002_v63, %v3006_v58  ;;  %v3046_v19 = vld [vmem:[#allocation8 + $0x1ab0] sm:$0xff] }
 0x566   :  { %9226 = vmatpush1.bf16.msra.mxu0 %v13907_v20  ;;  %v13957_v20 = vcombine.low %v2995_v32, %v2999_v21  ;;  %v3043_v32 = vld [vmem:[#allocation8 + $0x1a98] sm:$0xff] }
 0x567   :  { %9554 = vmatpush1.bf16.msra.mxu1 %v13909_v27  ;;  %9227 = vmatprep.subr.bf16.mxu0 %v13916_v12  ;;  %v13964_v27 = vcombine.high %v3002_v63, %v3006_v58  ;;  %v13966_v12 = vcombine.high %v3003_v10, %v3007_v24  ;;  %v3047_v21 = vld [vmem:[#allocation8 + $0x1ab8] sm:$0xff]  ;;  %v3050_v58 = vld [vmem:[#allocation8 + $0x1ad0] sm:$0xff] }
 0x568   :  { %9555 = vmatprep.subr.bf16.mxu1 %v13918_v30  ;;  %v3010_v30 = vld [vmem:[#allocation8 + $0x1990] sm:$0xff]  ;;  %v14006_v63 = vcombine.high %v3043_v32, %v3047_v21 }
 0x569   :  { %v13971_v51 = vcombine.low %v3010_v30, %v3014_v50 }
 0x56a   :  { %9228 = vmatpush1.bf16.msra.mxu0 %v13915_v18  ;;  %v13965_v18 = vcombine.low %v3003_v10, %v3007_v24  ;;  %v3054_v10 = vld [vmem:[#allocation8 + $0x1af0] sm:$0xff]  ;;  %v3051_v24 = vld [vmem:[#allocation8 + $0x1ad8] sm:$0xff] }
 0x56b   :  { %9556 = vmatpush1.bf16.msra.mxu1 %v13917_v57  ;;  %9238 = vmatprep.subr.bf16.mxu0 %v13924_v52  ;;  %v13972_v57 = vcombine.high %v3010_v30, %v3014_v50  ;;  %v13974_v52 = vcombine.high %v3011_v28, %v3015_v1  ;;  %v3058_v28 = vld [vmem:[#allocation8 + $0x1b10] sm:$0xff] }
 0x56c   :  { %9566 = vmatprep.subr.bf16.mxu1 %v13926_v25  ;;  %v3018_v25 = vld [vmem:[#allocation8 + $0x19d0] sm:$0xff] }
 0x56d   :  { %9230 = vmatmul.mubr.bf16.vlgmr.msra.gmra.mrb[20].mxu0 %v16017_v49  ;;  %v3062_v1 = vld [vmem:[#allocation8 + $0x1b30] sm:$0xff] }
 0x56e   :  { %9558 = vmatmul.mubr.bf16.vlgmr.msra.gmra.mrb[20].mxu1 %v16017_v49  ;;  %9239 = vmatpush1.bf16.msra.mxu0 %v13923_v8  ;;  %v13941_v49 = vcombine.low %v2979_v4, %v2983_v5  ;;  %v3023_v8 = vld [vmem:[#allocation8 + $0x19f8] sm:$0xff]  ;;  %v13979_v5 = vcombine.low %v3018_v25, %v3022_v7 }
 0x56f   :  { %9270 = vmatprep.mubr.bf16.mxu0 %v16019_v6  ;;  %9567 = vmatpush1.bf16.msra.mxu1 %v13925_v60  ;;  %v13980_v60 = vcombine.high %v3018_v25, %v3022_v7  ;;  %v3031_v4 = vld [vmem:[#allocation8 + $0x1a38] sm:$0xff]  ;;  %v14020_v25 = vcombine.high %v3058_v28, %v3062_v1 }
 0x570   :  { %9598 = vmatprep.mubr.bf16.mxu1 %v16019_v6  ;;  %9240 = vmatprep.subr.bf16.mxu0 %v13932_v0  ;;  %v13947_v6 = vcombine.low %v2986_v45, %v2990_v35  ;;  %v13982_v0 = vcombine.high %v3019_v43, %v3023_v8  ;;  %v3038_v45 = vld [vmem:[#allocation8 + $0x1a70] sm:$0xff]  ;;  %v3035_v35 = vld [vmem:[#allocation8 + $0x1a58] sm:$0xff] }
 0x571   :  { %9568 = vmatprep.subr.bf16.mxu1 %v13934_v39  ;;  %v3027_v39 = vld [vmem:[#allocation8 + $0x1a18] sm:$0xff] }
 0x572   :  { %9241 = vmatpush1.bf16.msra.mxu0 %v13931_v29  ;;  %v13981_v29 = vcombine.low %v3019_v43, %v3023_v8  ;;  %v3066_v8 = vld [vmem:[#allocation8 + $0x1b50] sm:$0xff] }
 0x573   :  { %9569 = vmatpush1.bf16.msra.mxu1 %v13933_v9  ;;  %9242 = vmatprep.subr.bf16.mxu0 %v13940_v34  ;;  %v13988_v9 = vcombine.high %v3026_v2, %v3030_v3  ;;  %v13990_v34 = vcombine.high %v3027_v39, %v3031_v4 }
 0x574   :  { %9570 = vmatprep.subr.bf16.mxu1 %v13942_v11  ;;  %v3034_v11 = vld [vmem:[#allocation8 + $0x1a50] sm:$0xff] }
 0x576   :  { %9243 = vmatpush1.bf16.msra.mxu0 %v13939_v16  ;;  %v13989_v16 = vcombine.low %v3027_v39, %v3031_v4 }
 0x577   :  { %9571 = vmatpush1.bf16.msra.mxu1 %v13941_v49  ;;  %9244 = vmatprep.subr.bf16.mxu0 %v13948_v55  ;;  %v13996_v49 = vcombine.high %v3034_v11, %v3038_v45  ;;  %v9656_v55 = vrot.slane %v16067_v36, 4 }
 0x578   :  { %9572 = vmatprep.subr.bf16.mxu1 %v13950_v46  ;;  %v13998_v46 = vcombine.high %v3035_v35, %v3039_v47 }
 0x57a   :  { %9245 = vmatpush1.bf16.msra.mxu0 %v13947_v6  ;;  %v13995_v6 = vcombine.low %v3034_v11, %v3038_v45 }
 0x57b   :  { %9573 = vmatpush1.bf16.msra.mxu1 %v13949_v42  ;;  %9246 = vmatprep.subr.bf16.mxu0 %v13956_v23  ;;  %v13997_v42 = vcombine.low %v3035_v35, %v3039_v47  ;;  %v14004_v23 = vcombine.high %v3042_v17, %v3046_v19 }
 0x57c   :  { %9574 = vmatprep.subr.bf16.mxu1 %v13958_v33  ;;  %v9657_v33 = vadd.f32 %v9656_v55, %v16067_v36  ;;  %v3083_v55 = vld [vmem:[#allocation8 + $0x1bd8] sm:$0xff] }
 0x57e   :  { %9247 = vmatpush1.bf16.msra.mxu0 %v13955_v31  ;;  %v3055_v31 = vld [vmem:[#allocation8 + $0x1af8] sm:$0xff]  ;;  %v9658_v30 = vrot.slane %v9657_v33, 2 }
 0x57f   :  { %9575 = vmatpush1.bf16.msra.mxu1 %v13957_v20  ;;  %9248 = vmatprep.subr.bf16.mxu0 %v13964_v27  ;;  %v14003_v20 = vcombine.low %v3042_v17, %v3046_v19  ;;  %v14005_v27 = vcombine.low %v3043_v32, %v3047_v21  ;;  %v14014_v50 = vcombine.high %v3051_v24, %v3055_v31 }
 0x580   :  { %9576 = vmatprep.subr.bf16.mxu1 %v13966_v12  ;;  %v14012_v12 = vcombine.high %v3050_v58, %v3054_v10  ;;  %v9659_v7 = vadd.f32 %v9658_v30, %v9657_v33  ;;  %v3091_v33 = vld [vmem:[#allocation8 + $0x1c18] sm:$0xff] }
 0x582   :  { %9249 = vmatpush1.bf16.msra.mxu0 %v13963_v44  ;;  %v3059_v44 = vld [vmem:[#allocation8 + $0x1b18] sm:$0xff]  ;;  %v9660_v39 = vrot.slane %v9659_v7, 1 }
 0x583   :  { %9577 = vmatpush1.bf16.msra.mxu1 %v13965_v18  ;;  %9250 = vmatprep.subr.bf16.mxu0 %v13972_v57  ;;  %v3063_v18 = vld [vmem:[#allocation8 + $0x1b38] sm:$0xff]  ;;  %v14011_v57 = vcombine.low %v3050_v58, %v3054_v10 }
 0x584   :  { %9578 = vmatprep.subr.bf16.mxu1 %v13974_v52  ;;  %v14013_v52 = vcombine.low %v3051_v24, %v3055_v31  ;;  %v14022_v43 = vcombine.high %v3059_v44, %v3063_v18  ;;  %v14021_v2 = vcombine.low %v3059_v44, %v3063_v18  ;;  %v9661_v47 = vadd.f32 %v9660_v39, %v9659_v7  ;;  %v3111_v7 = vld [vmem:[#allocation8 + $0x1cb8] sm:$0xff] }
 0x585   :  { %v3119_v39 = vld [vmem:[#allocation8 + $0x1cf8] sm:$0xff] }
 0x586   :  { %9251 = vmatpush1.bf16.msra.mxu0 %v13971_v51  ;;  %v3070_v51 = vld [vmem:[#allocation8 + $0x1b70] sm:$0xff]  ;;  %v9700_v21 = vmul.f32 0.125, %v9661_v47 }
 0x587   :  { %9579 = vmatpush1.bf16.msra.mxu1 %v13973_v54  ;;  %9252 = vmatprep.subr.bf16.mxu0 %v13980_v60  ;;  %v3067_v54 = vld [vmem:[#allocation8 + $0x1b58] sm:$0xff]  ;;  %v14028_v3 = vcombine.high %v3066_v8, %v3070_v51  ;;  %v14027_v11 = vcombine.low %v3066_v8, %v3070_v51 }
 0x588   :  { %9580 = vmatprep.subr.bf16.mxu1 %v13982_v0  ;;  %v3071_v60 = vld [vmem:[#allocation8 + $0x1b78] sm:$0xff]  ;;  %v14019_v0 = vcombine.low %v3058_v28, %v3062_v1  ;;  %v16135_v31 = vsub.f32 %v16067_v36, %v9700_v21 }
 0x589   :  { %v14030_v4 = vcombine.high %v3067_v54, %v3071_v60  ;;  %v14029_v45 = vcombine.low %v3067_v54, %v3071_v60  ;;  %v3103_v28 = vld [vmem:[#allocation8 + $0x1c78] sm:$0xff] }
 0x58a   :  { %9253 = vmatpush1.bf16.msra.mxu0 %v13979_v5  ;;  %v3074_v5 = vld [vmem:[#allocation8 + $0x1b90] sm:$0xff]  ;;  %v9716_v44 = vmul.f32 %v16135_v31, %v16135_v31 }
 0x58b   :  { %9581 = vmatpush1.bf16.msra.mxu1 %v13981_v29  ;;  %9254 = vmatprep.subr.bf16.mxu0 %v13988_v9  ;;  %v3078_v29 = vld [vmem:[#allocation8 + $0x1bb0] sm:$0xff]  ;;  %v3075_v9 = vld [vmem:[#allocation8 + $0x1b98] sm:$0xff] }
 0x58c   :  { %9582 = vmatprep.subr.bf16.mxu1 %v13990_v34  ;;  %v3079_v34 = vld [vmem:[#allocation8 + $0x1bb8] sm:$0xff]  ;;  %v14036_v35 = vcombine.high %v3074_v5, %v3078_v29  ;;  %v14035_v17 = vcombine.low %v3074_v5, %v3078_v29  ;;  %v9729_v54 = vrot.slane %v9716_v44, 4 }
 0x58d   :  { %v14037_v19 = vcombine.low %v3075_v9, %v3079_v34 }
 0x58e   :  { %9255 = vmatpush1.bf16.msra.mxu0 %v13987_v38  ;;  %v14038_v38 = vcombine.high %v3075_v9, %v3079_v34  ;;  %v9730_v29 = vadd.f32 %v9729_v54, %v9716_v44  ;;  %v3122_v34 = vld [vmem:[#allocation8 + $0x1d10] sm:$0xff]  ;;  %v3151_v44 = vld [vmem:[#allocation8 + $0x1df8] sm:$0xff] }
 0x58f   :  { %9583 = vmatpush1.bf16.msra.mxu1 %v13989_v16  ;;  %9256 = vmatprep.subr.bf16.mxu0 %v13996_v49  ;;  %v3082_v16 = vld [vmem:[#allocation8 + $0x1bd0] sm:$0xff] }
 0x590   :  { %9584 = vmatprep.subr.bf16.mxu1 %v13998_v46  ;;  %v3086_v49 = vld [vmem:[#allocation8 + $0x1bf0] sm:$0xff]  ;;  %v3087_v46 = vld [vmem:[#allocation8 + $0x1bf8] sm:$0xff] }
 0x591   :  { %v14044_v32 = vcombine.high %v3082_v16, %v3086_v49  ;;  %v14043_v58 = vcombine.low %v3082_v16, %v3086_v49  ;;  %v14045_v10 = vcombine.low %v3083_v55, %v3087_v46  ;;  %v9731_v16 = vrot.slane %v9730_v29, 2 }
 0x592   :  { %9257 = vmatpush1.bf16.msra.mxu0 %v13995_v6  ;;  %v14046_v6 = vcombine.high %v3083_v55, %v3087_v46  ;;  %v3130_v55 = vld [vmem:[#allocation8 + $0x1d50] sm:$0xff] }
 0x593   :  { %9585 = vmatpush1.bf16.msra.mxu1 %v13997_v42  ;;  %9258 = vmatprep.subr.bf16.mxu0 %v14004_v23  ;;  %v3090_v42 = vld [vmem:[#allocation8 + $0x1c10] sm:$0xff] }
 0x594   :  { %9586 = vmatprep.subr.bf16.mxu1 %v14006_v63  ;;  %v3094_v23 = vld [vmem:[#allocation8 + $0x1c30] sm:$0xff]  ;;  %v3095_v63 = vld [vmem:[#allocation8 + $0x1c38] sm:$0xff] }
 0x595   :  { %v14052_v24 = vcombine.high %v3090_v42, %v3094_v23  ;;  %v14051_v30 = vcombine.low %v3090_v42, %v3094_v23  ;;  %v14053_v1 = vcombine.low %v3091_v33, %v3095_v63  ;;  %v3134_v46 = vld [vmem:[#allocation8 + $0x1d70] sm:$0xff]  ;;  %v9732_v42 = vadd.f32 %v9731_v16, %v9730_v29 }
 0x596   :  { %9259 = vmatpush1.bf16.msra.mxu0 %v14003_v20  ;;  %v14054_v20 = vcombine.high %v3091_v33, %v3095_v63  ;;  %v3138_v33 = vld [vmem:[#allocation8 + $0x1d90] sm:$0xff] }
 0x597   :  { %9587 = vmatpush1.bf16.msra.mxu1 %v14005_v27  ;;  %9260 = vmatprep.subr.bf16.mxu0 %v14012_v12  ;;  %v3098_v27 = vld [vmem:[#allocation8 + $0x1c50] sm:$0xff] }
 0x598   :  { %9588 = vmatprep.subr.bf16.mxu1 %v14014_v50  ;;  %v3102_v12 = vld [vmem:[#allocation8 + $0x1c70] sm:$0xff]  ;;  %v3099_v50 = vld [vmem:[#allocation8 + $0x1c58] sm:$0xff] }
 0x599   :  { %v14060_v18 = vcombine.high %v3098_v27, %v3102_v12  ;;  %v14062_v36 = vcombine.high %v3099_v50, %v3103_v28  ;;  %v14061_v8 = vcombine.low %v3099_v50, %v3103_v28  ;;  %v3142_v63 = vld [vmem:[#allocation8 + $0x1db0] sm:$0xff] }
 0x59a   :  { %9261 = vmatpush1.bf16.msra.mxu0 %v14011_v57  ;;  %v3106_v57 = vld [vmem:[#allocation8 + $0x1c90] sm:$0xff] }
 0x59b   :  { %9589 = vmatpush1.bf16.msra.mxu1 %v14013_v52  ;;  %9262 = vmatprep.subr.bf16.mxu0 %v14020_v25  ;;  %v3110_v52 = vld [vmem:[#allocation8 + $0x1cb0] sm:$0xff]  ;;  %v3107_v25 = vld [vmem:[#allocation8 + $0x1c98] sm:$0xff] }
 0x59c   :  { %9590 = vmatprep.subr.bf16.mxu1 %v14022_v43  ;;  %v14059_v43 = vcombine.low %v3098_v27, %v3102_v12  ;;  %v14068_v51 = vcombine.high %v3106_v57, %v3110_v52  ;;  %v14070_v60 = vcombine.high %v3107_v25, %v3111_v7  ;;  %v14100_v27 = vcombine.high %v3138_v33, %v3142_v63  ;;  %v3146_v50 = vld [vmem:[#allocation8 + $0x1dd0] sm:$0xff] }
 0x59d   :  { %v9733_v12 = vrot.slane %v9732_v42, 1  ;;  %v3150_v28 = vld [vmem:[#allocation8 + $0x1df0] sm:$0xff] }
 0x59e   :  { %9263 = vmatpush1.bf16.msra.mxu0 %v14019_v0  ;;  %v3114_v0 = vld [vmem:[#allocation8 + $0x1cd0] sm:$0xff]  ;;  %v14107_v54 = vcombine.low %v3146_v50, %v3150_v28 }
 0x59f   :  { %9591 = vmatpush1.bf16.msra.mxu1 %v14021_v2  ;;  %9264 = vmatprep.subr.bf16.mxu0 %v14028_v3  ;;  %v3118_v2 = vld [vmem:[#allocation8 + $0x1cf0] sm:$0xff]  ;;  %v3115_v3 = vld [vmem:[#allocation8 + $0x1cd8] sm:$0xff] }
 0x5a0   :  { %9592 = vmatprep.subr.bf16.mxu1 %v14030_v4  ;;  %v14067_v4 = vcombine.low %v3106_v57, %v3110_v52  ;;  %v14076_v5 = vcombine.high %v3114_v0, %v3118_v2  ;;  %v14078_v9 = vcombine.high %v3115_v3, %v3119_v39  ;;  %v14077_v47 = vcombine.low %v3115_v3, %v3119_v39  ;;  %v3162_v39 = vld [vmem:[#allocation8 + $0x1e50] sm:$0xff] }
 0x5a1   :  { %v14108_v52 = vcombine.high %v3146_v50, %v3150_v28  ;;  %v3194_v50 = vld [vmem:[#allocation8 + $0x1f50] sm:$0xff] }
 0x5a2   :  { %9265 = vmatpush1.bf16.msra.mxu0 %v14027_v11  ;;  %v3126_v11 = vld [vmem:[#allocation8 + $0x1d30] sm:$0xff] }
 0x5a3   :  { %9593 = vmatpush1.bf16.msra.mxu1 %v14029_v45  ;;  %9266 = vmatprep.subr.bf16.mxu0 %v14036_v35  ;;  %v3123_v45 = vld [vmem:[#allocation8 + $0x1d18] sm:$0xff]  ;;  %v14075_v35 = vcombine.low %v3114_v0, %v3118_v2  ;;  %v3198_v28 = vld [vmem:[#allocation8 + $0x1f70] sm:$0xff] }
 0x5a4   :  { %9594 = vmatprep.subr.bf16.mxu1 %v14038_v38  ;;  %v14084_v38 = vcombine.high %v3122_v34, %v3126_v11 }
 0x5a6   :  { %9267 = vmatpush1.bf16.msra.mxu0 %v14035_v17  ;;  %v3131_v17 = vld [vmem:[#allocation8 + $0x1d58] sm:$0xff] }
 0x5a7   :  { %9595 = vmatpush1.bf16.msra.mxu1 %v14037_v19  ;;  %9268 = vmatprep.subr.bf16.mxu0 %v14044_v32  ;;  %v3135_v19 = vld [vmem:[#allocation8 + $0x1d78] sm:$0xff]  ;;  %v14083_v32 = vcombine.low %v3122_v34, %v3126_v11 }
 0x5a8   :  { %9596 = vmatprep.subr.bf16.mxu1 %v14046_v6  ;;  %v14092_v6 = vcombine.high %v3130_v55, %v3134_v46  ;;  %v14094_v23 = vcombine.high %v3131_v17, %v3135_v19 }
 0x5aa   :  { %9269 = vmatpush1.bf16.msra.mxu0 %v14043_v58  ;;  %v3139_v58 = vld [vmem:[#allocation8 + $0x1d98] sm:$0xff] }
 0x5ab   :  { %9597 = vmatpush1.bf16.msra.mxu1 %v14045_v10  ;;  %9279 = vmatprep.subr.bf16.mxu0 %v14052_v24  ;;  %v3143_v10 = vld [vmem:[#allocation8 + $0x1db8] sm:$0xff]  ;;  %v14091_v24 = vcombine.low %v3130_v55, %v3134_v46 }
 0x5ac   :  { %9607 = vmatprep.subr.bf16.mxu1 %v14054_v20  ;;  %v14093_v20 = vcombine.low %v3131_v17, %v3135_v19  ;;  %v14101_v57 = vcombine.low %v3139_v58, %v3143_v10  ;;  %v3178_v17 = vld [vmem:[#allocation8 + $0x1ed0] sm:$0xff] }
 0x5ad   :  { %9271 = vmatmul.mubr.bf16.vlgmr.msra.gmra.mrb[20].mxu0 %v16033_v26  ;;  %v3182_v19 = vld [vmem:[#allocation8 + $0x1ef0] sm:$0xff] }
 0x5ae   :  { %9599 = vmatmul.mubr.bf16.vlgmr.msra.gmra.mrb[20].mxu1 %v16033_v26  ;;  %9280 = vmatpush1.bf16.msra.mxu0 %v14051_v30  ;;  %v14069_v26 = vcombine.low %v3107_v25, %v3111_v7  ;;  %v14102_v30 = vcombine.high %v3139_v58, %v3143_v10  ;;  %v3154_v7 = vld [vmem:[#allocation8 + $0x1e10] sm:$0xff]  ;;  %v3187_v10 = vld [vmem:[#allocation8 + $0x1f18] sm:$0xff] }
 0x5af   :  { %9311 = vmatprep.mubr.bf16.mxu0 %v16035_v61  ;;  %9608 = vmatpush1.bf16.msra.mxu1 %v14053_v1  ;;  %v3147_v1 = vld [vmem:[#allocation8 + $0x1dd8] sm:$0xff]  ;;  %v3190_v58 = vld [vmem:[#allocation8 + $0x1f30] sm:$0xff] }
 0x5b0   :  { %9639 = vmatprep.mubr.bf16.mxu1 %v16035_v61  ;;  %9281 = vmatprep.subr.bf16.mxu0 %v14060_v18  ;;  %v3127_v61 = vld [vmem:[#allocation8 + $0x1d38] sm:$0xff]  ;;  %v14099_v18 = vcombine.low %v3138_v33, %v3142_v63  ;;  %v14110_v25 = vcombine.high %v3147_v1, %v3151_v44  ;;  %v3186_v63 = vld [vmem:[#allocation8 + $0x1f10] sm:$0xff] }
 0x5b1   :  { %9609 = vmatprep.subr.bf16.mxu1 %v14062_v36  ;;  %v14086_v49 = vcombine.high %v3123_v45, %v3127_v61  ;;  %v14085_v21 = vcombine.low %v3123_v45, %v3127_v61  ;;  %v9734_v36 = vadd.f32 %v9733_v12, %v9732_v42  ;;  %v3170_v61 = vld [vmem:[#allocation8 + $0x1e90] sm:$0xff]  ;;  %v14148_v12 = vcombine.high %v3186_v63, %v3190_v58 }
 0x5b2   :  { %9282 = vmatpush1.bf16.msra.mxu0 %v14059_v43  ;;  %v3158_v43 = vld [vmem:[#allocation8 + $0x1e30] sm:$0xff] }
 0x5b3   :  { %9610 = vmatpush1.bf16.msra.mxu1 %v14061_v8  ;;  %9283 = vmatprep.subr.bf16.mxu0 %v14068_v51  ;;  %v3155_v8 = vld [vmem:[#allocation8 + $0x1e18] sm:$0xff]  ;;  %v14116_v0 = vcombine.high %v3154_v7, %v3158_v43  ;;  %v9772_v2 = vmul.f32 0.125, %v9734_v36  ;;  %v14115_v29 = vcombine.low %v3154_v7, %v3158_v43  ;;  %v14147_v36 = vcombine.low %v3186_v63, %v3190_v58  ;;  %v14750_v58 = vld [vmem:[#allocation11 + $0x44] ss:$16 sps:$4 sm:$0xff]  }
 0x5b4   :  { %9611 = vmatprep.subr.bf16.mxu1 %v14070_v60  ;;  %v3159_v51 = vld [vmem:[#allocation8 + $0x1e38] sm:$0xff]  ;;  %v14109_v60 = vcombine.low %v3147_v1, %v3151_v44  ;;  %v14156_v7 = vcombine.high %v3194_v50, %v3198_v28 }
 0x5b5   :  { %v14118_v3 = vcombine.high %v3155_v8, %v3159_v51  ;;  %v9780_v11 = vadd.f32 1e-05, %v9772_v2  ;;  %v3195_v1 = vld [vmem:[#allocation8 + $0x1f58] sm:$0xff] }
 0x5b6   :  { %9284 = vmatpush1.bf16.msra.mxu0 %v14067_v4  ;;  %v3166_v4 = vld [vmem:[#allocation8 + $0x1e70] sm:$0xff]  ;;  %v3199_v44 = vld [vmem:[#allocation8 + $0x1f78] sm:$0xff] }
 0x5b7   :  { %9612 = vmatpush1.bf16.msra.mxu1 %v14069_v26  ;;  %9285 = vmatprep.subr.bf16.mxu0 %v14076_v5  ;;  %v3163_v26 = vld [vmem:[#allocation8 + $0x1e58] sm:$0xff]  ;;  %v14124_v34 = vcombine.high %v3162_v39, %v3166_v4  ;;  %v14123_v16 = vcombine.low %v3162_v39, %v3166_v4  ;;  %15246 = vrsqrt.f32 %v9780_v11  ;;  %v14158_v43 = vcombine.high %v3195_v1, %v3199_v44 }
 0x5b8   :  { %9613 = vmatprep.subr.bf16.mxu1 %v14078_v9  ;;  %v3167_v5 = vld [vmem:[#allocation8 + $0x1e78] sm:$0xff]  ;;  %v14117_v9 = vcombine.low %v3155_v8, %v3159_v51  ;;  %v3202_v8 = vld [vmem:[#allocation8 + $0x1f90] sm:$0xff]  ;;  %v14155_v39 = vcombine.low %v3194_v50, %v3198_v28  ;;  %v14157_v4 = vcombine.low %v3195_v1, %v3199_v44 }
 0x5b9   :  { %v14126_v45 = vcombine.high %v3163_v26, %v3167_v5  ;;  %v3206_v51 = vld [vmem:[#allocation8 + $0x1fb0] sm:$0xff]  ;;  %v3215_v11 = vld [vmem:[#allocation8 + $0x1ff8] sm:$0xff] }
 0x5ba   :  { %9286 = vmatpush1.bf16.msra.mxu0 %v14075_v35  ;;  %v3174_v35 = vld [vmem:[#allocation8 + $0x1eb0] sm:$0xff]  ;;  %v14745_v63 = vld [vmem:[#allocation11 + $0x28] ss:$16 sps:$4 sm:$0xff]   ;;  %v14765_v28 = vld [vmem:[#allocation11 + $0x8c] ss:$16 sps:$4 sm:$0xff]  }
 0x5bb   :  { %9614 = vmatpush1.bf16.msra.mxu1 %v14077_v47  ;;  %9287 = vmatprep.subr.bf16.mxu0 %v14084_v38  ;;  %v3171_v47 = vld [vmem:[#allocation8 + $0x1e98] sm:$0xff]  ;;  %v14132_v55 = vcombine.high %v3170_v61, %v3174_v35  ;;  %v14762_v50 = vld [vmem:[#allocation11 + $0x84] ss:$16 sps:$4 sm:$0xff]   ;;  %v14760_v1 = vld [vmem:[#allocation11 + $0x80] ss:$16 sps:$4 sm:$0xff]  }
 0x5bc   :  { %9615 = vmatprep.subr.bf16.mxu1 %v14086_v49  ;;  %v3175_v38 = vld [vmem:[#allocation8 + $0x1eb8] sm:$0xff]  ;;  %v14125_v49 = vcombine.low %v3163_v26, %v3167_v5  ;;  %v14164_v26 = vcombine.high %v3202_v8, %v3206_v51 }
 0x5bd   :  { %v14134_v46 = vcombine.high %v3171_v47, %v3175_v38  ;;  %v14133_v42 = vcombine.low %v3171_v47, %v3175_v38  ;;  %v14763_v44 = vld [vmem:[#allocation11 + $0x88] ss:$16 sps:$4 sm:$0xff]  }
 0x5be   :  { %9288 = vmatpush1.bf16.msra.mxu0 %v14083_v32  ;;  %v3179_v32 = vld [vmem:[#allocation8 + $0x1ed8] sm:$0xff] }
 0x5bf   :  { %9616 = vmatpush1.bf16.msra.mxu1 %v14085_v21  ;;  %9289 = vmatprep.subr.bf16.mxu0 %v14092_v6  ;;  %v3183_v21 = vld [vmem:[#allocation8 + $0x1ef8] sm:$0xff]  ;;  %v14131_v6 = vcombine.low %v3170_v61, %v3174_v35  ;;  %v14163_v61 = vcombine.low %v3202_v8, %v3206_v51  ;;  %v14780_v51 = vld [vmem:[#allocation11 + $0xe4] ss:$16 sps:$4 sm:$0xff]  }
 0x5c0   :  { %9617 = vmatprep.subr.bf16.mxu1 %v14094_v23  ;;  %v14140_v23 = vcombine.high %v3178_v17, %v3182_v19  ;;  %v14142_v33 = vcombine.high %v3179_v32, %v3183_v21  ;;  %v14775_v8 = vld [vmem:[#allocation11 + $0xc8] ss:$16 sps:$4 sm:$0xff]  }
 0x5c2   :  { %9290 = vmatpush1.bf16.msra.mxu0 %v14091_v24  ;;  %v3191_v24 = vld [vmem:[#allocation8 + $0x1f38] sm:$0xff] }
 0x5c3   :  { %9618 = vmatpush1.bf16.msra.mxu1 %v14093_v20  ;;  %9291 = vmatprep.subr.bf16.mxu0 %v14100_v27  ;;  %v14139_v20 = vcombine.low %v3178_v17, %v3182_v19  ;;  %v14141_v27 = vcombine.low %v3179_v32, %v3183_v21  ;;  %v14741_v17 = vld [vmem:[#allocation11 + $0xc] ss:$16 sps:$4 sm:$0xff]   ;;  %v14736_v32 = vld [vmem:[#allocation11] ss:$16 sps:$4 sm:$0xff]   ;;  %v14739_v21 = vld [vmem:[#allocation11 + $0x8] ss:$16 sps:$4 sm:$0xff]  }
 0x5c4   :  { %9619 = vmatprep.subr.bf16.mxu1 %v14102_v30  ;;  %v14150_v30 = vcombine.high %v3187_v10, %v3191_v24 }
 0x5c6   :  { %9292 = vmatpush1.bf16.msra.mxu0 %v14099_v18  ;;  %v15272_v18 = vld [vmem:[#allocation10] sm:$0xff] }
 0x5c7   :  { %9620 = vmatpush1.bf16.msra.mxu1 %v14101_v57  ;;  %9293 = vmatprep.subr.bf16.mxu0 %v14108_v52  ;;  %v9812_v57 = vrot.slane %v15272_v18, %v15921_v53  ;;  %v15247_v52 = vpop.eup %15246 }
 0x5c8   :  { %9621 = vmatprep.subr.bf16.mxu1 %v14110_v25  ;;  %v14149_v25 = vcombine.low %v3187_v10, %v3191_v24  ;;  %v14753_v10 = vld [vmem:[#allocation11 + $0x4c] ss:$16 sps:$4 sm:$0xff]   ;;  %v14748_v24 = vld [vmem:[#allocation11 + $0x40] ss:$16 sps:$4 sm:$0xff]  }
 0x5c9   :  { %v9852_v2 = vrot.slane %v9812_v57, %v15893_v15  ;;  %v14771_v57 = vld [vmem:[#allocation11 + $0xac] ss:$16 sps:$4 sm:$0xff]  }
 0x5ca   :  { %9294 = vmatpush1.bf16.msra.mxu0 %v14107_v54  ;;  %v9796_v54 = vmul.f32 %v15247_v52, %v16135_v31  ;;  %v14766_v52 = vld [vmem:[#allocation11 + $0xa0] ss:$16 sps:$4 sm:$0xff]  }
 0x5cb   :  { %9622 = vmatpush1.bf16.msra.mxu1 %v14109_v60  ;;  %9295 = vmatprep.subr.bf16.mxu0 %v14116_v0  ;;  %v3203_v60 = vld [vmem:[#allocation8 + $0x1f98] sm:$0xff] }
 0x5cc   :  { %9623 = vmatprep.subr.bf16.mxu1 %v14118_v3  ;;  %v3207_v0 = vld [vmem:[#allocation8 + $0x1fb8] sm:$0xff]  ;;  %v9892_v3 = vrot.slane %v15272_v18, %v15896_v22  ;;  %v14768_v18 = vld [vmem:[#allocation11 + $0xa4] ss:$16 sps:$4 sm:$0xff]  }
 0x5cd   :  { %v14166_v5 = vcombine.high %v3203_v60, %v3207_v0  ;;  %v14165_v35 = vcombine.low %v3203_v60, %v3207_v0  ;;  %v14778_v60 = vld [vmem:[#allocation11 + $0xe0] ss:$16 sps:$4 sm:$0xff]   ;;  %v14781_v0 = vld [vmem:[#allocation11 + $0xe8] ss:$16 sps:$4 sm:$0xff]  }
 0x5ce   :  { %9296 = vmatpush1.bf16.msra.mxu0 %v14115_v29  ;;  %v3210_v29 = vld [vmem:[#allocation8 + $0x1fd0] sm:$0xff]  ;;  %v9932_v31 = vrot.slane %v9892_v3, %v15876_v59  ;;  %v14789_v3 = vld [vmem:[#allocation11 + $0x10c] ss:$16 sps:$4 sm:$0xff]  }
 0x5cf   :  { %9624 = vmatpush1.bf16.msra.mxu1 %v14117_v9  ;;  %9297 = vmatprep.subr.bf16.mxu0 %v14124_v34  ;;  %v3214_v9 = vld [vmem:[#allocation8 + $0x1ff0] sm:$0xff]  ;;  %v3211_v34 = vld [vmem:[#allocation8 + $0x1fd8] sm:$0xff] }
 0x5d0   :  { %9625 = vmatprep.subr.bf16.mxu1 %v14126_v45  ;;  %v9878_v45 = vmul.f32 %v9852_v2, %v9796_v54  ;;  %v14172_v47 = vcombine.high %v3210_v29, %v3214_v9  ;;  %v14174_v38 = vcombine.high %v3211_v34, %v3215_v11  ;;  %v14783_v54 = vld [vmem:[#allocation11 + $0xec] ss:$16 sps:$4 sm:$0xff]   ;;  %v14786_v2 = vld [vmem:[#allocation11 + $0x104] ss:$16 sps:$4 sm:$0xff]  }
 0x5d2   :  { %9298 = vmatpush1.bf16.msra.mxu0 %v14123_v16  ;;  %v9958_v16 = vadd.f32 %v9932_v31, %v9878_v45  ;;  %v14796_v45 = vld [vmem:[#allocation11 + $0x140] ss:$16 sps:$4 sm:$0xff]   ;;  %v14799_v31 = vld [vmem:[#allocation11 + $0x148] ss:$16 sps:$4 sm:$0xff]  }
 0x5d3   :  { %9626 = vmatpush1.bf16.msra.mxu1 %v14125_v49  ;;  %9299 = vmatprep.subr.bf16.mxu0 %v14132_v55  ;;  %v14171_v49 = vcombine.low %v3210_v29, %v3214_v9  ;;  %v14173_v55 = vcombine.low %v3211_v34, %v3215_v11  ;;  %v14790_v29 = vld [vmem:[#allocation11 + $0x120] ss:$16 sps:$4 sm:$0xff]   ;;  %v14793_v9 = vld [vmem:[#allocation11 + $0x128] ss:$16 sps:$4 sm:$0xff]   ;;  %v14798_v34 = vld [vmem:[#allocation11 + $0x144] ss:$16 sps:$4 sm:$0xff]  }
 0x5d4   :  { %9627 = vmatprep.subr.bf16.mxu1 %v14134_v46  ;;  %v14738_v46 = vld [vmem:[#allocation11 + $0x4] ss:$16 sps:$4 sm:$0xff]   ;;  %v9966_v19 = vmax.f32 %v9958_v16, 0.0  ;;  %v14801_v11 = vld [vmem:[#allocation11 + $0x14c] ss:$16 sps:$4 sm:$0xff]  }
 0x5d5   :  { %v14810_v16 = vld [vmem:[#allocation11 + $0x184] ss:$16 sps:$4 sm:$0xff]  }
 0x5d6   :  { %9300 = vmatpush1.bf16.msra.mxu0 %v14131_v6  ;;  %v14744_v6 = vld [vmem:[#allocation11 + $0x24] ss:$16 sps:$4 sm:$0xff]  }
 0x5d7   :  { %9628 = vmatpush1.bf16.msra.mxu1 %v14133_v42  ;;  %9301 = vmatprep.subr.bf16.mxu0 %v14140_v23  ;;  %v9974_v42 = vpack.c.bf16 %v9966_v19, %v9966_v19  ;;  %v14747_v23 = vld [vmem:[#allocation11 + $0x2c] ss:$16 sps:$4 sm:$0xff]  }
 0x5d8   :  { %9629 = vmatprep.subr.bf16.mxu1 %v14142_v33  ;;  %v14742_v33 = vld [vmem:[#allocation11 + $0x20] ss:$16 sps:$4 sm:$0xff]   ;;  %v14819_v19 = vld [vmem:[#allocation11 + $0x1ac] ss:$16 sps:$4 sm:$0xff]  }
 0x5da   :  { %9302 = vmatpush1.bf16.msra.mxu0 %v14139_v20  ;;  %v14751_v20 = vld [vmem:[#allocation11 + $0x48] ss:$16 sps:$4 sm:$0xff]  }
 0x5db   :  { %9630 = vmatpush1.bf16.msra.mxu1 %v14141_v27  ;;  %9303 = vmatprep.subr.bf16.mxu0 %v14148_v12  ;;  %v14756_v27 = vld [vmem:[#allocation11 + $0x64] ss:$16 sps:$4 sm:$0xff]   ;;  %v14759_v12 = vld [vmem:[#allocation11 + $0x6c] ss:$16 sps:$4 sm:$0xff]  }
 0x5dc   :  { %9631 = vmatprep.subr.bf16.mxu1 %v14150_v30  ;;  %v14757_v30 = vld [vmem:[#allocation11 + $0x68] ss:$16 sps:$4 sm:$0xff]  }
 0x5de   :  { %9304 = vmatpush1.bf16.msra.mxu0 %v14147_v36  ;;  %v14769_v36 = vld [vmem:[#allocation11 + $0xa8] ss:$16 sps:$4 sm:$0xff]  }
 0x5df   :  { %9632 = vmatpush1.bf16.msra.mxu1 %v14149_v25  ;;  %9305 = vmatprep.subr.bf16.mxu0 %v14156_v7  ;;  %v14774_v25 = vld [vmem:[#allocation11 + $0xc4] ss:$16 sps:$4 sm:$0xff]   ;;  %v14777_v7 = vld [vmem:[#allocation11 + $0xcc] ss:$16 sps:$4 sm:$0xff]  }
 0x5e0   :  { %9633 = vmatprep.subr.bf16.mxu1 %v14158_v43  ;;  %v14772_v43 = vld [vmem:[#allocation11 + $0xc0] ss:$16 sps:$4 sm:$0xff]  }
 0x5e2   :  { %9306 = vmatpush1.bf16.msra.mxu0 %v14155_v39  ;;  %v14784_v39 = vld [vmem:[#allocation11 + $0x100] ss:$16 sps:$4 sm:$0xff]  }
 0x5e3   :  { %9634 = vmatpush1.bf16.msra.mxu1 %v14157_v4  ;;  %9307 = vmatprep.subr.bf16.mxu0 %v14164_v26  ;;  %v14787_v4 = vld [vmem:[#allocation11 + $0x108] ss:$16 sps:$4 sm:$0xff]   ;;  %v14792_v26 = vld [vmem:[#allocation11 + $0x124] ss:$16 sps:$4 sm:$0xff]  }
 0x5e4   :  { %9635 = vmatprep.subr.bf16.mxu1 %v14166_v5  ;;  %v14795_v5 = vld [vmem:[#allocation11 + $0x12c] ss:$16 sps:$4 sm:$0xff]  }
 0x5e6   :  { %9308 = vmatpush1.bf16.msra.mxu0 %v14163_v61  ;;  %v14804_v61 = vld [vmem:[#allocation11 + $0x164] ss:$16 sps:$4 sm:$0xff]  }
 0x5e7   :  { %9636 = vmatpush1.bf16.msra.mxu1 %v14165_v35  ;;  %9309 = vmatprep.subr.bf16.mxu0 %v14172_v47  ;;  %v14807_v35 = vld [vmem:[#allocation11 + $0x16c] ss:$16 sps:$4 sm:$0xff]   ;;  %v14802_v47 = vld [vmem:[#allocation11 + $0x160] ss:$16 sps:$4 sm:$0xff]  }
 0x5e8   :  { %9637 = vmatprep.subr.bf16.mxu1 %v14174_v38  ;;  %v14805_v38 = vld [vmem:[#allocation11 + $0x168] ss:$16 sps:$4 sm:$0xff]  }
 0x5ea   :  { %9310 = vmatpush1.bf16.msra.mxu0 %v14171_v49  ;;  %v14813_v49 = vld [vmem:[#allocation11 + $0x18c] ss:$16 sps:$4 sm:$0xff]  }
 0x5eb   :  { %9638 = vmatpush1.bf16.msra.mxu1 %v14173_v55  ;;  %11517 = vmatprep.subr.bf16.mxu0 %v14738_v46  ;;  %v14808_v55 = vld [vmem:[#allocation11 + $0x180] ss:$16 sps:$4 sm:$0xff]   ;;  %v14811_v46 = vld [vmem:[#allocation11 + $0x188] ss:$16 sps:$4 sm:$0xff]  }
 0x5ec   :  { %11681 = vmatprep.subr.bf16.mxu1 %v14741_v17  ;;  %v14816_v17 = vld [vmem:[#allocation11 + $0x1a4] ss:$16 sps:$4 sm:$0xff]  }
 0x5ed   :  { %9312 = vmatmul.mubr.bf16.vlgmr.msra.gmra.mrb[20].mxu0 %v16044_v41 }
 0x5ee   :  { %9640 = vmatmul.mubr.bf16.vlgmr.msra.gmra.mrb[20].mxu1 %v16044_v41  ;;  %11518 = vmatpush1.bf16.msra.mxu0 %v14736_v32  ;;  %v14754_v41 = vld [vmem:[#allocation11 + $0x60] ss:$16 sps:$4 sm:$0xff]  }
 0x5ef   :  { %11549 = vmatprep.mubr.bf16.mxu0 %v9974_v42  ;;  %11682 = vmatpush1.bf16.msra.mxu1 %v14739_v21  ;;  %v14814_v32 = vld [vmem:[#allocation11 + $0x1a0] ss:$16 sps:$4 sm:$0xff]   ;;  %v14817_v21 = vld [vmem:[#allocation11 + $0x1a8] ss:$16 sps:$4 sm:$0xff]  }
 0x5f0   :  { %11713 = vmatprep.mubr.bf16.mxu1 %v9974_v42  ;;  %11519 = vmatprep.subr.bf16.mxu0 %v14744_v6  ;;  %v14822_v6 = vld [vmem:[#allocation11 + $0x1c4] ss:$16 sps:$4 sm:$0xff]   ;;  %v14825_v42 = vld [vmem:[#allocation11 + $0x1cc] ss:$16 sps:$4 sm:$0xff]  }
 0x5f1   :  { %11683 = vmatprep.subr.bf16.mxu1 %v14747_v23  ;;  %v14820_v23 = vld [vmem:[#allocation11 + $0x1c0] ss:$16 sps:$4 sm:$0xff]  }
 0x5f2   :  { %11520 = vmatpush1.bf16.msra.mxu0 %v14742_v33  ;;  %v14823_v33 = vld [vmem:[#allocation11 + $0x1c8] ss:$16 sps:$4 sm:$0xff]  }
 0x5f3   :  { %11684 = vmatpush1.bf16.msra.mxu1 %v14745_v63  ;;  %11521 = vmatprep.subr.bf16.mxu0 %v14750_v58  ;;  %v14828_v63 = vld [vmem:[#allocation11 + $0x1e4] ss:$16 sps:$4 sm:$0xff]   ;;  %v14831_v58 = vld [vmem:[#allocation11 + $0x1ec] ss:$16 sps:$4 sm:$0xff]  }
 0x5f4   :  { %11685 = vmatprep.subr.bf16.mxu1 %v14753_v10  ;;  %v14826_v10 = vld [vmem:[#allocation11 + $0x1e0] ss:$16 sps:$4 sm:$0xff]  }
 0x5f6   :  { %11522 = vmatpush1.bf16.msra.mxu0 %v14748_v24  ;;  %v14829_v24 = vld [vmem:[#allocation11 + $0x1e8] ss:$16 sps:$4 sm:$0xff]  }
 0x5f7   :  { %11686 = vmatpush1.bf16.msra.mxu1 %v14751_v20  ;;  %11523 = vmatprep.subr.bf16.mxu0 %v14756_v27  ;;  %v9965_v20 = vmax.f32 %v16118_v14, 0.0  ;;  %v14834_v27 = vld [vmem:[#allocation11 + $0x204] ss:$16 sps:$4 sm:$0xff]   ;;  %v14841_v14 = vld [vmem:[#allocation11 + $0x228] ss:$16 sps:$4 sm:$0xff]  }
 0x5f8   :  { %11687 = vmatprep.subr.bf16.mxu1 %v14759_v12  ;;  %v14837_v12 = vld [vmem:[#allocation11 + $0x20c] ss:$16 sps:$4 sm:$0xff]  }
 0x5fa   :  { %11524 = vmatpush1.bf16.msra.mxu0 %v14754_v41  ;;  %v9968_v41 = vmax.f32 %v16122_v37, 0.0  ;;  %v14849_v37 = vld [vmem:[#allocation11 + $0x24c] ss:$16 sps:$4 sm:$0xff]  }
 0x5fb   :  { %11688 = vmatpush1.bf16.msra.mxu1 %v14757_v30  ;;  %11525 = vmatprep.subr.bf16.mxu0 %v14762_v50  ;;  %v14832_v30 = vld [vmem:[#allocation11 + $0x200] ss:$16 sps:$4 sm:$0xff]   ;;  %v9973_v50 = vpack.c.bf16 %v9965_v20, %v9965_v20  ;;  %v14907_v20 = vld [vmem:[#allocation11 + $0x388] ss:$16 sps:$4 sm:$0xff]  }
 0x5fc   :  { %11689 = vmatprep.subr.bf16.mxu1 %v14765_v28  ;;  %v14835_v28 = vld [vmem:[#allocation11 + $0x208] ss:$16 sps:$4 sm:$0xff]  }
 0x5fe   :  { %11526 = vmatpush1.bf16.msra.mxu0 %v14760_v1  ;;  %v14840_v1 = vld [vmem:[#allocation11 + $0x224] ss:$16 sps:$4 sm:$0xff]  }
 0x5ff   :  { %11690 = vmatpush1.bf16.msra.mxu1 %v14763_v44  ;;  %11527 = vmatprep.subr.bf16.mxu0 %v14768_v18  ;;  %v9976_v44 = vpack.c.bf16 %v9968_v41, %v9968_v41  ;;  %v14843_v18 = vld [vmem:[#allocation11 + $0x22c] ss:$16 sps:$4 sm:$0xff]   ;;  %v14910_v41 = vld [vmem:[#allocation11 + $0x3a0] ss:$16 sps:$4 sm:$0xff]  }
 0x600   :  { %11691 = vmatprep.subr.bf16.mxu1 %v14771_v57  ;;  %v14838_v57 = vld [vmem:[#allocation11 + $0x220] ss:$16 sps:$4 sm:$0xff]  }
 0x602   :  { %11528 = vmatpush1.bf16.msra.mxu0 %v14766_v52  ;;  %v14846_v52 = vld [vmem:[#allocation11 + $0x244] ss:$16 sps:$4 sm:$0xff]  }
 0x603   :  { %11692 = vmatpush1.bf16.msra.mxu1 %v14769_v36  ;;  %11529 = vmatprep.subr.bf16.mxu0 %v14774_v25  ;;  %v14844_v36 = vld [vmem:[#allocation11 + $0x240] ss:$16 sps:$4 sm:$0xff]   ;;  %v14847_v25 = vld [vmem:[#allocation11 + $0x248] ss:$16 sps:$4 sm:$0xff]  }
 0x604   :  { %11693 = vmatprep.subr.bf16.mxu1 %v14777_v7  ;;  %v14852_v7 = vld [vmem:[#allocation11 + $0x264] ss:$16 sps:$4 sm:$0xff]  }
 0x606   :  { %11530 = vmatpush1.bf16.msra.mxu0 %v14772_v43  ;;  %v14855_v43 = vld [vmem:[#allocation11 + $0x26c] ss:$16 sps:$4 sm:$0xff]  }
 0x607   :  { %11694 = vmatpush1.bf16.msra.mxu1 %v14775_v8  ;;  %11531 = vmatprep.subr.bf16.mxu0 %v14780_v51  ;;  %v14850_v8 = vld [vmem:[#allocation11 + $0x260] ss:$16 sps:$4 sm:$0xff]   ;;  %v14853_v51 = vld [vmem:[#allocation11 + $0x268] ss:$16 sps:$4 sm:$0xff]  }
 0x608   :  { %11695 = vmatprep.subr.bf16.mxu1 %v14783_v54  ;;  %v14858_v54 = vld [vmem:[#allocation11 + $0x284] ss:$16 sps:$4 sm:$0xff]  }
 0x60a   :  { %11532 = vmatpush1.bf16.msra.mxu0 %v14778_v60  ;;  %v14861_v60 = vld [vmem:[#allocation11 + $0x28c] ss:$16 sps:$4 sm:$0xff]  }
 0x60b   :  { %11696 = vmatpush1.bf16.msra.mxu1 %v14781_v0  ;;  %11533 = vmatprep.subr.bf16.mxu0 %v14786_v2  ;;  %v14856_v0 = vld [vmem:[#allocation11 + $0x280] ss:$16 sps:$4 sm:$0xff]   ;;  %v14859_v2 = vld [vmem:[#allocation11 + $0x288] ss:$16 sps:$4 sm:$0xff]  }
 0x60c   :  { %11697 = vmatprep.subr.bf16.mxu1 %v14789_v3  ;;  %v14864_v3 = vld [vmem:[#allocation11 + $0x2a4] ss:$16 sps:$4 sm:$0xff]  }
 0x60e   :  { %11534 = vmatpush1.bf16.msra.mxu0 %v14784_v39  ;;  %v14867_v39 = vld [vmem:[#allocation11 + $0x2ac] ss:$16 sps:$4 sm:$0xff]  }
 0x60f   :  { %11698 = vmatpush1.bf16.msra.mxu1 %v14787_v4  ;;  %11535 = vmatprep.subr.bf16.mxu0 %v14792_v26  ;;  %v14862_v4 = vld [vmem:[#allocation11 + $0x2a0] ss:$16 sps:$4 sm:$0xff]   ;;  %v14865_v26 = vld [vmem:[#allocation11 + $0x2a8] ss:$16 sps:$4 sm:$0xff]  }
 0x610   :  { %11699 = vmatprep.subr.bf16.mxu1 %v14795_v5  ;;  %v14870_v5 = vld [vmem:[#allocation11 + $0x2c4] ss:$16 sps:$4 sm:$0xff]  }
 0x612   :  { %11536 = vmatpush1.bf16.msra.mxu0 %v14790_v29  ;;  %v14873_v29 = vld [vmem:[#allocation11 + $0x2cc] ss:$16 sps:$4 sm:$0xff]  }
 0x613   :  { %11700 = vmatpush1.bf16.msra.mxu1 %v14793_v9  ;;  %11537 = vmatprep.subr.bf16.mxu0 %v14798_v34  ;;  %v14868_v9 = vld [vmem:[#allocation11 + $0x2c0] ss:$16 sps:$4 sm:$0xff]   ;;  %v14871_v34 = vld [vmem:[#allocation11 + $0x2c8] ss:$16 sps:$4 sm:$0xff]  }
 0x614   :  { %11701 = vmatprep.subr.bf16.mxu1 %v14801_v11  ;;  %v14876_v11 = vld [vmem:[#allocation11 + $0x2e4] ss:$16 sps:$4 sm:$0xff]  }
 0x616   :  { %11538 = vmatpush1.bf16.msra.mxu0 %v14796_v45  ;;  %v14879_v45 = vld [vmem:[#allocation11 + $0x2ec] ss:$16 sps:$4 sm:$0xff]  }
 0x617   :  { %11702 = vmatpush1.bf16.msra.mxu1 %v14799_v31  ;;  %11539 = vmatprep.subr.bf16.mxu0 %v14804_v61  ;;  %v14874_v31 = vld [vmem:[#allocation11 + $0x2e0] ss:$16 sps:$4 sm:$0xff]   ;;  %v14877_v61 = vld [vmem:[#allocation11 + $0x2e8] ss:$16 sps:$4 sm:$0xff]  }
 0x618   :  { %11703 = vmatprep.subr.bf16.mxu1 %v14807_v35  ;;  %v14882_v35 = vld [vmem:[#allocation11 + $0x304] ss:$16 sps:$4 sm:$0xff]  }
 0x61a   :  { %11540 = vmatpush1.bf16.msra.mxu0 %v14802_v47  ;;  %v14885_v47 = vld [vmem:[#allocation11 + $0x30c] ss:$16 sps:$4 sm:$0xff]  }
 0x61b   :  { %11704 = vmatpush1.bf16.msra.mxu1 %v14805_v38  ;;  %11541 = vmatprep.subr.bf16.mxu0 %v14810_v16  ;;  %v14880_v38 = vld [vmem:[#allocation11 + $0x300] ss:$16 sps:$4 sm:$0xff]   ;;  %v14883_v16 = vld [vmem:[#allocation11 + $0x308] ss:$16 sps:$4 sm:$0xff]  }
 0x61c   :  { %11705 = vmatprep.subr.bf16.mxu1 %v14813_v49  ;;  %v14888_v49 = vld [vmem:[#allocation11 + $0x324] ss:$16 sps:$4 sm:$0xff]  }
 0x61e   :  { %11542 = vmatpush1.bf16.msra.mxu0 %v14808_v55  ;;  %v14891_v55 = vld [vmem:[#allocation11 + $0x32c] ss:$16 sps:$4 sm:$0xff]  }
 0x61f   :  { %11706 = vmatpush1.bf16.msra.mxu1 %v14811_v46  ;;  %11543 = vmatprep.subr.bf16.mxu0 %v14816_v17  ;;  %v14886_v46 = vld [vmem:[#allocation11 + $0x320] ss:$16 sps:$4 sm:$0xff]   ;;  %v14889_v17 = vld [vmem:[#allocation11 + $0x328] ss:$16 sps:$4 sm:$0xff]  }
 0x620   :  { %11707 = vmatprep.subr.bf16.mxu1 %v14819_v19  ;;  %v14894_v19 = vld [vmem:[#allocation11 + $0x344] ss:$16 sps:$4 sm:$0xff]  }
 0x622   :  { %11544 = vmatpush1.bf16.msra.mxu0 %v14814_v32  ;;  %v14897_v32 = vld [vmem:[#allocation11 + $0x34c] ss:$16 sps:$4 sm:$0xff]  }
 0x623   :  { %11708 = vmatpush1.bf16.msra.mxu1 %v14817_v21  ;;  %11545 = vmatprep.subr.bf16.mxu0 %v14822_v6  ;;  %v14892_v21 = vld [vmem:[#allocation11 + $0x340] ss:$16 sps:$4 sm:$0xff]   ;;  %v14895_v6 = vld [vmem:[#allocation11 + $0x348] ss:$16 sps:$4 sm:$0xff]  }
 0x624   :  { %11709 = vmatprep.subr.bf16.mxu1 %v14825_v42  ;;  %v14900_v42 = vld [vmem:[#allocation11 + $0x364] ss:$16 sps:$4 sm:$0xff]  }
 0x626   :  { %11546 = vmatpush1.bf16.msra.mxu0 %v14820_v23  ;;  %v14903_v23 = vld [vmem:[#allocation11 + $0x36c] ss:$16 sps:$4 sm:$0xff]  }
 0x627   :  { %11710 = vmatpush1.bf16.msra.mxu1 %v14823_v33  ;;  %11547 = vmatprep.subr.bf16.mxu0 %v14828_v63  ;;  %v14898_v33 = vld [vmem:[#allocation11 + $0x360] ss:$16 sps:$4 sm:$0xff]   ;;  %v14901_v63 = vld [vmem:[#allocation11 + $0x368] ss:$16 sps:$4 sm:$0xff]  }
 0x628   :  { %11711 = vmatprep.subr.bf16.mxu1 %v14831_v58  ;;  %v14906_v58 = vld [vmem:[#allocation11 + $0x384] ss:$16 sps:$4 sm:$0xff]  }
 0x62a   :  { %11548 = vmatpush1.bf16.msra.mxu0 %v14826_v10  ;;  %v14909_v10 = vld [vmem:[#allocation11 + $0x38c] ss:$16 sps:$4 sm:$0xff]  }
 0x62b   :  { %11712 = vmatpush1.bf16.msra.mxu1 %v14829_v24  ;;  %11558 = vmatprep.subr.bf16.mxu0 %v14834_v27  ;;  %v14904_v24 = vld [vmem:[#allocation11 + $0x380] ss:$16 sps:$4 sm:$0xff]   ;;  %v14912_v27 = vld [vmem:[#allocation11 + $0x3a4] ss:$16 sps:$4 sm:$0xff]  }
 0x62c   :  { %11722 = vmatprep.subr.bf16.mxu1 %v14837_v12  ;;  %v14915_v12 = vld [vmem:[#allocation11 + $0x3ac] ss:$16 sps:$4 sm:$0xff]  }
 0x62d   :  { %11550 = vmatmul.mubr.bf16.vlgmr.msra.gmra.mrb[24].mxu0 %v9973_v50 }
 0x62e   :  { %11714 = vmatmul.mubr.bf16.vlgmr.msra.gmra.mrb[24].mxu1 %v9973_v50  ;;  %11559 = vmatpush1.bf16.msra.mxu0 %v14832_v30  ;;  %v14913_v30 = vld [vmem:[#allocation11 + $0x3a8] ss:$16 sps:$4 sm:$0xff]   ;;  %v14918_v50 = vld [vmem:[#allocation11 + $0x3c4] ss:$16 sps:$4 sm:$0xff]  }
 0x62f   :  { %11590 = vmatprep.mubr.bf16.mxu0 %v9976_v44  ;;  %11723 = vmatpush1.bf16.msra.mxu1 %v14835_v28  ;;  %v14921_v28 = vld [vmem:[#allocation11 + $0x3cc] ss:$16 sps:$4 sm:$0xff]  }
 0x630   :  { %11754 = vmatprep.mubr.bf16.mxu1 %v9976_v44  ;;  %11560 = vmatprep.subr.bf16.mxu0 %v14840_v1  ;;  %v14916_v1 = vld [vmem:[#allocation11 + $0x3c0] ss:$16 sps:$4 sm:$0xff]   ;;  %v14919_v44 = vld [vmem:[#allocation11 + $0x3c8] ss:$16 sps:$4 sm:$0xff]  }
 0x631   :  { %11724 = vmatprep.subr.bf16.mxu1 %v14843_v18  ;;  %v14924_v18 = vld [vmem:[#allocation11 + $0x3e4] ss:$16 sps:$4 sm:$0xff]  }
 0x632   :  { %11561 = vmatpush1.bf16.msra.mxu0 %v14838_v57  ;;  %v14927_v57 = vld [vmem:[#allocation11 + $0x3ec] ss:$16 sps:$4 sm:$0xff]  }
 0x633   :  { %11725 = vmatpush1.bf16.msra.mxu1 %v14841_v14  ;;  %11562 = vmatprep.subr.bf16.mxu0 %v14846_v52  ;;  %v14922_v14 = vld [vmem:[#allocation11 + $0x3e0] ss:$16 sps:$4 sm:$0xff]   ;;  %v14925_v52 = vld [vmem:[#allocation11 + $0x3e8] ss:$16 sps:$4 sm:$0xff]  }
 0x634   :  { %11726 = vmatprep.subr.bf16.mxu1 %v14849_v37  ;;  %v9967_v37 = vmax.f32 %v16120_v40, 0.0  ;;  %v14942_v40 = vld [vmem:[#allocation11 + $0x444] ss:$16 sps:$4 sm:$0xff]  }
 0x636   :  { %11563 = vmatpush1.bf16.msra.mxu0 %v14844_v36  ;;  %v14930_v36 = vld [vmem:[#allocation11 + $0x404] ss:$16 sps:$4 sm:$0xff]  }
 0x637   :  { %11727 = vmatpush1.bf16.msra.mxu1 %v14847_v25  ;;  %11564 = vmatprep.subr.bf16.mxu0 %v14852_v7  ;;  %v14933_v25 = vld [vmem:[#allocation11 + $0x40c] ss:$16 sps:$4 sm:$0xff]   ;;  %v14928_v7 = vld [vmem:[#allocation11 + $0x400] ss:$16 sps:$4 sm:$0xff]  }
 0x638   :  { %11728 = vmatprep.subr.bf16.mxu1 %v14855_v43  ;;  %v9975_v43 = vpack.c.bf16 %v9967_v37, %v9967_v37  ;;  %v15006_v37 = vld [vmem:[#allocation11 + $0x5a0] ss:$16 sps:$4 sm:$0xff]  }
 0x63a   :  { %11565 = vmatpush1.bf16.msra.mxu0 %v14850_v8  ;;  %v14931_v8 = vld [vmem:[#allocation11 + $0x408] ss:$16 sps:$4 sm:$0xff]  }
 0x63b   :  { %11729 = vmatpush1.bf16.msra.mxu1 %v14853_v51  ;;  %11566 = vmatprep.subr.bf16.mxu0 %v14858_v54  ;;  %v14936_v51 = vld [vmem:[#allocation11 + $0x424] ss:$16 sps:$4 sm:$0xff]   ;;  %v14939_v54 = vld [vmem:[#allocation11 + $0x42c] ss:$16 sps:$4 sm:$0xff]  }
 0x63c   :  { %11730 = vmatprep.subr.bf16.mxu1 %v14861_v60  ;;  %v14934_v60 = vld [vmem:[#allocation11 + $0x420] ss:$16 sps:$4 sm:$0xff]  }
 0x63e   :  { %11567 = vmatpush1.bf16.msra.mxu0 %v14856_v0  ;;  %v14937_v0 = vld [vmem:[#allocation11 + $0x428] ss:$16 sps:$4 sm:$0xff]  }
 0x63f   :  { %11731 = vmatpush1.bf16.msra.mxu1 %v14859_v2  ;;  %11568 = vmatprep.subr.bf16.mxu0 %v14864_v3  ;;  %v14945_v2 = vld [vmem:[#allocation11 + $0x44c] ss:$16 sps:$4 sm:$0xff]   ;;  %v14940_v3 = vld [vmem:[#allocation11 + $0x440] ss:$16 sps:$4 sm:$0xff]  }
 0x640   :  { %11732 = vmatprep.subr.bf16.mxu1 %v14867_v39  ;;  %v14943_v39 = vld [vmem:[#allocation11 + $0x448] ss:$16 sps:$4 sm:$0xff]  }
 0x642   :  { %11569 = vmatpush1.bf16.msra.mxu0 %v14862_v4  ;;  %v14948_v4 = vld [vmem:[#allocation11 + $0x464] ss:$16 sps:$4 sm:$0xff]  }
 0x643   :  { %11733 = vmatpush1.bf16.msra.mxu1 %v14865_v26  ;;  %11570 = vmatprep.subr.bf16.mxu0 %v14870_v5  ;;  %v14951_v26 = vld [vmem:[#allocation11 + $0x46c] ss:$16 sps:$4 sm:$0xff]   ;;  %v14946_v5 = vld [vmem:[#allocation11 + $0x460] ss:$16 sps:$4 sm:$0xff]  }
 0x644   :  { %11734 = vmatprep.subr.bf16.mxu1 %v14873_v29  ;;  %v14949_v29 = vld [vmem:[#allocation11 + $0x468] ss:$16 sps:$4 sm:$0xff]  }
 0x646   :  { %11571 = vmatpush1.bf16.msra.mxu0 %v14868_v9  ;;  %v14954_v9 = vld [vmem:[#allocation11 + $0x484] ss:$16 sps:$4 sm:$0xff]  }
 0x647   :  { %11735 = vmatpush1.bf16.msra.mxu1 %v14871_v34  ;;  %11572 = vmatprep.subr.bf16.mxu0 %v14876_v11  ;;  %v14957_v34 = vld [vmem:[#allocation11 + $0x48c] ss:$16 sps:$4 sm:$0xff]   ;;  %v14952_v11 = vld [vmem:[#allocation11 + $0x480] ss:$16 sps:$4 sm:$0xff]  }
 0x648   :  { %11736 = vmatprep.subr.bf16.mxu1 %v14879_v45  ;;  %v14955_v45 = vld [vmem:[#allocation11 + $0x488] ss:$16 sps:$4 sm:$0xff]  }
 0x64a   :  { %11573 = vmatpush1.bf16.msra.mxu0 %v14874_v31  ;;  %v14960_v31 = vld [vmem:[#allocation11 + $0x4a4] ss:$16 sps:$4 sm:$0xff]  }
 0x64b   :  { %11737 = vmatpush1.bf16.msra.mxu1 %v14877_v61  ;;  %11574 = vmatprep.subr.bf16.mxu0 %v14882_v35  ;;  %v14963_v61 = vld [vmem:[#allocation11 + $0x4ac] ss:$16 sps:$4 sm:$0xff]   ;;  %v14958_v35 = vld [vmem:[#allocation11 + $0x4a0] ss:$16 sps:$4 sm:$0xff]  }
 0x64c   :  { %11738 = vmatprep.subr.bf16.mxu1 %v14885_v47  ;;  %v14961_v47 = vld [vmem:[#allocation11 + $0x4a8] ss:$16 sps:$4 sm:$0xff]  }
 0x64e   :  { %11575 = vmatpush1.bf16.msra.mxu0 %v14880_v38  ;;  %v14966_v38 = vld [vmem:[#allocation11 + $0x4c4] ss:$16 sps:$4 sm:$0xff]  }
 0x64f   :  { %11739 = vmatpush1.bf16.msra.mxu1 %v14883_v16  ;;  %11576 = vmatprep.subr.bf16.mxu0 %v14888_v49  ;;  %v14969_v16 = vld [vmem:[#allocation11 + $0x4cc] ss:$16 sps:$4 sm:$0xff]   ;;  %v14964_v49 = vld [vmem:[#allocation11 + $0x4c0] ss:$16 sps:$4 sm:$0xff]  }
 0x650   :  { %11740 = vmatprep.subr.bf16.mxu1 %v14891_v55  ;;  %v14967_v55 = vld [vmem:[#allocation11 + $0x4c8] ss:$16 sps:$4 sm:$0xff]  }
 0x652   :  { %11577 = vmatpush1.bf16.msra.mxu0 %v14886_v46  ;;  %v14972_v46 = vld [vmem:[#allocation11 + $0x4e4] ss:$16 sps:$4 sm:$0xff]  }
 0x653   :  { %11741 = vmatpush1.bf16.msra.mxu1 %v14889_v17  ;;  %11578 = vmatprep.subr.bf16.mxu0 %v14894_v19  ;;  %v14975_v17 = vld [vmem:[#allocation11 + $0x4ec] ss:$16 sps:$4 sm:$0xff]   ;;  %v14970_v19 = vld [vmem:[#allocation11 + $0x4e0] ss:$16 sps:$4 sm:$0xff]  }
 0x654   :  { %11742 = vmatprep.subr.bf16.mxu1 %v14897_v32  ;;  %v14973_v32 = vld [vmem:[#allocation11 + $0x4e8] ss:$16 sps:$4 sm:$0xff]  }
 0x656   :  { %11579 = vmatpush1.bf16.msra.mxu0 %v14892_v21  ;;  %v14978_v21 = vld [vmem:[#allocation11 + $0x504] ss:$16 sps:$4 sm:$0xff]  }
 0x657   :  { %11743 = vmatpush1.bf16.msra.mxu1 %v14895_v6  ;;  %11580 = vmatprep.subr.bf16.mxu0 %v14900_v42  ;;  %v14981_v6 = vld [vmem:[#allocation11 + $0x50c] ss:$16 sps:$4 sm:$0xff]   ;;  %v14976_v42 = vld [vmem:[#allocation11 + $0x500] ss:$16 sps:$4 sm:$0xff]  }
 0x658   :  { %11744 = vmatprep.subr.bf16.mxu1 %v14903_v23  ;;  %v14979_v23 = vld [vmem:[#allocation11 + $0x508] ss:$16 sps:$4 sm:$0xff]  }
 0x65a   :  { %11581 = vmatpush1.bf16.msra.mxu0 %v14898_v33  ;;  %v14984_v33 = vld [vmem:[#allocation11 + $0x524] ss:$16 sps:$4 sm:$0xff]  }
 0x65b   :  { %11745 = vmatpush1.bf16.msra.mxu1 %v14901_v63  ;;  %11582 = vmatprep.subr.bf16.mxu0 %v14906_v58  ;;  %v14987_v63 = vld [vmem:[#allocation11 + $0x52c] ss:$16 sps:$4 sm:$0xff]   ;;  %v14982_v58 = vld [vmem:[#allocation11 + $0x520] ss:$16 sps:$4 sm:$0xff]  }
 0x65c   :  { %11746 = vmatprep.subr.bf16.mxu1 %v14909_v10  ;;  %v14985_v10 = vld [vmem:[#allocation11 + $0x528] ss:$16 sps:$4 sm:$0xff]  }
 0x65e   :  { %11583 = vmatpush1.bf16.msra.mxu0 %v14904_v24  ;;  %v14990_v24 = vld [vmem:[#allocation11 + $0x544] ss:$16 sps:$4 sm:$0xff]  }
 0x65f   :  { %11747 = vmatpush1.bf16.msra.mxu1 %v14907_v20  ;;  %11584 = vmatprep.subr.bf16.mxu0 %v14912_v27  ;;  %v14993_v20 = vld [vmem:[#allocation11 + $0x54c] ss:$16 sps:$4 sm:$0xff]   ;;  %v14988_v27 = vld [vmem:[#allocation11 + $0x540] ss:$16 sps:$4 sm:$0xff]  }
 0x660   :  { %11748 = vmatprep.subr.bf16.mxu1 %v14915_v12  ;;  %v14991_v12 = vld [vmem:[#allocation11 + $0x548] ss:$16 sps:$4 sm:$0xff]  }
 0x662   :  { %11585 = vmatpush1.bf16.msra.mxu0 %v14910_v41  ;;  %v14996_v41 = vld [vmem:[#allocation11 + $0x564] ss:$16 sps:$4 sm:$0xff]  }
 0x663   :  { %11749 = vmatpush1.bf16.msra.mxu1 %v14913_v30  ;;  %11586 = vmatprep.subr.bf16.mxu0 %v14918_v50  ;;  %v14999_v30 = vld [vmem:[#allocation11 + $0x56c] ss:$16 sps:$4 sm:$0xff]   ;;  %v14994_v50 = vld [vmem:[#allocation11 + $0x560] ss:$16 sps:$4 sm:$0xff]  }
 0x664   :  { %11750 = vmatprep.subr.bf16.mxu1 %v14921_v28  ;;  %v14997_v28 = vld [vmem:[#allocation11 + $0x568] ss:$16 sps:$4 sm:$0xff]  }
 0x666   :  { %11587 = vmatpush1.bf16.msra.mxu0 %v14916_v1  ;;  %v15002_v1 = vld [vmem:[#allocation11 + $0x584] ss:$16 sps:$4 sm:$0xff]  }
 0x667   :  { %11751 = vmatpush1.bf16.msra.mxu1 %v14919_v44  ;;  %11588 = vmatprep.subr.bf16.mxu0 %v14924_v18  ;;  %v15005_v44 = vld [vmem:[#allocation11 + $0x58c] ss:$16 sps:$4 sm:$0xff]   ;;  %v15000_v18 = vld [vmem:[#allocation11 + $0x580] ss:$16 sps:$4 sm:$0xff]  }
 0x668   :  { %11752 = vmatprep.subr.bf16.mxu1 %v14927_v57  ;;  %v15003_v57 = vld [vmem:[#allocation11 + $0x588] ss:$16 sps:$4 sm:$0xff]  }
 0x66a   :  { %11589 = vmatpush1.bf16.msra.mxu0 %v14922_v14  ;;  %v15008_v14 = vld [vmem:[#allocation11 + $0x5a4] ss:$16 sps:$4 sm:$0xff]  }
 0x66b   :  { %11753 = vmatpush1.bf16.msra.mxu1 %v14925_v52  ;;  %11599 = vmatprep.subr.bf16.mxu0 %v14930_v36  ;;  %v15011_v52 = vld [vmem:[#allocation11 + $0x5ac] ss:$16 sps:$4 sm:$0xff]   ;;  %v15009_v36 = vld [vmem:[#allocation11 + $0x5a8] ss:$16 sps:$4 sm:$0xff]  }
 0x66c   :  { %11763 = vmatprep.subr.bf16.mxu1 %v14933_v25  ;;  %v15014_v25 = vld [vmem:[#allocation11 + $0x5c4] ss:$16 sps:$4 sm:$0xff]  }
 0x66d   :  { %11591 = vmatmul.mubr.bf16.vlgmr.msra.gmra.mrb[24].mxu0 %v9975_v43 }
 0x66e   :  { %11755 = vmatmul.mubr.bf16.vlgmr.msra.gmra.mrb[24].mxu1 %v9975_v43  ;;  %11600 = vmatpush1.bf16.msra.mxu0 %v14928_v7  ;;  %v15017_v7 = vld [vmem:[#allocation11 + $0x5cc] ss:$16 sps:$4 sm:$0xff]   ;;  %v15012_v43 = vld [vmem:[#allocation11 + $0x5c0] ss:$16 sps:$4 sm:$0xff]  }
 0x66f   :  { %11764 = vmatpush1.bf16.msra.mxu1 %v14931_v8  ;;  %11601 = vmatprep.subr.bf16.mxu0 %v14936_v51  ;;  %v15015_v8 = vld [vmem:[#allocation11 + $0x5c8] ss:$16 sps:$4 sm:$0xff]   ;;  %v15020_v51 = vld [vmem:[#allocation11 + $0x5e4] ss:$16 sps:$4 sm:$0xff]  }
 0x670   :  { %11765 = vmatprep.subr.bf16.mxu1 %v14939_v54  ;;  %v15023_v54 = vld [vmem:[#allocation11 + $0x5ec] ss:$16 sps:$4 sm:$0xff]  }
 0x672   :  { %11602 = vmatpush1.bf16.msra.mxu0 %v14934_v60  ;;  %v15018_v60 = vld [vmem:[#allocation11 + $0x5e0] ss:$16 sps:$4 sm:$0xff]  }
 0x673   :  { %11766 = vmatpush1.bf16.msra.mxu1 %v14937_v0  ;;  %11603 = vmatprep.subr.bf16.mxu0 %v14942_v40  ;;  %v15021_v0 = vld [vmem:[#allocation11 + $0x5e8] ss:$16 sps:$4 sm:$0xff]   ;;  %v15026_v40 = vld [vmem:[#allocation11 + $0x604] ss:$16 sps:$4 sm:$0xff]  }
 0x674   :  { %11767 = vmatprep.subr.bf16.mxu1 %v14945_v2  ;;  %v15029_v2 = vld [vmem:[#allocation11 + $0x60c] ss:$16 sps:$4 sm:$0xff]  }
 0x676   :  { %11604 = vmatpush1.bf16.msra.mxu0 %v14940_v3 }
 0x677   :  { %11768 = vmatpush1.bf16.msra.mxu1 %v14943_v39  ;;  %11605 = vmatprep.subr.bf16.mxu0 %v14948_v4 }
 0x678   :  { %11769 = vmatprep.subr.bf16.mxu1 %v14951_v26 }
 0x67a   :  { %11606 = vmatpush1.bf16.msra.mxu0 %v14946_v5 }
 0x67b   :  { %11770 = vmatpush1.bf16.msra.mxu1 %v14949_v29  ;;  %11607 = vmatprep.subr.bf16.mxu0 %v14954_v9 }
 0x67c   :  { %11771 = vmatprep.subr.bf16.mxu1 %v14957_v34 }
 0x67e   :  { %11608 = vmatpush1.bf16.msra.mxu0 %v14952_v11 }
 0x67f   :  { %11772 = vmatpush1.bf16.msra.mxu1 %v14955_v45  ;;  %11609 = vmatprep.subr.bf16.mxu0 %v14960_v31 }
 0x680   :  { %11773 = vmatprep.subr.bf16.mxu1 %v14963_v61 }
 0x682   :  { %11610 = vmatpush1.bf16.msra.mxu0 %v14958_v35 }
 0x683   :  { %11774 = vmatpush1.bf16.msra.mxu1 %v14961_v47  ;;  %11611 = vmatprep.subr.bf16.mxu0 %v14966_v38 }
 0x684   :  { %11775 = vmatprep.subr.bf16.mxu1 %v14969_v16 }
 0x686   :  { %11612 = vmatpush1.bf16.msra.mxu0 %v14964_v49 }
 0x687   :  { %11776 = vmatpush1.bf16.msra.mxu1 %v14967_v55  ;;  %11613 = vmatprep.subr.bf16.mxu0 %v14972_v46 }
 0x688   :  { %11777 = vmatprep.subr.bf16.mxu1 %v14975_v17 }
 0x68a   :  { %11614 = vmatpush1.bf16.msra.mxu0 %v14970_v19 }
 0x68b   :  { %11778 = vmatpush1.bf16.msra.mxu1 %v14973_v32  ;;  %11615 = vmatprep.subr.bf16.mxu0 %v14978_v21 }
 0x68c   :  { %11779 = vmatprep.subr.bf16.mxu1 %v14981_v6 }
 0x68e   :  { %11616 = vmatpush1.bf16.msra.mxu0 %v14976_v42 }
 0x68f   :  { %11780 = vmatpush1.bf16.msra.mxu1 %v14979_v23  ;;  %11617 = vmatprep.subr.bf16.mxu0 %v14984_v33 }
 0x690   :  { %11781 = vmatprep.subr.bf16.mxu1 %v14987_v63 }
 0x692   :  { %11618 = vmatpush1.bf16.msra.mxu0 %v14982_v58 }
 0x693   :  { %11782 = vmatpush1.bf16.msra.mxu1 %v14985_v10  ;;  %11619 = vmatprep.subr.bf16.mxu0 %v14990_v24 }
 0x694   :  { %11783 = vmatprep.subr.bf16.mxu1 %v14993_v20 }
 0x696   :  { %11620 = vmatpush1.bf16.msra.mxu0 %v14988_v27 }
 0x697   :  { %11784 = vmatpush1.bf16.msra.mxu1 %v14991_v12  ;;  %11621 = vmatprep.subr.bf16.mxu0 %v14996_v41 }
 0x698   :  { %11785 = vmatprep.subr.bf16.mxu1 %v14999_v30 }
 0x69a   :  { %11622 = vmatpush1.bf16.msra.mxu0 %v14994_v50 }
 0x69b   :  { %11786 = vmatpush1.bf16.msra.mxu1 %v14997_v28  ;;  %11623 = vmatprep.subr.bf16.mxu0 %v15002_v1 }
 0x69c   :  { %11787 = vmatprep.subr.bf16.mxu1 %v15005_v44 }
 0x69e   :  { %11624 = vmatpush1.bf16.msra.mxu0 %v15000_v18 }
 0x69f   :  { %11788 = vmatpush1.bf16.msra.mxu1 %v15003_v57  ;;  %11625 = vmatprep.subr.bf16.mxu0 %v15008_v14 }
 0x6a0   :  { %11789 = vmatprep.subr.bf16.mxu1 %v15011_v52 }
 0x6a2   :  { %11626 = vmatpush1.bf16.msra.mxu0 %v15006_v37 }
 0x6a3   :  { %11790 = vmatpush1.bf16.msra.mxu1 %v15009_v36  ;;  %11627 = vmatprep.subr.bf16.mxu0 %v15014_v25 }
 0x6a4   :  { %11791 = vmatprep.subr.bf16.mxu1 %v15017_v7 }
 0x6a6   :  { %11628 = vmatpush1.bf16.msra.mxu0 %v15012_v43 }
 0x6a7   :  { %11792 = vmatpush1.bf16.msra.mxu1 %v15015_v8  ;;  %11629 = vmatprep.subr.bf16.mxu0 %v15020_v51 }
 0x6a8   :  { %11793 = vmatprep.subr.bf16.mxu1 %v15023_v54 }
 0x6aa   :  { %11630 = vmatpush1.bf16.msra.mxu0 %v15018_v60 }
 0x6ab   :  { %11794 = vmatpush1.bf16.msra.mxu1 %v15021_v0  ;;  %11640 = vmatprep.subr.bf16.mxu0 %v15026_v40 }
 0x6ac   :  { %11804 = vmatprep.subr.bf16.mxu1 %v15029_v2 }
 0x6c0   :  { %v9313_v3 = vpop.f32.mrb[20].mxu0 }
 0x6c1   :  { %v9674_v39 = vrot.slane %v9313_v3, 4  ;;  %v9641_v4 = vpop.f32.mrb[20].mxu1  ;;  %v9315_v26 = vpop.f32.mrb[21].mxu0 }
 0x6c2   :  { %v9686_v5 = vrot.slane %v9641_v4, 4  ;;  %v9680_v29 = vrot.slane %v9315_v26, 4  ;;  %v9643_v9 = vpop.f32.mrb[21].mxu1  ;;  %v9317_v34 = vpop.f32.mrb[22].mxu0 }
 0x6c3   :  { %v9675_v11 = vadd.f32 %v9674_v39, %v9313_v3  ;;  %v9692_v45 = vrot.slane %v9643_v9, 4  ;;  %v9645_v31 = vpop.f32.mrb[22].mxu1  ;;  %v9318_v61 = vpop.f32.mrb[23].mxu0 }
 0x6c4   :  { %v9687_v35 = vadd.f32 %v9686_v5, %v9641_v4  ;;  %v9681_v47 = vadd.f32 %v9680_v29, %v9315_v26  ;;  %v9646_v38 = vpop.f32.mrb[23].mxu1 }
 0x6c5   :  { %v9676_v16 = vrot.slane %v9675_v11, 2  ;;  %v9693_v49 = vadd.f32 %v9692_v45, %v9643_v9 }
 0x6c6   :  { %v9688_v55 = vrot.slane %v9687_v35, 2  ;;  %v9682_v46 = vrot.slane %v9681_v47, 2 }
 0x6c7   :  { %v9677_v17 = vadd.f32 %v9676_v16, %v9675_v11  ;;  %v9694_v19 = vrot.slane %v9693_v49, 2 }
 0x6c8   :  { %v9689_v32 = vadd.f32 %v9688_v55, %v9687_v35  ;;  %v9683_v21 = vadd.f32 %v9682_v46, %v9681_v47 }
 0x6c9   :  { %v9678_v6 = vrot.slane %v9677_v17, 1  ;;  %v9695_v42 = vadd.f32 %v9694_v19, %v9693_v49  ;;  %v9649_v19 = vld [vmem:[#allocation10 + $0x8] sm:$0xff] }
 0x6ca   :  { %v9690_v23 = vrot.slane %v9689_v32, 1  ;;  %v9684_v33 = vrot.slane %v9683_v21, 1 }
 0x6cb   :  { %v9679_v63 = vadd.f32 %v9678_v6, %v9677_v17  ;;  %v9696_v58 = vrot.slane %v9695_v42, 1  ;;  %v9828_v6 = vrot.slane %v9649_v19, %v15921_v53 }
 0x6cc   :  { %v9691_v10 = vadd.f32 %v9690_v23, %v9689_v32  ;;  %v9685_v24 = vadd.f32 %v9684_v33, %v9683_v21  ;;  %v9824_v32 = vrot.slane %v9649_v19, %v15893_v15  ;;  %v9832_v21 = vrot.slane %v9649_v19, %v15949_v48 }
 0x6cd   :  { %v9703_v20 = vmul.f32 0.125, %v9679_v63  ;;  %v9697_v27 = vadd.f32 %v9696_v58, %v9695_v42  ;;  %v9904_v42 = vrot.slane %v9649_v19, %v15876_v59  ;;  %v9836_v23 = vrot.slane %v9649_v19, %v15979_v13 }
 0x6ce   :  { %v9705_v12 = vmul.f32 0.125, %v9691_v10  ;;  %v9704_v41 = vmul.f32 0.125, %v9685_v24  ;;  %v9912_v33 = vrot.slane %v9649_v19, %v15924_v62  ;;  %v9864_v63 = vrot.slane %v9824_v32, %v15893_v15  ;;  %v15056_v32 = vld [vmem:[#allocation11 + $0x6a4] ss:$16 sps:$4 sm:$0xff]  }
 0x6cf   :  { %v9711_v30 = vsub.f32 %v9313_v3, %v9703_v20  ;;  %v9706_v50 = vmul.f32 0.125, %v9697_v27  ;;  %v9908_v58 = vrot.slane %v9649_v19, %v15896_v22  ;;  %v9872_v24 = vrot.slane %v9832_v21, %v15893_v15  ;;  %v15059_v21 = vld [vmem:[#allocation11 + $0x6ac] ss:$16 sps:$4 sm:$0xff]  }
 0x6d0   :  { %v9713_v28 = vsub.f32 %v9641_v4, %v9705_v12  ;;  %v16153_v1 = vsub.f32 %v9315_v26, %v9704_v41  ;;  %v9916_v20 = vrot.slane %v9649_v19, %v15952_v56  ;;  %v9868_v41 = vrot.slane %v9828_v6, %v15893_v15  ;;  %v15051_v19 = vld [vmem:[#allocation11 + $0x688] ss:$16 sps:$4 sm:$0xff]   ;;  %v15054_v6 = vld [vmem:[#allocation11 + $0x6a0] ss:$16 sps:$4 sm:$0xff]  }
 0x6d1   :  { %v9719_v44 = vmul.f32 %v9711_v30, %v9711_v30  ;;  %v16155_v18 = vsub.f32 %v9643_v9, %v9706_v50  ;;  %v9944_v50 = vrot.slane %v9904_v42, %v15876_v59  ;;  %v15057_v42 = vld [vmem:[#allocation11 + $0x6a8] ss:$16 sps:$4 sm:$0xff]  }
 0x6d2   :  { %v9721_v57 = vmul.f32 %v9713_v28, %v9713_v28  ;;  %v9720_v14 = vmul.f32 %v16153_v1, %v16153_v1 }
 0x6d3   :  { %v9747_v52 = vrot.slane %v9719_v44, 4  ;;  %v9722_v37 = vmul.f32 %v16155_v18, %v16155_v18 }
 0x6d4   :  { %v9759_v36 = vrot.slane %v9721_v57, 4  ;;  %v9753_v25 = vrot.slane %v9720_v14, 4 }
 0x6d5   :  { %v9748_v7 = vadd.f32 %v9747_v52, %v9719_v44  ;;  %v9765_v43 = vrot.slane %v9722_v37, 4  ;;  %v9952_v52 = vrot.slane %v9912_v33, %v15876_v59  ;;  %v15065_v33 = vld [vmem:[#allocation11 + $0x6cc] ss:$16 sps:$4 sm:$0xff]  }
 0x6d6   :  { %v9760_v8 = vadd.f32 %v9759_v36, %v9721_v57  ;;  %v9754_v51 = vadd.f32 %v9753_v25, %v9720_v14  ;;  %v9876_v14 = vrot.slane %v9836_v23, %v15893_v15  ;;  %v15062_v23 = vld [vmem:[#allocation11 + $0x6c4] ss:$16 sps:$4 sm:$0xff]  }
 0x6d7   :  { %v9749_v54 = vrot.slane %v9748_v7, 2  ;;  %v9766_v60 = vadd.f32 %v9765_v43, %v9722_v37 }
 0x6d8   :  { %v9761_v0 = vrot.slane %v9760_v8, 2  ;;  %v9755_v40 = vrot.slane %v9754_v51, 2 }
 0x6d9   :  { %v9750_v2 = vadd.f32 %v9749_v54, %v9748_v7  ;;  %v9767_v3 = vrot.slane %v9766_v60, 2  ;;  %v9948_v7 = vrot.slane %v9908_v58, %v15876_v59  ;;  %v15063_v58 = vld [vmem:[#allocation11 + $0x6c8] ss:$16 sps:$4 sm:$0xff]  }
 0x6da   :  { %v9762_v39 = vadd.f32 %v9761_v0, %v9760_v8  ;;  %v9756_v4 = vadd.f32 %v9755_v40, %v9754_v51 }
 0x6db   :  { %v9751_v26 = vrot.slane %v9750_v2, 1  ;;  %v9768_v5 = vadd.f32 %v9767_v3, %v9766_v60 }
 0x6dc   :  { %v9763_v29 = vrot.slane %v9762_v39, 1  ;;  %v9757_v9 = vrot.slane %v9756_v4, 1 }
 0x6dd   :  { %v9752_v34 = vadd.f32 %v9751_v26, %v9750_v2  ;;  %v9769_v11 = vrot.slane %v9768_v5, 1  ;;  %v15024_v26 = vld [vmem:[#allocation11 + $0x600] ss:$16 sps:$4 sm:$0xff]  }
 0x6de   :  { %v9764_v45 = vadd.f32 %v9763_v29, %v9762_v39  ;;  %v9758_v31 = vadd.f32 %v9757_v9, %v9756_v4  ;;  %v15032_v29 = vld [vmem:[#allocation11 + $0x624] ss:$16 sps:$4 sm:$0xff]  }
 0x6df   :  { %v9775_v61 = vmul.f32 0.125, %v9752_v34  ;;  %v9770_v35 = vadd.f32 %v9769_v11, %v9768_v5  ;;  %v15030_v34 = vld [vmem:[#allocation11 + $0x620] ss:$16 sps:$4 sm:$0xff]   ;;  %v15033_v11 = vld [vmem:[#allocation11 + $0x628] ss:$16 sps:$4 sm:$0xff]  }
 0x6e0   :  { %v9777_v47 = vmul.f32 0.125, %v9764_v45  ;;  %v9776_v38 = vmul.f32 0.125, %v9758_v31  ;;  %v15038_v45 = vld [vmem:[#allocation11 + $0x644] ss:$16 sps:$4 sm:$0xff]   ;;  %v15041_v31 = vld [vmem:[#allocation11 + $0x64c] ss:$16 sps:$4 sm:$0xff]  }
 0x6e1   :  { %v9783_v16 = vadd.f32 1e-05, %v9775_v61  ;;  %v9778_v49 = vmul.f32 0.125, %v9770_v35  ;;  %v15036_v61 = vld [vmem:[#allocation11 + $0x640] ss:$16 sps:$4 sm:$0xff]  }
 0x6e2   :  { %v9785_v55 = vadd.f32 1e-05, %v9777_v47  ;;  %v9784_v46 = vadd.f32 1e-05, %v9776_v38  ;;  %v15039_v35 = vld [vmem:[#allocation11 + $0x648] ss:$16 sps:$4 sm:$0xff]  }
 0x6e3   :  { %15248 = vrsqrt.f32 %v9783_v16  ;;  %v9786_v17 = vadd.f32 1e-05, %v9778_v49  ;;  %v15044_v47 = vld [vmem:[#allocation11 + $0x664] ss:$16 sps:$4 sm:$0xff]   ;;  %v15047_v38 = vld [vmem:[#allocation11 + $0x66c] ss:$16 sps:$4 sm:$0xff]  }
 0x6e4   :  { %15250 = vrsqrt.f32 %v9785_v55  ;;  %v15042_v16 = vld [vmem:[#allocation11 + $0x660] ss:$16 sps:$4 sm:$0xff]   ;;  %v15045_v49 = vld [vmem:[#allocation11 + $0x668] ss:$16 sps:$4 sm:$0xff]   ;;  %v15050_v55 = vld [vmem:[#allocation11 + $0x684] ss:$16 sps:$4 sm:$0xff]  }
 0x6e5   :  { %15252 = vrsqrt.f32 %v9784_v46  ;;  %v15053_v46 = vld [vmem:[#allocation11 + $0x68c] ss:$16 sps:$4 sm:$0xff]  }
 0x6e6   :  { %15254 = vrsqrt.f32 %v9786_v17  ;;  %v15048_v17 = vld [vmem:[#allocation11 + $0x680] ss:$16 sps:$4 sm:$0xff]  }
 0x6ed   :  { %v15249_v10 = vpop.eup %15248 }
 0x6ee   :  { %v15251_v27 = vpop.eup %15250  ;;  %v9799_v12 = vmul.f32 %v15249_v10, %v9711_v30  ;;  %v9956_v30 = vrot.slane %v9916_v20, %v15876_v59  ;;  %v15068_v10 = vld [vmem:[#allocation11 + $0x6e4] ss:$16 sps:$4 sm:$0xff]   ;;  %v15066_v20 = vld [vmem:[#allocation11 + $0x6e0] ss:$16 sps:$4 sm:$0xff]  }
 0x6ef   :  { %v15253_v44 = vpop.eup %15252  ;;  %v9801_v57 = vmul.f32 %v15251_v27, %v9713_v28  ;;  %v15069_v27 = vld [vmem:[#allocation11 + $0x6e8] ss:$16 sps:$4 sm:$0xff]  }
 0x6f0   :  { %v15255_v37 = vpop.eup %15254  ;;  %v9881_v36 = vmul.f32 %v9864_v63, %v9799_v12  ;;  %v9800_v25 = vmul.f32 %v15253_v44, %v16153_v1  ;;  %v15027_v1 = vld [vmem:[#allocation11 + $0x608] ss:$16 sps:$4 sm:$0xff]   ;;  %v15060_v63 = vld [vmem:[#allocation11 + $0x6c0] ss:$16 sps:$4 sm:$0xff]   ;;  %v15074_v12 = vld [vmem:[#allocation11 + $0x704] ss:$16 sps:$4 sm:$0xff]  }
 0x6f1   :  { %v9883_v43 = vmul.f32 %v9872_v24, %v9801_v57  ;;  %v9802_v8 = vmul.f32 %v15255_v37, %v16155_v18  ;;  %v15035_v18 = vld [vmem:[#allocation11 + $0x62c] ss:$16 sps:$4 sm:$0xff]   ;;  %v15075_v44 = vld [vmem:[#allocation11 + $0x708] ss:$16 sps:$4 sm:$0xff]   ;;  %v15080_v57 = vld [vmem:[#allocation11 + $0x724] ss:$16 sps:$4 sm:$0xff]  }
 0x6f2   :  { %v9882_v51 = vmul.f32 %v9868_v41, %v9800_v25  ;;  %v9961_v54 = vadd.f32 %v9944_v50, %v9881_v36  ;;  %v15071_v24 = vld [vmem:[#allocation11 + $0x6ec] ss:$16 sps:$4 sm:$0xff]   ;;  %v15072_v50 = vld [vmem:[#allocation11 + $0x700] ss:$16 sps:$4 sm:$0xff]   ;;  %v15081_v37 = vld [vmem:[#allocation11 + $0x728] ss:$16 sps:$4 sm:$0xff]  }
 0x6f3   :  { %v9884_v60 = vmul.f32 %v9876_v14, %v9802_v8  ;;  %v16179_v0 = vadd.f32 %v9952_v52, %v9883_v43  ;;  %v15077_v41 = vld [vmem:[#allocation11 + $0x70c] ss:$16 sps:$4 sm:$0xff]   ;;  %v15078_v52 = vld [vmem:[#allocation11 + $0x720] ss:$16 sps:$4 sm:$0xff]   ;;  %v15086_v36 = vld [vmem:[#allocation11 + $0x744] ss:$16 sps:$4 sm:$0xff]  }
 0x6f4   :  { %v9962_v28 = vadd.f32 %v9948_v7, %v9882_v51  ;;  %v9969_v40 = vmax.f32 %v9961_v54, 0.0  ;;  %v15083_v14 = vld [vmem:[#allocation11 + $0x72c] ss:$16 sps:$4 sm:$0xff]   ;;  %v15084_v7 = vld [vmem:[#allocation11 + $0x740] ss:$16 sps:$4 sm:$0xff]  }
 0x6f5   :  { %v9964_v2 = vadd.f32 %v9956_v30, %v9884_v60  ;;  %v15089_v25 = vld [vmem:[#allocation11 + $0x74c] ss:$16 sps:$4 sm:$0xff]   ;;  %v15087_v43 = vld [vmem:[#allocation11 + $0x748] ss:$16 sps:$4 sm:$0xff]   ;;  %v15092_v8 = vld [vmem:[#allocation11 + $0x764] ss:$16 sps:$4 sm:$0xff]  }
 0x6f6   :  { %v9970_v3 = vmax.f32 %v9962_v28, 0.0  ;;  %v9977_v5 = vpack.c.bf16 %v9969_v40, %v9969_v40  ;;  %v15095_v30 = vld [vmem:[#allocation11 + $0x76c] ss:$16 sps:$4 sm:$0xff]   ;;  %v15090_v51 = vld [vmem:[#allocation11 + $0x760] ss:$16 sps:$4 sm:$0xff]  }
 0x6f7   :  { %v9972_v39 = vmax.f32 %v9964_v2, 0.0  ;;  %v15093_v54 = vld [vmem:[#allocation11 + $0x768] ss:$16 sps:$4 sm:$0xff]   ;;  %v15098_v60 = vld [vmem:[#allocation11 + $0x784] ss:$16 sps:$4 sm:$0xff]  }
 0x6f8   :  { %v9978_v4 = vpack.c.bf16 %v9970_v3, %v9970_v3  ;;  %v15101_v28 = vld [vmem:[#allocation11 + $0x78c] ss:$16 sps:$4 sm:$0xff]   ;;  %v15096_v40 = vld [vmem:[#allocation11 + $0x780] ss:$16 sps:$4 sm:$0xff]   ;;  %v15099_v2 = vld [vmem:[#allocation11 + $0x788] ss:$16 sps:$4 sm:$0xff]  }
 0x6f9   :  { %v9980_v9 = vpack.c.bf16 %v9972_v39, %v9972_v39  ;;  %v15104_v3 = vld [vmem:[#allocation11 + $0x7a4] ss:$16 sps:$4 sm:$0xff]   ;;  %v15107_v39 = vld [vmem:[#allocation11 + $0x7ac] ss:$16 sps:$4 sm:$0xff]  }
 0x6fa   :  { %11631 = vmatprep.mubr.bf16.mxu0 %v9978_v4  ;;  %11795 = vmatprep.mubr.bf16.mxu1 %v9978_v4  ;;  %v15102_v4 = vld [vmem:[#allocation11 + $0x7a0] ss:$16 sps:$4 sm:$0xff]  }
 0x6fb   :  { %11632 = vmatmul.mubr.bf16.vlgmr.msra.gmra.mrb[24].mxu0 %v9977_v5  ;;  %11796 = vmatmul.mubr.bf16.vlgmr.msra.gmra.mrb[24].mxu1 %v9977_v5  ;;  %v15113_v5 = vld [vmem:[#allocation11 + $0x7cc] ss:$16 sps:$4 sm:$0xff]  }
 0x6fc   :  { %11641 = vmatpush1.bf16.msra.mxu0 %v15024_v26  ;;  %11805 = vmatpush1.bf16.msra.mxu1 %v15027_v1  ;;  %v15105_v26 = vld [vmem:[#allocation11 + $0x7a8] ss:$16 sps:$4 sm:$0xff]   ;;  %v15110_v1 = vld [vmem:[#allocation11 + $0x7c4] ss:$16 sps:$4 sm:$0xff]  }
 0x6fd   :  { %11672 = vmatprep.mubr.bf16.mxu0 %v9980_v9  ;;  %11836 = vmatprep.mubr.bf16.mxu1 %v9980_v9  ;;  %v15116_v9 = vld [vmem:[#allocation11 + $0x7e4] ss:$16 sps:$4 sm:$0xff]  }
 0x6fe   :  { %11642 = vmatprep.subr.bf16.mxu0 %v15032_v29  ;;  %11806 = vmatprep.subr.bf16.mxu1 %v15035_v18  ;;  %v15108_v29 = vld [vmem:[#allocation11 + $0x7c0] ss:$16 sps:$4 sm:$0xff]   ;;  %v15111_v18 = vld [vmem:[#allocation11 + $0x7c8] ss:$16 sps:$4 sm:$0xff]  }
 0x700   :  { %11643 = vmatpush1.bf16.msra.mxu0 %v15030_v34  ;;  %11807 = vmatpush1.bf16.msra.mxu1 %v15033_v11  ;;  %v15119_v34 = vld [vmem:[#allocation11 + $0x7ec] ss:$16 sps:$4 sm:$0xff]   ;;  %v15114_v11 = vld [vmem:[#allocation11 + $0x7e0] ss:$16 sps:$4 sm:$0xff]  }
 0x701   :  { %11644 = vmatprep.subr.bf16.mxu0 %v15038_v45  ;;  %11808 = vmatprep.subr.bf16.mxu1 %v15041_v31  ;;  %v15117_v45 = vld [vmem:[#allocation11 + $0x7e8] ss:$16 sps:$4 sm:$0xff]   ;;  %v9971_v31 = vmax.f32 %v16179_v0, 0.0  ;;  %v15134_v0 = vld [vmem:[#allocation14 + $0x44] ss:$8 sps:$4 sm:$0xff]  }
 0x704   :  { %11645 = vmatpush1.bf16.msra.mxu0 %v15036_v61  ;;  %11809 = vmatpush1.bf16.msra.mxu1 %v15039_v35  ;;  %v15122_v61 = vld [vmem:[#allocation14 + $0x4] ss:$8 sps:$4 sm:$0xff]   ;;  %v15120_v35 = vld [vmem:[#allocation14] ss:$8 sps:$4 sm:$0xff]  }
 0x705   :  { %11646 = vmatprep.subr.bf16.mxu0 %v15044_v47  ;;  %11810 = vmatprep.subr.bf16.mxu1 %v15047_v38  ;;  %v9979_v47 = vpack.c.bf16 %v9971_v31, %v9971_v31  ;;  %v15125_v38 = vld [vmem:[#allocation14 + $0x14] ss:$8 sps:$4 sm:$0xff]  }
 0x708   :  { %11647 = vmatpush1.bf16.msra.mxu0 %v15042_v16  ;;  %11811 = vmatpush1.bf16.msra.mxu1 %v15045_v49  ;;  %v15123_v16 = vld [vmem:[#allocation14 + $0x10] ss:$8 sps:$4 sm:$0xff]   ;;  %v15128_v49 = vld [vmem:[#allocation14 + $0x24] ss:$8 sps:$4 sm:$0xff]  }
 0x709   :  { %11648 = vmatprep.subr.bf16.mxu0 %v15050_v55  ;;  %11812 = vmatprep.subr.bf16.mxu1 %v15053_v46  ;;  %v15126_v55 = vld [vmem:[#allocation14 + $0x20] ss:$8 sps:$4 sm:$0xff]   ;;  %v15131_v46 = vld [vmem:[#allocation14 + $0x34] ss:$8 sps:$4 sm:$0xff]  }
 0x70c   :  { %11649 = vmatpush1.bf16.msra.mxu0 %v15048_v17  ;;  %11813 = vmatpush1.bf16.msra.mxu1 %v15051_v19  ;;  %v15129_v17 = vld [vmem:[#allocation14 + $0x30] ss:$8 sps:$4 sm:$0xff]   ;;  %v15132_v19 = vld [vmem:[#allocation14 + $0x40] ss:$8 sps:$4 sm:$0xff]  }
 0x70d   :  { %11650 = vmatprep.subr.bf16.mxu0 %v15056_v32  ;;  %11814 = vmatprep.subr.bf16.mxu1 %v15059_v21  ;;  %v15137_v32 = vld [vmem:[#allocation14 + $0x54] ss:$8 sps:$4 sm:$0xff]   ;;  %v15135_v21 = vld [vmem:[#allocation14 + $0x50] ss:$8 sps:$4 sm:$0xff]  }
 0x710   :  { %11651 = vmatpush1.bf16.msra.mxu0 %v15054_v6  ;;  %11815 = vmatpush1.bf16.msra.mxu1 %v15057_v42  ;;  %v15140_v6 = vld [vmem:[#allocation14 + $0x64] ss:$8 sps:$4 sm:$0xff]   ;;  %v15138_v42 = vld [vmem:[#allocation14 + $0x60] ss:$8 sps:$4 sm:$0xff]  }
 0x711   :  { %11652 = vmatprep.subr.bf16.mxu0 %v15062_v23  ;;  %11816 = vmatprep.subr.bf16.mxu1 %v15065_v33  ;;  %v15143_v23 = vld [vmem:[#allocation14 + $0x74] ss:$8 sps:$4 sm:$0xff]   ;;  %v15141_v33 = vld [vmem:[#allocation14 + $0x70] ss:$8 sps:$4 sm:$0xff]  }
 0x714   :  { %11653 = vmatpush1.bf16.msra.mxu0 %v15060_v63  ;;  %11817 = vmatpush1.bf16.msra.mxu1 %v15063_v58  ;;  %v15146_v63 = vld [vmem:[#allocation14 + $0x84] ss:$8 sps:$4 sm:$0xff]   ;;  %v15144_v58 = vld [vmem:[#allocation14 + $0x80] ss:$8 sps:$4 sm:$0xff]  }
 0x715   :  { %11654 = vmatprep.subr.bf16.mxu0 %v15068_v10  ;;  %11818 = vmatprep.subr.bf16.mxu1 %v15071_v24  ;;  %v15149_v10 = vld [vmem:[#allocation14 + $0x94] ss:$8 sps:$4 sm:$0xff]   ;;  %v15147_v24 = vld [vmem:[#allocation14 + $0x90] ss:$8 sps:$4 sm:$0xff]  }
 0x718   :  { %11655 = vmatpush1.bf16.msra.mxu0 %v15066_v20  ;;  %11819 = vmatpush1.bf16.msra.mxu1 %v15069_v27  ;;  %v15152_v20 = vld [vmem:[#allocation14 + $0xa4] ss:$8 sps:$4 sm:$0xff]   ;;  %v15150_v27 = vld [vmem:[#allocation14 + $0xa0] ss:$8 sps:$4 sm:$0xff]  }
 0x719   :  { %11656 = vmatprep.subr.bf16.mxu0 %v15074_v12  ;;  %11820 = vmatprep.subr.bf16.mxu1 %v15077_v41  ;;  %v15155_v12 = vld [vmem:[#allocation14 + $0xb4] ss:$8 sps:$4 sm:$0xff]   ;;  %v15153_v41 = vld [vmem:[#allocation14 + $0xb0] ss:$8 sps:$4 sm:$0xff]  }
 0x71c   :  { %11657 = vmatpush1.bf16.msra.mxu0 %v15072_v50  ;;  %11821 = vmatpush1.bf16.msra.mxu1 %v15075_v44  ;;  %v15158_v50 = vld [vmem:[#allocation14 + $0xc4] ss:$8 sps:$4 sm:$0xff]   ;;  %v15156_v44 = vld [vmem:[#allocation14 + $0xc0] ss:$8 sps:$4 sm:$0xff]  }
 0x71d   :  { %11658 = vmatprep.subr.bf16.mxu0 %v15080_v57  ;;  %11822 = vmatprep.subr.bf16.mxu1 %v15083_v14  ;;  %v15161_v57 = vld [vmem:[#allocation14 + $0xd4] ss:$8 sps:$4 sm:$0xff]   ;;  %v15159_v14 = vld [vmem:[#allocation14 + $0xd0] ss:$8 sps:$4 sm:$0xff]  }
 0x720   :  { %11659 = vmatpush1.bf16.msra.mxu0 %v15078_v52  ;;  %11823 = vmatpush1.bf16.msra.mxu1 %v15081_v37  ;;  %v15162_v52 = vld [vmem:[#allocation14 + $0xe0] ss:$8 sps:$4 sm:$0xff]   ;;  %v15164_v37 = vld [vmem:[#allocation14 + $0xe4] ss:$8 sps:$4 sm:$0xff]  }
 0x721   :  { %11660 = vmatprep.subr.bf16.mxu0 %v15086_v36  ;;  %11824 = vmatprep.subr.bf16.mxu1 %v15089_v25  ;;  %v15167_v36 = vld [vmem:[#allocation14 + $0xf4] ss:$8 sps:$4 sm:$0xff]   ;;  %v15165_v25 = vld [vmem:[#allocation14 + $0xf0] ss:$8 sps:$4 sm:$0xff]  }
 0x724   :  { %11661 = vmatpush1.bf16.msra.mxu0 %v15084_v7  ;;  %11825 = vmatpush1.bf16.msra.mxu1 %v15087_v43  ;;  %v15170_v7 = vld [vmem:[#allocation14 + $0x104] ss:$8 sps:$4 sm:$0xff]  }
 0x725   :  { %11662 = vmatprep.subr.bf16.mxu0 %v15092_v8  ;;  %11826 = vmatprep.subr.bf16.mxu1 %v15095_v30 }
 0x728   :  { %11663 = vmatpush1.bf16.msra.mxu0 %v15090_v51  ;;  %11827 = vmatpush1.bf16.msra.mxu1 %v15093_v54 }
 0x729   :  { %11664 = vmatprep.subr.bf16.mxu0 %v15098_v60  ;;  %11828 = vmatprep.subr.bf16.mxu1 %v15101_v28 }
 0x72c   :  { %11665 = vmatpush1.bf16.msra.mxu0 %v15096_v40  ;;  %11829 = vmatpush1.bf16.msra.mxu1 %v15099_v2 }
 0x72d   :  { %11666 = vmatprep.subr.bf16.mxu0 %v15104_v3  ;;  %11830 = vmatprep.subr.bf16.mxu1 %v15107_v39 }
 0x730   :  { %11667 = vmatpush1.bf16.msra.mxu0 %v15102_v4  ;;  %11831 = vmatpush1.bf16.msra.mxu1 %v15105_v26 }
 0x731   :  { %11668 = vmatprep.subr.bf16.mxu0 %v15110_v1  ;;  %11832 = vmatprep.subr.bf16.mxu1 %v15113_v5 }
 0x734   :  { %11669 = vmatpush1.bf16.msra.mxu0 %v15108_v29  ;;  %11833 = vmatpush1.bf16.msra.mxu1 %v15111_v18 }
 0x735   :  { %11670 = vmatprep.subr.bf16.mxu0 %v15116_v9  ;;  %11834 = vmatprep.subr.bf16.mxu1 %v15119_v34 }
 0x738   :  { %11671 = vmatpush1.bf16.msra.mxu0 %v15114_v11  ;;  %11835 = vmatpush1.bf16.msra.mxu1 %v15117_v45 }
 0x739   :  { %12395 = vmatprep.subr.bf16.mxu0 %v15122_v61 }
 0x73b   :  { %11673 = vmatmul.mubr.bf16.vlgmr.msra.gmra.mrb[24].mxu0 %v9979_v47  ;;  %11837 = vmatmul.mubr.bf16.vlgmr.msra.gmra.mrb[24].mxu1 %v9979_v47 }
 0x73c   :  { %12396 = vmatpush1.bf16.msra.mxu0 %v15120_v35 }
 0x73d   :  { %12397 = vmatprep.subr.bf16.mxu0 %v15125_v38 }
 0x740   :  { %12398 = vmatpush1.bf16.msra.mxu0 %v15123_v16 }
 0x741   :  { %12399 = vmatprep.subr.bf16.mxu0 %v15128_v49 }
 0x744   :  { %12400 = vmatpush1.bf16.msra.mxu0 %v15126_v55 }
 0x745   :  { %12401 = vmatprep.subr.bf16.mxu0 %v15131_v46 }
 0x748   :  { %12402 = vmatpush1.bf16.msra.mxu0 %v15129_v17 }
 0x749   :  { %12403 = vmatprep.subr.bf16.mxu0 %v15134_v0 }
 0x74c   :  { %12404 = vmatpush1.bf16.msra.mxu0 %v15132_v19 }
 0x74d   :  { %12405 = vmatprep.subr.bf16.mxu0 %v15137_v32 }
 0x750   :  { %12406 = vmatpush1.bf16.msra.mxu0 %v15135_v21 }
 0x751   :  { %12407 = vmatprep.subr.bf16.mxu0 %v15140_v6 }
 0x754   :  { %12408 = vmatpush1.bf16.msra.mxu0 %v15138_v42 }
 0x755   :  { %12409 = vmatprep.subr.bf16.mxu0 %v15143_v23 }
 0x758   :  { %12410 = vmatpush1.bf16.msra.mxu0 %v15141_v33 }
 0x759   :  { %12411 = vmatprep.subr.bf16.mxu0 %v15146_v63 }
 0x75c   :  { %12412 = vmatpush1.bf16.msra.mxu0 %v15144_v58 }
 0x75d   :  { %12413 = vmatprep.subr.bf16.mxu0 %v15149_v10 }
 0x760   :  { %12414 = vmatpush1.bf16.msra.mxu0 %v15147_v24 }
 0x761   :  { %12415 = vmatprep.subr.bf16.mxu0 %v15152_v20 }
 0x764   :  { %12416 = vmatpush1.bf16.msra.mxu0 %v15150_v27 }
 0x765   :  { %12417 = vmatprep.subr.bf16.mxu0 %v15155_v12 }
 0x768   :  { %12418 = vmatpush1.bf16.msra.mxu0 %v15153_v41 }
 0x769   :  { %12419 = vmatprep.subr.bf16.mxu0 %v15158_v50 }
 0x76c   :  { %12420 = vmatpush1.bf16.msra.mxu0 %v15156_v44 }
 0x76d   :  { %12421 = vmatprep.subr.bf16.mxu0 %v15161_v57 }
 0x770   :  { %12422 = vmatpush1.bf16.msra.mxu0 %v15159_v14 }
 0x771   :  { %12423 = vmatprep.subr.bf16.mxu0 %v15164_v37 }
 0x774   :  { %12424 = vmatpush1.bf16.msra.mxu0 %v15162_v52 }
 0x775   :  { %12425 = vmatprep.subr.bf16.mxu0 %v15167_v36 }
 0x778   :  { %12426 = vmatpush1.bf16.msra.mxu0 %v15165_v25 }
 0x779   :  { %12436 = vmatprep.subr.bf16.mxu0 %v15170_v7 }
 0x80e   :  { %v11674_v43 = vpop.f32.mrb[24].mxu0  ;;  %v11838_v8 = vpop.f32.mrb[24].mxu1 }
 0x80f   :  { %v11846_v30 = vrot.slane %v11674_v43, 4  ;;  %v11858_v51 = vrot.slane %v11838_v8, 4  ;;  %v11676_v54 = vpop.f32.mrb[25].mxu0  ;;  %v11840_v60 = vpop.f32.mrb[25].mxu1 }
 0x810   :  { %v11852_v28 = vrot.slane %v11676_v54, 4  ;;  %v11864_v40 = vrot.slane %v11840_v60, 4  ;;  %v11678_v2 = vpop.f32.mrb[26].mxu0  ;;  %v11842_v3 = vpop.f32.mrb[26].mxu1 }
 0x811   :  { %v11847_v39 = vadd.f32 %v11846_v30, %v11674_v43  ;;  %v11859_v4 = vadd.f32 %v11858_v51, %v11838_v8  ;;  %v11679_v26 = vpop.f32.mrb[27].mxu0  ;;  %v11843_v1 = vpop.f32.mrb[27].mxu1 }
 0x812   :  { %v11853_v5 = vadd.f32 %v11852_v28, %v11676_v54  ;;  %v11865_v29 = vadd.f32 %v11864_v40, %v11840_v60 }
 0x813   :  { %v11848_v18 = vrot.slane %v11847_v39, 2  ;;  %v11860_v9 = vrot.slane %v11859_v4, 2 }
 0x814   :  { %v11854_v34 = vrot.slane %v11853_v5, 2  ;;  %v11866_v11 = vrot.slane %v11865_v29, 2 }
 0x815   :  { %v11849_v45 = vadd.f32 %v11848_v18, %v11847_v39  ;;  %v11861_v31 = vadd.f32 %v11860_v9, %v11859_v4 }
 0x816   :  { %v11855_v61 = vadd.f32 %v11854_v34, %v11853_v5  ;;  %v11867_v35 = vadd.f32 %v11866_v11, %v11865_v29 }
 0x817   :  { %v11850_v47 = vrot.slane %v11849_v45, 1  ;;  %v11862_v38 = vrot.slane %v11861_v31, 1 }
 0x818   :  { %v11856_v16 = vrot.slane %v11855_v61, 1  ;;  %v11868_v49 = vrot.slane %v11867_v35, 1 }
 0x819   :  { %v11851_v55 = vadd.f32 %v11850_v47, %v11849_v45  ;;  %v11863_v46 = vadd.f32 %v11862_v38, %v11861_v31  ;;  %v11845_v45 = vld [vmem:[#allocation13] sm:$0xff] }
 0x81a   :  { %v11857_v17 = vadd.f32 %v11856_v16, %v11855_v61  ;;  %v11869_v0 = vadd.f32 %v11868_v49, %v11867_v35  ;;  %v11926_v31 = vrot.slane %v11845_v45, %v15893_v15  ;;  %v11934_v61 = vrot.slane %v11845_v45, %v15949_v48 }
 0x81b   :  { %v11870_v19 = vmul.f32 0.125, %v11851_v55  ;;  %v11872_v32 = vmul.f32 0.125, %v11863_v46  ;;  %v11930_v35 = vrot.slane %v11845_v45, %v15921_v53  ;;  %v11966_v47 = vrot.slane %v11845_v45, %v15876_v59 }
 0x81c   :  { %v11871_v21 = vmul.f32 0.125, %v11857_v17  ;;  %v11873_v6 = vmul.f32 0.125, %v11869_v0  ;;  %v11938_v38 = vrot.slane %v11845_v45, %v15979_v13  ;;  %v11974_v16 = vrot.slane %v11845_v45, %v15924_v62 }
 0x81d   :  { %v11874_v42 = vsub.f32 %v11674_v43, %v11870_v19  ;;  %v11876_v23 = vsub.f32 %v11838_v8, %v11872_v32  ;;  %v11946_v49 = vrot.slane %v11926_v31, %v15893_v15  ;;  %v11970_v55 = vrot.slane %v11845_v45, %v15896_v22  ;;  %v15201_v31 = vld [vmem:[#allocation14 + $0x1b0] ss:$8 sps:$4 sm:$0xff]  }
 0x81e   :  { %v16182_v33 = vsub.f32 %v11676_v54, %v11871_v21  ;;  %v16184_v63 = vsub.f32 %v11840_v60, %v11873_v6  ;;  %v11954_v17 = vrot.slane %v11934_v61, %v15893_v15  ;;  %v11978_v0 = vrot.slane %v11845_v45, %v15952_v56  ;;  %v15203_v45 = vld [vmem:[#allocation14 + $0x1b4] ss:$8 sps:$4 sm:$0xff]   ;;  %v15206_v61 = vld [vmem:[#allocation14 + $0x1c4] ss:$8 sps:$4 sm:$0xff]  }
 0x81f   :  { %v11878_v58 = vmul.f32 %v11874_v42, %v11874_v42  ;;  %v11880_v10 = vmul.f32 %v11876_v23, %v11876_v23  ;;  %v11950_v48 = vrot.slane %v11930_v35, %v15893_v15  ;;  %v11986_v21 = vrot.slane %v11966_v47, %v15876_v59  ;;  %v15204_v35 = vld [vmem:[#allocation14 + $0x1c0] ss:$8 sps:$4 sm:$0xff]   ;;  %v15209_v47 = vld [vmem:[#allocation14 + $0x1d4] ss:$8 sps:$4 sm:$0xff]  }
 0x820   :  { %v11879_v24 = vmul.f32 %v16182_v33, %v16182_v33  ;;  %v11881_v20 = vmul.f32 %v16184_v63, %v16184_v63  ;;  %v11958_v13 = vrot.slane %v11938_v38, %v15893_v15  ;;  %v11994_v62 = vrot.slane %v11974_v16, %v15876_v59  ;;  %v15207_v38 = vld [vmem:[#allocation14 + $0x1d0] ss:$8 sps:$4 sm:$0xff]   ;;  %v15212_v16 = vld [vmem:[#allocation14 + $0x1e4] ss:$8 sps:$4 sm:$0xff]  }
 0x821   :  { %v11882_v27 = vrot.slane %v11878_v58, 4  ;;  %v11894_v12 = vrot.slane %v11880_v10, 4 }
 0x822   :  { %v11888_v41 = vrot.slane %v11879_v24, 4  ;;  %v11900_v50 = vrot.slane %v11881_v20, 4 }
 0x823   :  { %v11883_v44 = vadd.f32 %v11882_v27, %v11878_v58  ;;  %v11895_v57 = vadd.f32 %v11894_v12, %v11880_v10  ;;  %v11990_v27 = vrot.slane %v11970_v55, %v15876_v59  ;;  %v15215_v55 = vld [vmem:[#allocation14 + $0x1f4] ss:$8 sps:$4 sm:$0xff]  }
 0x824   :  { %v11889_v14 = vadd.f32 %v11888_v41, %v11879_v24  ;;  %v11901_v52 = vadd.f32 %v11900_v50, %v11881_v20 }
 0x825   :  { %v11884_v37 = vrot.slane %v11883_v44, 2  ;;  %v11896_v36 = vrot.slane %v11895_v57, 2 }
 0x826   :  { %v11890_v25 = vrot.slane %v11889_v14, 2  ;;  %v11902_v7 = vrot.slane %v11901_v52, 2 }
 0x827   :  { %v11885_v43 = vadd.f32 %v11884_v37, %v11883_v44  ;;  %v11897_v8 = vadd.f32 %v11896_v36, %v11895_v57 }
 0x828   :  { %v11891_v30 = vadd.f32 %v11890_v25, %v11889_v14  ;;  %v11903_v51 = vadd.f32 %v11902_v7, %v11901_v52  ;;  %v15168_v7 = vld [vmem:[#allocation14 + $0x100] ss:$8 sps:$4 sm:$0xff]  }
 0x829   :  { %v11886_v54 = vrot.slane %v11885_v43, 1  ;;  %v11898_v60 = vrot.slane %v11897_v8, 1 }
 0x82a   :  { %v11892_v28 = vrot.slane %v11891_v30, 1  ;;  %v11904_v40 = vrot.slane %v11903_v51, 1 }
 0x82b   :  { %v11887_v2 = vadd.f32 %v11886_v54, %v11885_v43  ;;  %v11899_v3 = vadd.f32 %v11898_v60, %v11897_v8  ;;  %v15173_v43 = vld [vmem:[#allocation14 + $0x114] ss:$8 sps:$4 sm:$0xff]   ;;  %v15177_v60 = vld [vmem:[#allocation14 + $0x130] ss:$8 sps:$4 sm:$0xff]  }
 0x82c   :  { %v11893_v39 = vadd.f32 %v11892_v28, %v11891_v30  ;;  %v11905_v4 = vadd.f32 %v11904_v40, %v11903_v51  ;;  %v15176_v30 = vld [vmem:[#allocation14 + $0x124] ss:$8 sps:$4 sm:$0xff]   ;;  %v15174_v51 = vld [vmem:[#allocation14 + $0x120] ss:$8 sps:$4 sm:$0xff]   ;;  %v15179_v54 = vld [vmem:[#allocation14 + $0x134] ss:$8 sps:$4 sm:$0xff]  }
 0x82d   :  { %v11906_v26 = vmul.f32 0.125, %v11887_v2  ;;  %v11908_v1 = vmul.f32 0.125, %v11899_v3  ;;  %v15182_v28 = vld [vmem:[#allocation14 + $0x144] ss:$8 sps:$4 sm:$0xff]   ;;  %v15180_v40 = vld [vmem:[#allocation14 + $0x140] ss:$8 sps:$4 sm:$0xff]  }
 0x82e   :  { %v11907_v5 = vmul.f32 0.125, %v11893_v39  ;;  %v11909_v29 = vmul.f32 0.125, %v11905_v4  ;;  %v15185_v2 = vld [vmem:[#allocation14 + $0x154] ss:$8 sps:$4 sm:$0xff]   ;;  %v15183_v3 = vld [vmem:[#allocation14 + $0x150] ss:$8 sps:$4 sm:$0xff]  }
 0x82f   :  { %v11910_v18 = vadd.f32 1e-05, %v11906_v26  ;;  %v11912_v9 = vadd.f32 1e-05, %v11908_v1  ;;  %v15188_v39 = vld [vmem:[#allocation14 + $0x164] ss:$8 sps:$4 sm:$0xff]  }
 0x830   :  { %v11911_v34 = vadd.f32 1e-05, %v11907_v5  ;;  %v11913_v11 = vadd.f32 1e-05, %v11909_v29  ;;  %v15186_v4 = vld [vmem:[#allocation14 + $0x160] ss:$8 sps:$4 sm:$0xff]  }
 0x831   :  { %15256 = vrsqrt.f32 %v11910_v18  ;;  %v15191_v26 = vld [vmem:[#allocation14 + $0x174] ss:$8 sps:$4 sm:$0xff]   ;;  %v15189_v1 = vld [vmem:[#allocation14 + $0x170] ss:$8 sps:$4 sm:$0xff]   ;;  %v15194_v5 = vld [vmem:[#allocation14 + $0x184] ss:$8 sps:$4 sm:$0xff]  }
 0x832   :  { %15258 = vrsqrt.f32 %v11912_v9  ;;  %v15192_v29 = vld [vmem:[#allocation14 + $0x180] ss:$8 sps:$4 sm:$0xff]   ;;  %v15197_v18 = vld [vmem:[#allocation14 + $0x194] ss:$8 sps:$4 sm:$0xff]   ;;  %v15195_v9 = vld [vmem:[#allocation14 + $0x190] ss:$8 sps:$4 sm:$0xff]  }
 0x833   :  { %15260 = vrsqrt.f32 %v11911_v34  ;;  %v15200_v34 = vld [vmem:[#allocation14 + $0x1a4] ss:$8 sps:$4 sm:$0xff]  }
 0x834   :  { %15262 = vrsqrt.f32 %v11913_v11  ;;  %v15198_v11 = vld [vmem:[#allocation14 + $0x1a0] ss:$8 sps:$4 sm:$0xff]  }
 0x83b   :  { %v15257_v46 = vpop.eup %15256 }
 0x83c   :  { %v15259_v19 = vpop.eup %15258  ;;  %v11918_v32 = vmul.f32 %v15257_v46, %v11874_v42  ;;  %v11998_v42 = vrot.slane %v11978_v0, %v15876_v59  ;;  %v15213_v46 = vld [vmem:[#allocation14 + $0x1f0] ss:$8 sps:$4 sm:$0xff]  }
 0x83d   :  { %v15261_v6 = vpop.eup %15260  ;;  %v11920_v58 = vmul.f32 %v15259_v19, %v11876_v23  ;;  %v15216_v19 = vld [vmem:[#allocation17 + $0x40] sm:$0xff]  }
 0x83e   :  { %v15263_v10 = vpop.eup %15262  ;;  %v11959_v24 = vmul.f32 %v11946_v49, %v11918_v32  ;;  %v11919_v20 = vmul.f32 %v15261_v6, %v16182_v33  ;;  %v15210_v49 = vld [vmem:[#allocation14 + $0x1e0] ss:$8 sps:$4 sm:$0xff]   ;;  %14520 = vmatprep.subr.bf16.mxu1 %v15216_v19  ;;  %v15220_v6 = vld [vmem:[#allocation17 + $0x50] sm:$0xff]  }
 0x83f   :  { %v11961_v12 = vmul.f32 %v11954_v17, %v11920_v58  ;;  %v11921_v56 = vmul.f32 %v15263_v10, %v16184_v63  ;;  %v15171_v63 = vld [vmem:[#allocation14 + $0x110] ss:$8 sps:$4 sm:$0xff]   ;;  %v15217_v32 = vld [vmem:[#allocation17] sm:$0xff]  }
 0x840   :  { %v11960_v41 = vmul.f32 %v11950_v48, %v11919_v20  ;;  %v11999_v50 = vadd.f32 %v11986_v21, %v11959_v24  ;;  %14521 = vmatpush3.bf16.msra.mxu1 %v15217_v32  ;;  %v15218_v48 = vld [vmem:[#allocation17 + $0x48] sm:$0xff]   ;;  %v15221_v58 = vld [vmem:[#allocation17 + $0x10] sm:$0xff]   ;;  %v15224_v10 = vld [vmem:[#allocation17 + $0x60] sm:$0xff]  }
 0x841   :  { %v11962_v44 = vmul.f32 %v11958_v13, %v11921_v56  ;;  %v16208_v57 = vadd.f32 %v11994_v62, %v11961_v12  ;;  %v15219_v21 = vld [vmem:[#allocation17 + $0x8] sm:$0xff]   ;;  %14522 = vmatprep.subr.bf16.mxu1 %v15218_v48  ;;  %v15222_v13 = vld [vmem:[#allocation17 + $0x58] sm:$0xff]   ;;  %v15225_v24 = vld [vmem:[#allocation17 + $0x20] sm:$0xff]  }
 0x842   :  { %v12000_v23 = vadd.f32 %v11990_v27, %v11960_v41  ;;  %v12003_v14 = vmax.f32 %v11999_v50, 0.0  ;;  %v15223_v62 = vld [vmem:[#allocation17 + $0x18] sm:$0xff]   ;;  %v15226_v20 = vld [vmem:[#allocation17 + $0x68] sm:$0xff]   ;;  %v15228_v12 = vld [vmem:[#allocation17 + $0x70] sm:$0xff]  }
 0x843   :  { %v12002_v52 = vadd.f32 %v11998_v42, %v11962_v44  ;;  %v12005_v17 = vmax.f32 %v16208_v57, 0.0  ;;  %v15227_v27 = vld [vmem:[#allocation17 + $0x28] sm:$0xff]   ;;  %v15229_v56 = vld [vmem:[#allocation17 + $0x30] sm:$0xff]   ;;  %v15230_v42 = vld [vmem:[#allocation17 + $0x78] sm:$0xff]  }
 0x844   :  { %v12004_v37 = vmax.f32 %v12000_v23, 0.0  ;;  %v12007_v33 = vpack.c.bf16 %v12003_v14, %v12003_v14  ;;  %14523 = vmatpush3.bf16.msra.mxu1 %v15219_v21  ;;  %v15231_v41 = vld [vmem:[#allocation17 + $0x38] sm:$0xff]  }
 0x845   :  { %v12006_v36 = vmax.f32 %v12002_v52, 0.0  ;;  %v12009_v0 = vpack.c.bf16 %v12005_v17, %v12005_v17  ;;  %14524 = vmatprep.subr.bf16.mxu1 %v15220_v6 }
 0x846   :  { %v12008_v25 = vpack.c.bf16 %v12004_v37, %v12004_v37 }
 0x847   :  { %v12010_v8 = vpack.c.bf16 %v12006_v36, %v12006_v36 }
 0x848   :  { %12427 = vmatprep.mubr.bf16.mxu0 %v12008_v25  ;;  %14525 = vmatpush3.bf16.msra.mxu1 %v15221_v58 }
 0x849   :  { %12428 = vmatmul.mubr.bf16.vlgmr.msra.gmra.mrb[28].mxu0 %v12007_v33  ;;  %14526 = vmatprep.subr.bf16.mxu1 %v15222_v13 }
 0x84a   :  { %12437 = vmatpush1.bf16.msra.mxu0 %v15168_v7  ;;  %12468 = vmatprep.mubr.bf16.mxu0 %v12010_v8 }
 0x84b   :  { %12438 = vmatprep.subr.bf16.mxu0 %v15173_v43 }
 0x84c   :  { %14527 = vmatpush3.bf16.msra.mxu1 %v15223_v62 }
 0x84d   :  { %14528 = vmatprep.subr.bf16.mxu1 %v15224_v10 }
 0x84e   :  { %12439 = vmatpush1.bf16.msra.mxu0 %v15171_v63 }
 0x84f   :  { %12440 = vmatprep.subr.bf16.mxu0 %v15176_v30 }
 0x850   :  { %14529 = vmatpush3.bf16.msra.mxu1 %v15225_v24 }
 0x851   :  { %14530 = vmatprep.subr.bf16.mxu1 %v15226_v20 }
 0x852   :  { %12441 = vmatpush1.bf16.msra.mxu0 %v15174_v51 }
 0x853   :  { %12442 = vmatprep.subr.bf16.mxu0 %v15179_v54 }
 0x854   :  { %14531 = vmatpush3.bf16.msra.mxu1 %v15227_v27 }
 0x855   :  { %14532 = vmatprep.subr.bf16.mxu1 %v15228_v12 }
 0x856   :  { %12443 = vmatpush1.bf16.msra.mxu0 %v15177_v60 }
 0x857   :  { %12444 = vmatprep.subr.bf16.mxu0 %v15182_v28 }
 0x858   :  { %14533 = vmatpush3.bf16.msra.mxu1 %v15229_v56  ;;  %v15232_v56 = vld [vmem:[#allocation20] sm:$0xff]  }
 0x859   :  { %14534 = vmatprep.subr.bf16.mxu1 %v15230_v42  ;;  %v15619_v42 = vmov 0.0  }
 0x85a   :  { %12445 = vmatpush1.bf16.msra.mxu0 %v15180_v40 }
 0x85b   :  { %12446 = vmatprep.subr.bf16.mxu0 %v15185_v2 }
 0x85c   :  { %14535 = vmatpush3.bf16.msra.mxu1 %v15231_v41  ;;  %v15233_v41 = vld [vmem:[#allocation20 + $0x8] sm:$0xff]  }
 0x85d   :  { %14551 = vmatprep.subr.bf16.mxu1 %v15619_v42 }
 0x85e   :  { %12447 = vmatpush1.bf16.msra.mxu0 %v15183_v3 }
 0x85f   :  { %12448 = vmatprep.subr.bf16.mxu0 %v15188_v39 }
 0x862   :  { %12449 = vmatpush1.bf16.msra.mxu0 %v15186_v4 }
 0x863   :  { %12450 = vmatprep.subr.bf16.mxu0 %v15191_v26 }
 0x866   :  { %12451 = vmatpush1.bf16.msra.mxu0 %v15189_v1 }
 0x867   :  { %12452 = vmatprep.subr.bf16.mxu0 %v15194_v5 }
 0x86a   :  { %12453 = vmatpush1.bf16.msra.mxu0 %v15192_v29 }
 0x86b   :  { %12454 = vmatprep.subr.bf16.mxu0 %v15197_v18 }
 0x86e   :  { %12455 = vmatpush1.bf16.msra.mxu0 %v15195_v9 }
 0x86f   :  { %12456 = vmatprep.subr.bf16.mxu0 %v15200_v34 }
 0x872   :  { %12457 = vmatpush1.bf16.msra.mxu0 %v15198_v11 }
 0x873   :  { %12458 = vmatprep.subr.bf16.mxu0 %v15203_v45 }
 0x876   :  { %12459 = vmatpush1.bf16.msra.mxu0 %v15201_v31 }
 0x877   :  { %12460 = vmatprep.subr.bf16.mxu0 %v15206_v61 }
 0x87a   :  { %12461 = vmatpush1.bf16.msra.mxu0 %v15204_v35 }
 0x87b   :  { %12462 = vmatprep.subr.bf16.mxu0 %v15209_v47 }
 0x87e   :  { %12463 = vmatpush1.bf16.msra.mxu0 %v15207_v38 }
 0x87f   :  { %12464 = vmatprep.subr.bf16.mxu0 %v15212_v16  ;;  %v12477_v16 = vld [vmem:[#allocation16] sm:$0xf] }
 0x880   :  { %v12544_v17 = vrot.slane %v12477_v16, %v15896_v22 }
 0x882   :  { %12465 = vmatpush1.bf16.msra.mxu0 %v15210_v49  ;;  %v12520_v49 = vrot.slane %v12477_v16, %v15893_v15  ;;  %v12554_v13 = vrot.slane %v12544_v17, %v15876_v59 }
 0x883   :  { %12466 = vmatprep.subr.bf16.mxu0 %v15215_v55  ;;  %v12524_v55 = vrot.slane %v12477_v16, %v15921_v53 }
 0x885   :  { %v12534_v32 = vrot.slane %v12524_v55, %v15893_v15 }
 0x886   :  { %12467 = vmatpush1.bf16.msra.mxu0 %v15213_v46  ;;  %v12540_v46 = vrot.slane %v12477_v16, %v15876_v59 }
 0x888   :  { %v12550_v6 = vrot.slane %v12540_v46, %v15876_v59 }
 0x889   :  { %12469 = vmatmul.mubr.bf16.vlgmr.msra.gmra.mrb[28].mxu0 %v12009_v0  ;;  %v12530_v0 = vrot.slane %v12520_v49, %v15893_v15 }
 0x95c   :  { %v12470_v50 = vpop.f32.mrb[28].mxu0 }
 0x95d   :  { %v12478_v44 = vrot.slane %v12470_v50, 4  ;;  %v12472_v57 = vpop.f32.mrb[29].mxu0 }
 0x95e   :  { %v12484_v23 = vrot.slane %v12472_v57, 4  ;;  %v12474_v14 = vpop.f32.mrb[30].mxu0 }
 0x95f   :  { %v12479_v52 = vadd.f32 %v12478_v44, %v12470_v50  ;;  %v12475_v37 = vpop.f32.mrb[31].mxu0  ;;  %v15235_v44 = vld [vmem:[#allocation20 + $0x18] sm:$0xff]   ;;  %v15238_v14 = vld [vmem:[#allocation20 + $0x30] sm:$0xff]  }
 0x960   :  { %v12485_v36 = vadd.f32 %v12484_v23, %v12472_v57  ;;  %v15237_v23 = vld [vmem:[#allocation20 + $0x28] sm:$0xff]  }
 0x961   :  { %v12480_v25 = vrot.slane %v12479_v52, 2 }
 0x962   :  { %v12486_v7 = vrot.slane %v12485_v36, 2 }
 0x963   :  { %v12481_v33 = vadd.f32 %v12480_v25, %v12479_v52  ;;  %v15239_v52 = vld [vmem:[#allocation20 + $0x38] sm:$0xff]  }
 0x964   :  { %v12487_v43 = vadd.f32 %v12486_v7, %v12485_v36 }
 0x965   :  { %v12482_v8 = vrot.slane %v12481_v33, 1 }
 0x966   :  { %v12488_v63 = vrot.slane %v12487_v43, 1 }
 0x967   :  { %v12483_v30 = vadd.f32 %v12482_v8, %v12481_v33 }
 0x968   :  { %v12489_v51 = vadd.f32 %v12488_v63, %v12487_v43 }
 0x969   :  { %v12490_v54 = vmul.f32 0.125, %v12483_v30 }
 0x96a   :  { %v12491_v60 = vmul.f32 0.125, %v12489_v51 }
 0x96b   :  { %v12492_v28 = vsub.f32 %v12470_v50, %v12490_v54  ;;  %v15234_v50 = vld [vmem:[#allocation20 + $0x10] sm:$0xff]  }
 0x96c   :  { %v12493_v40 = vsub.f32 %v12472_v57, %v12491_v60  ;;  %v15236_v57 = vld [vmem:[#allocation20 + $0x20] sm:$0xff]  }
 0x96d   :  { %v12494_v2 = vmul.f32 %v12492_v28, %v12492_v28 }
 0x96e   :  { %v12495_v3 = vmul.f32 %v12493_v40, %v12493_v40 }
 0x96f   :  { %v12496_v39 = vrot.slane %v12494_v2, 4 }
 0x970   :  { %v12502_v4 = vrot.slane %v12495_v3, 4 }
 0x971   :  { %v12497_v26 = vadd.f32 %v12496_v39, %v12494_v2 }
 0x972   :  { %v12503_v1 = vadd.f32 %v12502_v4, %v12495_v3 }
 0x973   :  { %v12498_v5 = vrot.slane %v12497_v26, 2 }
 0x974   :  { %v12504_v29 = vrot.slane %v12503_v1, 2 }
 0x975   :  { %v12499_v18 = vadd.f32 %v12498_v5, %v12497_v26 }
 0x976   :  { %v12505_v9 = vadd.f32 %v12504_v29, %v12503_v1 }
 0x977   :  { %v12500_v34 = vrot.slane %v12499_v18, 1 }
 0x978   :  { %v12506_v11 = vrot.slane %v12505_v9, 1 }
 0x979   :  { %v12501_v45 = vadd.f32 %v12500_v34, %v12499_v18  ;;  %v12729_v18 = vld [vmem:[#allocation19] sm:$0x3] }
 0x97a   :  { %v12507_v31 = vadd.f32 %v12506_v11, %v12505_v9  ;;  %v12752_v9 = vrot.slane %v12729_v18, %v15893_v15 }
 0x97b   :  { %v12508_v61 = vmul.f32 0.125, %v12501_v45  ;;  %v12757_v45 = vrot.slane %v12729_v18, %v15876_v59 }
 0x97c   :  { %v12509_v35 = vmul.f32 0.125, %v12507_v31 }
 0x97d   :  { %v12510_v47 = vadd.f32 1e-05, %v12508_v61 }
 0x97e   :  { %v12511_v38 = vadd.f32 1e-05, %v12509_v35 }
 0x97f   :  { %15264 = vrsqrt.f32 %v12510_v47 }
 0x980   :  { %15266 = vrsqrt.f32 %v12511_v38  ;;  %v14511_v38 = vld [vmem:[#allocation22] ss:$0 sm:$0xff] }
 0x989   :  { %v15265_v19 = vpop.eup %15264 }
 0x98a   :  { %v15267_v48 = vpop.eup %15266  ;;  %v12514_v21 = vmul.f32 %v15265_v19, %v12492_v28 }
 0x98b   :  { %v12515_v58 = vmul.f32 %v15267_v48, %v12493_v40 }
 0x98c   :  { %v12535_v62 = vmul.f32 %v12530_v0, %v12514_v21 }
 0x98d   :  { %v12536_v10 = vmul.f32 %v12534_v32, %v12515_v58 }
 0x98e   :  { %v12555_v24 = vadd.f32 %v12550_v6, %v12535_v62 }
 0x98f   :  { %v12556_v53 = vadd.f32 %v12554_v13, %v12536_v10 }
 0x990   :  { %v12557_v20 = vmax.f32 %v12555_v24, 0.0 }
 0x991   :  { %v12558_v27 = vmax.f32 %v12556_v53, 0.0 }
 0x992   :  { %v12559_v22 = vpack.c.bf16 %v12557_v20, %v12557_v20 }
 0x993   :  { %v12560_v12 = vpack.c.bf16 %v12558_v27, %v12558_v27 }
 0x995   :  { %12721 = vmatprep.mubr.bf16.mxu1 %v12560_v12 }
 0x996   :  { %12722 = vmatmul.mubr.bf16.vlgmr.msra.gmra.mrb[28].mxu1 %v12559_v22 }
 0x997   :  { %14552 = vmatpush3.bf16.msra.mxu1 %v15232_v56  ;;  %14567 = vmatprep.mubr.msk.bf16.mxu1 %vm15620_vm0, %v15619_v42 }
 0x998   :  { %14553 = vmatprep.subr.bf16.mxu1 %v15619_v42 }
 0x99b   :  { %14554 = vmatpush3.bf16.msra.mxu1 %v15233_v41 }
 0x99c   :  { %14555 = vmatprep.subr.bf16.mxu1 %v15619_v42 }
 0x99f   :  { %14556 = vmatpush3.bf16.msra.mxu1 %v15234_v50 }
 0x9a0   :  { %14557 = vmatprep.subr.bf16.mxu1 %v15619_v42 }
 0x9a3   :  { %14558 = vmatpush3.bf16.msra.mxu1 %v15235_v44 }
 0x9a4   :  { %14559 = vmatprep.subr.bf16.mxu1 %v15619_v42 }
 0x9a7   :  { %14560 = vmatpush3.bf16.msra.mxu1 %v15236_v57 }
 0x9a8   :  { %14561 = vmatprep.subr.bf16.mxu1 %v15619_v42 }
 0x9ab   :  { %14562 = vmatpush3.bf16.msra.mxu1 %v15237_v23 }
 0x9ac   :  { %14563 = vmatprep.subr.bf16.mxu1 %v15619_v42 }
 0x9af   :  { %14564 = vmatpush3.bf16.msra.mxu1 %v15238_v14 }
 0x9b0   :  { %14565 = vmatprep.subr.bf16.mxu1 %v15619_v42 }
 0x9b3   :  { %14566 = vmatpush3.bf16.msra.mxu1 %v15239_v52 }
 0xa69   :  { %v14536_v37 = vpop.f32.mrb[28].mxu1 }
 0xa6a   :  { %v14537_v36 = vpop.f32.mrb[29].mxu1 }
 0xa6b   :  { %v14538_v25 = vadd.f32 %v14537_v36, %v14536_v37  ;;  %v14539_v7 = vpop.f32.mrb[30].mxu1 }
 0xa6c   :  { %v14540_v33 = vpop.f32.mrb[31].mxu1 }
 0xa6d   :  { %v12730_v43 = vrot.slane %v14538_v25, 4 }
 0xa6f   :  { %v12731_v8 = vadd.f32 %v14538_v25, %v12730_v43 }
 0xa71   :  { %v12732_v63 = vrot.slane %v12731_v8, 2 }
 0xa73   :  { %v12733_v30 = vadd.f32 %v12732_v63, %v12731_v8 }
 0xa75   :  { %v12734_v51 = vrot.slane %v12733_v30, 1 }
 0xa77   :  { %v12735_v54 = vadd.f32 %v12734_v51, %v12733_v30 }
 0xa79   :  { %v12736_v60 = vmul.f32 0.125, %v12735_v54 }
 0xa7b   :  { %v12737_v28 = vsub.f32 %v14538_v25, %v12736_v60 }
 0xa7d   :  { %v12738_v40 = vmul.f32 %v12737_v28, %v12737_v28 }
 0xa7f   :  { %v12739_v2 = vrot.slane %v12738_v40, 4 }
 0xa81   :  { %v12740_v3 = vadd.f32 %v12739_v2, %v12738_v40 }
 0xa83   :  { %v12741_v39 = vrot.slane %v12740_v3, 2 }
 0xa85   :  { %v12742_v4 = vadd.f32 %v12741_v39, %v12740_v3 }
 0xa87   :  { %v12743_v26 = vrot.slane %v12742_v4, 1 }
 0xa89   :  { %v12744_v1 = vadd.f32 %v12743_v26, %v12742_v4 }
 0xa8b   :  { %v12745_v5 = vmul.f32 0.125, %v12744_v1 }
 0xa8d   :  { %v12746_v29 = vadd.f32 1e-05, %v12745_v5 }
 0xa8f   :  { %15268 = vrsqrt.f32 %v12746_v29 }
 0xa99   :  { %v15269_v34 = vpop.eup %15268 }
 0xa9a   :  { %v12748_v11 = vmul.f32 %v15269_v34, %v12737_v28 }
 0xa9c   :  { %v12753_v31 = vmul.f32 %v12752_v9, %v12748_v11 }
 0xa9e   :  { %v12758_v61 = vadd.f32 %v12757_v45, %v12753_v31 }
 0xaa0   :  { %v12759_v35 = vmax.f32 %v12758_v61, 0.0 }
 0xaa2   :  { %v12760_v47 = vpack.c.bf16 %v12759_v35, %v12759_v35 }
 0xaa4   :  { %14568 = vmatmul.mubr.bf16.vlgmr.msra.gmra.mrb[32].mxu1 %v12760_v47 }
 0xb77   :  { %v12866_v16 = vpop.f32.mrb[32].mxu1 }
 0xb78   :  { %v12867_v49 = vadd.f32 %v14511_v38, %v12866_v16  ;;  %v14569_v55 = vpop.f32.mrb[33].mxu1 }
 0xb79   :  { %v12869_v46 = vpop.f32.mrb[34].mxu1 }
 0xb7a   :  { %v12872_v17 = vmax.f32 %v12867_v49, 0.0  ;;  %v14570_v0 = vpop.f32.mrb[35].mxu1 }
 0xb7c   :  { %12873 = vst [vmem:[#allocation23] sm:$0xff] %v12872_v17 }
 0xb7d   :  { %15570 = shalt.err (!%p15567_p10)
}
 0xb7e   :  { %s15571_s21 = scalar_lea.hbm %s16246_s13, 128 }
 0xb7f   :  { %p15572_p11 = scmp.ne.s32.totalorder %s16246_s13, %s15571_s21  ;;  %p15575_p12 = scmp.lt.u32.totalorder %s15571_s21, %s16246_s13 }
 0xb81   :  { %p15577_p13 = pnand %p15575_p12, %p15572_p11 }
 0xb83   :  { %15580 = shalt.err (!%p15577_p13)
}
 0xb84   :  { %12883 = dma.vmem_to_hbm [thread:$0]  %s12881_s25, 128, %s16246_s13, [#allocation4]  }
 0xb85   :  { %15595 = dma.done.wait [#allocation4], 128  }
 0xb86   :  { %15596 = vsyncadd [#allocation4], 4294967168 }
 0xb87   :  { %12887 = vsyncpa [#allocation3], 1 }
 0xb88   :  { %12888 = vsyncpa [#allocation6], 1 }
 0xb89   :  { %12889 = vsyncpa [#allocation9], 1 }
 0xb8a   :  { %12890 = vsyncpa [#allocation12], 1 }
 0xb8b   :  { %12891 = vsyncpa [#allocation15], 1 }
 0xb8c   :  { %12892 = vsyncpa [#allocation18], 1 }
 0xb8d   :  { %12893 = vsyncpa [#allocation21], 1 }
 0xb8e   :  { %12894 = vsyncpa [#allocation4], 1 }

</bundles_post_ra>
